<compile_context>
chip_gen: v7x
topology: tpu7x:2x2x1
jax: 0.10.0
libtpu: 0.0.40
codegen_flags: <defaults>
</compile_context>

<pallas_src>
import math
from functools import partial

import jax
import jax.numpy as jnp
from jax.experimental import pallas as pl
from jax.experimental.pallas import tpu as pltpu


def _round_up(x, m):
    return (x + m - 1) // m * m


def _tile_rows(m, pref, align=16, min_blocks=2):
    """Pick an M tile (multiple of `align`, <= pref) and padded M it divides.

    Prefers >= min_blocks grid blocks so v7x can shard the parallel axis
    across both TensorCores.
    """
    tm = min(pref, _round_up(max(1, -(-m // min_blocks)), align))
    tm = max(tm, align)
    mp = _round_up(m, tm)
    return tm, mp


def _pick_bnho(n):
    """Pick how many (n, ho) row groups the conv2 kernel processes per step."""
    rows = n * 14
    for b in (28, 14, 7):
        if rows % b == 0 and rows // b >= 2:
            return b
    return 14


# ----------------------------------------------------------------------------
# Pallas kernels
# ----------------------------------------------------------------------------
def conv1_kernel(p_ref, w_ref, b_ref, o_ref):
    """conv1 as packed matmul + bias + ReLU (single K step, no scratch).

    p_ref: (tm, 36) bf16  -- 4 adjacent pixels' 9-tap patches per row
    w_ref: (36, 128) bf16 -- block-diagonal 4x copies of (9, 32) conv1 weight
    b_ref: (1, 128) f32, o_ref: (tm, 128) bf16 (lane-dense)
    """
    y = jnp.dot(p_ref[...], w_ref[...], preferred_element_type=jnp.float32)
    o_ref[...] = jnp.maximum(y + b_ref[...], 0.0).astype(o_ref.dtype)


def conv2_pool_kernel(x_ref, w_ref, b_ref, o_ref, stage_ref, *, b_nho):
    """Fused conv2 matmul + 2x2 max-pool + bias + ReLU.

    x_ref:     (b_nho, 2, 14, 576) bf16 -- rows (n*ho, hi, wo); 576 lanes are
               the two w-pool-parity 288-feature patches, concatenated.
    w_ref:     (576, 128) bf16 -- block-diagonal 2x copies of (288, 64) conv2
               weight (one copy per w pool parity).
    b_ref:     (1, 64) f32
    o_ref:     (1, b_nho*14, 64) bf16 -- NHWC-ordered pooled rows (ho, wo, c)
    stage_ref: (2*b_nho*14, 576) bf16 scratch.

    The (14, 576) slabs are staged into a contiguous matrix (hi=0 rows in the
    first half, hi=1 rows in the second half) so a single matmul per grid
    step feeds the MXU.  max / bias / ReLU commute (monotonic), so bias+ReLU
    is applied once after both pool maxes.
    """
    h_rows = b_nho * 14
    for hi in range(2):
        for r in range(b_nho):
            row0 = (hi * b_nho + r) * 14
            stage_ref[row0:row0 + 14, :] = x_ref[r, hi]

    d = jnp.dot(stage_ref[...], w_ref[...],
                preferred_element_type=jnp.float32)          # (2*h_rows, 128)
    wmax = jnp.maximum(d[:, 0:64], d[:, 64:128])             # max over w pool
    pooled = jnp.maximum(wmax[0:h_rows, :],
                         wmax[h_rows:2 * h_rows, :])         # max over h pool
    o_ref[0] = jnp.maximum(pooled + b_ref[...], 0.0).astype(o_ref.dtype)


def fc_kernel(x_ref, w1_ref, b1_ref, w2_ref, b2_ref, o_ref):
    """fc1 + ReLU + fc2 in one step; fc1 weight is VMEM-resident (no K grid).

    x_ref: (tm, 12544) bf16, w1_ref: (12544, 128) bf16, b1_ref: (1, 128) f32
    w2_ref: (128, 128) bf16 (zero-padded from (128, 10)), b2_ref: (1, 128) f32
    o_ref: (tm, 128) f32 (lane-dense; sliced to 10 in the wrapper)
    """
    h = jnp.dot(x_ref[...], w1_ref[...], preferred_element_type=jnp.float32)
    h = jnp.maximum(h + b1_ref[...], 0.0)
    # Dropout(p=0.25) is identity at inference.
    # TODO(synk): training-mode stochastic dropout (pltpu.prng_*) omitted.
    logits = jnp.dot(h.astype(w2_ref.dtype), w2_ref[...],
                     preferred_element_type=jnp.float32) + b2_ref[...]
    o_ref[...] = logits.astype(o_ref.dtype)


# ----------------------------------------------------------------------------
# pallas_call wrappers
# ----------------------------------------------------------------------------
def conv1_relu(p1, w, b, *, tm):
    M, K = p1.shape
    _, C = w.shape
    assert M % tm == 0, (M, tm)
    return pl.pallas_call(
        conv1_kernel,
        out_shape=jax.ShapeDtypeStruct((M, C), jnp.bfloat16),
        grid_spec=pltpu.PrefetchScalarGridSpec(
            num_scalar_prefetch=0,
            grid=(M // tm,),
            in_specs=[
                pl.BlockSpec((tm, K), lambda i: (i, 0)),
                pl.BlockSpec((K, C), lambda i: (0, 0)),
                pl.BlockSpec((1, C), lambda i: (0, 0)),
            ],
            out_specs=pl.BlockSpec((tm, C), lambda i: (i, 0)),
        ),
        compiler_params=pltpu.CompilerParams(
            dimension_semantics=("parallel",)),
    )(p1, w, b)


def conv2_relu_pool(pat5, w, b, *, b_nho):
    A = pat5.shape[0]                     # N*14
    assert pat5.shape[1:] == (2, 14, 576), pat5.shape
    assert A % b_nho == 0, (A, b_nho)
    G = A // b_nho
    H = b_nho * 14
    kern = partial(conv2_pool_kernel, b_nho=b_nho)
    return pl.pallas_call(
        kern,
        out_shape=jax.ShapeDtypeStruct((G, H, 64), jnp.bfloat16),
        grid_spec=pltpu.PrefetchScalarGridSpec(
            num_scalar_prefetch=0,
            grid=(G,),
            in_specs=[
                pl.BlockSpec((b_nho, 2, 14, 576), lambda g: (g, 0, 0, 0)),
                pl.BlockSpec((576, 128), lambda g: (0, 0)),
                pl.BlockSpec((1, 64), lambda g: (0, 0)),
            ],
            out_specs=pl.BlockSpec((1, H, 64), lambda g: (g, 0, 0)),
            scratch_shapes=[pltpu.VMEM((2 * H, 576), jnp.bfloat16)],
        ),
        compiler_params=pltpu.CompilerParams(
            dimension_semantics=("parallel",)),
    )(pat5, w, b)


def fc_fused(x, w1, b1, w2, b2, *, tm):
    M, K = x.shape
    Hd = w1.shape[1]
    O = w2.shape[1]
    assert M % tm == 0, (M, tm)
    return pl.pallas_call(
        fc_kernel,
        out_shape=jax.ShapeDtypeStruct((M, O), jnp.float32),
        grid_spec=pltpu.PrefetchScalarGridSpec(
            num_scalar_prefetch=0,
            grid=(M // tm,),
            in_specs=[
                pl.BlockSpec((tm, K), lambda i: (i, 0)),
                pl.BlockSpec((K, Hd), lambda i: (0, 0)),
                pl.BlockSpec((1, Hd), lambda i: (0, 0)),
                pl.BlockSpec((Hd, O), lambda i: (0, 0)),
                pl.BlockSpec((1, O), lambda i: (0, 0)),
            ],
            out_specs=pl.BlockSpec((tm, O), lambda i: (i, 0)),
        ),
        compiler_params=pltpu.CompilerParams(
            dimension_semantics=("parallel",)),
    )(x, w1, b1, w2, b2)


# ----------------------------------------------------------------------------
# JAX glue: NHWC im2col, layout packing, parameter setup
# ----------------------------------------------------------------------------
def im2col_3x3_same_nhwc(x):
    """x: (N, H, W, C) -> (N, H, W, 9*C); feature order (tap=(dy,dx), c)."""
    N, H, W, C = x.shape
    xp = jnp.pad(x, ((0, 0), (1, 1), (1, 1), (0, 0)))
    cols = [xp[:, dy:dy + H, dx:dx + W, :]
            for dy in range(3) for dx in range(3)]       # each (N, H, W, C)
    pat = jnp.stack(cols, axis=3)                        # (N, H, W, 9, C)
    return pat.reshape(N, H, W, 9 * C)


def make_params(key):
    ks = jax.random.split(key, 8)

    def init(k, shape, fan_in):
        return jax.random.normal(k, shape, jnp.float32) / math.sqrt(fan_in)

    w1 = init(ks[0], (32, 1, 3, 3), 9)                    # OIHW
    b1 = init(ks[1], (32,), 9)
    w2 = init(ks[2], (64, 32, 3, 3), 288)
    b2 = init(ks[3], (64,), 288)
    wf1 = init(ks[4], (128, 64 * 14 * 14), 64 * 14 * 14)  # (out, in) c-h-w order
    bf1 = init(ks[5], (128,), 64 * 14 * 14)
    wf2 = init(ks[6], (10, 128), 128)
    bf2 = init(ks[7], (10,), 128)

    # Quantize weights to bf16 once; reference uses the same rounded values.
    w1_bf, w2_bf = w1.astype(jnp.bfloat16), w2.astype(jnp.bfloat16)
    wf1_bf, wf2_bf = wf1.astype(jnp.bfloat16), wf2.astype(jnp.bfloat16)

    p = {}
    # f32 copies (bf16 round-tripped) for the pure-JAX reference.
    p["w1"], p["b1"] = w1_bf.astype(jnp.float32), b1
    p["w2"], p["b2"] = w2_bf.astype(jnp.float32), b2
    p["wf1"], p["bf1"] = wf1_bf.astype(jnp.float32), bf1
    p["wf2"], p["bf2"] = wf2_bf.astype(jnp.float32), bf2

    # Kernel layouts: K order (tap, cin) to match NHWC im2col.
    w1m = w1_bf.transpose(2, 3, 1, 0).reshape(9, 32)       # (9, 32)
    w2m = w2_bf.transpose(2, 3, 1, 0).reshape(288, 64)     # (288, 64)
    # Block-diagonal packing for lane-dense conv1 output / w-pool-pair conv2.
    p["w1p"] = jnp.kron(jnp.eye(4, dtype=jnp.bfloat16), w1m)   # (36, 128)
    p["b1p"] = jnp.tile(b1, 4).reshape(1, 128)                 # f32
    p["w2p"] = jnp.kron(jnp.eye(2, dtype=jnp.bfloat16), w2m)   # (576, 128)
    p["b2m"] = b2.reshape(1, 64)                               # f32
    # fc1 weight: permute K from (c, h, w) -> (h, w, c) (NHWC flatten order).
    wf1_hwc = (wf1_bf.reshape(128, 64, 14, 14)
               .transpose(0, 2, 3, 1).reshape(128, 64 * 14 * 14))
    p["wf1m"] = wf1_hwc.T                                      # (12544, 128) bf16
    p["bf1m"] = bf1.reshape(1, 128)                            # f32
    # fc2 padded to lane-dense 128 outputs (zeros in lanes 10..127).
    p["wf2m"] = jnp.pad(wf2_bf.T, ((0, 0), (0, 118)))          # (128, 128) bf16
    p["bf2m"] = jnp.pad(bf2, (0, 118)).reshape(1, 128)         # f32
    return p


def mnist_forward(x, p):
    """x: (N, 1, 28, 28) float32 -> logits (N, 10)."""
    N, Cin, H, W = x.shape
    assert (Cin, H, W) == (1, 28, 28), "fc1 size 64*14*14 requires 1x28x28"

    xb = x.astype(jnp.bfloat16).reshape(N, 28, 28, 1)    # Cin=1: pure reshape

    # ---- conv1 + ReLU: 4 pixels packed per row -> lane-dense (., 128) ----
    p1 = im2col_3x3_same_nhwc(xb).reshape(N * 28 * 7, 36)  # rows (n,h,wg4)
    M1 = N * 196
    tm1, M1p = _tile_rows(M1, 2048)
    p1 = jnp.pad(p1, ((0, M1p - M1), (0, 0)))
    y1 = conv1_relu(p1, p["w1p"], p["b1p"], tm=tm1)      # (M1p, 128) bf16
    y1 = y1[:M1].reshape(N, 28, 28, 32)                  # NHWC, same bytes

    # ---- conv2 + ReLU + 2x2 max-pool, pool regroup done in-kernel ----
    pat = im2col_3x3_same_nhwc(y1)                       # (N, 28, 28, 288) bf16
    # Free bitcast view: (n*ho, h-parity, wo, w-parity*288).
    pat5 = pat.reshape(N * 14, 2, 14, 576)
    b_nho = _pick_bnho(N)
    y2 = conv2_relu_pool(pat5, p["w2p"], p["b2m"], b_nho=b_nho)
    flat = y2.reshape(N, 64 * 14 * 14)                   # NHWC (h,w,c) flatten

    # ---- fc1 + ReLU + (dropout=identity) + fc2, one fused kernel ----
    tmf, Mfp = _tile_rows(N, 128)
    flat = jnp.pad(flat, ((0, Mfp - N), (0, 0)))
    logits = fc_fused(flat, p["wf1m"], p["bf1m"], p["wf2m"], p["bf2m"],
                      tm=tmf)                            # (Mfp, 128) f32
    return logits[:N, :10]


def reference_forward(x, p):
    """Pure-JAX f32 reference matching the PyTorch module (eval mode)."""
    dn = ("NCHW", "OIHW", "NCHW")
    y = jax.lax.conv_general_dilated(x, p["w1"], (1, 1), "SAME",
                                     dimension_numbers=dn)
    y = jnp.maximum(y + p["b1"][None, :, None, None], 0.0)
    y = jax.lax.conv_general_dilated(y, p["w2"], (1, 1), "SAME",
                                     dimension_numbers=dn)
    y = jnp.maximum(y + p["b2"][None, :, None, None], 0.0)
    y = jax.lax.reduce_window(y, -jnp.inf, jax.lax.max,
                              (1, 1, 2, 2), (1, 1, 2, 2), "VALID")
    y = y.reshape(x.shape[0], -1)
    y = jnp.maximum(y @ p["wf1"].T + p["bf1"], 0.0)
    return y @ p["wf2"].T + p["bf2"]


if __name__ == "__main__":
    key = jax.random.PRNGKey(0)
    kx, kp = jax.random.split(key)
    # MNIST-shaped input (fc1 size 64*14*14 requires 1x28x28 spatial).
    x = jax.random.normal(kx, (2, 1, 28, 28), jnp.float32)
    # Round-trip to bf16 so both paths see identical input values.
    x = x.astype(jnp.bfloat16).astype(jnp.float32)
    params = make_params(kp)

    fwd = jax.jit(mnist_forward)
    out = jax.block_until_ready(fwd(x, params))
    ref = jax.block_until_ready(reference_forward(x, params))

    assert out.shape == (2, 10), out.shape
    err = jnp.max(jnp.abs(out - ref))
    assert jnp.allclose(out, ref, rtol=2e-2, atol=2e-2), f"max abs err {err}"
    print("KERNEL_OK")
</pallas_src>

<mosaic_0001>
module attributes {stable_mosaic.version = 11 : i64} {
  func.func @conv1_kernel(%arg0: i32, %arg1: memref<208x36xbf16, #tpu.memory_space<vmem>>, %arg2: memref<36x128xbf16, #tpu.memory_space<vmem>>, %arg3: memref<1x128xf32, #tpu.memory_space<vmem>>, %arg4: memref<208x128xbf16, #tpu.memory_space<vmem>>) attributes {dimension_semantics = [#tpu.dimension_semantics<parallel>], iteration_bounds = array<i64: 2>, scalar_prefetch = 0 : i64, scratch_operands = 0 : i64, tpu.core_type = #tpu.core_type<tc>, window_params = [{transform_indices = @transform_0, window_bounds = array<i64: 208, 36>}, {pipeline_mode = #tpu.pipeline_mode<synchronous>, transform_indices = @transform_1, window_bounds = array<i64: 36, 128>}, {pipeline_mode = #tpu.pipeline_mode<synchronous>, transform_indices = @transform_2, window_bounds = array<i64: 1, 128>}, {transform_indices = @transform_3, window_bounds = array<i64: 208, 128>}]} {
    %c0 = arith.constant 0 : index
    %c0_0 = arith.constant 0 : index
    %0 = vector.load %arg1[%c0, %c0_0] : memref<208x36xbf16, #tpu.memory_space<vmem>>, vector<208x36xbf16>
    %c0_1 = arith.constant 0 : index
    %c0_2 = arith.constant 0 : index
    %1 = vector.load %arg2[%c0_1, %c0_2] : memref<36x128xbf16, #tpu.memory_space<vmem>>, vector<36x128xbf16>
    %cst = arith.constant dense<0.000000e+00> : vector<208x128xf32>
    %2 = tpu.matmul %0, %1, %cst {dimension_numbers = #tpu.dot_dimension_numbers<[1], [0], [0], [1], [0, 0, 1, 1], [], []>} : vector<208x36xbf16>, vector<36x128xbf16>, vector<208x128xf32> -> vector<208x128xf32>
    %c0_3 = arith.constant 0 : index
    %c0_4 = arith.constant 0 : index
    %3 = vector.load %arg3[%c0_3, %c0_4] : memref<1x128xf32, #tpu.memory_space<vmem>>, vector<1x128xf32>
    %4 = vector.broadcast %3 : vector<1x128xf32> to vector<208x128xf32>
    %5 = arith.addf %2, %4 : vector<208x128xf32>
    %cst_5 = arith.constant 0.000000e+00 : f32
    %6 = vector.broadcast %cst_5 : f32 to vector<208x128xf32>
    %7 = arith.maximumf %5, %6 : vector<208x128xf32>
    %8 = arith.truncf %7 : vector<208x128xf32> to vector<208x128xbf16>
    %c0_6 = arith.constant 0 : index
    %c0_7 = arith.constant 0 : index
    %9 = vector.load %arg4[%c0_6, %c0_7] : memref<208x128xbf16, #tpu.memory_space<vmem>>, vector<208x128xbf16>
    tpu.vector_store %arg4[%c0_6, %c0_7], %8 {strides = array<i32>} : memref<208x128xbf16, #tpu.memory_space<vmem>>, vector<208x128xbf16>,
    return
  }
  func.func @transform_0(%arg0: i32) -> (i32, i32) {
    %c0_i32 = arith.constant 0 : i32
    %c0_i32_0 = arith.constant 0 : i32
    return %arg0, %c0_i32 : i32, i32
  }
  func.func @transform_1(%arg0: i32) -> (i32, i32) {
    %c0_i32 = arith.constant 0 : i32
    %c0_i32_0 = arith.constant 0 : i32
    %c0_i32_1 = arith.constant 0 : i32
    return %c0_i32, %c0_i32_0 : i32, i32
  }
  func.func @transform_2(%arg0: i32) -> (i32, i32) {
    %c0_i32 = arith.constant 0 : i32
    %c0_i32_0 = arith.constant 0 : i32
    %c0_i32_1 = arith.constant 0 : i32
    return %c0_i32, %c0_i32_0 : i32, i32
  }
  func.func @transform_3(%arg0: i32) -> (i32, i32) {
    %c0_i32 = arith.constant 0 : i32
    %c0_i32_0 = arith.constant 0 : i32
    return %arg0, %c0_i32 : i32, i32
  }
}

module attributes {stable_mosaic.version = 11 : i64} {
  func.func @conv2_pool_kernel(%arg0: i32, %arg1: memref<14x2x14x576xbf16, #tpu.memory_space<vmem>>, %arg2: memref<576x128xbf16, #tpu.memory_space<vmem>>, %arg3: memref<1x64xf32, #tpu.memory_space<vmem>>, %arg4: memref<1x196x64xbf16, #tpu.memory_space<vmem>>, %arg5: memref<392x576xbf16, #tpu.memory_space<vmem>>) attributes {dimension_semantics = [#tpu.dimension_semantics<parallel>], iteration_bounds = array<i64: 2>, scalar_prefetch = 0 : i64, scratch_operands = 1 : i64, tpu.core_type = #tpu.core_type<tc>, window_params = [{transform_indices = @transform_0, window_bounds = array<i64: 14, 2, 14, 576>}, {pipeline_mode = #tpu.pipeline_mode<synchronous>, transform_indices = @transform_1, window_bounds = array<i64: 576, 128>}, {pipeline_mode = #tpu.pipeline_mode<synchronous>, transform_indices = @transform_2, window_bounds = array<i64: 1, 64>}, {transform_indices = @transform_3, window_bounds = array<i64: 1, 196, 64>}]} {
    %c0 = arith.constant 0 : index
    %c0_0 = arith.constant 0 : index
    %c0_1 = arith.constant 0 : index
    %c0_2 = arith.constant 0 : index
    %0 = vector.load %arg1[%c0, %c0_0, %c0_1, %c0_2] : memref<14x2x14x576xbf16, #tpu.memory_space<vmem>>, vector<1x1x14x576xbf16>
    %1 = vector.shape_cast %0 : vector<1x1x14x576xbf16> to vector<14x576xbf16>
    %c0_3 = arith.constant 0 : index
    %c0_4 = arith.constant 0 : index
    %2 = vector.load %arg5[%c0_3, %c0_4] : memref<392x576xbf16, #tpu.memory_space<vmem>>, vector<14x576xbf16>
    tpu.vector_store %arg5[%c0_3, %c0_4], %1 {strides = array<i32>} : memref<392x576xbf16, #tpu.memory_space<vmem>>, vector<14x576xbf16>,
    %c1 = arith.constant 1 : index
    %c0_5 = arith.constant 0 : index
    %c0_6 = arith.constant 0 : index
    %c0_7 = arith.constant 0 : index
    %3 = vector.load %arg1[%c1, %c0_5, %c0_6, %c0_7] : memref<14x2x14x576xbf16, #tpu.memory_space<vmem>>, vector<1x1x14x576xbf16>
    %4 = vector.shape_cast %3 : vector<1x1x14x576xbf16> to vector<14x576xbf16>
    %c14 = arith.constant 14 : index
    %c0_8 = arith.constant 0 : index
    %5 = vector.load %arg5[%c14, %c0_8] : memref<392x576xbf16, #tpu.memory_space<vmem>>, vector<14x576xbf16>
    tpu.vector_store %arg5[%c14, %c0_8], %4 {strides = array<i32>} : memref<392x576xbf16, #tpu.memory_space<vmem>>, vector<14x576xbf16>,
    %c2 = arith.constant 2 : index
    %c0_9 = arith.constant 0 : index
    %c0_10 = arith.constant 0 : index
    %c0_11 = arith.constant 0 : index
    %6 = vector.load %arg1[%c2, %c0_9, %c0_10, %c0_11] : memref<14x2x14x576xbf16, #tpu.memory_space<vmem>>, vector<1x1x14x576xbf16>
    %7 = vector.shape_cast %6 : vector<1x1x14x576xbf16> to vector<14x576xbf16>
    %c28 = arith.constant 28 : index
    %c0_12 = arith.constant 0 : index
    %8 = vector.load %arg5[%c28, %c0_12] : memref<392x576xbf16, #tpu.memory_space<vmem>>, vector<14x576xbf16>
    tpu.vector_store %arg5[%c28, %c0_12], %7 {strides = array<i32>} : memref<392x576xbf16, #tpu.memory_space<vmem>>, vector<14x576xbf16>,
    %c3 = arith.constant 3 : index
    %c0_13 = arith.constant 0 : index
    %c0_14 = arith.constant 0 : index
    %c0_15 = arith.constant 0 : index
    %9 = vector.load %arg1[%c3, %c0_13, %c0_14, %c0_15] : memref<14x2x14x576xbf16, #tpu.memory_space<vmem>>, vector<1x1x14x576xbf16>
    %10 = vector.shape_cast %9 : vector<1x1x14x576xbf16> to vector<14x576xbf16>
    %c42 = arith.constant 42 : index
    %c0_16 = arith.constant 0 : index
    %11 = vector.load %arg5[%c42, %c0_16] : memref<392x576xbf16, #tpu.memory_space<vmem>>, vector<14x576xbf16>
    tpu.vector_store %arg5[%c42, %c0_16], %10 {strides = array<i32>} : memref<392x576xbf16, #tpu.memory_space<vmem>>, vector<14x576xbf16>,
    %c4 = arith.constant 4 : index
    %c0_17 = arith.constant 0 : index
    %c0_18 = arith.constant 0 : index
    %c0_19 = arith.constant 0 : index
    %12 = vector.load %arg1[%c4, %c0_17, %c0_18, %c0_19] : memref<14x2x14x576xbf16, #tpu.memory_space<vmem>>, vector<1x1x14x576xbf16>
    %13 = vector.shape_cast %12 : vector<1x1x14x576xbf16> to vector<14x576xbf16>
    %c56 = arith.constant 56 : index
    %c0_20 = arith.constant 0 : index
    %14 = vector.load %arg5[%c56, %c0_20] : memref<392x576xbf16, #tpu.memory_space<vmem>>, vector<14x576xbf16>
    tpu.vector_store %arg5[%c56, %c0_20], %13 {strides = array<i32>} : memref<392x576xbf16, #tpu.memory_space<vmem>>, vector<14x576xbf16>,
    %c5 = arith.constant 5 : index
    %c0_21 = arith.constant 0 : index
    %c0_22 = arith.constant 0 : index
    %c0_23 = arith.constant 0 : index
    %15 = vector.load %arg1[%c5, %c0_21, %c0_22, %c0_23] : memref<14x2x14x576xbf16, #tpu.memory_space<vmem>>, vector<1x1x14x576xbf16>
    %16 = vector.shape_cast %15 : vector<1x1x14x576xbf16> to vector<14x576xbf16>
    %c70 = arith.constant 70 : index
    %c0_24 = arith.constant 0 : index
    %17 = vector.load %arg5[%c70, %c0_24] : memref<392x576xbf16, #tpu.memory_space<vmem>>, vector<14x576xbf16>
    tpu.vector_store %arg5[%c70, %c0_24], %16 {strides = array<i32>} : memref<392x576xbf16, #tpu.memory_space<vmem>>, vector<14x576xbf16>,
    %c6 = arith.constant 6 : index
    %c0_25 = arith.constant 0 : index
    %c0_26 = arith.constant 0 : index
    %c0_27 = arith.constant 0 : index
    %18 = vector.load %arg1[%c6, %c0_25, %c0_26, %c0_27] : memref<14x2x14x576xbf16, #tpu.memory_space<vmem>>, vector<1x1x14x576xbf16>
    %19 = vector.shape_cast %18 : vector<1x1x14x576xbf16> to vector<14x576xbf16>
    %c84 = arith.constant 84 : index
    %c0_28 = arith.constant 0 : index
    %20 = vector.load %arg5[%c84, %c0_28] : memref<392x576xbf16, #tpu.memory_space<vmem>>, vector<14x576xbf16>
    tpu.vector_store %arg5[%c84, %c0_28], %19 {strides = array<i32>} : memref<392x576xbf16, #tpu.memory_space<vmem>>, vector<14x576xbf16>,
    %c7 = arith.constant 7 : index
    %c0_29 = arith.constant 0 : index
    %c0_30 = arith.constant 0 : index
    %c0_31 = arith.constant 0 : index
    %21 = vector.load %arg1[%c7, %c0_29, %c0_30, %c0_31] : memref<14x2x14x576xbf16, #tpu.memory_space<vmem>>, vector<1x1x14x576xbf16>
    %22 = vector.shape_cast %21 : vector<1x1x14x576xbf16> to vector<14x576xbf16>
    %c98 = arith.constant 98 : index
    %c0_32 = arith.constant 0 : index
    %23 = vector.load %arg5[%c98, %c0_32] : memref<392x576xbf16, #tpu.memory_space<vmem>>, vector<14x576xbf16>
    tpu.vector_store %arg5[%c98, %c0_32], %22 {strides = array<i32>} : memref<392x576xbf16, #tpu.memory_space<vmem>>, vector<14x576xbf16>,
    %c8 = arith.constant 8 : index
    %c0_33 = arith.constant 0 : index
    %c0_34 = arith.constant 0 : index
    %c0_35 = arith.constant 0 : index
    %24 = vector.load %arg1[%c8, %c0_33, %c0_34, %c0_35] : memref<14x2x14x576xbf16, #tpu.memory_space<vmem>>, vector<1x1x14x576xbf16>
    %25 = vector.shape_cast %24 : vector<1x1x14x576xbf16> to vector<14x576xbf16>
    %c112 = arith.constant 112 : index
    %c0_36 = arith.constant 0 : index
    %26 = vector.load %arg5[%c112, %c0_36] : memref<392x576xbf16, #tpu.memory_space<vmem>>, vector<14x576xbf16>
    tpu.vector_store %arg5[%c112, %c0_36], %25 {strides = array<i32>} : memref<392x576xbf16, #tpu.memory_space<vmem>>, vector<14x576xbf16>,
    %c9 = arith.constant 9 : index
    %c0_37 = arith.constant 0 : index
    %c0_38 = arith.constant 0 : index
    %c0_39 = arith.constant 0 : index
    %27 = vector.load %arg1[%c9, %c0_37, %c0_38, %c0_39] : memref<14x2x14x576xbf16, #tpu.memory_space<vmem>>, vector<1x1x14x576xbf16>
    %28 = vector.shape_cast %27 : vector<1x1x14x576xbf16> to vector<14x576xbf16>
    %c126 = arith.constant 126 : index
    %c0_40 = arith.constant 0 : index
    %29 = vector.load %arg5[%c126, %c0_40] : memref<392x576xbf16, #tpu.memory_space<vmem>>, vector<14x576xbf16>
    tpu.vector_store %arg5[%c126, %c0_40], %28 {strides = array<i32>} : memref<392x576xbf16, #tpu.memory_space<vmem>>, vector<14x576xbf16>,
    %c10 = arith.constant 10 : index
    %c0_41 = arith.constant 0 : index
    %c0_42 = arith.constant 0 : index
    %c0_43 = arith.constant 0 : index
    %30 = vector.load %arg1[%c10, %c0_41, %c0_42, %c0_43] : memref<14x2x14x576xbf16, #tpu.memory_space<vmem>>, vector<1x1x14x576xbf16>
    %31 = vector.shape_cast %30 : vector<1x1x14x576xbf16> to vector<14x576xbf16>
    %c140 = arith.constant 140 : index
    %c0_44 = arith.constant 0 : index
    %32 = vector.load %arg5[%c140, %c0_44] : memref<392x576xbf16, #tpu.memory_space<vmem>>, vector<14x576xbf16>
    tpu.vector_store %arg5[%c140, %c0_44], %31 {strides = array<i32>} : memref<392x576xbf16, #tpu.memory_space<vmem>>, vector<14x576xbf16>,
    %c11 = arith.constant 11 : index
    %c0_45 = arith.constant 0 : index
    %c0_46 = arith.constant 0 : index
    %c0_47 = arith.constant 0 : index
    %33 = vector.load %arg1[%c11, %c0_45, %c0_46, %c0_47] : memref<14x2x14x576xbf16, #tpu.memory_space<vmem>>, vector<1x1x14x576xbf16>
    %34 = vector.shape_cast %33 : vector<1x1x14x576xbf16> to vector<14x576xbf16>
    %c154 = arith.constant 154 : index
    %c0_48 = arith.constant 0 : index
    %35 = vector.load %arg5[%c154, %c0_48] : memref<392x576xbf16, #tpu.memory_space<vmem>>, vector<14x576xbf16>
    tpu.vector_store %arg5[%c154, %c0_48], %34 {strides = array<i32>} : memref<392x576xbf16, #tpu.memory_space<vmem>>, vector<14x576xbf16>,
    %c12 = arith.constant 12 : index
    %c0_49 = arith.constant 0 : index
    %c0_50 = arith.constant 0 : index
    %c0_51 = arith.constant 0 : index
    %36 = vector.load %arg1[%c12, %c0_49, %c0_50, %c0_51] : memref<14x2x14x576xbf16, #tpu.memory_space<vmem>>, vector<1x1x14x576xbf16>
    %37 = vector.shape_cast %36 : vector<1x1x14x576xbf16> to vector<14x576xbf16>
    %c168 = arith.constant 168 : index
    %c0_52 = arith.constant 0 : index
    %38 = vector.load %arg5[%c168, %c0_52] : memref<392x576xbf16, #tpu.memory_space<vmem>>, vector<14x576xbf16>
    tpu.vector_store %arg5[%c168, %c0_52], %37 {strides = array<i32>} : memref<392x576xbf16, #tpu.memory_space<vmem>>, vector<14x576xbf16>,
    %c13 = arith.constant 13 : index
    %c0_53 = arith.constant 0 : index
    %c0_54 = arith.constant 0 : index
    %c0_55 = arith.constant 0 : index
    %39 = vector.load %arg1[%c13, %c0_53, %c0_54, %c0_55] : memref<14x2x14x576xbf16, #tpu.memory_space<vmem>>, vector<1x1x14x576xbf16>
    %40 = vector.shape_cast %39 : vector<1x1x14x576xbf16> to vector<14x576xbf16>
    %c182 = arith.constant 182 : index
    %c0_56 = arith.constant 0 : index
    %41 = vector.load %arg5[%c182, %c0_56] : memref<392x576xbf16, #tpu.memory_space<vmem>>, vector<14x576xbf16>
    tpu.vector_store %arg5[%c182, %c0_56], %40 {strides = array<i32>} : memref<392x576xbf16, #tpu.memory_space<vmem>>, vector<14x576xbf16>,
    %c0_57 = arith.constant 0 : index
    %c1_58 = arith.constant 1 : index
    %c0_59 = arith.constant 0 : index
    %c0_60 = arith.constant 0 : index
    %42 = vector.load %arg1[%c0_57, %c1_58, %c0_59, %c0_60] : memref<14x2x14x576xbf16, #tpu.memory_space<vmem>>, vector<1x1x14x576xbf16>
    %43 = vector.shape_cast %42 : vector<1x1x14x576xbf16> to vector<14x576xbf16>
    %c196 = arith.constant 196 : index
    %c0_61 = arith.constant 0 : index
    %44 = vector.load %arg5[%c196, %c0_61] : memref<392x576xbf16, #tpu.memory_space<vmem>>, vector<14x576xbf16>
    tpu.vector_store %arg5[%c196, %c0_61], %43 {strides = array<i32>} : memref<392x576xbf16, #tpu.memory_space<vmem>>, vector<14x576xbf16>,
    %c1_62 = arith.constant 1 : index
    %c1_63 = arith.constant 1 : index
    %c0_64 = arith.constant 0 : index
    %c0_65 = arith.constant 0 : index
    %45 = vector.load %arg1[%c1_62, %c1_63, %c0_64, %c0_65] : memref<14x2x14x576xbf16, #tpu.memory_space<vmem>>, vector<1x1x14x576xbf16>
    %46 = vector.shape_cast %45 : vector<1x1x14x576xbf16> to vector<14x576xbf16>
    %c210 = arith.constant 210 : index
    %c0_66 = arith.constant 0 : index
    %47 = vector.load %arg5[%c210, %c0_66] : memref<392x576xbf16, #tpu.memory_space<vmem>>, vector<14x576xbf16>
    tpu.vector_store %arg5[%c210, %c0_66], %46 {strides = array<i32>} : memref<392x576xbf16, #tpu.memory_space<vmem>>, vector<14x576xbf16>,
    %c2_67 = arith.constant 2 : index
    %c1_68 = arith.constant 1 : index
    %c0_69 = arith.constant 0 : index
    %c0_70 = arith.constant 0 : index
    %48 = vector.load %arg1[%c2_67, %c1_68, %c0_69, %c0_70] : memref<14x2x14x576xbf16, #tpu.memory_space<vmem>>, vector<1x1x14x576xbf16>
    %49 = vector.shape_cast %48 : vector<1x1x14x576xbf16> to vector<14x576xbf16>
    %c224 = arith.constant 224 : index
    %c0_71 = arith.constant 0 : index
    %50 = vector.load %arg5[%c224, %c0_71] : memref<392x576xbf16, #tpu.memory_space<vmem>>, vector<14x576xbf16>
    tpu.vector_store %arg5[%c224, %c0_71], %49 {strides = array<i32>} : memref<392x576xbf16, #tpu.memory_space<vmem>>, vector<14x576xbf16>,
    %c3_72 = arith.constant 3 : index
    %c1_73 = arith.constant 1 : index
    %c0_74 = arith.constant 0 : index
    %c0_75 = arith.constant 0 : index
    %51 = vector.load %arg1[%c3_72, %c1_73, %c0_74, %c0_75] : memref<14x2x14x576xbf16, #tpu.memory_space<vmem>>, vector<1x1x14x576xbf16>
    %52 = vector.shape_cast %51 : vector<1x1x14x576xbf16> to vector<14x576xbf16>
    %c238 = arith.constant 238 : index
    %c0_76 = arith.constant 0 : index
    %53 = vector.load %arg5[%c238, %c0_76] : memref<392x576xbf16, #tpu.memory_space<vmem>>, vector<14x576xbf16>
    tpu.vector_store %arg5[%c238, %c0_76], %52 {strides = array<i32>} : memref<392x576xbf16, #tpu.memory_space<vmem>>, vector<14x576xbf16>,
    %c4_77 = arith.constant 4 : index
    %c1_78 = arith.constant 1 : index
    %c0_79 = arith.constant 0 : index
    %c0_80 = arith.constant 0 : index
    %54 = vector.load %arg1[%c4_77, %c1_78, %c0_79, %c0_80] : memref<14x2x14x576xbf16, #tpu.memory_space<vmem>>, vector<1x1x14x576xbf16>
    %55 = vector.shape_cast %54 : vector<1x1x14x576xbf16> to vector<14x576xbf16>
    %c252 = arith.constant 252 : index
    %c0_81 = arith.constant 0 : index
    %56 = vector.load %arg5[%c252, %c0_81] : memref<392x576xbf16, #tpu.memory_space<vmem>>, vector<14x576xbf16>
    tpu.vector_store %arg5[%c252, %c0_81], %55 {strides = array<i32>} : memref<392x576xbf16, #tpu.memory_space<vmem>>, vector<14x576xbf16>,
    %c5_82 = arith.constant 5 : index
    %c1_83 = arith.constant 1 : index
    %c0_84 = arith.constant 0 : index
    %c0_85 = arith.constant 0 : index
    %57 = vector.load %arg1[%c5_82, %c1_83, %c0_84, %c0_85] : memref<14x2x14x576xbf16, #tpu.memory_space<vmem>>, vector<1x1x14x576xbf16>
    %58 = vector.shape_cast %57 : vector<1x1x14x576xbf16> to vector<14x576xbf16>
    %c266 = arith.constant 266 : index
    %c0_86 = arith.constant 0 : index
    %59 = vector.load %arg5[%c266, %c0_86] : memref<392x576xbf16, #tpu.memory_space<vmem>>, vector<14x576xbf16>
    tpu.vector_store %arg5[%c266, %c0_86], %58 {strides = array<i32>} : memref<392x576xbf16, #tpu.memory_space<vmem>>, vector<14x576xbf16>,
    %c6_87 = arith.constant 6 : index
    %c1_88 = arith.constant 1 : index
    %c0_89 = arith.constant 0 : index
    %c0_90 = arith.constant 0 : index
    %60 = vector.load %arg1[%c6_87, %c1_88, %c0_89, %c0_90] : memref<14x2x14x576xbf16, #tpu.memory_space<vmem>>, vector<1x1x14x576xbf16>
    %61 = vector.shape_cast %60 : vector<1x1x14x576xbf16> to vector<14x576xbf16>
    %c280 = arith.constant 280 : index
    %c0_91 = arith.constant 0 : index
    %62 = vector.load %arg5[%c280, %c0_91] : memref<392x576xbf16, #tpu.memory_space<vmem>>, vector<14x576xbf16>
    tpu.vector_store %arg5[%c280, %c0_91], %61 {strides = array<i32>} : memref<392x576xbf16, #tpu.memory_space<vmem>>, vector<14x576xbf16>,
    %c7_92 = arith.constant 7 : index
    %c1_93 = arith.constant 1 : index
    %c0_94 = arith.constant 0 : index
    %c0_95 = arith.constant 0 : index
    %63 = vector.load %arg1[%c7_92, %c1_93, %c0_94, %c0_95] : memref<14x2x14x576xbf16, #tpu.memory_space<vmem>>, vector<1x1x14x576xbf16>
    %64 = vector.shape_cast %63 : vector<1x1x14x576xbf16> to vector<14x576xbf16>
    %c294 = arith.constant 294 : index
    %c0_96 = arith.constant 0 : index
    %65 = vector.load %arg5[%c294, %c0_96] : memref<392x576xbf16, #tpu.memory_space<vmem>>, vector<14x576xbf16>
    tpu.vector_store %arg5[%c294, %c0_96], %64 {strides = array<i32>} : memref<392x576xbf16, #tpu.memory_space<vmem>>, vector<14x576xbf16>,
    %c8_97 = arith.constant 8 : index
    %c1_98 = arith.constant 1 : index
    %c0_99 = arith.constant 0 : index
    %c0_100 = arith.constant 0 : index
    %66 = vector.load %arg1[%c8_97, %c1_98, %c0_99, %c0_100] : memref<14x2x14x576xbf16, #tpu.memory_space<vmem>>, vector<1x1x14x576xbf16>
    %67 = vector.shape_cast %66 : vector<1x1x14x576xbf16> to vector<14x576xbf16>
    %c308 = arith.constant 308 : index
    %c0_101 = arith.constant 0 : index
    %68 = vector.load %arg5[%c308, %c0_101] : memref<392x576xbf16, #tpu.memory_space<vmem>>, vector<14x576xbf16>
    tpu.vector_store %arg5[%c308, %c0_101], %67 {strides = array<i32>} : memref<392x576xbf16, #tpu.memory_space<vmem>>, vector<14x576xbf16>,
    %c9_102 = arith.constant 9 : index
    %c1_103 = arith.constant 1 : index
    %c0_104 = arith.constant 0 : index
    %c0_105 = arith.constant 0 : index
    %69 = vector.load %arg1[%c9_102, %c1_103, %c0_104, %c0_105] : memref<14x2x14x576xbf16, #tpu.memory_space<vmem>>, vector<1x1x14x576xbf16>
    %70 = vector.shape_cast %69 : vector<1x1x14x576xbf16> to vector<14x576xbf16>
    %c322 = arith.constant 322 : index
    %c0_106 = arith.constant 0 : index
    %71 = vector.load %arg5[%c322, %c0_106] : memref<392x576xbf16, #tpu.memory_space<vmem>>, vector<14x576xbf16>
    tpu.vector_store %arg5[%c322, %c0_106], %70 {strides = array<i32>} : memref<392x576xbf16, #tpu.memory_space<vmem>>, vector<14x576xbf16>,
    %c10_107 = arith.constant 10 : index
    %c1_108 = arith.constant 1 : index
    %c0_109 = arith.constant 0 : index
    %c0_110 = arith.constant 0 : index
    %72 = vector.load %arg1[%c10_107, %c1_108, %c0_109, %c0_110] : memref<14x2x14x576xbf16, #tpu.memory_space<vmem>>, vector<1x1x14x576xbf16>
    %73 = vector.shape_cast %72 : vector<1x1x14x576xbf16> to vector<14x576xbf16>
    %c336 = arith.constant 336 : index
    %c0_111 = arith.constant 0 : index
    %74 = vector.load %arg5[%c336, %c0_111] : memref<392x576xbf16, #tpu.memory_space<vmem>>, vector<14x576xbf16>
    tpu.vector_store %arg5[%c336, %c0_111], %73 {strides = array<i32>} : memref<392x576xbf16, #tpu.memory_space<vmem>>, vector<14x576xbf16>,
    %c11_112 = arith.constant 11 : index
    %c1_113 = arith.constant 1 : index
    %c0_114 = arith.constant 0 : index
    %c0_115 = arith.constant 0 : index
    %75 = vector.load %arg1[%c11_112, %c1_113, %c0_114, %c0_115] : memref<14x2x14x576xbf16, #tpu.memory_space<vmem>>, vector<1x1x14x576xbf16>
    %76 = vector.shape_cast %75 : vector<1x1x14x576xbf16> to vector<14x576xbf16>
    %c350 = arith.constant 350 : index
    %c0_116 = arith.constant 0 : index
    %77 = vector.load %arg5[%c350, %c0_116] : memref<392x576xbf16, #tpu.memory_space<vmem>>, vector<14x576xbf16>
    tpu.vector_store %arg5[%c350, %c0_116], %76 {strides = array<i32>} : memref<392x576xbf16, #tpu.memory_space<vmem>>, vector<14x576xbf16>,
    %c12_117 = arith.constant 12 : index
    %c1_118 = arith.constant 1 : index
    %c0_119 = arith.constant 0 : index
    %c0_120 = arith.constant 0 : index
    %78 = vector.load %arg1[%c12_117, %c1_118, %c0_119, %c0_120] : memref<14x2x14x576xbf16, #tpu.memory_space<vmem>>, vector<1x1x14x576xbf16>
    %79 = vector.shape_cast %78 : vector<1x1x14x576xbf16> to vector<14x576xbf16>
    %c364 = arith.constant 364 : index
    %c0_121 = arith.constant 0 : index
    %80 = vector.load %arg5[%c364, %c0_121] : memref<392x576xbf16, #tpu.memory_space<vmem>>, vector<14x576xbf16>
    tpu.vector_store %arg5[%c364, %c0_121], %79 {strides = array<i32>} : memref<392x576xbf16, #tpu.memory_space<vmem>>, vector<14x576xbf16>,
    %c13_122 = arith.constant 13 : index
    %c1_123 = arith.constant 1 : index
    %c0_124 = arith.constant 0 : index
    %c0_125 = arith.constant 0 : index
    %81 = vector.load %arg1[%c13_122, %c1_123, %c0_124, %c0_125] : memref<14x2x14x576xbf16, #tpu.memory_space<vmem>>, vector<1x1x14x576xbf16>
    %82 = vector.shape_cast %81 : vector<1x1x14x576xbf16> to vector<14x576xbf16>
    %c378 = arith.constant 378 : index
    %c0_126 = arith.constant 0 : index
    %83 = vector.load %arg5[%c378, %c0_126] : memref<392x576xbf16, #tpu.memory_space<vmem>>, vector<14x576xbf16>
    tpu.vector_store %arg5[%c378, %c0_126], %82 {strides = array<i32>} : memref<392x576xbf16, #tpu.memory_space<vmem>>, vector<14x576xbf16>,
    %c0_127 = arith.constant 0 : index
    %c0_128 = arith.constant 0 : index
    %84 = vector.load %arg5[%c0_127, %c0_128] : memref<392x576xbf16, #tpu.memory_space<vmem>>, vector<392x576xbf16>
    %c0_129 = arith.constant 0 : index
    %c0_130 = arith.constant 0 : index
    %85 = vector.load %arg2[%c0_129, %c0_130] : memref<576x128xbf16, #tpu.memory_space<vmem>>, vector<576x128xbf16>
    %cst = arith.constant dense<0.000000e+00> : vector<392x128xf32>
    %86 = tpu.matmul %84, %85, %cst {dimension_numbers = #tpu.dot_dimension_numbers<[1], [0], [0], [1], [0, 0, 1, 1], [], []>} : vector<392x576xbf16>, vector<576x128xbf16>, vector<392x128xf32> -> vector<392x128xf32>
    %87 = vector.extract_strided_slice %86 {offsets = [0, 0], sizes = [392, 64], strides = [1, 1]} : vector<392x128xf32> to vector<392x64xf32>
    %88 = vector.extract_strided_slice %86 {offsets = [0, 64], sizes = [392, 64], strides = [1, 1]} : vector<392x128xf32> to vector<392x64xf32>
    %89 = arith.maximumf %87, %88 : vector<392x64xf32>
    %90 = vector.extract_strided_slice %89 {offsets = [0, 0], sizes = [196, 64], strides = [1, 1]} : vector<392x64xf32> to vector<196x64xf32>
    %91 = vector.extract_strided_slice %89 {offsets = [196, 0], sizes = [196, 64], strides = [1, 1]} : vector<392x64xf32> to vector<196x64xf32>
    %92 = arith.maximumf %90, %91 : vector<196x64xf32>
    %c0_131 = arith.constant 0 : index
    %c0_132 = arith.constant 0 : index
    %93 = vector.load %arg3[%c0_131, %c0_132] : memref<1x64xf32, #tpu.memory_space<vmem>>, vector<1x64xf32>
    %94 = vector.broadcast %93 : vector<1x64xf32> to vector<196x64xf32>
    %95 = arith.addf %92, %94 : vector<196x64xf32>
    %cst_133 = arith.constant 0.000000e+00 : f32
    %96 = vector.broadcast %cst_133 : f32 to vector<196x64xf32>
    %97 = arith.maximumf %95, %96 : vector<196x64xf32>
    %98 = arith.truncf %97 : vector<196x64xf32> to vector<196x64xbf16>
    %c0_134 = arith.constant 0 : index
    %c0_135 = arith.constant 0 : index
    %c0_136 = arith.constant 0 : index
    %99 = vector.load %arg4[%c0_134, %c0_135, %c0_136] : memref<1x196x64xbf16, #tpu.memory_space<vmem>>, vector<1x196x64xbf16>
    %100 = vector.shape_cast %99 : vector<1x196x64xbf16> to vector<196x64xbf16>
    %101 = vector.shape_cast %98 : vector<196x64xbf16> to vector<1x196x64xbf16>
    tpu.vector_store %arg4[%c0_134, %c0_135, %c0_136], %101 {strides = array<i32>} : memref<1x196x64xbf16, #tpu.memory_space<vmem>>, vector<1x196x64xbf16>,
    return
  }
  func.func @transform_0(%arg0: i32) -> (i32, i32, i32, i32) {
    %c0_i32 = arith.constant 0 : i32
    %c0_i32_0 = arith.constant 0 : i32
    %c0_i32_1 = arith.constant 0 : i32
    %c0_i32_2 = arith.constant 0 : i32
    return %arg0, %c0_i32, %c0_i32_0, %c0_i32_1 : i32, i32, i32, i32
  }
  func.func @transform_1(%arg0: i32) -> (i32, i32) {
    %c0_i32 = arith.constant 0 : i32
    %c0_i32_0 = arith.constant 0 : i32
    %c0_i32_1 = arith.constant 0 : i32
    return %c0_i32, %c0_i32_0 : i32, i32
  }
  func.func @transform_2(%arg0: i32) -> (i32, i32) {
    %c0_i32 = arith.constant 0 : i32
    %c0_i32_0 = arith.constant 0 : i32
    %c0_i32_1 = arith.constant 0 : i32
    return %c0_i32, %c0_i32_0 : i32, i32
  }
  func.func @transform_3(%arg0: i32) -> (i32, i32, i32) {
    %c0_i32 = arith.constant 0 : i32
    %c0_i32_0 = arith.constant 0 : i32
    %c0_i32_1 = arith.constant 0 : i32
    return %arg0, %c0_i32, %c0_i32_0 : i32, i32, i32
  }
}

module attributes {stable_mosaic.version = 11 : i64} {
  func.func @fc_kernel(%arg0: i32, %arg1: memref<16x12544xbf16, #tpu.memory_space<vmem>>, %arg2: memref<12544x128xbf16, #tpu.memory_space<vmem>>, %arg3: memref<1x128xf32, #tpu.memory_space<vmem>>, %arg4: memref<128x128xbf16, #tpu.memory_space<vmem>>, %arg5: memref<1x128xf32, #tpu.memory_space<vmem>>, %arg6: memref<16x128xf32, #tpu.memory_space<vmem>>) attributes {dimension_semantics = [#tpu.dimension_semantics<parallel>], iteration_bounds = array<i64: 1>, scalar_prefetch = 0 : i64, scratch_operands = 0 : i64, tpu.core_type = #tpu.core_type<tc>, window_params = [{transform_indices = @transform_0, window_bounds = array<i64: 16, 12544>}, {pipeline_mode = #tpu.pipeline_mode<synchronous>, transform_indices = @transform_1, window_bounds = array<i64: 12544, 128>}, {pipeline_mode = #tpu.pipeline_mode<synchronous>, transform_indices = @transform_2, window_bounds = array<i64: 1, 128>}, {pipeline_mode = #tpu.pipeline_mode<synchronous>, transform_indices = @transform_3, window_bounds = array<i64: 128, 128>}, {pipeline_mode = #tpu.pipeline_mode<synchronous>, transform_indices = @transform_4, window_bounds = array<i64: 1, 128>}, {transform_indices = @transform_5, window_bounds = array<i64: 16, 128>}]} {
    %c0 = arith.constant 0 : index
    %c0_0 = arith.constant 0 : index
    %0 = vector.load %arg1[%c0, %c0_0] : memref<16x12544xbf16, #tpu.memory_space<vmem>>, vector<16x12544xbf16>
    %c0_1 = arith.constant 0 : index
    %c0_2 = arith.constant 0 : index
    %1 = vector.load %arg2[%c0_1, %c0_2] : memref<12544x128xbf16, #tpu.memory_space<vmem>>, vector<12544x128xbf16>
    %cst = arith.constant dense<0.000000e+00> : vector<16x128xf32>
    %2 = tpu.matmul %0, %1, %cst {dimension_numbers = #tpu.dot_dimension_numbers<[1], [0], [0], [1], [0, 0, 1, 1], [], []>} : vector<16x12544xbf16>, vector<12544x128xbf16>, vector<16x128xf32> -> vector<16x128xf32>
    %c0_3 = arith.constant 0 : index
    %c0_4 = arith.constant 0 : index
    %3 = vector.load %arg3[%c0_3, %c0_4] : memref<1x128xf32, #tpu.memory_space<vmem>>, vector<1x128xf32>
    %4 = vector.broadcast %3 : vector<1x128xf32> to vector<16x128xf32>
    %5 = arith.addf %2, %4 : vector<16x128xf32>
    %cst_5 = arith.constant 0.000000e+00 : f32
    %6 = vector.broadcast %cst_5 : f32 to vector<16x128xf32>
    %7 = arith.maximumf %5, %6 : vector<16x128xf32>
    %8 = arith.truncf %7 : vector<16x128xf32> to vector<16x128xbf16>
    %c0_6 = arith.constant 0 : index
    %c0_7 = arith.constant 0 : index
    %9 = vector.load %arg4[%c0_6, %c0_7] : memref<128x128xbf16, #tpu.memory_space<vmem>>, vector<128x128xbf16>
    %cst_8 = arith.constant dense<0.000000e+00> : vector<16x128xf32>
    %10 = tpu.matmul %8, %9, %cst_8 {dimension_numbers = #tpu.dot_dimension_numbers<[1], [0], [0], [1], [0, 0, 1, 1], [], []>} : vector<16x128xbf16>, vector<128x128xbf16>, vector<16x128xf32> -> vector<16x128xf32>
    %c0_9 = arith.constant 0 : index
    %c0_10 = arith.constant 0 : index
    %11 = vector.load %arg5[%c0_9, %c0_10] : memref<1x128xf32, #tpu.memory_space<vmem>>, vector<1x128xf32>
    %12 = vector.broadcast %11 : vector<1x128xf32> to vector<16x128xf32>
    %13 = arith.addf %10, %12 : vector<16x128xf32>
    %c0_11 = arith.constant 0 : index
    %c0_12 = arith.constant 0 : index
    %14 = vector.load %arg6[%c0_11, %c0_12] : memref<16x128xf32, #tpu.memory_space<vmem>>, vector<16x128xf32>
    tpu.vector_store %arg6[%c0_11, %c0_12], %13 {strides = array<i32>} : memref<16x128xf32, #tpu.memory_space<vmem>>, vector<16x128xf32>,
    return
  }
  func.func @transform_0(%arg0: i32) -> (i32, i32) {
    %c0_i32 = arith.constant 0 : i32
    %c0_i32_0 = arith.constant 0 : i32
    return %arg0, %c0_i32 : i32, i32
  }
  func.func @transform_1(%arg0: i32) -> (i32, i32) {
    %c0_i32 = arith.constant 0 : i32
    %c0_i32_0 = arith.constant 0 : i32
    %c0_i32_1 = arith.constant 0 : i32
    return %c0_i32, %c0_i32_0 : i32, i32
  }
  func.func @transform_2(%arg0: i32) -> (i32, i32) {
    %c0_i32 = arith.constant 0 : i32
    %c0_i32_0 = arith.constant 0 : i32
    %c0_i32_1 = arith.constant 0 : i32
    return %c0_i32, %c0_i32_0 : i32, i32
  }
  func.func @transform_3(%arg0: i32) -> (i32, i32) {
    %c0_i32 = arith.constant 0 : i32
    %c0_i32_0 = arith.constant 0 : i32
    %c0_i32_1 = arith.constant 0 : i32
    return %c0_i32, %c0_i32_0 : i32, i32
  }
  func.func @transform_4(%arg0: i32) -> (i32, i32) {
    %c0_i32 = arith.constant 0 : i32
    %c0_i32_0 = arith.constant 0 : i32
    %c0_i32_1 = arith.constant 0 : i32
    return %c0_i32, %c0_i32_0 : i32, i32
  }
  func.func @transform_5(%arg0: i32) -> (i32, i32) {
    %c0_i32 = arith.constant 0 : i32
    %c0_i32_0 = arith.constant 0 : i32
    return %arg0, %c0_i32 : i32, i32
  }
}

</mosaic_0001>

<bundles_post_ra>
// kernel: mnist_forward.3
= control target key start
LH: loop header
LB: loop body
LE: loop exit
PB: predicated region body
PF: predicated region fallthrough
CT: control target
= control target key end

     0   :  { %8 = vsyncpa [#allocation3], 0  ;;  %s1323_s0 = inlined_call_operand.vmem [shape: bf16[416,36], index: 0, kind: input, shape index: {}]   ;;  %s1324_s1 = inlined_call_operand.hbm [shape: bf16[36,128], index: 1, kind: input, shape index: {}]   ;;  %s1325_s2 = inlined_call_operand.hbm [shape: f32[1,128], index: 2, kind: input, shape index: {}]   ;;  %s1326_s3 = inlined_call_operand.vmem [shape: bf16[416,128], index: 3, kind: output, shape index: {}]  }
   0x1   :  { %9 = vsyncpa [#allocation5], 0  ;;  %s1135_s12 = smov 0  }
   0x2 LB: > { %s736_s13 = sadd.s32 4294967295, %s1107_s12   ;;  %p738_p0 = scmp.ge.s32.totalorder %s1107_s12, 1  ;;  %s1107_s12 = sphi %s1135_s12, %s15_s12  }
   0x3   : > { %p114_p1 = scmp.lt.s32.totalorder %s1107_s12, 3  ;;  %s1109_s14 = smov [#allocation2]  }
   0x4   : > { %s126_s15 = sshll.u32 %s1109_s14, 4  ;;  %p1149_p3 = scmp.eq.s32.totalorder %s736_s13, 0  ;;  %s127_s15 = int_to_ptr.vmem [resolvable:$true] %s126_s15 }
   0x5   : > { %p1143_p2 = pnand %p738_p0, %p114_p1  ;;  %s1110_s18 = smov [#allocation4]  }
   0x6   : > { %s1331_s17 = scalar_select %p1149_p3, 1, 0 }
   0x7   : > { %s1330_s16 = scalar_select %p1143_p2, 1, 0 }
   0x8   : > { %p996_p4 = pneg %p1143_p2  ;;  %s140_s19 = sshll.u32 %s1110_s18, 4  ;;  %s1161_s19 = int_to_ptr.vmem [resolvable:$true] %s140_s19 }
   0x9   : > { %s1037_s23 = scalar_lea.hbm %s1324_s1, 320 }
   0xa   : > { %p1157_p5 = pnand %p1149_p3, %p996_p4  ;;  %p1038_p6 = scmp.ne.s32.totalorder %s1324_s1, %s1037_s23 }
   0xb   : > { %p1044_p10 = scmp.lt.u32.totalorder %s1037_s23, %s1324_s1 }
   0xc   : > { %p1039_p7 = pneg %p1157_p5 }
   0xe   : > { %p1040_p8 = pnand %p1039_p7, %p1038_p6 }
  0x10   : > { %p1041_p9 = pneg %p1040_p8 }
  0x12   : > { %p1046_p11 = pnand %p1044_p10, %p1041_p9 }
  0x14   : > { %1049 = shalt.err (!%p1046_p11)
}
  0x15   : > { %s1050_s28 = scalar_lea.vmem %s127_s15, 320  ;;  %p1058_p1 = scmp.lt.s32.totalorder %s127_s15, %s127_s15 }
  0x16   : > { %p1051_p12 = scmp.ne.s32.totalorder %s127_s15, %s1050_s28  ;;  %p1059_p4 = scmp.lt.s32.totalorder %s1050_s28, %s1050_s28 }
  0x18   : > { %p1053_p13 = pnand %p1051_p12, %p1039_p7  ;;  %p1060_p3 = por %p1059_p4, %p1058_p1 }
  0x1a   : > { %p1054_p0 = pneg %p1053_p13 }
  0x1c   : > { %p1061_p2 = pnand %p1060_p3, %p1054_p0 }
  0x1e   : > { %1064 = shalt.err (!%p1061_p2)
}
  0x1f   : > { %s1111_s29 = smov 64   ;;  %s1112_s30 = smov 4  }
  0x20   : > { %999 = dma.hbm_to_vmem [thread:$0]  (!%p1157_p5), %s1324_s1, 320, %s127_s15, [#allocation3], %s1111_s29, %s1111_s29, %s1112_s30  }
  0x21   : > { %s1065_s8 = scalar_lea.hbm %s1325_s2, 16 }
  0x22   : > { %p1066_p6 = scmp.ne.s32.totalorder %s1325_s2, %s1065_s8  ;;  %p1072_p8 = scmp.lt.u32.totalorder %s1065_s8, %s1325_s2 }
  0x24   : > { %p1068_p2 = pnand %p1066_p6, %p1039_p7 }
  0x26   : > { %p1069_p3 = pneg %p1068_p2 }
  0x28   : > { %p1074_p9 = pnand %p1072_p8, %p1069_p3 }
  0x2a   : > { %1077 = shalt.err (!%p1074_p9)
}
  0x2b   : > { %s1078_s15 = scalar_lea.vmem %s1161_s19, 16  ;;  %s1085_s18 = scalar_lea.vmem %s1161_s19, 32 }
  0x2c   : > { %p1079_p10 = scmp.ne.s32.totalorder %s1161_s19, %s1078_s15  ;;  %p1086_p13 = scmp.lt.s32.totalorder %s1161_s19, %s1161_s19 }
  0x2d   : > { %p1087_p0 = scmp.lt.s32.totalorder %s1085_s18, %s1078_s15 }
  0x2e   : > { %p1081_p11 = pnand %p1079_p10, %p1039_p7 }
  0x2f   : > { %p1088_p1 = por %p1087_p0, %p1086_p13 }
  0x30   : > { %p1082_p12 = pneg %p1081_p11 }
  0x32   : > { %p1089_p4 = pnand %p1088_p1, %p1082_p12 }
  0x34   : > { %1092 = shalt.err (!%p1089_p4)
}
  0x35   : > { %1002 = dma.hbm_to_vmem [thread:$0]  (!%p1157_p5), %s1325_s2, 16, %s1161_s19, [#allocation5]  }
  0x36   : > { %p1333_p6 = scmp.ne.s32.totalorder %s1330_s16, 0 }
  0x37   : > { %p1334_p7 = scmp.ne.s32.totalorder (!%p1333_p6), %s1331_s17, 0 }
  0x38   : > { %162 = sbr.rel (%p1333_p6) target bundleno = 349 (0x15d), region = 32 }
  0x3f   : > { %1098 = dma.done.wait (%p1334_p7), [#allocation3], 320  }
  0x40   : > { %1100 = vsyncadd (%p1334_p7), [#allocation3], 4294966976 }
  0x41   : > { %1102 = dma.done.wait (%p1334_p7), [#allocation5], 16  }
  0x42   : > { %1104 = vsyncadd (%p1334_p7), [#allocation5], 4294967280  ;;  %s190_s20 = smul.u32 26, %s736_s13  ;;  %v1113_v0 = vmov 0.0   ;;  %vm1114_vm0 = vmmov 0   ;;  %v1021_v1 = vld [vmem:[#allocation2] sm:$0xff]  }
  0x43   : > { %924 = vmatprep.subr.bf16.mxu0 %v1113_v0  ;;  %982 = vmatprep.subr.bf16.mxu1 %v1113_v0  ;;  %v1022_v2 = vld [vmem:[#allocation2 + $0x8] sm:$0xff]   ;;  %v1023_v3 = vld [vmem:[#allocation2 + $0x10] ss:$0 sps:$4 sm:$0x33]   ;;  %vm361_vm1 = vcmask 1041408   ;;  %vm321_vm2 = vcmask 293888  }
  0x44   : > { %930 = vmatprep.mubr.msk.bf16.mxu0 %vm1114_vm0, %v1113_v0  ;;  %p191_p5 = scmp.lt.s32.totalorder %s190_s20, 51  ;;  %958 = vmatprep.mubr.msk.bf16.mxu1 %vm1114_vm0, %v1113_v0  ;;  %v363_v4 = vsel %vm361_vm1, %v1023_v3, 0  ;;  %v1272_v18 = vld [vmem:[#allocation4] ss:$0 sm:$0xff] }
  0x45   : > { %925 = vmatpush3.bf16.msra.mxu0 %v1021_v1  ;;  %985 = vmatpush3.bf16.msra.mxu1 %v1021_v1 }
  0x46   : > { %s1336_s20 = smov (!%p191_p5, %s190_s20), 51  ;;  %926 = vmatprep.subr.bf16.mxu0 %v1113_v0  ;;  %983 = vmatprep.subr.bf16.mxu1 %v1113_v0 }
  0x47   : > { %s745_s16 = sshll.u32 %s1336_s20, 2 }
  0x48   : > { %s1233_s19 = scalar_lea.vmem %s1323_s0, %s745_s16  ;;  %s1283_s25 = scalar_lea.vmem %s1326_s3, %s745_s16 }
  0x49   : > { %927 = vmatpush3.bf16.msra.mxu0 %v1022_v2  ;;  %986 = vmatpush3.bf16.msra.mxu1 %v1022_v2  ;;  %v1024_v5 = vld [vmem:[%s1233_s19] sm:$0xff]   ;;  %v1025_v6 = vld [vmem:[%s1233_s19 + $0x38] sm:$0xff]   ;;  %v1026_v7 = vld [vmem:[%s1233_s19 + $0x8] sm:$0xff]  }
  0x4a   : > { %928 = vmatprep.subr.bf16.mxu0 %v1113_v0  ;;  %984 = vmatprep.subr.bf16.mxu1 %v1113_v0  ;;  %v1027_v8 = vld [vmem:[%s1233_s19 + $0x40] sm:$0xff]   ;;  %v1028_v9 = vld [vmem:[%s1233_s19 + $0x10] sm:$0xff]   ;;  %v1029_v10 = vld [vmem:[%s1233_s19 + $0x48] sm:$0xff]  }
  0x4b   : > { %v1030_v11 = vld [vmem:[%s1233_s19 + $0x18] sm:$0xff]   ;;  %v1031_v12 = vld [vmem:[%s1233_s19 + $0x50] sm:$0xff]   ;;  %v1032_v13 = vld [vmem:[%s1233_s19 + $0x20] sm:$0xff]  }
  0x4c   : > { %v1033_v14 = vld [vmem:[%s1233_s19 + $0x58] sm:$0xff]   ;;  %v1034_v15 = vld [vmem:[%s1233_s19 + $0x28] sm:$0xff]   ;;  %v1035_v16 = vld [vmem:[%s1233_s19 + $0x60] sm:$0xff]  }
  0x4d   : > { %929 = vmatpush3.bf16.msra.mxu0 %v363_v4  ;;  %987 = vmatpush3.bf16.msra.mxu1 %v363_v4  ;;  %v1036_v17 = vld [vmem:[%s1233_s19 + $0x30] sm:$0xff]  }
  0x50   : > { %931 = vmatmul.mubr.msk.bf16.vlgmr.msra.gmra.mrb[0].mxu0 %vm321_vm2, %v1024_v5  ;;  %959 = vmatmul.mubr.msk.bf16.vlgmr.msra.gmra.mrb[0].mxu1 %vm321_vm2, %v1025_v6 }
  0x51   : > { %934 = vmatprep.mubr.msk.bf16.mxu0 %vm1114_vm0, %v1113_v0  ;;  %962 = vmatprep.mubr.msk.bf16.mxu1 %vm1114_vm0, %v1113_v0 }
  0x58   : > { %935 = vmatmul.mubr.msk.bf16.gmra.mrb[4].mxu0 %vm321_vm2, %v1026_v7  ;;  %963 = vmatmul.mubr.msk.bf16.gmra.mrb[4].mxu1 %vm321_vm2, %v1027_v8 }
  0x59   : > { %938 = vmatprep.mubr.msk.bf16.mxu0 %vm1114_vm0, %v1113_v0  ;;  %966 = vmatprep.mubr.msk.bf16.mxu1 %vm1114_vm0, %v1113_v0 }
  0x60   : > { %939 = vmatmul.mubr.msk.bf16.gmra.mrb[8].mxu0 %vm321_vm2, %v1028_v9  ;;  %967 = vmatmul.mubr.msk.bf16.gmra.mrb[8].mxu1 %vm321_vm2, %v1029_v10 }
  0x61   : > { %942 = vmatprep.mubr.msk.bf16.mxu0 %vm1114_vm0, %v1113_v0  ;;  %970 = vmatprep.mubr.msk.bf16.mxu1 %vm1114_vm0, %v1113_v0 }
  0x68   : > { %943 = vmatmul.mubr.msk.bf16.gmra.mrb[12].mxu0 %vm321_vm2, %v1030_v11  ;;  %971 = vmatmul.mubr.msk.bf16.gmra.mrb[12].mxu1 %vm321_vm2, %v1031_v12 }
  0x69   : > { %946 = vmatprep.mubr.msk.bf16.mxu0 %vm1114_vm0, %v1113_v0  ;;  %974 = vmatprep.mubr.msk.bf16.mxu1 %vm1114_vm0, %v1113_v0 }
  0x70   : > { %947 = vmatmul.mubr.msk.bf16.gmra.mrb[16].mxu0 %vm321_vm2, %v1032_v13  ;;  %975 = vmatmul.mubr.msk.bf16.gmra.mrb[16].mxu1 %vm321_vm2, %v1033_v14 }
  0x71   : > { %950 = vmatprep.mubr.msk.bf16.mxu0 %vm1114_vm0, %v1113_v0  ;;  %978 = vmatprep.mubr.msk.bf16.mxu1 %vm1114_vm0, %v1113_v0 }
  0x78   : > { %951 = vmatmul.mubr.msk.bf16.gmra.mrb[20].mxu0 %vm321_vm2, %v1034_v15  ;;  %979 = vmatmul.mubr.msk.bf16.gmra.mrb[20].mxu1 %vm321_vm2, %v1035_v16 }
  0x79   : > { %954 = vmatprep.mubr.msk.bf16.mxu0 %vm1114_vm0, %v1113_v0 }
  0x80   : > { %955 = vmatmul.mubr.msk.bf16.gmra.mrb[24].mxu0 %vm321_vm2, %v1036_v17 }
 0x123   : > { %v399_v19 = vpop.f32.mrb[0].mxu0  ;;  %v455_v20 = vpop.f32.mrb[0].mxu1 }
 0x124   : > { %v400_v21 = vadd.f32 %v1272_v18, %v399_v19  ;;  %v932_v22 = vpop.f32.mrb[1].mxu0  ;;  %v456_v23 = vadd.f32 %v1272_v18, %v455_v20  ;;  %v960_v24 = vpop.f32.mrb[1].mxu1 }
 0x125   : > { %v402_v25 = vpop.f32.mrb[2].mxu0  ;;  %v458_v26 = vpop.f32.mrb[2].mxu1 }
 0x126   : > { %v403_v27 = vadd.f32 %v1272_v18, %v402_v25  ;;  %v933_v28 = vpop.f32.mrb[3].mxu0  ;;  %v516_v29 = vmax.f32 %v456_v23, 0.0  ;;  %v459_v30 = vadd.f32 %v1272_v18, %v458_v26  ;;  %v961_v31 = vpop.f32.mrb[3].mxu1  ;;  %v502_v32 = vmax.f32 %v400_v21, 0.0 }
 0x128   : > { %v503_v33 = vmax.f32 %v403_v27, 0.0  ;;  %v517_v34 = vmax.f32 %v459_v30, 0.0 }
 0x12a   : > { %v834_v35 = vpack.c.bf16 %v503_v33, %v502_v32  ;;  %v869_v36 = vpack.c.bf16 %v517_v34, %v516_v29 }
 0x12b   : > { %v407_v37 = vpop.f32.mrb[4].mxu0  ;;  %v463_v38 = vpop.f32.mrb[4].mxu1 }
 0x12c   : > { %835 = vst [vmem:[%s1283_s25] sm:$0xff] %v834_v35   ;;  %902 = vst [vmem:[%s1283_s25 + $0x38] sm:$0xff] %v869_v36   ;;  %v408_v39 = vadd.f32 %v1272_v18, %v407_v37  ;;  %v936_v40 = vpop.f32.mrb[5].mxu0  ;;  %v464_v41 = vadd.f32 %v1272_v18, %v463_v38  ;;  %v964_v42 = vpop.f32.mrb[5].mxu1 }
 0x12d   : > { %v410_v43 = vpop.f32.mrb[6].mxu0  ;;  %v466_v44 = vpop.f32.mrb[6].mxu1 }
 0x12e   : > { %v411_v45 = vadd.f32 %v1272_v18, %v410_v43  ;;  %v937_v46 = vpop.f32.mrb[7].mxu0  ;;  %v518_v47 = vmax.f32 %v464_v41, 0.0  ;;  %v467_v48 = vadd.f32 %v1272_v18, %v466_v44  ;;  %v965_v49 = vpop.f32.mrb[7].mxu1  ;;  %v504_v50 = vmax.f32 %v408_v39, 0.0 }
 0x130   : > { %v505_v51 = vmax.f32 %v411_v45, 0.0  ;;  %v519_v52 = vmax.f32 %v467_v48, 0.0 }
 0x132   : > { %v839_v53 = vpack.c.bf16 %v505_v51, %v504_v50  ;;  %v874_v54 = vpack.c.bf16 %v519_v52, %v518_v47 }
 0x133   : > { %v415_v55 = vpop.f32.mrb[8].mxu0  ;;  %v471_v56 = vpop.f32.mrb[8].mxu1 }
 0x134   : > { %896 = vst [vmem:[%s1283_s25 + $0x8] sm:$0xff] %v839_v53   ;;  %903 = vst [vmem:[%s1283_s25 + $0x40] sm:$0xff] %v874_v54   ;;  %v416_v57 = vadd.f32 %v1272_v18, %v415_v55  ;;  %v940_v58 = vpop.f32.mrb[9].mxu0  ;;  %v472_v59 = vadd.f32 %v1272_v18, %v471_v56  ;;  %v968_v60 = vpop.f32.mrb[9].mxu1 }
 0x135   : > { %v418_v61 = vpop.f32.mrb[10].mxu0  ;;  %v474_v62 = vpop.f32.mrb[10].mxu1 }
 0x136   : > { %v419_v63 = vadd.f32 %v1272_v18, %v418_v61  ;;  %v941_v0 = vpop.f32.mrb[11].mxu0  ;;  %v520_v1 = vmax.f32 %v472_v59, 0.0  ;;  %v475_v2 = vadd.f32 %v1272_v18, %v474_v62  ;;  %v969_v3 = vpop.f32.mrb[11].mxu1  ;;  %v506_v4 = vmax.f32 %v416_v57, 0.0 }
 0x138   : > { %v507_v5 = vmax.f32 %v419_v63, 0.0  ;;  %v521_v6 = vmax.f32 %v475_v2, 0.0 }
 0x13a   : > { %v844_v7 = vpack.c.bf16 %v507_v5, %v506_v4  ;;  %v879_v8 = vpack.c.bf16 %v521_v6, %v520_v1 }
 0x13b   : > { %v423_v9 = vpop.f32.mrb[12].mxu0  ;;  %v479_v10 = vpop.f32.mrb[12].mxu1 }
 0x13c   : > { %897 = vst [vmem:[%s1283_s25 + $0x10] sm:$0xff] %v844_v7   ;;  %904 = vst [vmem:[%s1283_s25 + $0x48] sm:$0xff] %v879_v8   ;;  %v424_v11 = vadd.f32 %v1272_v18, %v423_v9  ;;  %v944_v12 = vpop.f32.mrb[13].mxu0  ;;  %v480_v13 = vadd.f32 %v1272_v18, %v479_v10  ;;  %v972_v14 = vpop.f32.mrb[13].mxu1 }
 0x13d   : > { %v426_v15 = vpop.f32.mrb[14].mxu0  ;;  %v482_v16 = vpop.f32.mrb[14].mxu1 }
 0x13e   : > { %v427_v17 = vadd.f32 %v1272_v18, %v426_v15  ;;  %v945_v19 = vpop.f32.mrb[15].mxu0  ;;  %v522_v20 = vmax.f32 %v480_v13, 0.0  ;;  %v483_v21 = vadd.f32 %v1272_v18, %v482_v16  ;;  %v973_v22 = vpop.f32.mrb[15].mxu1  ;;  %v508_v23 = vmax.f32 %v424_v11, 0.0 }
 0x140   : > { %v509_v24 = vmax.f32 %v427_v17, 0.0  ;;  %v523_v25 = vmax.f32 %v483_v21, 0.0 }
 0x142   : > { %v849_v26 = vpack.c.bf16 %v509_v24, %v508_v23  ;;  %v884_v27 = vpack.c.bf16 %v523_v25, %v522_v20 }
 0x143   : > { %v431_v28 = vpop.f32.mrb[16].mxu0  ;;  %v487_v29 = vpop.f32.mrb[16].mxu1 }
 0x144   : > { %898 = vst [vmem:[%s1283_s25 + $0x18] sm:$0xff] %v849_v26   ;;  %905 = vst [vmem:[%s1283_s25 + $0x50] sm:$0xff] %v884_v27   ;;  %v432_v30 = vadd.f32 %v1272_v18, %v431_v28  ;;  %v948_v31 = vpop.f32.mrb[17].mxu0  ;;  %v488_v32 = vadd.f32 %v1272_v18, %v487_v29  ;;  %v976_v33 = vpop.f32.mrb[17].mxu1 }
 0x145   : > { %v434_v34 = vpop.f32.mrb[18].mxu0  ;;  %v490_v35 = vpop.f32.mrb[18].mxu1 }
 0x146   : > { %v435_v36 = vadd.f32 %v1272_v18, %v434_v34  ;;  %v949_v37 = vpop.f32.mrb[19].mxu0  ;;  %v524_v38 = vmax.f32 %v488_v32, 0.0  ;;  %v491_v39 = vadd.f32 %v1272_v18, %v490_v35  ;;  %v977_v40 = vpop.f32.mrb[19].mxu1  ;;  %v510_v41 = vmax.f32 %v432_v30, 0.0 }
 0x148   : > { %v511_v42 = vmax.f32 %v435_v36, 0.0  ;;  %v525_v43 = vmax.f32 %v491_v39, 0.0 }
 0x14a   : > { %v854_v44 = vpack.c.bf16 %v511_v42, %v510_v41  ;;  %v889_v45 = vpack.c.bf16 %v525_v43, %v524_v38 }
 0x14b   : > { %v439_v46 = vpop.f32.mrb[20].mxu0  ;;  %v495_v47 = vpop.f32.mrb[20].mxu1 }
 0x14c   : > { %899 = vst [vmem:[%s1283_s25 + $0x20] sm:$0xff] %v854_v44   ;;  %906 = vst [vmem:[%s1283_s25 + $0x58] sm:$0xff] %v889_v45   ;;  %v440_v48 = vadd.f32 %v1272_v18, %v439_v46  ;;  %v952_v49 = vpop.f32.mrb[21].mxu0  ;;  %v496_v50 = vadd.f32 %v1272_v18, %v495_v47  ;;  %v980_v51 = vpop.f32.mrb[21].mxu1 }
 0x14d   : > { %v442_v52 = vpop.f32.mrb[22].mxu0  ;;  %v498_v53 = vpop.f32.mrb[22].mxu1 }
 0x14e   : > { %v443_v54 = vadd.f32 %v1272_v18, %v442_v52  ;;  %v953_v55 = vpop.f32.mrb[23].mxu0  ;;  %v526_v56 = vmax.f32 %v496_v50, 0.0  ;;  %v499_v57 = vadd.f32 %v1272_v18, %v498_v53  ;;  %v981_v58 = vpop.f32.mrb[23].mxu1  ;;  %v512_v59 = vmax.f32 %v440_v48, 0.0 }
 0x150   : > { %v513_v60 = vmax.f32 %v443_v54, 0.0  ;;  %v527_v61 = vmax.f32 %v499_v57, 0.0 }
 0x152   : > { %v859_v62 = vpack.c.bf16 %v513_v60, %v512_v59  ;;  %v894_v63 = vpack.c.bf16 %v527_v61, %v526_v56 }
 0x153   : > { %v447_v0 = vpop.f32.mrb[24].mxu0 }
 0x154   : > { %900 = vst [vmem:[%s1283_s25 + $0x28] sm:$0xff] %v859_v62   ;;  %907 = vst [vmem:[%s1283_s25 + $0x60] sm:$0xff] %v894_v63   ;;  %v448_v1 = vadd.f32 %v1272_v18, %v447_v0  ;;  %v956_v2 = vpop.f32.mrb[25].mxu0 }
 0x155   : > { %v450_v3 = vpop.f32.mrb[26].mxu0 }
 0x156   : > { %v451_v4 = vadd.f32 %v1272_v18, %v450_v3  ;;  %v957_v5 = vpop.f32.mrb[27].mxu0  ;;  %v514_v6 = vmax.f32 %v448_v1, 0.0 }
 0x158   : > { %v515_v7 = vmax.f32 %v451_v4, 0.0 }
 0x15a   : > { %v864_v8 = vpack.c.bf16 %v515_v7, %v514_v6 }
 0x15c   : > { %901 = vst [vmem:[%s1283_s25 + $0x30] sm:$0xff] %v864_v8  }
 0x15d PF: > { %s15_s12 = sadd.s32 1, %s1107_s12  }
 0x15e   : > { %p12_p2 = scmp.ge.s32.totalorder %s15_s12, 4  }
 0x160   :  { %14 = sbr.rel (!%p12_p2) target bundleno = 2 (0x2), region = 71 }
 0x167   :  { %680 = vsyncpa [#allocation3], 1 }
 0x168   :  { %682 = vsyncpa [#allocation3 + $0x1], 1 }
 0x169   :  { %683 = vsyncpa [#allocation5], 1 }

// kernel: mnist_forward.4
= control target key start
LH: loop header
LB: loop body
LE: loop exit
PB: predicated region body
PF: predicated region fallthrough
CT: control target
= control target key end

     0   :  { %s4461_s12 = smov 0   ;;  %s5971_s0 = inlined_call_operand.vmem [shape: bf16[28,2,14,576], index: 0, kind: input, shape index: {}]   ;;  %s5972_s1 = inlined_call_operand.vmem [shape: bf16[576,128], index: 1, kind: input, shape index: {}]   ;;  %s5973_s2 = inlined_call_operand.vmem [shape: f32[1,64], index: 2, kind: input, shape index: {}]   ;;  %s5974_s3 = inlined_call_operand.vmem [shape: bf16[2,196,64], index: 3, kind: output, shape index: {}]  }
   0x1 LB: > { %s4467_s13 = sadd.s32 4294967295, %s4435_s12   ;;  %p3622_p0 = scmp.ge.s32.totalorder %s4435_s12, 1  ;;  %s4435_s12 = sphi %s4461_s12, %s13_s12  }
   0x2   : > { %p139_p1 = scmp.lt.s32.totalorder %s4435_s12, 3 }
   0x4   : > { %p140_p2 = pnand %p3622_p0, %p139_p1 }
   0x6   : > { %143 = sbr.rel (%p140_p2) target bundleno = 718 (0x2ce), region = 32 }
   0xd   : > { %v4358_v0 = vld [vmem:[%s5972_s1] sm:$0xff]   ;;  %v4437_v1 = vmov 0   ;;  %v4360_v3 = vld [vmem:[%s5972_s1 + $0x8] sm:$0xff]   ;;  %v4362_v5 = vld [vmem:[%s5972_s1 + $0x10] sm:$0xff]   ;;  %s164_s30 = smul.u32 14, %s4467_s13  ;;  %vm204_vm0 = vcmask 1042432  }
   0xe   : > { %2314 = vmatprep.subr.bf16.mxu1 %v4437_v1  ;;  %2546 = vmatprep.subr.bf16.mxu0 %v4437_v1  ;;  %v4479_v2 = vld [vmem:[%s5972_s1 + $0x80] sm:$0xff]   ;;  %v4489_v4 = vld [vmem:[%s5972_s1 + $0x88] sm:$0xff]   ;;  %v4500_v6 = vld [vmem:[%s5972_s1 + $0x90] sm:$0xff]   ;;  %vm205_vm1 = vcmask 1046532   ;;  %vm255_vm2 = vcmask 1041408   ;;  %vm256_vm3 = vcmask 1045508  }
   0xf   : > { %2315 = vmatpush1.bf16.msra.mxu1 %v4358_v0  ;;  %2547 = vmatpush1.bf16.msra.mxu0 %v4479_v2  ;;  %v4364_v7 = vld [vmem:[%s5972_s1 + $0x18] sm:$0xff]   ;;  %v4366_v9 = vld [vmem:[%s5972_s1 + $0x20] sm:$0xff]   ;;  %p165_p3 = scmp.lt.s32.totalorder %s164_s30, 27  ;;  %v4368_v11 = vld [vmem:[%s5972_s1 + $0x28] sm:$0xff]   ;;  %vm306_vm5 = vcmask 1040384   ;;  %vm307_vm6 = vcmask 1044484  }
  0x10   : > { %2316 = vmatprep.subr.bf16.mxu1 %v4437_v1  ;;  %2548 = vmatprep.subr.bf16.mxu0 %v4437_v1  ;;  %v4511_v8 = vld [vmem:[%s5972_s1 + $0x98] sm:$0xff]   ;;  %v4523_v10 = vld [vmem:[%s5972_s1 + $0xa0] sm:$0xff]   ;;  %v4369_v12 = vld [vmem:[%s5972_s1 + $0xa8] sm:$0xff]   ;;  %vm185_vm9 = vcmask 519168   ;;  %vm189_vm10 = vcmask 518144   ;;  %vm233_vm11 = vcmask 519171  }
  0x11   : > { %s6032_s30 = smov (!%p165_p3, %s164_s30), 27  ;;  %v4370_v13 = vld [vmem:[%s5972_s1 + $0x30] sm:$0xff]   ;;  %v4372_v15 = vld [vmem:[%s5972_s1 + $0x38] sm:$0xff]   ;;  %v4374_v17 = vld [vmem:[%s5972_s1 + $0x40] sm:$0xff]   ;;  %vm240_vm12 = vcmask 517120   ;;  %vm284_vm13 = vcmask 519170  }
  0x12   : > { %v4371_v14 = vld [vmem:[%s5972_s1 + $0xb0] sm:$0xff]   ;;  %s4344_s18 = smul.u32 80, %s6032_s30  ;;  %v4373_v16 = vld [vmem:[%s5972_s1 + $0xb8] sm:$0xff]   ;;  %v4375_v18 = vld [vmem:[%s5972_s1 + $0xc0] sm:$0xff]   ;;  %vm291_vm14 = vcmask 516096   ;;  %vm329_vm15 = vcmask 519169  }
  0x13   : > { %2317 = vmatpush1.bf16.msra.mxu1 %v4360_v3  ;;  %2549 = vmatpush1.bf16.msra.mxu0 %v4489_v4  ;;  %v4376_v19 = vld [vmem:[%s5972_s1 + $0x48] sm:$0xff]   ;;  %vm4584_vm4 = vmor %vm204_vm0, %vm205_vm1  ;;  %v4378_v33 = vld [vmem:[%s5972_s1 + $0x50] sm:$0xff]   ;;  %vm4439_vm0 = vmmov 0   ;;  %vm2238_vm1 = vcmask 523264   ;;  %p171_p4 = scmp.lt.s32.totalorder %s4467_s13, 1 }
  0x14   : > { %2318 = vmatprep.subr.bf16.mxu1 %v4437_v1  ;;  %2550 = vmatprep.subr.bf16.mxu0 %v4437_v1  ;;  %s4554_s25 = scalar_lea.vmem %s5971_s0, %s4344_s18  ;;  %v4377_v27 = vld [vmem:[%s5972_s1 + $0xc8] sm:$0xff]   ;;  %vm4597_vm7 = vmor %vm255_vm2, %vm256_vm3  ;;  %v4379_v40 = vld [vmem:[%s5972_s1 + $0xd0] sm:$0xff]   ;;  %vm3280_vm2 = vcmask 1043456  }
  0x15   : > { %v4568_v20 = vld [vmem:[%s4554_s25] sm:$0xff]  ;;  %v180_v21 = vld [vmem:[%s4554_s25 + $0x14] sm:$0x77]  ;;  %v4573_v24 = vld [vmem:[%s4554_s25 + $0x8] sm:$0xff]  ;;  %s6034_s13 = smov (!%p171_p4, %s4467_s13), 1 }
  0x16   : > { %v3625_v22 = vld [vmem:[%s4554_s25 + $0x50] sm:$0xff]  ;;  %187 = vst [vmem:[#allocation2 + $0x14] sm:$0x77] %v180_v21  ;;  %v181_v25 = vld [vmem:[%s4554_s25 + $0x1c] sm:$0x77]  ;;  %v3632_v38 = vld [vmem:[%s4554_s25 + $0xa8] sm:$0xff] }
  0x17   : > { %2319 = vmatpush1.bf16.msra.mxu1 %v4362_v5  ;;  %2551 = vmatpush1.bf16.msra.mxu0 %v4500_v6  ;;  %v207_v23 = vrot.slane %v3625_v22, 5  ;;  %v3626_v26 = vld [vmem:[%s4554_s25 + $0x58] sm:$0xff]  ;;  %188 = vst [vmem:[#allocation2 + $0x1c] sm:$0x77] %v181_v25  ;;  %v3628_v30 = vld [vmem:[%s4554_s25 + $0x64] sm:$0x77]  ;;  %vm4634_vm8 = vmor %vm306_vm5, %vm307_vm6 }
  0x18   : > { %2320 = vmatprep.subr.bf16.mxu1 %v4437_v1  ;;  %2552 = vmatprep.subr.bf16.mxu0 %v4437_v1  ;;  %v208_v28 = vrot.slane %v3626_v26, 5  ;;  %v3631_v32 = vld [vmem:[%s4554_s25 + $0xa0] sm:$0xff]  ;;  %v211_v35 = vrot.slane %v3628_v30, 5  ;;  %v3629_v37 = vld [vmem:[%s4554_s25 + $0x6c] sm:$0x77]  ;;  %v259_v42 = vrot.slane %v3632_v38, 6 }
  0x19   : > { %v210_v29 = vrot.slane %v207_v23, 4  ;;  %231 = vst [vmem:[#allocation2 + $0x14] sm:$0x88] %v207_v23  ;;  %v258_v36 = vrot.slane %v3631_v32, 6  ;;  %v214_v41 = vrot.slane %v3629_v37, 5  ;;  %v3637_v44 = vld [vmem:[%s4554_s25 + $0xf0] sm:$0xff] }
  0x1a   : > { %v213_v34 = vrot.slane %v208_v28, 4  ;;  %232 = vst [vmem:[#allocation2 + $0x1c] sm:$0x88] %v208_v28  ;;  %v3634_v43 = vld [vmem:[%s4554_s25 + $0xb4] sm:$0x77]  ;;  %v219_v47 = vrot.slane %v211_v35, 4 }
  0x1b   : > { %2321 = vmatpush1.bf16.msra.mxu1 %v4364_v7  ;;  %2553 = vmatpush1.bf16.msra.mxu0 %v4511_v8  ;;  %v3638_v45 = vld [vmem:[%s4554_s25 + $0xf8] sm:$0xff]  ;;  %v4609_v46 = vsel %vm4584_vm4, %v210_v29, %v211_v35  ;;  %v261_v48 = vrot.slane %v258_v36, 4  ;;  %282 = vst [vmem:[#allocation2 + $0x3c] sm:$0xcc] %v258_v36  ;;  %v262_v49 = vrot.slane %v3634_v43, 6  ;;  %v4613_v51 = vld [vmem:[%s4554_s25 + $0x140] sm:$0xff] }
  0x1c   : > { %2322 = vmatprep.subr.bf16.mxu1 %v4437_v1  ;;  %2554 = vmatprep.subr.bf16.mxu0 %v4437_v1  ;;  %v3635_v50 = vld [vmem:[%s4554_s25 + $0xbc] sm:$0x77]  ;;  %v4618_v52 = vsel %vm4584_vm4, %v213_v34, %v214_v41  ;;  %v220_v53 = vrot.slane %v214_v41, 4  ;;  %v264_v54 = vrot.slane %v259_v42, 4  ;;  %283 = vst [vmem:[#allocation2 + $0x44] sm:$0xcc] %v259_v42 }
  0x1d   : > { %v309_v55 = vrot.slane %v3637_v44, 7  ;;  %v3640_v56 = vld [vmem:[%s4554_s25 + $0x104] sm:$0x77]  ;;  %v4380_v58 = vld [vmem:[%s5972_s1 + $0x58] sm:$0xff]   ;;  %238 = vst [vmem:[#allocation2 + $0x3c] sm:$0x33] %v219_v47  ;;  %v4630_v59 = vsel %vm4597_vm7, %v261_v48, %v262_v49 }
  0x1e   : > { %v4622_v57 = vld [vmem:[%s4554_s25 + $0x148] sm:$0xff]  ;;  %v270_v60 = vrot.slane %v262_v49, 4  ;;  %v265_v61 = vrot.slane %v3635_v50, 6  ;;  %v310_v62 = vrot.slane %v3638_v45, 7  ;;  %v4381_v3 = vld [vmem:[%s5972_s1 + $0xd8] sm:$0xff]   ;;  %v313_v7 = vrot.slane %v3640_v56, 7 }
  0x1f   : > { %2323 = vmatpush1.bf16.msra.mxu1 %v4366_v9  ;;  %2555 = vmatpush1.bf16.msra.mxu0 %v4523_v10  ;;  %v3641_v0 = vld [vmem:[%s4554_s25 + $0x10c] sm:$0x77]  ;;  %239 = vst [vmem:[#allocation2 + $0x44] sm:$0x33] %v220_v53  ;;  %v312_v5 = vrot.slane %v309_v55, 4  ;;  %v4382_v23 = vld [vmem:[%s5972_s1 + $0x60] sm:$0xff]  }
  0x20   : > { %2324 = vmatprep.subr.bf16.mxu1 %v4437_v1  ;;  %2556 = vmatprep.subr.bf16.mxu0 %v4437_v1  ;;  %327 = vst [vmem:[#allocation2 + $0x64] sm:$0xee] %v309_v55  ;;  %v316_v9 = vrot.slane %v3641_v0, 7  ;;  %289 = vst [vmem:[#allocation2 + $0x64] sm:$0x11] %v270_v60  ;;  %v3650_v28 = vld [vmem:[%s4554_s25 + $0x198] sm:$0xff] }
  0x21   : > { %328 = vst [vmem:[#allocation2 + $0x6c] sm:$0xee] %v310_v62  ;;  %v3646_v21 = vld [vmem:[%s4554_s25 + $0x154] sm:$0x77]  ;;  %v3652_v22 = vld [vmem:[%s4554_s25 + $0x1a4] sm:$0x77] }
  0x22   : > { %344 = vst [vmem:[#allocation2 + $0xa0] sm:$0x77] %v3646_v21  ;;  %v3653_v29 = vld [vmem:[%s4554_s25 + $0x1ac] sm:$0x77]  ;;  %v3655_v32 = vld [vmem:[%s4554_s25 + $0x1e0] sm:$0xff]  ;;  %v364_v35 = vrot.slane %v3652_v22, 5 }
  0x23   : > { %2325 = vmatpush1.bf16.msra.mxu1 %v4368_v11  ;;  %2557 = vmatpush1.bf16.msra.mxu0 %v4369_v12  ;;  %v3649_v11 = vld [vmem:[%s4554_s25 + $0x190] sm:$0xff]  ;;  %v3656_v34 = vld [vmem:[%s4554_s25 + $0x1e8] sm:$0xff]  ;;  %v361_v36 = vrot.slane %v3650_v28, 5  ;;  %v367_v37 = vrot.slane %v3653_v29, 5  ;;  %v406_v38 = vrot.slane %v3655_v32, 6  ;;  %v4383_v41 = vld [vmem:[%s5972_s1 + $0xe0] sm:$0xff]  }
  0x24   : > { %2326 = vmatprep.subr.bf16.mxu1 %v4437_v1  ;;  %2558 = vmatprep.subr.bf16.mxu0 %v4437_v1  ;;  %v4643_v12 = vld [vmem:[#allocation2 + $0x14] sm:$0xff]  ;;  %v407_v43 = vrot.slane %v3656_v34, 6  ;;  %v4384_v44 = vld [vmem:[%s5972_s1 + $0x68] sm:$0xff]   ;;  %v372_v53 = vrot.slane %v364_v35, 4  ;;  %v3679_v28 = vld [vmem:[%s4554_s25 + $0x320] sm:$0xff]  ;;  %s4345_s11 = smul.u32 100, %s6034_s13 }
  0x25   : > { %v366_v47 = vrot.slane %v361_v36, 4  ;;  %385 = vst [vmem:[#allocation2 + $0xa8] sm:$0x88] %v361_v36  ;;  %430 = vst [vmem:[#allocation2 + $0xc8] sm:$0xcc] %v406_v38  ;;  %v3661_v49 = vld [vmem:[%s4554_s25 + $0x230] sm:$0xff] }
  0x26   : > { %v4385_v50 = vld [vmem:[%s5972_s1 + $0xe8] sm:$0xff]   ;;  %431 = vst [vmem:[#allocation2 + $0xd0] sm:$0xcc] %v407_v43  ;;  %v3662_v56 = vld [vmem:[%s4554_s25 + $0x238] sm:$0xff]  ;;  %v373_v60 = vrot.slane %v367_v37, 4  ;;  %s5805_s16 = scalar_lea.vmem %s5974_s3, %s4345_s11 }
  0x27   : > { %2327 = vmatpush1.bf16.msra.mxu1 %v4370_v13  ;;  %2559 = vmatpush1.bf16.msra.mxu0 %v4371_v14  ;;  %v4647_v13 = vsel %vm4597_vm7, %v264_v54, %v265_v61  ;;  %v271_v14 = vrot.slane %v265_v61, 4  ;;  %v409_v54 = vrot.slane %v406_v38, 4  ;;  %v3664_v55 = vld [vmem:[%s4554_s25 + $0x244] sm:$0x77]  ;;  %390 = vst [vmem:[#allocation2 + $0xc8] sm:$0x33] %v372_v53 }
  0x28   : > { %2328 = vmatprep.subr.bf16.mxu1 %v4437_v1  ;;  %2560 = vmatprep.subr.bf16.mxu0 %v4437_v1  ;;  %v4700_v61 = vld [vmem:[%s4554_s25 + $0x280] sm:$0xff]  ;;  %391 = vst [vmem:[#allocation2 + $0xd0] sm:$0x33] %v373_v60  ;;  %v453_v29 = vrot.slane %v3662_v56, 7  ;;  %v3677_v34 = vld [vmem:[%s4554_s25 + $0x2ec] sm:$0x77] }
  0x29   : > { %290 = vst [vmem:[#allocation2 + $0x6c] sm:$0x11] %v271_v14  ;;  %v4386_v14 = vld [vmem:[%s5972_s1 + $0x70] sm:$0xff]   ;;  %v548_v38 = vrot.slane %v3679_v28, 6  ;;  %v4749_v56 = vld [vmem:[%s4554_s25 + $0x3c0] sm:$0xff] }
  0x2a   : > { %471 = vst [vmem:[#allocation2 + $0xf8] sm:$0xee] %v453_v29  ;;  %v4751_v60 = vld [vmem:[#allocation2 + $0x3c] sm:$0xff]  ;;  %v4783_v28 = vld [vmem:[%s4554_s25 + $0x38c] sm:$0x77] }
  0x2b   : > { %2329 = vmatpush1.bf16.msra.mxu1 %v4372_v15  ;;  %2561 = vmatpush1.bf16.msra.mxu0 %v4373_v16  ;;  %v315_v15 = vrot.slane %v310_v62, 4  ;;  %v360_v16 = vrot.slane %v3649_v11, 5  ;;  %v3670_v62 = vld [vmem:[%s4554_s25 + $0x294] sm:$0x77]  ;;  %572 = vst [vmem:[#allocation2 + $0x154] sm:$0xcc] %v548_v38 }
  0x2c   : > { %2330 = vmatprep.subr.bf16.mxu1 %v4437_v1  ;;  %2562 = vmatprep.subr.bf16.mxu0 %v4437_v1  ;;  %486 = vst [vmem:[#allocation2 + $0x12c] sm:$0x77] %v3670_v62  ;;  %v3673_v11 = vld [vmem:[%s4554_s25 + $0x2d0] sm:$0xff] }
  0x2d   : > { %v4668_v26 = vsel %vm4634_vm8, %v315_v15, %v316_v9  ;;  %384 = vst [vmem:[#allocation2 + $0xa0] sm:$0x88] %v360_v16  ;;  %v363_v30 = vrot.slane %v360_v16, 4  ;;  %v3665_v9 = vld [vmem:[%s4554_s25 + $0x24c] sm:$0x77]  ;;  %v502_v32 = vrot.slane %v3673_v11, 5 }
  0x2e   : > { %v4715_v15 = vld [vmem:[%s4554_s25 + $0x288] sm:$0xff]  ;;  %v3671_v16 = vld [vmem:[%s4554_s25 + $0x29c] sm:$0x77] }
  0x2f   : > { %2331 = vmatpush1.bf16.msra.mxu1 %v4374_v17  ;;  %2563 = vmatpush1.bf16.msra.mxu0 %v4375_v18  ;;  %v3788_v17 = vcombine.high %v4568_v20, %v4643_v12  ;;  %v4652_v18 = vld [vmem:[#allocation2 + $0x1c] sm:$0xff]  ;;  %v4687_v45 = vsel %vm4584_vm4, %v363_v30, %v364_v35  ;;  %487 = vst [vmem:[#allocation2 + $0x134] sm:$0x77] %v3671_v16  ;;  %v459_v30 = vrot.slane %v3665_v9, 7  ;;  %v4730_v35 = vld [vmem:[%s5972_s1 + $0xf0] sm:$0xff]   ;;  %v4763_v11 = vld [vmem:[%s4554_s25 + $0x3c8] sm:$0xff] }
  0x30   : > { %2332 = vmatprep.subr.bf16.mxu1 %v4437_v1  ;;  %2564 = vmatprep.subr.bf16.mxu0 %v4437_v1  ;;  %v3790_v25 = vcombine.high %v4573_v24, %v4652_v18  ;;  %526 = vst [vmem:[#allocation2 + $0x12c] sm:$0x88] %v502_v32  ;;  %v3683_v9 = vld [vmem:[%s4554_s25 + $0x33c] sm:$0x77] }
  0x31   : > { %2346 = vmatprep.mubr.bf16.mxu1 %v3788_v17  ;;  %v3674_v17 = vld [vmem:[%s4554_s25 + $0x2d8] sm:$0xff] }
  0x32   : > { %2578 = vmatprep.mubr.bf16.mxu0 %v3790_v25 }
  0x33   : > { %2333 = vmatpush1.bf16.msra.mxu1 %v4376_v19  ;;  %2565 = vmatpush1.bf16.msra.mxu0 %v4377_v27  ;;  %v4656_v19 = vsel %vm4634_vm8, %v312_v5, %v313_v7  ;;  %v3647_v27 = vld [vmem:[%s4554_s25 + $0x15c] sm:$0x77]  ;;  %v452_v7 = vrot.slane %v3661_v49, 7 }
  0x34   : > { %2334 = vmatprep.subr.bf16.mxu1 %v4437_v1  ;;  %2566 = vmatprep.subr.bf16.mxu0 %v4437_v1  ;;  %345 = vst [vmem:[#allocation2 + $0xa8] sm:$0x77] %v3647_v27  ;;  %v3676_v27 = vld [vmem:[%s4554_s25 + $0x2e4] sm:$0x77]  ;;  %v4746_v49 = vld [vmem:[%s5972_s1 + $0xf8] sm:$0xff]  }
  0x35   : > { %v455_v22 = vrot.slane %v452_v7, 4  ;;  %470 = vst [vmem:[#allocation2 + $0xf0] sm:$0xee] %v452_v7 }
  0x37   : > { %2335 = vmatpush1.bf16.msra.mxu1 %v4378_v33  ;;  %2567 = vmatpush1.bf16.msra.mxu0 %v4379_v40  ;;  %v3658_v33 = vld [vmem:[%s4554_s25 + $0x1f4] sm:$0x77]  ;;  %v3659_v40 = vld [vmem:[%s4554_s25 + $0x1fc] sm:$0x77] }
  0x38   : > { %2336 = vmatprep.subr.bf16.mxu1 %v4437_v1  ;;  %2568 = vmatprep.subr.bf16.mxu0 %v4437_v1  ;;  %v410_v42 = vrot.slane %v3658_v33, 6  ;;  %v413_v48 = vrot.slane %v3659_v40, 6  ;;  %v503_v33 = vrot.slane %v3674_v17, 5  ;;  %v509_v40 = vrot.slane %v3677_v34, 5  ;;  %v3686_v17 = vld [vmem:[%s4554_s25 + $0x378] sm:$0xff] }
  0x39   : > { %v3698_v34 = vld [vmem:[%s4554_s25 + $0x418] sm:$0xff] }
  0x3a   : > { %v4706_v0 = vsel %vm4597_vm7, %v409_v54, %v410_v42  ;;  %v418_v5 = vrot.slane %v410_v42, 4  ;;  %v419_v25 = vrot.slane %v413_v48, 4  ;;  %v4388_v42 = vld [vmem:[%s5972_s1 + $0x78] sm:$0xff]   ;;  %527 = vst [vmem:[#allocation2 + $0x134] sm:$0x88] %v503_v33  ;;  %v551_v54 = vrot.slane %v548_v38, 4 }
  0x3b   : > { %2337 = vmatpush1.bf16.msra.mxu1 %v4380_v58  ;;  %2569 = vmatpush1.bf16.msra.mxu0 %v4381_v3  ;;  %v4697_v58 = vsel %vm4584_vm4, %v366_v47, %v367_v37  ;;  %v412_v3 = vrot.slane %v407_v43, 4  ;;  %v506_v37 = vrot.slane %v3676_v27, 5  ;;  %v458_v43 = vrot.slane %v453_v29, 4  ;;  %v3682_v47 = vld [vmem:[%s4554_s25 + $0x334] sm:$0x77] }
  0x3c   : > { %2338 = vmatprep.subr.bf16.mxu1 %v4437_v1  ;;  %2570 = vmatprep.subr.bf16.mxu0 %v4437_v1  ;;  %436 = vst [vmem:[#allocation2 + $0xf0] sm:$0x11] %v418_v5  ;;  %437 = vst [vmem:[#allocation2 + $0xf8] sm:$0x11] %v419_v25  ;;  %v552_v7 = vrot.slane %v3682_v47, 6  ;;  %v4776_v25 = vld [vmem:[#allocation2 + $0x44] sm:$0xff]  ;;  %v3789_v29 = vcombine.low %v4573_v24, %v4652_v18 }
  0x3d   : > { %v4721_v21 = vsel %vm4597_vm7, %v412_v3, %v413_v48  ;;  %v3685_v48 = vld [vmem:[%s4554_s25 + $0x370] sm:$0xff]  ;;  %v514_v53 = vrot.slane %v506_v37, 4  ;;  %v4755_v62 = vsel %vm4634_vm8, %v458_v43, %v459_v30  ;;  %v3793_v30 = vcombine.high %v4609_v46, %v4751_v60  ;;  %v3700_v43 = vld [vmem:[%s4554_s25 + $0x424] sm:$0x77] }
  0x3e   : > { %v594_v16 = vrot.slane %v3685_v48, 7  ;;  %v4780_v27 = vsel %vm4597_vm7, %v551_v54, %v552_v7  ;;  %v555_v38 = vrot.slane %v3683_v9, 6  ;;  %v4390_v24 = vld [vmem:[%s5972_s1 + $0x100] sm:$0xff]   ;;  %v3795_v18 = vcombine.high %v4618_v52, %v4776_v25  ;;  %v3701_v54 = vld [vmem:[%s4554_s25 + $0x42c] sm:$0x77] }
  0x3f   : > { %2339 = vmatpush1.bf16.msra.mxu1 %v4382_v23  ;;  %2571 = vmatpush1.bf16.msra.mxu0 %v4383_v41  ;;  %v456_v23 = vrot.slane %v3664_v55, 7  ;;  %v3680_v41 = vld [vmem:[%s4554_s25 + $0x328] sm:$0xff]  ;;  %v515_v55 = vrot.slane %v509_v40, 4  ;;  %532 = vst [vmem:[#allocation2 + $0x154] sm:$0x33] %v514_v53  ;;  %v4438_v47 = vmov 0.0  }
  0x40   : > { %2340 = vmatprep.subr.bf16.mxu1 %v4437_v1  ;;  %2572 = vmatprep.subr.bf16.mxu0 %v4437_v1  ;;  %v549_v5 = vrot.slane %v3680_v41, 6  ;;  %612 = vst [vmem:[#allocation2 + $0x17c] sm:$0xee] %v594_v16  ;;  %v601_v48 = vrot.slane %v4783_v28, 7  ;;  %v3695_v53 = vld [vmem:[%s4554_s25 + $0x3dc] sm:$0x77] }
  0x41   : > { %v4734_v36 = vsel %vm4634_vm8, %v455_v22, %v456_v23  ;;  %533 = vst [vmem:[#allocation2 + $0x15c] sm:$0x33] %v515_v55  ;;  %v3688_v22 = vld [vmem:[%s4554_s25 + $0x384] sm:$0x77]  ;;  %v3787_v23 = vcombine.low %v4568_v20, %v4643_v12  ;;  %v3694_v20 = vld [vmem:[%s4554_s25 + $0x3d4] sm:$0x77] }
  0x42   : > { %573 = vst [vmem:[#allocation2 + $0x15c] sm:$0xcc] %v549_v5  ;;  %v3697_v12 = vld [vmem:[%s4554_s25 + $0x410] sm:$0xff]  ;;  %v598_v41 = vrot.slane %v3688_v22, 7  ;;  %628 = vst [vmem:[#allocation2 + $0x1b8] sm:$0x77] %v3694_v20 }
  0x43   : > { %2341 = vmatpush1.bf16.msra.mxu1 %v4384_v44  ;;  %2573 = vmatpush1.bf16.msra.mxu0 %v4385_v50  ;;  %v505_v44 = vrot.slane %v502_v32, 4  ;;  %v508_v50 = vrot.slane %v503_v33, 4  ;;  %v554_v32 = vrot.slane %v549_v5, 4  ;;  %v560_v33 = vrot.slane %v552_v7, 4  ;;  %v4804_v55 = vld [vmem:[#allocation2 + $0x64] sm:$0xff]  ;;  %v4810_v9 = vld [vmem:[#allocation2 + $0x6c] sm:$0xff] }
  0x44   : > { %2342 = vmatprep.subr.bf16.mxu1 %v4437_v1  ;;  %2574 = vmatprep.subr.bf16.mxu0 %v4437_v1  ;;  %v561_v7 = vrot.slane %v555_v38, 4  ;;  %629 = vst [vmem:[#allocation2 + $0x1c0] sm:$0x77] %v3695_v53  ;;  %v3703_v20 = vld [vmem:[%s4554_s25 + $0x28] sm:$0xff] }
  0x45   : > { %v4759_v3 = vsel %vm4584_vm4, %v505_v44, %v506_v37  ;;  %v597_v37 = vrot.slane %v594_v16, 4  ;;  %578 = vst [vmem:[#allocation2 + $0x17c] sm:$0x11] %v560_v33  ;;  %v645_v44 = vrot.slane %v3698_v34, 5  ;;  %v4808_v5 = vsel %vm4597_vm7, %v554_v32, %v555_v38  ;;  %v4391_v16 = vld [vmem:[%s5972_s1 + $0x108] sm:$0xff]  }
  0x46   : > { %v3715_v32 = vld [vmem:[%s4554_s25 + $0xc8] sm:$0xff]  ;;  %579 = vst [vmem:[#allocation2 + $0x184] sm:$0x11] %v561_v7  ;;  %v651_v33 = vrot.slane %v3701_v54, 5  ;;  %v179_v34 = vld [vmem:[%s4554_s25 + $0x10] sm:$0xf] }
  0x47   : > { %2343 = vmatpush1.bf16.msra.mxu1 %v4386_v14  ;;  %2575 = vmatpush1.bf16.msra.mxu0 %v4730_v35  ;;  %v4769_v14 = vsel %vm4584_vm4, %v508_v50, %v509_v40  ;;  %v595_v40 = vrot.slane %v3686_v17, 7  ;;  %v648_v50 = vrot.slane %v3700_v43, 5  ;;  %669 = vst [vmem:[#allocation2 + $0x1c0] sm:$0x88] %v645_v44  ;;  %v4817_v22 = vsel %vm4634_vm8, %v597_v37, %v598_v41  ;;  %v4839_v41 = vld [vmem:[%s4554_s25 + $0x44] sm:$0x77] }
  0x48   : > { %2344 = vmatprep.subr.bf16.mxu1 %v4437_v1  ;;  %2576 = vmatprep.subr.bf16.mxu0 %v4437_v1  ;;  %v650_v28 = vrot.slane %v645_v44, 4  ;;  %767 = vst [vmem:[#allocation2 + $0x230] sm:$0xff] %v3715_v32  ;;  %v3794_v37 = vcombine.low %v4618_v52, %v4776_v25  ;;  %v182_v43 = vld [vmem:[%s4554_s25 + $0x24] sm:$0x7]  ;;  %186 = vst.msk [vmem:[#allocation2 + $0x10] sm:$0xf] %vm185_vm9, %v179_v34  ;;  %v3837_v52 = vcombine.low %v4817_v22, %v4749_v56 }
  0x49   : > { %613 = vst [vmem:[#allocation2 + $0x184] sm:$0xee] %v595_v40  ;;  %v600_v17 = vrot.slane %v595_v40, 4  ;;  %v656_v38 = vrot.slane %v648_v50, 4  ;;  %v3704_v40 = vld [vmem:[%s4554_s25 + $0x30] sm:$0xff]  ;;  %v690_v53 = vrot.slane %v3703_v20, 6 }
  0x4a   : > { %190 = vst.msk [vmem:[#allocation2 + $0x24] sm:$0x7] %vm189_vm10, %v182_v43  ;;  %v3718_v44 = vld [vmem:[%s4554_s25 + $0xdc] sm:$0x77]  ;;  %v657_v7 = vrot.slane %v651_v33, 4  ;;  %v697_v32 = vrot.slane %v4839_v41, 6 }
  0x4b   : > { %2345 = vmatpush1.bf16.msra.mxu1 %v4388_v42  ;;  %2577 = vmatpush1.bf16.msra.mxu0 %v4746_v49  ;;  %v644_v42 = vrot.slane %v3697_v12, 5  ;;  %v3706_v12 = vld [vmem:[%s4554_s25 + $0x3c] sm:$0x77]  ;;  %674 = vst [vmem:[#allocation2 + $0x1e0] sm:$0x33] %v656_v38  ;;  %v3803_v38 = vcombine.high %v4656_v19, %v4613_v51 }
  0x4c   : > { %4163 = vmatprep.subr.bf16.mxu1 %v4437_v1  ;;  %4055 = vmatprep.subr.bf16.mxu0 %v4438_v47  ;;  %v694_v54 = vrot.slane %v3706_v12, 6  ;;  %770 = vst [vmem:[#allocation2 + $0x244] sm:$0x77] %v3718_v44  ;;  %v3627_v34 = vld [vmem:[%s4554_s25 + $0x60] sm:$0xf]  ;;  %v3721_v12 = vld [vmem:[%s4554_s25 + $0x118] sm:$0xff] }
  0x4d   : > { %668 = vst [vmem:[#allocation2 + $0x1b8] sm:$0x88] %v644_v42  ;;  %714 = vst [vmem:[#allocation2 + $0x1e0] sm:$0xcc] %v690_v53  ;;  %v3630_v43 = vld [vmem:[%s4554_s25 + $0x74] sm:$0x7] }
  0x4e   : > { %2347 = vmatmul.mubr.bf16.vlgmr.msra.gmra.mrb[0].mxu1 %v3787_v23  ;;  %2579 = vmatmul.mubr.bf16.vlgmr.msra.gmra.mrb[0].mxu0 %v3789_v29  ;;  %v647_v23 = vrot.slane %v644_v42, 4  ;;  %v3792_v29 = vcombine.low %v4609_v46, %v4751_v60  ;;  %v3798_v46 = vcombine.high %v4630_v59, %v4804_v55  ;;  %v4835_v60 = vsel %vm4634_vm8, %v600_v17, %v601_v48  ;;  %v3712_v42 = vld [vmem:[%s4554_s25 + $0x8c] sm:$0x77]  ;;  %v3636_v25 = vld [vmem:[%s4554_s25 + $0xc4] sm:$0x7] }
  0x4f   : > { %2354 = vmatprep.mubr.bf16.mxu1 %v3793_v30  ;;  %4056 = vmatpush3.bf16.msra.mxu0 %v4390_v24  ;;  %v3838_v30 = vcombine.high %v4817_v22, %v4749_v56  ;;  %v4860_v48 = vsel %vm4584_vm4, %v650_v28, %v651_v33  ;;  %v4392_v17 = vld [vmem:[%s5972_s1 + $0x110] sm:$0xff]   ;;  %v693_v28 = vrot.slane %v690_v53, 4  ;;  %675 = vst [vmem:[#allocation2 + $0x1e8] sm:$0x33] %v657_v7  ;;  %v740_v20 = vrot.slane %v3712_v42, 7  ;;  %v4881_v53 = vld [vmem:[%s4554_s25 + $0x208] sm:$0xff] }
  0x50   : > { %2586 = vmatprep.mubr.bf16.mxu0 %v3795_v18  ;;  %4179 = vmatpush1.bf16.msra.mxu1 %v4479_v2  ;;  %v3840_v2 = vcombine.high %v4835_v60, %v4763_v11  ;;  %v4852_v24 = vsel %vm4584_vm4, %v647_v23, %v648_v50  ;;  %v3709_v18 = vld [vmem:[%s4554_s25 + $0x78] sm:$0xff]  ;;  %v3800_v50 = vcombine.high %v4647_v13, %v4810_v9  ;;  %v691_v23 = vrot.slane %v3704_v40, 6  ;;  %v3633_v44 = vld [vmem:[%s4554_s25 + $0xb0] sm:$0xf]  ;;  %v3731_v56 = vld [vmem:[%s4554_s25 + $0x184] sm:$0x77] }
  0x51   : > { %4057 = vmatprep.subr.bf16.mxu0 %v4438_v47  ;;  %4164 = vmatprep.subr.bf16.mxu1 %v4437_v1  ;;  %v736_v33 = vrot.slane %v3709_v18, 7  ;;  %v4887_v18 = vsel %vm4597_vm7, %v693_v28, %v694_v54  ;;  %v209_v7 = vrot.slane %v3627_v34, 5  ;;  %v786_v28 = vrot.slane %v3721_v12, 5  ;;  %v3645_v34 = vld [vmem:[%s4554_s25 + $0x150] sm:$0xf] }
  0x52   : > { %v696_v40 = vrot.slane %v691_v23, 4  ;;  %715 = vst [vmem:[#allocation2 + $0x1e8] sm:$0xcc] %v691_v23  ;;  %v3724_v23 = vld [vmem:[%s4554_s25 + $0x12c] sm:$0x77] }
  0x53   : > { %4058 = vmatpush3.bf16.msra.mxu0 %v4391_v16  ;;  %v702_v16 = vrot.slane %v694_v54, 4  ;;  %v739_v42 = vrot.slane %v736_v33, 4  ;;  %754 = vst [vmem:[#allocation2 + $0x208] sm:$0xee] %v736_v33  ;;  %234 = vst.msk [vmem:[#allocation2 + $0x24] sm:$0x8] %vm233_vm11, %v209_v7 }
  0x54   : > { %4180 = vmatpush1.bf16.msra.mxu1 %v4489_v4  ;;  %4059 = vmatprep.subr.bf16.mxu0 %v4438_v47  ;;  %v4393_v4 = vld [vmem:[%s5972_s1 + $0x118] sm:$0xff]   ;;  %v4899_v54 = vsel %vm4597_vm7, %v696_v40, %v697_v32  ;;  %343 = vst.msk [vmem:[#allocation2 + $0x9c] sm:$0xf] %vm185_vm9, %v3645_v34  ;;  %810 = vst [vmem:[#allocation2 + $0x244] sm:$0x88] %v786_v28  ;;  %v268_v40 = vrot.slane %v3636_v25, 6 }
  0x55   : > { %4165 = vmatprep.subr.bf16.mxu1 %v4437_v1  ;;  %720 = vst [vmem:[#allocation2 + $0x208] sm:$0x11] %v702_v16  ;;  %v3727_v16 = vld [vmem:[%s4554_s25 + $0x168] sm:$0xff]  ;;  %v3733_v25 = vld [vmem:[%s4554_s25 + $0x1b8] sm:$0xff]  ;;  %v3642_v34 = vld [vmem:[%s4554_s25 + $0x114] sm:$0x7] }
  0x56   : > { %2355 = vmatmul.mubr.bf16.gmra.mrb[4].mxu1 %v3792_v29  ;;  %2587 = vmatmul.mubr.bf16.gmra.mrb[4].mxu0 %v3794_v37  ;;  %v3805_v29 = vcombine.high %v4668_v26, %v4622_v57  ;;  %v3797_v37 = vcombine.low %v4630_v59, %v4804_v55  ;;  %v4907_v59 = vsel %vm4634_vm8, %v739_v42, %v740_v20  ;;  %v217_v55 = vrot.slane %v3630_v43, 5  ;;  %v3639_v43 = vld [vmem:[%s4554_s25 + $0x100] sm:$0xf] }
  0x57   : > { %2362 = vmatprep.mubr.bf16.mxu1 %v3798_v46  ;;  %2594 = vmatprep.mubr.bf16.mxu0 %v3800_v50  ;;  %v3799_v46 = vcombine.low %v4647_v13, %v4810_v9  ;;  %v216_v13 = vrot.slane %v209_v7, 4  ;;  %v789_v9 = vrot.slane %v786_v28, 4  ;;  %v260_v50 = vrot.slane %v3633_v44, 6  ;;  %v4925_v28 = vld [vmem:[#allocation2 + $0xa0] sm:$0xff] }
  0x58   : > { %4060 = vmatpush3.bf16.msra.mxu0 %v4392_v17  ;;  %4181 = vmatpush1.bf16.msra.mxu1 %v4500_v6  ;;  %v790_v6 = vrot.slane %v3724_v23, 5  ;;  %v3648_v17 = vld [vmem:[%s4554_s25 + $0x164] sm:$0x7]  ;;  %v221_v20 = vrot.slane %v217_v55, 4  ;;  %v832_v12 = vrot.slane %v3727_v16, 6  ;;  %v272_v16 = vrot.slane %v268_v40, 4 }
  0x59   : > { %4061 = vmatprep.subr.bf16.mxu0 %v4438_v47  ;;  %4166 = vmatprep.subr.bf16.mxu1 %v4437_v1  ;;  %v218_v33 = vsel %vm4584_vm4, %v216_v13, %v217_v55  ;;  %346 = vst.msk [vmem:[#allocation2 + $0xb0] sm:$0x7] %vm189_vm10, %v3648_v17  ;;  %v267_v44 = vrot.slane %v260_v50, 4  ;;  %v3730_v23 = vld [vmem:[%s4554_s25 + $0x17c] sm:$0x77] }
  0x5a   : > { %237 = vst.msk [vmem:[#allocation2 + $0x38] sm:$0xf] %vm185_vm9, %v218_v33  ;;  %v4921_v42 = vsel %vm4584_vm4, %v789_v9, %v790_v6  ;;  %v798_v7 = vrot.slane %v790_v6, 4  ;;  %856 = vst [vmem:[#allocation2 + $0x26c] sm:$0xcc] %v832_v12  ;;  %v311_v9 = vrot.slane %v3639_v43, 7 }
  0x5b   : > { %285 = vst.msk [vmem:[#allocation2 + $0x4c] sm:$0xc] %vm284_vm13, %v260_v50  ;;  %v3742_v13 = vld [vmem:[%s4554_s25 + $0x21c] sm:$0x77]  ;;  %v269_v55 = vsel %vm4597_vm7, %v267_v44, %v268_v40  ;;  %v3736_v50 = vld [vmem:[%s4554_s25 + $0x1cc] sm:$0x77] }
  0x5c   : > { %4062 = vmatpush3.bf16.msra.mxu0 %v4393_v4  ;;  %4182 = vmatpush1.bf16.msra.mxu1 %v4511_v8  ;;  %241 = vst.msk [vmem:[#allocation2 + $0x4c] sm:$0x3] %vm240_vm12, %v221_v20  ;;  %v835_v4 = vrot.slane %v832_v12, 4  ;;  %816 = vst [vmem:[#allocation2 + $0x26c] sm:$0x33] %v798_v7  ;;  %v3745_v8 = vld [vmem:[%s4554_s25 + $0x258] sm:$0xff]  ;;  %v3802_v20 = vcombine.low %v4656_v19, %v4613_v51  ;;  %v3804_v51 = vcombine.low %v4668_v26, %v4622_v57 }
  0x5d   : > { %4167 = vmatprep.subr.bf16.mxu1 %v4437_v1  ;;  %v3651_v6 = vld [vmem:[%s4554_s25 + $0x1a0] sm:$0xf]  ;;  %912 = vst [vmem:[#allocation2 + $0x2d0] sm:$0x77] %v3742_v13  ;;  %288 = vst.msk [vmem:[#allocation2 + $0x60] sm:$0xf] %vm185_vm9, %v269_v55  ;;  %v3808_v19 = vcombine.high %v4925_v28, %v4687_v45 }
  0x5e   : > { %2363 = vmatmul.mubr.bf16.gmra.mrb[8].mxu1 %v3797_v37  ;;  %2595 = vmatmul.mubr.bf16.gmra.mrb[8].mxu0 %v3799_v46  ;;  %292 = vst.msk [vmem:[#allocation2 + $0x74] sm:$0x1] %vm291_vm14, %v272_v16  ;;  %v836_v37 = vrot.slane %v3730_v23, 6  ;;  %v3654_v17 = vld [vmem:[%s4554_s25 + $0x1b4] sm:$0x7]  ;;  %v318_v46 = vrot.slane %v311_v9, 4 }
  0x5f   : > { %2370 = vmatprep.mubr.bf16.mxu1 %v3803_v38  ;;  %v3748_v33 = vld [vmem:[%s4554_s25 + $0x26c] sm:$0x77]  ;;  %2602 = vmatprep.mubr.bf16.mxu0 %v3805_v29  ;;  %330 = vst.msk [vmem:[#allocation2 + $0x74] sm:$0xe] %vm329_vm15, %v311_v9  ;;  %v878_v38 = vrot.slane %v3733_v25, 7  ;;  %v319_v29 = vrot.slane %v3642_v34, 7 }
  0x60   : > { %v3657_v12 = vld [vmem:[%s4554_s25 + $0x1f0] sm:$0xf]  ;;  %v4951_v40 = vld [vmem:[#allocation2 + $0xa8] sm:$0xff]  ;;  %4183 = vmatpush1.bf16.msra.mxu1 %v4523_v10  ;;  %v4956_v43 = vsel %vm4597_vm7, %v835_v4, %v836_v37  ;;  %v844_v44 = vrot.slane %v836_v37, 4  ;;  %v882_v7 = vrot.slane %v3736_v50, 7  ;;  %v362_v10 = vrot.slane %v3651_v6, 5 }
  0x61   : > { %4168 = vmatprep.subr.bf16.mxu1 %v4437_v1  ;;  %v881_v23 = vrot.slane %v878_v38, 4  ;;  %896 = vst [vmem:[#allocation2 + $0x294] sm:$0xee] %v878_v38  ;;  %v3660_v25 = vld [vmem:[%s4554_s25 + $0x204] sm:$0x7]  ;;  %v320_v4 = vsel %vm4634_vm8, %v318_v46, %v319_v29  ;;  %v370_v16 = vrot.slane %v3654_v17, 5  ;;  %v3810_v26 = vcombine.high %v4951_v40, %v4697_v58 }
  0x62   : > { %862 = vst [vmem:[#allocation2 + $0x294] sm:$0x11] %v844_v44  ;;  %v928_v34 = vrot.slane %v3745_v8, 5  ;;  %v932_v13 = vrot.slane %v3748_v33, 5  ;;  %v3751_v55 = vld [vmem:[%s4554_s25 + $0x2a8] sm:$0xff]  ;;  %v369_v50 = vrot.slane %v362_v10, 4 }
  0x63   : > { %v4968_v57 = vld [vmem:[%s4554_s25 + $0x2bc] sm:$0x77]  ;;  %333 = vst.msk [vmem:[#allocation2 + $0x88] sm:$0xf] %vm185_vm9, %v320_v4  ;;  %v4975_v9 = vsel %vm4634_vm8, %v881_v23, %v882_v7  ;;  %v408_v6 = vrot.slane %v3657_v12, 6  ;;  %v4419_v37 = vld [vmem:[%s5972_s1 + $0xa8] sm:$0xff]   ;;  %v3807_v4 = vcombine.low %v4925_v28, %v4687_v45 }
  0x64   : > { %386 = vst.msk [vmem:[#allocation2 + $0xb0] sm:$0x8] %vm233_vm11, %v362_v10  ;;  %v3663_v8 = vld [vmem:[%s4554_s25 + $0x240] sm:$0xf]  ;;  %4184 = vmatpush1.bf16.msra.mxu1 %v4419_v37  ;;  %v3873_v17 = vcombine.high %v4975_v9, %v4881_v53  ;;  %v3872_v33 = vcombine.low %v4975_v9, %v4881_v53  ;;  %v931_v46 = vrot.slane %v928_v34, 4  ;;  %v374_v38 = vrot.slane %v370_v16, 4 }
  0x65   : > { %952 = vst [vmem:[#allocation2 + $0x2d0] sm:$0x88] %v928_v34  ;;  %v3666_v44 = vld [vmem:[%s4554_s25 + $0x254] sm:$0x7]  ;;  %v3669_v29 = vld [vmem:[%s4554_s25 + $0x290] sm:$0xf]  ;;  %4169 = vmatprep.subr.bf16.mxu1 %v4437_v1  ;;  %v371_v12 = vsel %vm4584_vm4, %v369_v50, %v370_v16 }
  0x66   : > { %2371 = vmatmul.mubr.bf16.gmra.mrb[12].mxu1 %v3802_v20  ;;  %v415_v7 = vrot.slane %v408_v6, 4  ;;  %432 = vst.msk [vmem:[#allocation2 + $0xd8] sm:$0xc] %vm284_vm13, %v408_v6  ;;  %v3757_v23 = vld [vmem:[%s4554_s25 + $0x2f8] sm:$0xff]  ;;  %v3672_v10 = vld [vmem:[%s4554_s25 + $0x2a4] sm:$0x7]  ;;  %2603 = vmatmul.mubr.bf16.gmra.mrb[12].mxu0 %v3804_v51  ;;  %v5002_v20 = vsel %vm4584_vm4, %v931_v46, %v932_v13 }
  0x67   : > { %485 = vst.msk [vmem:[#allocation2 + $0x128] sm:$0xf] %vm185_vm9, %v3669_v29  ;;  %2378 = vmatprep.mubr.bf16.mxu1 %v3808_v19  ;;  %v4997_v34 = vld [vmem:[#allocation2 + $0xc8] sm:$0xff]  ;;  %389 = vst.msk [vmem:[#allocation2 + $0xc4] sm:$0xf] %vm185_vm9, %v371_v12  ;;  %v416_v16 = vrot.slane %v3660_v25, 6  ;;  %2610 = vmatprep.mubr.bf16.mxu0 %v3810_v26 }
  0x68   : > { %392 = vst.msk [vmem:[#allocation2 + $0xd8] sm:$0x3] %vm240_vm12, %v374_v38  ;;  %v940_v50 = vrot.slane %v932_v13, 4  ;;  %v974_v51 = vrot.slane %v3751_v55, 6  ;;  %v978_v19 = vrot.slane %v4968_v57, 6  ;;  %v454_v45 = vrot.slane %v3663_v8, 7 }
  0x69   : > { %488 = vst.msk [vmem:[#allocation2 + $0x13c] sm:$0x7] %vm189_vm10, %v3672_v10  ;;  %v462_v28 = vrot.slane %v3666_v44, 7  ;;  %v3760_v6 = vld [vmem:[%s4554_s25 + $0x30c] sm:$0x77]  ;;  %v417_v25 = vsel %vm4597_vm7, %v415_v7, %v416_v16  ;;  %v420_v13 = vrot.slane %v416_v16, 4  ;;  %v3809_v7 = vcombine.low %v4951_v40, %v4697_v58 }
  0x6a   : > { %v5008_v37 = vld [vmem:[#allocation2 + $0xd0] sm:$0xff]  ;;  %958 = vst [vmem:[#allocation2 + $0x2f8] sm:$0x33] %v940_v50  ;;  %v1020_v26 = vrot.slane %v3757_v23, 7  ;;  %v1024_v55 = vrot.slane %v3760_v6, 7  ;;  %v977_v57 = vrot.slane %v974_v51, 4  ;;  %v3813_v23 = vcombine.high %v4997_v34, %v4706_v0 }
  0x6b   : > { %v4420_v46 = vld [vmem:[%s5972_s1 + $0xb0] sm:$0xff]   ;;  %v3675_v38 = vld [vmem:[%s4554_s25 + $0x2e0] sm:$0xf]  ;;  %435 = vst.msk [vmem:[#allocation2 + $0xec] sm:$0xf] %vm185_vm9, %v417_v25  ;;  %v461_v8 = vrot.slane %v454_v45, 4  ;;  %v3815_v10 = vcombine.high %v5008_v37, %v4721_v21 }
  0x6c   : > { %4185 = vmatpush1.bf16.msra.mxu1 %v4420_v46  ;;  %998 = vst [vmem:[#allocation2 + $0x2f8] sm:$0xcc] %v974_v51  ;;  %472 = vst.msk [vmem:[#allocation2 + $0x100] sm:$0xe] %vm329_vm15, %v454_v45  ;;  %v986_v44 = vrot.slane %v978_v19, 4  ;;  %v504_v29 = vrot.slane %v3675_v38, 5  ;;  %v5029_v16 = vsel %vm4597_vm7, %v977_v57, %v978_v19 }
  0x6d   : > { %4170 = vmatprep.subr.bf16.mxu1 %v4437_v1  ;;  %v3769_v12 = vld [vmem:[%s4554_s25 + $0x398] sm:$0xff]  ;;  %438 = vst.msk [vmem:[#allocation2 + $0x100] sm:$0x1] %vm291_vm14, %v420_v13  ;;  %1038 = vst [vmem:[#allocation2 + $0x320] sm:$0xee] %v1020_v26  ;;  %v463_v50 = vsel %vm4634_vm8, %v461_v8, %v462_v28  ;;  %v1023_v58 = vrot.slane %v1020_v26, 4 }
  0x6e   : > { %1004 = vst [vmem:[#allocation2 + $0x320] sm:$0x11] %v986_v44  ;;  %528 = vst.msk [vmem:[#allocation2 + $0x13c] sm:$0x8] %vm233_vm11, %v504_v29  ;;  %v3766_v40 = vld [vmem:[%s4554_s25 + $0x35c] sm:$0x77]  ;;  %2379 = vmatmul.mubr.bf16.gmra.mrb[16].mxu1 %v3807_v4  ;;  %2611 = vmatmul.mubr.bf16.gmra.mrb[16].mxu0 %v3809_v7 }
  0x6f   : > { %v4421_v51 = vld [vmem:[%s5972_s1 + $0xb8] sm:$0xff]   ;;  %475 = vst.msk [vmem:[#allocation2 + $0x114] sm:$0xf] %vm185_vm9, %v463_v50  ;;  %v511_v45 = vrot.slane %v504_v29, 4  ;;  %1054 = vst [vmem:[#allocation2 + $0x35c] sm:$0x77] %v3766_v40  ;;  %v5043_v28 = vsel %vm4634_vm8, %v1023_v58, %v1024_v55  ;;  %2386 = vmatprep.mubr.bf16.mxu1 %v3813_v23  ;;  %2618 = vmatprep.mubr.bf16.mxu0 %v3815_v10  ;;  %v3812_v29 = vcombine.low %v4997_v34, %v4706_v0 }
  0x70   : > { %4186 = vmatpush1.bf16.msra.mxu1 %v4421_v51  ;;  %v1070_v19 = vrot.slane %v3769_v12, 5  ;;  %v3678_v6 = vld [vmem:[%s4554_s25 + $0x2f4] sm:$0x7]  ;;  %v5046_v46 = vld [vmem:[%s4554_s25 + $0x348] sm:$0xff]  ;;  %v3681_v13 = vld [vmem:[%s4554_s25 + $0x330] sm:$0xf]  ;;  %v3814_v10 = vcombine.low %v5008_v37, %v4721_v21 }
  0x71   : > { %4171 = vmatprep.subr.bf16.mxu1 %v4437_v1  ;;  %v512_v25 = vrot.slane %v3678_v6, 5  ;;  %v5049_v26 = vld [vmem:[#allocation2 + $0xf0] sm:$0xff]  ;;  %v550_v38 = vrot.slane %v3681_v13, 6  ;;  %v5052_v57 = vld [vmem:[#allocation2 + $0xf8] sm:$0xff]  ;;  %v4422_v55 = vld [vmem:[%s5972_s1 + $0xc0] sm:$0xff]  }
  0x72   : > { %1094 = vst [vmem:[#allocation2 + $0x35c] sm:$0x88] %v1070_v19  ;;  %v3772_v4 = vld [vmem:[%s4554_s25 + $0x3ac] sm:$0x77]  ;;  %v3684_v23 = vld [vmem:[%s4554_s25 + $0x344] sm:$0x7]  ;;  %v3818_v50 = vcombine.high %v5049_v26, %v4734_v36  ;;  %v3820_v0 = vcombine.high %v5052_v57, %v4755_v62 }
  0x73   : > { %v513_v8 = vsel %vm4584_vm4, %v511_v45, %v512_v25  ;;  %v516_v44 = vrot.slane %v512_v25, 4  ;;  %574 = vst.msk [vmem:[#allocation2 + $0x164] sm:$0xc] %vm284_vm13, %v550_v38  ;;  %v1074_v12 = vrot.slane %v3772_v4, 5  ;;  %v3775_v7 = vld [vmem:[%s4554_s25 + $0x3e8] sm:$0xff]  ;;  %v1073_v58 = vrot.slane %v1070_v19, 4 }
  0x74   : > { %4187 = vmatpush1.bf16.msra.mxu1 %v4422_v55  ;;  %531 = vst.msk [vmem:[#allocation2 + $0x150] sm:$0xf] %vm185_vm9, %v513_v8  ;;  %v557_v34 = vrot.slane %v550_v38, 4  ;;  %v1116_v51 = vrot.slane %v3775_v7, 6  ;;  %v4423_v45 = vld [vmem:[%s5972_s1 + $0xc8] sm:$0xff]   ;;  %v558_v6 = vrot.slane %v3684_v23, 6 }
  0x75   : > { %4172 = vmatprep.subr.bf16.mxu1 %v4437_v1  ;;  %534 = vst.msk [vmem:[#allocation2 + $0x164] sm:$0x3] %vm240_vm12, %v516_v44  ;;  %v1082_v40 = vrot.slane %v1074_v12, 4  ;;  %v3687_v21 = vld [vmem:[%s4554_s25 + $0x380] sm:$0xf]  ;;  %v5080_v19 = vsel %vm4584_vm4, %v1073_v58, %v1074_v12  ;;  %v1231_v13 = vld [vmem:[#allocation2 + $0x12c] sm:$0xff]  ;;  %v3817_v12 = vcombine.low %v5049_v26, %v4734_v36 }
  0x76   : > { %2387 = vmatmul.mubr.bf16.gmra.mrb[20].mxu1 %v3812_v29  ;;  %1140 = vst [vmem:[#allocation2 + $0x384] sm:$0xcc] %v1116_v51  ;;  %v596_v37 = vrot.slane %v3687_v21, 7  ;;  %2619 = vmatmul.mubr.bf16.gmra.mrb[20].mxu0 %v3814_v10  ;;  %v3778_v25 = vld [vmem:[%s4554_s25 + $0x3fc] sm:$0x77]  ;;  %v559_v38 = vsel %vm4597_vm7, %v557_v34, %v558_v6  ;;  %v562_v4 = vrot.slane %v558_v6, 4  ;;  %v3819_v10 = vcombine.low %v5052_v57, %v4755_v62 }
  0x77   : > { %1100 = vst [vmem:[#allocation2 + $0x384] sm:$0x33] %v1082_v40  ;;  %2394 = vmatprep.mubr.bf16.mxu1 %v3818_v50  ;;  %2626 = vmatprep.mubr.bf16.mxu0 %v3820_v0  ;;  %v1120_v55 = vrot.slane %v3778_v25, 6  ;;  %v1232_v8 = vld [vmem:[#allocation2 + $0x134] sm:$0xff]  ;;  %577 = vst.msk [vmem:[#allocation2 + $0x178] sm:$0xf] %vm185_vm9, %v559_v38  ;;  %v3823_v50 = vcombine.high %v4700_v61, %v1231_v13  ;;  %v3822_v38 = vcombine.low %v4700_v61, %v1231_v13 }
  0x78   : > { %4188 = vmatpush1.bf16.msra.mxu1 %v4423_v45  ;;  %614 = vst.msk [vmem:[#allocation2 + $0x18c] sm:$0xe] %vm329_vm15, %v596_v37  ;;  %v4424_v44 = vld [vmem:[%s5972_s1 + $0xd0] sm:$0xff]   ;;  %v3781_v29 = vld [vmem:[%s4554_s25 + $0x438] sm:$0xff]  ;;  %v1119_v58 = vrot.slane %v1116_v51, 4  ;;  %v603_v0 = vrot.slane %v596_v37, 4  ;;  %v3825_v40 = vcombine.high %v4715_v15, %v1232_v8 }
  0x79   : > { %4173 = vmatprep.subr.bf16.mxu1 %v4437_v1  ;;  %580 = vst.msk [vmem:[#allocation2 + $0x18c] sm:$0x1] %vm291_vm14, %v562_v4  ;;  %v1128_v7 = vrot.slane %v1120_v55, 4  ;;  %v1162_v23 = vrot.slane %v3781_v29, 7  ;;  %v3690_v34 = vld [vmem:[%s4554_s25 + $0x394] sm:$0x7] }
  0x7a   : > { %v604_v36 = vrot.slane %v3690_v34, 7  ;;  %v4425_v26 = vld [vmem:[%s5972_s1 + $0xd8] sm:$0xff]   ;;  %v3693_v45 = vld [vmem:[%s4554_s25 + $0x3d0] sm:$0xf]  ;;  %v5110_v57 = vsel %vm4597_vm7, %v1119_v58, %v1120_v55  ;;  %v3699_v6 = vld [vmem:[%s4554_s25 + $0x420] sm:$0xf]  ;;  %v3824_v55 = vcombine.low %v4715_v15, %v1232_v8 }
  0x7b   : > { %1146 = vst [vmem:[#allocation2 + $0x3ac] sm:$0x11] %v1128_v7  ;;  %1180 = vst [vmem:[#allocation2 + $0x3ac] sm:$0xee] %v1162_v23  ;;  %v1237_v51 = vld [vmem:[#allocation2 + $0x154] sm:$0xff]  ;;  %v1238_v21 = vld [vmem:[#allocation2 + $0x15c] sm:$0xff] }
  0x7c   : > { %4189 = vmatpush1.bf16.msra.mxu1 %v4424_v44  ;;  %v605_v62 = vsel %vm4634_vm8, %v603_v0, %v604_v36  ;;  %627 = vst.msk [vmem:[#allocation2 + $0x1b4] sm:$0xf] %vm185_vm9, %v3693_v45  ;;  %v4426_v37 = vld [vmem:[%s5972_s1 + $0xe0] sm:$0xff]   ;;  %v646_v25 = vrot.slane %v3699_v6, 5  ;;  %v3702_v4 = vld [vmem:[%s4554_s25 + $0x434] sm:$0x7]  ;;  %v3828_v44 = vcombine.high %v4759_v3, %v1237_v51  ;;  %v3830_v7 = vcombine.high %v4769_v14, %v1238_v21 }
  0x7d   : > { %4174 = vmatprep.subr.bf16.mxu1 %v4437_v1  ;;  %617 = vst.msk [vmem:[#allocation2 + $0x1a0] sm:$0xf] %vm185_vm9, %v605_v62  ;;  %v3696_v61 = vld [vmem:[%s4554_s25 + $0x3e4] sm:$0x7]  ;;  %v1165_v13 = vrot.slane %v1162_v23, 4  ;;  %v3827_v23 = vcombine.low %v4759_v3, %v1237_v51  ;;  %v703_v45 = vrot.slane %v697_v32, 4 }
  0x7e   : > { %2395 = vmatmul.mubr.bf16.gmra.mrb[24].mxu1 %v3817_v12  ;;  %2627 = vmatmul.mubr.bf16.gmra.mrb[24].mxu0 %v3819_v10  ;;  %v653_v29 = vrot.slane %v646_v25, 4  ;;  %v654_v12 = vrot.slane %v3702_v4, 5  ;;  %670 = vst.msk [vmem:[#allocation2 + $0x1c8] sm:$0x8] %vm233_vm11, %v646_v25  ;;  %v4427_v10 = vld [vmem:[%s5972_s1 + $0xe8] sm:$0xff]   ;;  %v3722_v4 = vld [vmem:[%s4554_s25 + $0x120] sm:$0xff] }
  0x7f   : > { %2402 = vmatprep.mubr.bf16.mxu1 %v3823_v50  ;;  %2634 = vmatprep.mubr.bf16.mxu0 %v3825_v40  ;;  %630 = vst.msk [vmem:[#allocation2 + $0x1c8] sm:$0x7] %vm189_vm10, %v3696_v61  ;;  %v3784_v8 = vld [vmem:[%s4554_s25 + $0x44c] sm:$0x77]  ;;  %v1243_v50 = vld [vmem:[#allocation2 + $0x17c] sm:$0xff]  ;;  %v1244_v34 = vld [vmem:[#allocation2 + $0x184] sm:$0xff] }
  0x80   : > { %4190 = vmatpush1.bf16.msra.mxu1 %v4425_v26  ;;  %v655_v15 = vsel %vm4584_vm4, %v653_v29, %v654_v12  ;;  %v1166_v58 = vrot.slane %v3784_v8, 7  ;;  %v3705_v0 = vld [vmem:[%s4554_s25 + $0x38] sm:$0xf]  ;;  %v3710_v40 = vld [vmem:[%s4554_s25 + $0x80] sm:$0xff]  ;;  %v3708_v6 = vld [vmem:[%s4554_s25 + $0x4c] sm:$0x7]  ;;  %v3835_v3 = vcombine.high %v4808_v5, %v1244_v34 }
  0x81   : > { %4175 = vmatprep.subr.bf16.mxu1 %v4437_v1  ;;  %673 = vst.msk [vmem:[#allocation2 + $0x1dc] sm:$0xf] %vm185_vm9, %v655_v15  ;;  %v692_v36 = vrot.slane %v3705_v0, 6  ;;  %v737_v62 = vrot.slane %v3710_v40, 7  ;;  %721 = vst [vmem:[#allocation2 + $0x210] sm:$0x11] %v703_v45 }
  0x82   : > { %v5140_v26 = vsel %vm4634_vm8, %v1165_v13, %v1166_v58  ;;  %v787_v29 = vrot.slane %v3722_v4, 5  ;;  %v3725_v8 = vld [vmem:[%s4554_s25 + $0x134] sm:$0x77]  ;;  %v1253_v0 = vld [vmem:[#allocation2 + $0x1c0] sm:$0xff]  ;;  %v1327_v63 = vld [vmem:[#allocation2 + $0x3ac] sm:$0xff] }
  0x83   : > { %v699_v25 = vrot.slane %v692_v36, 4  ;;  %716 = vst.msk [vmem:[#allocation2 + $0x1f0] sm:$0xc] %vm284_vm13, %v692_v36  ;;  %755 = vst [vmem:[#allocation2 + $0x210] sm:$0xee] %v737_v62  ;;  %v742_v32 = vrot.slane %v737_v62, 4  ;;  %v3845_v62 = vcombine.high %v1253_v0, %v4860_v48 }
  0x84   : > { %4191 = vmatpush1.bf16.msra.mxu1 %v4426_v37  ;;  %v3829_v37 = vcombine.low %v4769_v14, %v1238_v21  ;;  %v3713_v14 = vld [vmem:[%s4554_s25 + $0x94] sm:$0x77]  ;;  %v3711_v21 = vld [vmem:[%s4554_s25 + $0x88] sm:$0xf]  ;;  %811 = vst [vmem:[#allocation2 + $0x24c] sm:$0x88] %v787_v29 }
  0x85   : > { %4176 = vmatprep.subr.bf16.mxu1 %v4437_v1  ;;  %v743_v51 = vrot.slane %v3713_v14, 7  ;;  %v793_v58 = vrot.slane %v3725_v8, 5  ;;  %v792_v45 = vrot.slane %v787_v29, 4  ;;  %v1258_v22 = vld [vmem:[#allocation2 + $0x1e0] sm:$0xff]  ;;  %v1300_v53 = vld [vmem:[#allocation2 + $0x2f8] sm:$0xff] }
  0x86   : > { %2403 = vmatmul.mubr.bf16.gmra.mrb[28].mxu1 %v3822_v38  ;;  %2635 = vmatmul.mubr.bf16.gmra.mrb[28].mxu0 %v3824_v55  ;;  %v700_v38 = vrot.slane %v3708_v6, 6  ;;  %v738_v55 = vrot.slane %v3711_v21, 7  ;;  %v1306_v31 = vld [vmem:[#allocation2 + $0x320] sm:$0xff] }
  0x87   : > { %2410 = vmatprep.mubr.bf16.mxu1 %v3828_v44  ;;  %2642 = vmatprep.mubr.bf16.mxu0 %v3830_v7  ;;  %v5161_v44 = vsel %vm4634_vm8, %v742_v32, %v743_v51  ;;  %v3834_v7 = vcombine.low %v4808_v5, %v1244_v34  ;;  %v5175_v5 = vld [vmem:[%s4554_s25 + $0xd0] sm:$0xff]  ;;  %v799_v40 = vrot.slane %v793_v58, 4  ;;  %v3844_v32 = vcombine.low %v1253_v0, %v4860_v48 }
  0x88   : > { %4192 = vmatpush1.bf16.msra.mxu1 %v4427_v10  ;;  %v701_v41 = vsel %vm4597_vm7, %v699_v25, %v700_v38  ;;  %v3719_v10 = vld [vmem:[%s4554_s25 + $0xe4] sm:$0x77]  ;;  %v745_v61 = vrot.slane %v738_v55, 4  ;;  %756 = vst.msk [vmem:[#allocation2 + $0x218] sm:$0xe] %vm329_vm15, %v738_v55  ;;  %v704_v13 = vrot.slane %v700_v38, 4  ;;  %v5196_v25 = vsel %vm4584_vm4, %v792_v45, %v793_v58 }
  0x89   : > { %4177 = vmatprep.subr.bf16.mxu1 %v4437_v1  ;;  %719 = vst.msk [vmem:[#allocation2 + $0x204] sm:$0xf] %vm185_vm9, %v701_v41  ;;  %771 = vst [vmem:[#allocation2 + $0x24c] sm:$0x77] %v3719_v10  ;;  %v3728_v34 = vld [vmem:[%s4554_s25 + $0x170] sm:$0xff]  ;;  %v1259_v38 = vld [vmem:[#allocation2 + $0x1e8] sm:$0xff]  ;;  %v3848_v51 = vcombine.high %v1258_v22, %v4887_v18  ;;  %v3887_v39 = vcombine.low %v1306_v31, %v5043_v28 }
  0x8a   : > { %722 = vst.msk [vmem:[#allocation2 + $0x218] sm:$0x1] %vm291_vm14, %v704_v13  ;;  %v833_v36 = vrot.slane %v3728_v34, 6  ;;  %817 = vst [vmem:[#allocation2 + $0x274] sm:$0x33] %v799_v40  ;;  %v3849_v13 = vcombine.low %v1259_v38, %v4899_v54  ;;  %v3746_v45 = vld [vmem:[%s4554_s25 + $0x260] sm:$0xff] }
  0x8b   : > { %v3729_v55 = vld [vmem:[%s4554_s25 + $0x178] sm:$0xf]  ;;  %v3732_v10 = vld [vmem:[%s4554_s25 + $0x18c] sm:$0x7] }
  0x8c   : > { %4193 = vmatpush1.bf16.msra.mxu1 %v4730_v35  ;;  %v3833_v35 = vcombine.high %v4780_v27, %v1243_v50  ;;  %857 = vst [vmem:[#allocation2 + $0x274] sm:$0xcc] %v833_v36  ;;  %v838_v21 = vrot.slane %v833_v36, 4  ;;  %v5229_v36 = vld [vmem:[%s4554_s25 + $0x210] sm:$0xff] }
  0x8d   : > { %4178 = vmatprep.subr.bf16.mxu1 %v4437_v1  ;;  %v658_v1 = vrot.slane %v654_v12, 4  ;;  %v3714_v12 = vld [vmem:[%s4554_s25 + $0x9c] sm:$0x7] }
  0x8e   : > { %2411 = vmatmul.mubr.bf16.gmra.mrb[32].mxu1 %v3827_v23  ;;  %2643 = vmatmul.mubr.bf16.gmra.mrb[32].mxu0 %v3829_v37  ;;  %v746_v15 = vrot.slane %v3714_v12, 7  ;;  %v3720_v37 = vld [vmem:[%s4554_s25 + $0xec] sm:$0x7]  ;;  %v834_v12 = vrot.slane %v3729_v55, 6 }
  0x8f   : > { %676 = vst.msk [vmem:[#allocation2 + $0x1f0] sm:$0x3] %vm240_vm12, %v658_v1  ;;  %2418 = vmatprep.mubr.bf16.mxu1 %v3833_v35  ;;  %2650 = vmatprep.mubr.bf16.mxu0 %v3835_v3  ;;  %v5994_v35 = vcombine.low %v4835_v60, %v4763_v11  ;;  %v3734_v3 = vld [vmem:[%s4554_s25 + $0x1c0] sm:$0xff]  ;;  %v3726_v1 = vld [vmem:[%s4554_s25 + $0x13c] sm:$0x7] }
  0x90   : > { %4194 = vmatpush1.bf16.msra.mxu1 %v4746_v49  ;;  %v3832_v49 = vcombine.low %v4780_v27, %v1243_v50  ;;  %v747_v27 = vsel %vm4634_vm8, %v745_v61, %v746_v15  ;;  %v1252_v50 = vld [vmem:[#allocation2 + $0x1b8] sm:$0xff]  ;;  %772 = vst.msk [vmem:[#allocation2 + $0x254] sm:$0x7] %vm189_vm10, %v3720_v37  ;;  %v879_v41 = vrot.slane %v3734_v3, 7  ;;  %v796_v14 = vrot.slane %v3726_v1, 5 }
  0x91   : > { %759 = vst.msk [vmem:[#allocation2 + $0x22c] sm:$0xf] %vm185_vm9, %v747_v27  ;;  %v3843_v23 = vcombine.high %v1252_v50, %v4852_v24  ;;  %v3842_v11 = vcombine.low %v1252_v50, %v4852_v24  ;;  %v3847_v61 = vcombine.low %v1258_v22, %v4887_v18  ;;  %v842_v15 = vrot.slane %v3732_v10, 6  ;;  %v3735_v50 = vld [vmem:[%s4554_s25 + $0x1c8] sm:$0xf] }
  0x92   : > { %897 = vst [vmem:[#allocation2 + $0x29c] sm:$0xee] %v879_v41  ;;  %v800_v29 = vrot.slane %v796_v14, 4  ;;  %858 = vst.msk [vmem:[#allocation2 + $0x27c] sm:$0xc] %vm284_vm13, %v834_v12  ;;  %v841_v8 = vrot.slane %v834_v12, 4 }
  0x93   : > { %v846_v58 = vrot.slane %v842_v15, 4  ;;  %v880_v0 = vrot.slane %v3735_v50, 7  ;;  %v884_v40 = vrot.slane %v879_v41, 4  ;;  %v1273_v18 = vld [vmem:[#allocation2 + $0x244] sm:$0xff]  ;;  %v929_v37 = vrot.slane %v3746_v45, 5 }
  0x94   : > { %818 = vst.msk [vmem:[#allocation2 + $0x27c] sm:$0x3] %vm240_vm12, %v800_v29  ;;  %v843_v34 = vsel %vm4597_vm7, %v841_v8, %v842_v15  ;;  %v3743_v3 = vld [vmem:[%s4554_s25 + $0x224] sm:$0x77] }
  0x95   : > { %861 = vst.msk [vmem:[#allocation2 + $0x290] sm:$0xf] %vm185_vm9, %v843_v34  ;;  %913 = vst [vmem:[#allocation2 + $0x2d8] sm:$0x77] %v3743_v3  ;;  %v934_v41 = vrot.slane %v929_v37, 4 }
  0x96   : > { %2419 = vmatmul.mubr.bf16.gmra.mrb[36].mxu1 %v3832_v49  ;;  %2651 = vmatmul.mubr.bf16.gmra.mrb[36].mxu0 %v3834_v7  ;;  %v3850_v49 = vcombine.high %v1259_v38, %v4899_v54  ;;  %v1264_v7 = vld [vmem:[#allocation2 + $0x208] sm:$0xff]  ;;  %864 = vst.msk [vmem:[#allocation2 + $0x2a4] sm:$0x1] %vm291_vm14, %v846_v58  ;;  %v3737_v54 = vld [vmem:[%s4554_s25 + $0x1d4] sm:$0x77]  ;;  %v887_v38 = vrot.slane %v880_v0, 4 }
  0x97   : > { %2426 = vmatprep.mubr.bf16.mxu1 %v3838_v30  ;;  %2658 = vmatprep.mubr.bf16.mxu0 %v3840_v2  ;;  %v3723_v30 = vld [vmem:[%s4554_s25 + $0x128] sm:$0xf]  ;;  %v3717_v2 = vld [vmem:[%s4554_s25 + $0xd8] sm:$0xf]  ;;  %v3853_v27 = vcombine.high %v1264_v7, %v4907_v59  ;;  %898 = vst.msk [vmem:[#allocation2 + $0x2a4] sm:$0xe] %vm329_vm15, %v880_v0 }
  0x98   : > { %v788_v6 = vrot.slane %v3723_v30, 5  ;;  %769 = vst.msk [vmem:[#allocation2 + $0x240] sm:$0xf] %vm185_vm9, %v3717_v2  ;;  %v3852_v30 = vcombine.low %v1264_v7, %v4907_v59  ;;  %953 = vst [vmem:[#allocation2 + $0x2d8] sm:$0x88] %v929_v37  ;;  %v1285_v58 = vld [vmem:[#allocation2 + $0x294] sm:$0xff] }
  0x99   : > { %v4395_v7 = vld [vmem:[#allocation2 + $0x38] ss:$20 sps:$4 sm:$0xff]   ;;  %v3755_v8 = vld [vmem:[%s4554_s25 + $0x2c4] sm:$0x77]  ;;  %v3868_v37 = vcombine.high %v4956_v43, %v1285_v58 }
  0x9a   : > { %812 = vst.msk [vmem:[#allocation2 + $0x254] sm:$0x8] %vm233_vm11, %v788_v6  ;;  %v795_v4 = vrot.slane %v788_v6, 4  ;;  %v981_v0 = vrot.slane %v3755_v8, 6  ;;  %v3753_v34 = vld [vmem:[%s4554_s25 + $0x2b8] sm:$0xf] }
  0x9b   : > { %v3761_v3 = vld [vmem:[%s4554_s25 + $0x314] sm:$0x77] }
  0x9c   : > { %v797_v24 = vsel %vm4584_vm4, %v795_v4, %v796_v14  ;;  %v1279_v14 = vld [vmem:[#allocation2 + $0x26c] sm:$0xff]  ;;  %v987_v45 = vrot.slane %v981_v0, 4 }
  0x9d   : > { %815 = vst.msk [vmem:[#allocation2 + $0x268] sm:$0xf] %vm185_vm9, %v797_v24  ;;  %v3750_v24 = vld [vmem:[%s4554_s25 + $0x27c] sm:$0x7]  ;;  %v3863_v10 = vcombine.high %v4921_v42, %v1279_v14 }
  0x9e   : > { %2427 = vmatmul.mubr.bf16.gmra.mrb[40].mxu1 %v3837_v52  ;;  %2659 = vmatmul.mubr.bf16.gmra.mrb[40].mxu0 %v5994_v35  ;;  %v839_v52 = vrot.slane %v3731_v56, 6  ;;  %v3738_v35 = vld [vmem:[%s4554_s25 + $0x1dc] sm:$0x7]  ;;  %v4394_v56 = vld [vmem:[#allocation2 + $0x10] ss:$20 sps:$4 sm:$0xff]   ;;  %v938_v15 = vrot.slane %v3750_v24, 5 }
  0x9f   : > { %2434 = vmatprep.mubr.bf16.mxu1 %v3843_v23  ;;  %2666 = vmatprep.mubr.bf16.mxu0 %v3845_v62  ;;  %v885_v23 = vrot.slane %v3737_v54, 7  ;;  %v4428_v62 = vld [vmem:[#allocation2 + $0x230] sm:$0xff]  ;;  %v888_v59 = vrot.slane %v3738_v35, 7  ;;  %v3862_v54 = vcombine.low %v4921_v42, %v1279_v14  ;;  %1005 = vst [vmem:[#allocation2 + $0x328] sm:$0x11] %v987_v45  ;;  %v3867_v14 = vcombine.low %v4956_v43, %v1285_v58 }
  0xa0   : > { %v845_v60 = vrot.slane %v839_v52, 4  ;;  %v5215_v48 = vsel %vm4597_vm7, %v838_v21, %v839_v52  ;;  %v3858_v6 = vcombine.high %v4428_v62, %v1273_v18  ;;  %v3752_v21 = vld [vmem:[%s4554_s25 + $0x2b0] sm:$0xff]  ;;  %v3857_v55 = vcombine.low %v4428_v62, %v1273_v18  ;;  %v3756_v62 = vld [vmem:[%s4554_s25 + $0x2cc] sm:$0x7]  ;;  %v3779_v45 = vld [vmem:[%s4554_s25 + $0x404] sm:$0x77] }
  0xa1   : > { %v5237_v2 = vsel %vm4634_vm8, %v884_v40, %v885_v23  ;;  %v889_v1 = vsel %vm4634_vm8, %v887_v38, %v888_v59  ;;  %v975_v12 = vrot.slane %v3752_v21, 6  ;;  %v3758_v40 = vld [vmem:[%s4554_s25 + $0x300] sm:$0xff]  ;;  %v976_v18 = vrot.slane %v3753_v34, 6  ;;  %v3762_v21 = vld [vmem:[%s4554_s25 + $0x31c] sm:$0x7] }
  0xa2   : > { %863 = vst [vmem:[#allocation2 + $0x29c] sm:$0x11] %v845_v60  ;;  %v3875_v22 = vcombine.high %v5237_v2, %v5229_v36  ;;  %v3874_v52 = vcombine.low %v5237_v2, %v5229_v36  ;;  %901 = vst.msk [vmem:[#allocation2 + $0x2b8] sm:$0xf] %vm185_vm9, %v889_v1  ;;  %v3749_v60 = vld [vmem:[%s4554_s25 + $0x274] sm:$0x77] }
  0xa3   : > { %999 = vst [vmem:[#allocation2 + $0x300] sm:$0xcc] %v975_v12  ;;  %v980_v50 = vrot.slane %v975_v12, 4  ;;  %v983_v35 = vrot.slane %v976_v18, 4  ;;  %1000 = vst.msk [vmem:[#allocation2 + $0x308] sm:$0xc] %vm284_vm13, %v976_v18 }
  0xa4   : > { %v942_v42 = vrot.slane %v938_v15, 4  ;;  %v1027_v1 = vrot.slane %v3761_v3, 7  ;;  %v1030_v12 = vrot.slane %v3762_v21, 7  ;;  %v3771_v34 = vld [vmem:[%s4554_s25 + $0x3a8] sm:$0xf]  ;;  %v1123_v9 = vrot.slane %v3779_v45, 6 }
  0xa5   : > { %v5277_v23 = vsel %vm4597_vm7, %v980_v50, %v981_v0  ;;  %v4398_v50 = vld [vmem:[#allocation2 + $0xb0] ss:$20 sps:$4 sm:$0xff]   ;;  %v3768_v18 = vld [vmem:[%s4554_s25 + $0x36c] sm:$0x7]  ;;  %v4400_v21 = vld [vmem:[#allocation2 + $0x100] ss:$20 sps:$4 sm:$0xff]  }
  0xa6   : > { %2435 = vmatmul.mubr.bf16.gmra.mrb[44].mxu1 %v3842_v11  ;;  %2667 = vmatmul.mubr.bf16.gmra.mrb[44].mxu0 %v3844_v32  ;;  %v3741_v11 = vld [vmem:[%s4554_s25 + $0x218] sm:$0xf]  ;;  %v935_v32 = vrot.slane %v3749_v60, 5  ;;  %960 = vst.msk [vmem:[#allocation2 + $0x308] sm:$0x3] %vm240_vm12, %v942_v42  ;;  %v3770_v60 = vld [vmem:[%s4554_s25 + $0x3a0] sm:$0xff]  ;;  %v3883_v42 = vcombine.high %v1300_v53, %v5029_v16 }
  0xa7   : > { %2442 = vmatprep.mubr.bf16.mxu1 %v3848_v51  ;;  %2674 = vmatprep.mubr.bf16.mxu0 %v3850_v49  ;;  %911 = vst.msk [vmem:[#allocation2 + $0x2cc] sm:$0xf] %vm185_vm9, %v3741_v11  ;;  %v3747_v51 = vld [vmem:[%s4554_s25 + $0x268] sm:$0xf] }
  0xa8   : > { %v930_v4 = vrot.slane %v3747_v51, 5  ;;  %v5258_v49 = vsel %vm4584_vm4, %v934_v41, %v935_v32  ;;  %v941_v29 = vrot.slane %v935_v32, 4  ;;  %v3759_v11 = vld [vmem:[%s4554_s25 + $0x308] sm:$0xf]  ;;  %v1071_v51 = vrot.slane %v3770_v60, 5 }
  0xa9   : > { %v1022_v41 = vrot.slane %v3759_v11, 7  ;;  %1056 = vst.msk [vmem:[#allocation2 + $0x36c] sm:$0x7] %vm189_vm10, %v3768_v18 }
  0xaa   : > { %954 = vst.msk [vmem:[#allocation2 + $0x2e0] sm:$0x8] %vm233_vm11, %v930_v4  ;;  %959 = vst [vmem:[#allocation2 + $0x300] sm:$0x33] %v941_v29  ;;  %v1076_v0 = vrot.slane %v1071_v51, 4 }
  0xab   : > { %v1029_v29 = vrot.slane %v1022_v41, 4  ;;  %1040 = vst.msk [vmem:[#allocation2 + $0x330] sm:$0xe] %vm329_vm15, %v1022_v41  ;;  %1095 = vst [vmem:[#allocation2 + $0x364] sm:$0x88] %v1071_v51 }
  0xac   : > { %v3780_v41 = vld [vmem:[%s4554_s25 + $0x40c] sm:$0x7] }
  0xad   : > { %v1031_v43 = vsel %vm4634_vm8, %v1029_v29, %v1030_v12  ;;  %v1126_v51 = vrot.slane %v3780_v41, 6  ;;  %v3783_v29 = vld [vmem:[%s4554_s25 + $0x448] sm:$0xf] }
  0xae   : > { %2443 = vmatmul.mubr.bf16.gmra.mrb[48].mxu1 %v3847_v61  ;;  %2675 = vmatmul.mubr.bf16.gmra.mrb[48].mxu0 %v3849_v13  ;;  %v937_v61 = vrot.slane %v930_v4, 4  ;;  %v3744_v13 = vld [vmem:[%s4554_s25 + $0x22c] sm:$0x7]  ;;  %v4397_v4 = vld [vmem:[#allocation2 + $0x88] ss:$20 sps:$4 sm:$0xff]  }
  0xaf   : > { %2450 = vmatprep.mubr.bf16.mxu1 %v3853_v27  ;;  %4063 = vmatprep.mubr.msk.bf16.mxu0 %vm4439_vm0, %v4438_v47  ;;  %914 = vst.msk [vmem:[#allocation2 + $0x2e0] sm:$0x7] %vm189_vm10, %v3744_v13  ;;  %v3776_v13 = vld [vmem:[%s4554_s25 + $0x3f0] sm:$0xff]  ;;  %v1130_v12 = vrot.slane %v1126_v51, 4 }
  0xb0   : > { %v939_v27 = vsel %vm4584_vm4, %v937_v61, %v938_v15  ;;  %1043 = vst.msk [vmem:[#allocation2 + $0x344] sm:$0xf] %vm185_vm9, %v1031_v43  ;;  %v1294_v61 = vld [vmem:[#allocation2 + $0x2d0] sm:$0xff]  ;;  %v1117_v8 = vrot.slane %v3776_v13, 6 }
  0xb1   : > { %957 = vst.msk [vmem:[#allocation2 + $0x2f4] sm:$0xf] %vm185_vm9, %v939_v27  ;;  %v3878_v58 = vcombine.high %v1294_v61, %v5002_v20 }
  0xb2   : > { %1141 = vst [vmem:[#allocation2 + $0x38c] sm:$0xcc] %v1117_v8  ;;  %1148 = vst.msk [vmem:[#allocation2 + $0x3bc] sm:$0x1] %vm291_vm14, %v1130_v12  ;;  %v1295_v12 = vld [vmem:[#allocation2 + $0x2d8] sm:$0xff] }
  0xb6   : > { %2451 = vmatmul.mubr.bf16.gmra.mrb[52].mxu1 %v3852_v30  ;;  %4064 = vmatmul.mubr.msk.bf16.vlgmr.msra.gmra.mrb[0].mxu0 %vm2238_vm1, %v4394_v56  ;;  %v1021_v30 = vrot.slane %v3758_v40, 7  ;;  %v984_v56 = vrot.slane %v3756_v62, 6  ;;  %v3765_v40 = vld [vmem:[%s4554_s25 + $0x358] sm:$0xf]  ;;  %v3877_v62 = vcombine.low %v1294_v61, %v5002_v20  ;;  %v1315_v61 = vld [vmem:[#allocation2 + $0x35c] sm:$0xff] }
  0xb7   : > { %2458 = vmatprep.mubr.bf16.mxu1 %v3858_v6  ;;  %4067 = vmatprep.mubr.msk.bf16.mxu0 %vm4439_vm0, %v4438_v47  ;;  %v4396_v6 = vld [vmem:[#allocation2 + $0x60] ss:$20 sps:$4 sm:$0xff]   ;;  %1053 = vst.msk [vmem:[#allocation2 + $0x358] sm:$0xf] %vm185_vm9, %v3765_v40  ;;  %v4402_v40 = vld [vmem:[#allocation2 + $0x150] ss:$20 sps:$4 sm:$0xff]  }
  0xb8   : > { %1039 = vst [vmem:[#allocation2 + $0x328] sm:$0xee] %v1021_v30  ;;  %v985_v38 = vsel %vm4597_vm7, %v983_v35, %v984_v56  ;;  %v1026_v59 = vrot.slane %v1021_v30, 4  ;;  %v988_v24 = vrot.slane %v984_v56, 4  ;;  %v3774_v30 = vld [vmem:[%s4554_s25 + $0x3bc] sm:$0x7] }
  0xb9   : > { %1003 = vst.msk [vmem:[#allocation2 + $0x31c] sm:$0xf] %vm185_vm9, %v985_v38  ;;  %v1080_v35 = vrot.slane %v3774_v30, 5  ;;  %v4399_v56 = vld [vmem:[#allocation2 + $0xd8] ss:$20 sps:$4 sm:$0xff]   ;;  %v1122_v38 = vrot.slane %v1117_v8, 4  ;;  %v3908_v30 = vcombine.high %v5140_v26, %v5140_v26 }
  0xba   : > { %v5295_v32 = vsel %vm4634_vm8, %v1026_v59, %v1027_v1  ;;  %1006 = vst.msk [vmem:[#allocation2 + $0x330] sm:$0x1] %vm291_vm14, %v988_v24  ;;  %v3777_v59 = vld [vmem:[%s4554_s25 + $0x3f8] sm:$0xf]  ;;  %v1164_v24 = vrot.slane %v3783_v29, 7 }
  0xbb   : > { %v1084_v1 = vrot.slane %v1080_v35, 4  ;;  %v1118_v11 = vrot.slane %v3777_v59, 6  ;;  %v5346_v20 = vsel %vm4597_vm7, %v1122_v38, %v1123_v9  ;;  %v4401_v8 = vld [vmem:[#allocation2 + $0x128] ss:$20 sps:$4 sm:$0xff]  }
  0xbc   : > { %1182 = vst.msk [vmem:[#allocation2 + $0x3bc] sm:$0xe] %vm329_vm15, %v1164_v24 }
  0xbd   : > { %1102 = vst.msk [vmem:[#allocation2 + $0x394] sm:$0x3] %vm240_vm12, %v1084_v1 }
  0xbe   : > { %2459 = vmatmul.mubr.bf16.gmra.mrb[56].mxu1 %v3857_v55  ;;  %4068 = vmatmul.mubr.msk.bf16.gmra.mrb[4].mxu0 %vm2238_vm1, %v4395_v7  ;;  %v3767_v55 = vld [vmem:[%s4554_s25 + $0x364] sm:$0x77]  ;;  %v5309_v7 = vld [vmem:[%s4554_s25 + $0x350] sm:$0xff]  ;;  %1142 = vst.msk [vmem:[#allocation2 + $0x394] sm:$0xc] %vm284_vm13, %v1118_v11 }
  0xbf   : > { %2466 = vmatprep.mubr.bf16.mxu1 %v3863_v10  ;;  %4071 = vmatprep.mubr.msk.bf16.mxu0 %vm4439_vm0, %v4438_v47  ;;  %1055 = vst [vmem:[#allocation2 + $0x364] sm:$0x77] %v3767_v55  ;;  %v3773_v10 = vld [vmem:[%s4554_s25 + $0x3b4] sm:$0x77]  ;;  %v1125_v55 = vrot.slane %v1118_v11, 4  ;;  %v1307_v36 = vld [vmem:[#allocation2 + $0x328] sm:$0xff] }
  0xc0   : > { %v1077_v15 = vrot.slane %v3773_v10, 5 }
  0xc1   : > { %v1127_v43 = vsel %vm4597_vm7, %v1125_v55, %v1126_v51 }
  0xc2   : > { %v1083_v27 = vrot.slane %v1077_v15, 4  ;;  %1145 = vst.msk [vmem:[#allocation2 + $0x3a8] sm:$0xf] %vm185_vm9, %v1127_v43 }
  0xc4   : > { %1101 = vst [vmem:[#allocation2 + $0x38c] sm:$0x33] %v1083_v27  ;;  %v3786_v27 = vld [vmem:[%s4554_s25 + $0x45c] sm:$0x7] }
  0xc6   : > { %2467 = vmatmul.mubr.bf16.gmra.mrb[60].mxu1 %v3862_v54  ;;  %4072 = vmatmul.mubr.msk.bf16.gmra.mrb[8].mxu0 %vm2238_vm1, %v4396_v6  ;;  %v5326_v54 = vsel %vm4584_vm4, %v1076_v0, %v1077_v15  ;;  %v1129_v6 = vrot.slane %v1123_v9, 4  ;;  %v1172_v0 = vrot.slane %v3786_v27, 7  ;;  %v3903_v9 = vcombine.high %v5110_v57, %v1327_v63 }
  0xc7   : > { %2474 = vmatprep.mubr.bf16.mxu1 %v3868_v37  ;;  %4075 = vmatprep.mubr.msk.bf16.mxu0 %vm4439_vm0, %v4438_v47 }
  0xc8   : > { %1147 = vst [vmem:[#allocation2 + $0x3b4] sm:$0x11] %v1129_v6  ;;  %v4405_v6 = vld [vmem:[#allocation2 + $0x1c8] ss:$20 sps:$4 sm:$0xff]  }
  0xce   : > { %2475 = vmatmul.mubr.bf16.gmra.mrb[64].mxu1 %v3867_v14  ;;  %4076 = vmatmul.mubr.msk.bf16.gmra.mrb[12].mxu0 %vm2238_vm1, %v4397_v4  ;;  %v3882_v14 = vcombine.low %v1300_v53, %v5029_v16  ;;  %v3888_v4 = vcombine.high %v1306_v31, %v5043_v28  ;;  %v3785_v16 = vld [vmem:[%s4554_s25 + $0x454] sm:$0x77]  ;;  %v1321_v28 = vld [vmem:[#allocation2 + $0x384] sm:$0xff] }
  0xcf   : > { %2482 = vmatprep.mubr.bf16.mxu1 %v3873_v17  ;;  %4079 = vmatprep.mubr.msk.bf16.mxu0 %vm4439_vm0, %v4438_v47  ;;  %v1072_v17 = vrot.slane %v3771_v34, 5  ;;  %v1169_v15 = vrot.slane %v3785_v16, 7  ;;  %v3898_v18 = vcombine.high %v5080_v19, %v1321_v28  ;;  %v3897_v45 = vcombine.low %v5080_v19, %v1321_v28  ;;  %v4403_v53 = vld [vmem:[#allocation2 + $0x178] ss:$20 sps:$4 sm:$0xff]   ;;  %v1265_v19 = vld [vmem:[#allocation2 + $0x210] sm:$0xff] }
  0xd0   : > { %v4408_v31 = vld [vmem:[#allocation2 + $0x240] ss:$20 sps:$4 sm:$0xff]   ;;  %v3880_v16 = vcombine.high %v1295_v12, %v5258_v49 }
  0xd1   : > { %1096 = vst.msk [vmem:[#allocation2 + $0x36c] sm:$0x8] %vm233_vm11, %v1072_v17  ;;  %v1079_v3 = vrot.slane %v1072_v17, 4  ;;  %v3892_v17 = vcombine.low %v5046_v46, %v1315_v61 }
  0xd3   : > { %v1081_v60 = vsel %vm4584_vm4, %v1079_v3, %v1080_v35  ;;  %v3854_v35 = vcombine.low %v1265_v19, %v5161_v44  ;;  %v4407_v3 = vld [vmem:[#allocation2 + $0x218] ss:$20 sps:$4 sm:$0xff]  }
  0xd4   : > { %1099 = vst.msk [vmem:[#allocation2 + $0x380] sm:$0xf] %vm185_vm9, %v1081_v60 }
  0xd6   : > { %2483 = vmatmul.mubr.bf16.gmra.mrb[68].mxu1 %v3872_v33  ;;  %4080 = vmatmul.mubr.msk.bf16.gmra.mrb[16].mxu0 %vm2238_vm1, %v4398_v50  ;;  %v3782_v33 = vld [vmem:[%s4554_s25 + $0x440] sm:$0xff]  ;;  %v3893_v50 = vcombine.high %v5046_v46, %v1315_v61  ;;  %v3902_v46 = vcombine.low %v5110_v57, %v1327_v63  ;;  %v1274_v57 = vld [vmem:[#allocation2 + $0x24c] sm:$0xff]  ;;  %s4440_s25 = smov 64  }
  0xd7   : > { %2490 = vmatprep.mubr.bf16.mxu1 %v3878_v58  ;;  %4083 = vmatprep.mubr.msk.bf16.mxu0 %vm4439_vm0, %v4438_v47  ;;  %v1163_v37 = vrot.slane %v3782_v33, 7  ;;  %v1171_v58 = vrot.slane %v1164_v24, 4  ;;  %v4404_v33 = vld [vmem:[#allocation2 + $0x1a0] ss:$20 sps:$4 sm:$0xff]   ;;  %v3859_v38 = vcombine.low %v5175_v5, %v1274_v57 }
  0xd9   : > { %1181 = vst [vmem:[#allocation2 + $0x3b4] sm:$0xee] %v1163_v37  ;;  %v1168_v10 = vrot.slane %v1163_v37, 4  ;;  %v1173_v34 = vsel %vm4634_vm8, %v1171_v58, %v1172_v0  ;;  %v3855_v37 = vcombine.high %v1265_v19, %v5161_v44  ;;  %v1286_v44 = vld [vmem:[#allocation2 + $0x29c] sm:$0xff] }
  0xda   : > { %1185 = vst.msk [vmem:[#allocation2 + $0x3d0] sm:$0xf] %vm185_vm9, %v1173_v34  ;;  %v4412_v34 = vld [vmem:[#allocation2 + $0x2e0] ss:$20 sps:$4 sm:$0xff]  }
  0xdb   : > { %v5366_v13 = vsel %vm4634_vm8, %v1168_v10, %v1169_v15 }
  0xde   : > { %2491 = vmatmul.mubr.bf16.gmra.mrb[72].mxu1 %v3877_v62  ;;  %4084 = vmatmul.mubr.msk.bf16.gmra.mrb[20].mxu0 %vm2238_vm1, %v4399_v56  ;;  %v3907_v62 = vcombine.low %v5140_v26, %v5140_v26  ;;  %v4406_v56 = vld [vmem:[#allocation2 + $0x1f0] ss:$20 sps:$4 sm:$0xff]   ;;  %v1280_v26 = vld [vmem:[#allocation2 + $0x274] sm:$0xff] }
  0xdf   : > { %2498 = vmatprep.mubr.bf16.mxu1 %v3883_v42  ;;  %4087 = vmatprep.mubr.msk.bf16.mxu0 %vm4439_vm0, %v4438_v47  ;;  %v3860_v42 = vcombine.high %v5175_v5, %v1274_v57  ;;  %v3865_v59 = vcombine.high %v5196_v25, %v1280_v26  ;;  %v3864_v11 = vcombine.low %v5196_v25, %v1280_v26  ;;  %v4409_v25 = vld [vmem:[#allocation2 + $0x268] ss:$20 sps:$4 sm:$0xff]  }
  0xe0   : > { %v3870_v5 = vcombine.high %v5215_v48, %v1286_v44 }
  0xe6   : > { %2499 = vmatmul.mubr.bf16.gmra.mrb[76].mxu1 %v3882_v14  ;;  %4088 = vmatmul.mubr.msk.bf16.gmra.mrb[24].mxu0 %vm2238_vm1, %v4400_v21  ;;  %v3869_v21 = vcombine.low %v5215_v48, %v1286_v44  ;;  %v4410_v48 = vld [vmem:[#allocation2 + $0x290] ss:$20 sps:$4 sm:$0xff]  }
  0xe7   : > { %2506 = vmatprep.mubr.bf16.mxu1 %v3888_v4  ;;  %4091 = vmatprep.mubr.msk.bf16.mxu0 %vm4439_vm0, %v4438_v47 }
  0xee   : > { %2507 = vmatmul.mubr.bf16.gmra.mrb[80].mxu1 %v3887_v39  ;;  %4092 = vmatmul.mubr.msk.bf16.gmra.mrb[28].mxu0 %vm2238_vm1, %v4401_v8  ;;  %v3879_v39 = vcombine.low %v1295_v12, %v5258_v49  ;;  %v4411_v8 = vld [vmem:[#allocation2 + $0x2b8] ss:$20 sps:$4 sm:$0xff]  }
  0xef   : > { %2514 = vmatprep.mubr.bf16.mxu1 %v3893_v50  ;;  %4095 = vmatprep.mubr.msk.bf16.mxu0 %vm4439_vm0, %v4438_v47 }
  0xf6   : > { %2515 = vmatmul.mubr.bf16.gmra.mrb[84].mxu1 %v3892_v17  ;;  %4096 = vmatmul.mubr.msk.bf16.gmra.mrb[32].mxu0 %vm2238_vm1, %v4402_v40  ;;  %v3890_v17 = vcombine.high %v1307_v36, %v5295_v32 }
  0xf7   : > { %2522 = vmatprep.mubr.bf16.mxu1 %v3898_v18  ;;  %4099 = vmatprep.mubr.msk.bf16.mxu0 %vm4439_vm0, %v4438_v47  ;;  %v1316_v18 = vld [vmem:[#allocation2 + $0x364] sm:$0xff] }
  0xfe   : > { %2523 = vmatmul.mubr.bf16.gmra.mrb[88].mxu1 %v3897_v45  ;;  %4100 = vmatmul.mubr.msk.bf16.gmra.mrb[36].mxu0 %vm2238_vm1, %v4403_v53  ;;  %v3889_v45 = vcombine.low %v1307_v36, %v5295_v32  ;;  %v4413_v53 = vld [vmem:[#allocation2 + $0x308] ss:$20 sps:$4 sm:$0xff]  }
  0xff   : > { %2530 = vmatprep.mubr.bf16.mxu1 %v3903_v9  ;;  %4103 = vmatprep.mubr.msk.bf16.mxu0 %vm4439_vm0, %v4438_v47 }
 0x106   : > { %2531 = vmatmul.mubr.bf16.gmra.mrb[92].mxu1 %v3902_v46  ;;  %4104 = vmatmul.mubr.msk.bf16.gmra.mrb[40].mxu0 %vm2238_vm1, %v4404_v33  ;;  %v3895_v46 = vcombine.high %v5309_v7, %v1316_v18 }
 0x107   : > { %2538 = vmatprep.mubr.bf16.mxu1 %v3908_v30  ;;  %4107 = vmatprep.mubr.msk.bf16.mxu0 %vm4439_vm0, %v4438_v47  ;;  %v1322_v30 = vld [vmem:[#allocation2 + $0x38c] sm:$0xff] }
 0x108   : > { %v3900_v57 = vcombine.high %v5326_v54, %v1322_v30  ;;  %v3899_v26 = vcombine.low %v5326_v54, %v1322_v30  ;;  %v4416_v54 = vld [vmem:[#allocation2 + $0x380] ss:$20 sps:$4 sm:$0xff]  }
 0x10e   : > { %2539 = vmatmul.mubr.bf16.gmra.mrb[96].mxu1 %v3907_v62  ;;  %4108 = vmatmul.mubr.msk.bf16.gmra.mrb[44].mxu0 %vm2238_vm1, %v4405_v6  ;;  %v3894_v62 = vcombine.low %v5309_v7, %v1316_v18  ;;  %v4414_v6 = vld [vmem:[#allocation2 + $0x330] ss:$20 sps:$4 sm:$0xff]  }
 0x10f   : > { %2682 = vmatprep.mubr.bf16.mxu1 %v3855_v37  ;;  %4111 = vmatprep.mubr.msk.bf16.mxu0 %vm4439_vm0, %v4438_v47 }
 0x116   : > { %2683 = vmatmul.mubr.bf16.vlgmr.msra.gmra.mrb[52].mxu1 %v3854_v35  ;;  %4112 = vmatmul.mubr.msk.bf16.gmra.mrb[48].mxu0 %vm2238_vm1, %v4406_v56  ;;  %v1328_v56 = vld [vmem:[#allocation2 + $0x3b4] sm:$0xff] }
 0x117   : > { %2690 = vmatprep.mubr.bf16.mxu1 %v3860_v42  ;;  %4115 = vmatprep.mubr.msk.bf16.mxu0 %vm4439_vm0, %v4438_v47 }
 0x11e   : > { %2691 = vmatmul.mubr.bf16.gmra.mrb[56].mxu1 %v3859_v38  ;;  %4116 = vmatmul.mubr.msk.bf16.gmra.mrb[52].mxu0 %vm2238_vm1, %v4407_v3  ;;  %v4415_v38 = vld [vmem:[#allocation2 + $0x358] ss:$20 sps:$4 sm:$0xff]  }
 0x11f   : > { %2698 = vmatprep.mubr.bf16.mxu1 %v3865_v59  ;;  %4119 = vmatprep.mubr.msk.bf16.mxu0 %vm4439_vm0, %v4438_v47  ;;  %v3905_v59 = vcombine.high %v5346_v20, %v1328_v56 }
 0x121   : > { %v5408_v1 = vpop.f32.mrb[0].mxu1 }
 0x122   : > { %v2350_v60 = vpop.f32.mrb[1].mxu1 }
 0x123   : > { %v5411_v41 = vpop.f32.mrb[2].mxu1  ;;  %v3904_v60 = vcombine.low %v5346_v20, %v1328_v56  ;;  %v3909_v20 = vcombine.low %v5366_v13, %v5366_v13 }
 0x124   : > { %v2353_v14 = vpop.f32.mrb[3].mxu1 }
 0x125   : > { %v3910_v14 = vcombine.high %v5366_v13, %v5366_v13 }
 0x126   : > { %2699 = vmatmul.mubr.bf16.gmra.mrb[60].mxu1 %v3864_v11  ;;  %4120 = vmatmul.mubr.msk.bf16.gmra.mrb[56].mxu0 %vm2238_vm1, %v4408_v31 }
 0x127   : > { %2706 = vmatprep.mubr.bf16.mxu1 %v3870_v5  ;;  %4123 = vmatprep.mubr.msk.bf16.mxu0 %vm4439_vm0, %v4438_v47 }
 0x129   : > { %v5417_v51 = vpop.f32.mrb[4].mxu1 }
 0x12a   : > { %v2358_v4 = vpop.f32.mrb[5].mxu1 }
 0x12b   : > { %v5420_v55 = vpop.f32.mrb[6].mxu1 }
 0x12c   : > { %v2361_v29 = vpop.f32.mrb[7].mxu1 }
 0x12d   : > { %v4417_v29 = vld [vmem:[#allocation2 + $0x3a8] ss:$20 sps:$4 sm:$0xff]  }
 0x12e   : > { %2707 = vmatmul.mubr.bf16.gmra.mrb[64].mxu1 %v3869_v21  ;;  %4124 = vmatmul.mubr.msk.bf16.gmra.mrb[60].mxu0 %vm2238_vm1, %v4409_v25 }
 0x12f   : > { %2714 = vmatprep.mubr.bf16.mxu1 %v3875_v22  ;;  %4127 = vmatprep.mubr.msk.bf16.mxu0 %vm4439_vm0, %v4438_v47  ;;  %v1301_v22 = vld [vmem:[#allocation2 + $0x300] sm:$0xff] }
 0x130   : > { %v3885_v58 = vcombine.high %v1301_v22, %v5277_v23 }
 0x131   : > { %v5428_v24 = vpop.f32.mrb[8].mxu1 }
 0x132   : > { %v2366_v43 = vpop.f32.mrb[9].mxu1 }
 0x133   : > { %v5430_v10 = vpop.f32.mrb[10].mxu1 }
 0x134   : > { %v2369_v61 = vpop.f32.mrb[11].mxu1 }
 0x135   : > { %v4418_v61 = vld [vmem:[#allocation2 + $0x3d0] ss:$0 sps:$4 sm:$0xff]  }
 0x136   : > { %2715 = vmatmul.mubr.bf16.gmra.mrb[68].mxu1 %v3874_v52  ;;  %4128 = vmatmul.mubr.msk.bf16.gmra.mrb[64].mxu0 %vm2238_vm1, %v4410_v48  ;;  %v3884_v52 = vcombine.low %v1301_v22, %v5277_v23 }
 0x137   : > { %2722 = vmatprep.mubr.bf16.mxu1 %v3880_v16  ;;  %4131 = vmatprep.mubr.msk.bf16.mxu0 %vm4439_vm0, %v4438_v47 }
 0x139   : > { %v5439_v15 = vpop.f32.mrb[12].mxu1 }
 0x13a   : > { %v2374_v27 = vpop.f32.mrb[13].mxu1 }
 0x13b   : > { %v5442_v50 = vpop.f32.mrb[14].mxu1 }
 0x13c   : > { %v2377_v0 = vpop.f32.mrb[15].mxu1 }
 0x13e   : > { %2723 = vmatmul.mubr.bf16.gmra.mrb[72].mxu1 %v3879_v39  ;;  %4132 = vmatmul.mubr.msk.bf16.gmra.mrb[68].mxu0 %vm2238_vm1, %v4411_v8 }
 0x13f   : > { %2730 = vmatprep.mubr.bf16.mxu1 %v3885_v58  ;;  %4135 = vmatprep.mubr.msk.bf16.mxu0 %vm4439_vm0, %v4438_v47 }
 0x141   : > { %v5448_v2 = vpop.f32.mrb[16].mxu1 }
 0x142   : > { %v2382_v49 = vpop.f32.mrb[17].mxu1 }
 0x143   : > { %v5451_v28 = vpop.f32.mrb[18].mxu1 }
 0x144   : > { %v2385_v40 = vpop.f32.mrb[19].mxu1 }
 0x146   : > { %2731 = vmatmul.mubr.bf16.gmra.mrb[76].mxu1 %v3884_v52  ;;  %4136 = vmatmul.mubr.msk.bf16.gmra.mrb[72].mxu0 %vm2238_vm1, %v4412_v34 }
 0x147   : > { %2738 = vmatprep.mubr.bf16.mxu1 %v3890_v17  ;;  %4139 = vmatprep.mubr.msk.bf16.mxu0 %vm4439_vm0, %v4438_v47 }
 0x149   : > { %v5457_v63 = vpop.f32.mrb[20].mxu1 }
 0x14a   : > { %v2390_v23 = vpop.f32.mrb[21].mxu1 }
 0x14b   : > { %v5460_v9 = vpop.f32.mrb[22].mxu1 }
 0x14c   : > { %v2393_v33 = vpop.f32.mrb[23].mxu1 }
 0x14e   : > { %2739 = vmatmul.mubr.bf16.gmra.mrb[80].mxu1 %v3889_v45  ;;  %4140 = vmatmul.mubr.msk.bf16.gmra.mrb[76].mxu0 %vm2238_vm1, %v4413_v53 }
 0x14f   : > { %2746 = vmatprep.mubr.bf16.mxu1 %v3895_v46  ;;  %4143 = vmatprep.mubr.msk.bf16.mxu0 %vm4439_vm0, %v4438_v47 }
 0x151   : > { %v5466_v19 = vpop.f32.mrb[24].mxu1 }
 0x152   : > { %v2398_v32 = vpop.f32.mrb[25].mxu1 }
 0x153   : > { %v5469_v37 = vpop.f32.mrb[26].mxu1 }
 0x154   : > { %v2401_v35 = vpop.f32.mrb[27].mxu1 }
 0x156   : > { %2747 = vmatmul.mubr.bf16.gmra.mrb[84].mxu1 %v3894_v62  ;;  %4144 = vmatmul.mubr.msk.bf16.gmra.mrb[80].mxu0 %vm2238_vm1, %v4414_v6 }
 0x157   : > { %2754 = vmatprep.mubr.bf16.mxu1 %v3900_v57  ;;  %4147 = vmatprep.mubr.msk.bf16.mxu0 %vm4439_vm0, %v4438_v47 }
 0x159   : > { %v5475_v42 = vpop.f32.mrb[28].mxu1 }
 0x15a   : > { %v2406_v7 = vpop.f32.mrb[29].mxu1 }
 0x15b   : > { %v5478_v3 = vpop.f32.mrb[30].mxu1 }
 0x15c   : > { %v2409_v44 = vpop.f32.mrb[31].mxu1 }
 0x15e   : > { %2755 = vmatmul.mubr.bf16.gmra.mrb[88].mxu1 %v3899_v26  ;;  %4148 = vmatmul.mubr.msk.bf16.gmra.mrb[84].mxu0 %vm2238_vm1, %v4415_v38 }
 0x15f   : > { %2762 = vmatprep.mubr.bf16.mxu1 %v3905_v59  ;;  %4151 = vmatprep.mubr.msk.bf16.mxu0 %vm4439_vm0, %v4438_v47 }
 0x161   : > { %v5484_v11 = vpop.f32.mrb[32].mxu1 }
 0x162   : > { %v2414_v31 = vpop.f32.mrb[33].mxu1 }
 0x163   : > { %v5487_v5 = vpop.f32.mrb[34].mxu1 }
 0x164   : > { %v2417_v21 = vpop.f32.mrb[35].mxu1 }
 0x166   : > { %2763 = vmatmul.mubr.bf16.gmra.mrb[92].mxu1 %v3904_v60  ;;  %4152 = vmatmul.mubr.msk.bf16.gmra.mrb[88].mxu0 %vm2238_vm1, %v4416_v54 }
 0x167   : > { %2770 = vmatprep.mubr.bf16.mxu1 %v3910_v14  ;;  %4155 = vmatprep.mubr.msk.bf16.mxu0 %vm4439_vm0, %v4438_v47 }
 0x169   : > { %v5494_v4 = vpop.f32.mrb[36].mxu1 }
 0x16a   : > { %v2422_v25 = vpop.f32.mrb[37].mxu1 }
 0x16b   : > { %v5498_v12 = vpop.f32.mrb[38].mxu1 }
 0x16c   : > { %v2425_v43 = vpop.f32.mrb[39].mxu1 }
 0x16e   : > { %2771 = vmatmul.mubr.bf16.gmra.mrb[96].mxu1 %v3909_v20  ;;  %4156 = vmatmul.mubr.msk.bf16.gmra.mrb[92].mxu0 %vm2238_vm1, %v4417_v29 }
 0x16f   : > { %4159 = vmatprep.mubr.msk.bf16.mxu0 %vm4439_vm0, %v4438_v47 }
 0x171   : > { %v5503_v48 = vpop.f32.mrb[40].mxu1 }
 0x172   : > { %v2430_v16 = vpop.f32.mrb[41].mxu1 }
 0x173   : > { %v5505_v22 = vpop.f32.mrb[42].mxu1 }
 0x174   : > { %v2433_v39 = vpop.f32.mrb[43].mxu1 }
 0x176   : > { %4160 = vmatmul.mubr.msk.bf16.gmra.mrb[96].mxu0 %vm2238_vm1, %v4418_v61 }
 0x179   : > { %v5508_v13 = vpop.f32.mrb[44].mxu1 }
 0x17a   : > { %v2438_v27 = vpop.f32.mrb[45].mxu1 }
 0x17b   : > { %v5510_v8 = vpop.f32.mrb[46].mxu1 }
 0x17c   : > { %v2441_v58 = vpop.f32.mrb[47].mxu1 }
 0x181   : > { %v5512_v0 = vpop.f32.mrb[48].mxu1 }
 0x182   : > { %v2446_v36 = vpop.f32.mrb[49].mxu1 }
 0x183   : > { %v5514_v52 = vpop.f32.mrb[50].mxu1 }
 0x184   : > { %v2449_v47 = vpop.f32.mrb[51].mxu1 }
 0x189   : > { %v2812_v49 = vpop.f32.mrb[0].mxu0 }
 0x18a   : > { %v5517_v34 = vadd.f32 %v2812_v49, %v5408_v1  ;;  %v4065_v17 = vpop.f32.mrb[1].mxu0 }
 0x18b   : > { %v2815_v40 = vpop.f32.mrb[2].mxu0 }
 0x18c   : > { %v5520_v18 = vadd.f32 %v2815_v40, %v5411_v41  ;;  %v4066_v45 = vpop.f32.mrb[3].mxu0  ;;  %3059 = vrot.lane.b32.xlu0 %v5517_v34, %s4440_s25 }
 0x190   : > { %3061 = vrot.lane.b32.xlu0 %v5520_v18, %s4440_s25 }
 0x191   : > { %v2820_v23 = vpop.f32.mrb[4].mxu0 }
 0x192   : > { %v5527_v53 = vadd.f32 %v2820_v23, %v5417_v51  ;;  %v4069_v46 = vpop.f32.mrb[5].mxu0 }
 0x193   : > { %v2823_v1 = vpop.f32.mrb[6].mxu0 }
 0x194   : > { %v5530_v33 = vadd.f32 %v2823_v1, %v5420_v55  ;;  %v4070_v30 = vpop.f32.mrb[7].mxu0  ;;  %3063 = vrot.lane.b32.xlu1 %v5527_v53, %s4440_s25 }
 0x198   : > { %3065 = vrot.lane.b32.xlu1 %v5530_v33, %s4440_s25 }
 0x199   : > { %v2828_v41 = vpop.f32.mrb[8].mxu0 }
 0x19a   : > { %v5537_v62 = vadd.f32 %v2828_v41, %v5428_v24  ;;  %v4073_v32 = vpop.f32.mrb[9].mxu0 }
 0x19b   : > { %v2831_v6 = vpop.f32.mrb[10].mxu0 }
 0x19c   : > { %v5540_v51 = vadd.f32 %v2831_v6, %v5430_v10  ;;  %v4074_v57 = vpop.f32.mrb[11].mxu0  ;;  %3067 = vrot.lane.b32.xlu0 %v5537_v62, %s4440_s25 }
 0x19e   : > { %3069 = vrot.lane.b32.xlu1 %v5540_v51, %s4440_s25 }
 0x1a1   : > { %v2836_v55 = vpop.f32.mrb[12].mxu0 }
 0x1a2   : > { %v5547_v35 = vadd.f32 %v2836_v55, %v5439_v15  ;;  %v4077_v56 = vpop.f32.mrb[13].mxu0 }
 0x1a3   : > { %v2839_v26 = vpop.f32.mrb[14].mxu0 }
 0x1a4   : > { %v5550_v24 = vadd.f32 %v2839_v26, %v5442_v50  ;;  %v4078_v7 = vpop.f32.mrb[15].mxu0  ;;  %3071 = vrot.lane.b32.xlu0 %v5547_v35, %s4440_s25 }
 0x1a6   : > { %3073 = vrot.lane.b32.xlu1 %v5550_v24, %s4440_s25 }
 0x1a9   : > { %v2844_v10 = vpop.f32.mrb[16].mxu0 }
 0x1aa   : > { %v5557_v38 = vadd.f32 %v2844_v10, %v5448_v2  ;;  %v4081_v59 = vpop.f32.mrb[17].mxu0 }
 0x1ab   : > { %v2847_v44 = vpop.f32.mrb[18].mxu0 }
 0x1ac   : > { %v5560_v15 = vadd.f32 %v2847_v44, %v5451_v28  ;;  %v4082_v60 = vpop.f32.mrb[19].mxu0  ;;  %3075 = vrot.lane.b32.xlu0 %v5557_v38, %s4440_s25 }
 0x1ae   : > { %3077 = vrot.lane.b32.xlu1 %v5560_v15, %s4440_s25 }
 0x1b1   : > { %v2852_v50 = vpop.f32.mrb[20].mxu0 }
 0x1b2   : > { %v5567_v31 = vadd.f32 %v2852_v50, %v5457_v63  ;;  %v4085_v54 = vpop.f32.mrb[21].mxu0 }
 0x1b3   : > { %v2855_v14 = vpop.f32.mrb[22].mxu0 }
 0x1b4   : > { %v5570_v2 = vadd.f32 %v2855_v14, %v5460_v9  ;;  %v4086_v21 = vpop.f32.mrb[23].mxu0  ;;  %3079 = vrot.lane.b32.xlu0 %v5567_v31, %s4440_s25 }
 0x1b6   : > { %3081 = vrot.lane.b32.xlu1 %v5570_v2, %s4440_s25 }
 0x1b9   : > { %v2860_v28 = vpop.f32.mrb[24].mxu0 }
 0x1ba   : > { %v5577_v20 = vadd.f32 %v2860_v28, %v5466_v19  ;;  %v4089_v25 = vpop.f32.mrb[25].mxu0 }
 0x1bb   : > { %v2863_v29 = vpop.f32.mrb[26].mxu0 }
 0x1bc   : > { %v5580_v63 = vadd.f32 %v2863_v29, %v5469_v37  ;;  %v4090_v43 = vpop.f32.mrb[27].mxu0  ;;  %3083 = vrot.lane.b32.xlu0 %v5577_v20, %s4440_s25 }
 0x1be   : > { %3085 = vrot.lane.b32.xlu1 %v5580_v63, %s4440_s25 }
 0x1c1   : > { %v2868_v9 = vpop.f32.mrb[28].mxu0 }
 0x1c2   : > { %v5587_v16 = vadd.f32 %v2868_v9, %v5475_v42  ;;  %v4093_v61 = vpop.f32.mrb[29].mxu0 }
 0x1c3   : > { %v2871_v39 = vpop.f32.mrb[30].mxu0 }
 0x1c4   : > { %v5590_v19 = vadd.f32 %v2871_v39, %v5478_v3  ;;  %v4094_v27 = vpop.f32.mrb[31].mxu0  ;;  %3087 = vrot.lane.b32.xlu1 %v5587_v16, %s4440_s25 }
 0x1c6   : > { %3089 = vrot.lane.b32.xlu0 %v5590_v19, %s4440_s25 }
 0x1c9   : > { %v2876_v37 = vpop.f32.mrb[32].mxu0 }
 0x1ca   : > { %v5597_v58 = vadd.f32 %v2876_v37, %v5484_v11  ;;  %v4097_v36 = vpop.f32.mrb[33].mxu0 }
 0x1cb   : > { %v2879_v47 = vpop.f32.mrb[34].mxu0 }
 0x1cc   : > { %v5600_v42 = vadd.f32 %v2879_v47, %v5487_v5  ;;  %v4098_v49 = vpop.f32.mrb[35].mxu0  ;;  %3091 = vrot.lane.b32.xlu1 %v5597_v58, %s4440_s25 }
 0x1ce   : > { %5995 = vst [vmem:[#allocation3_spill] sm:$0xff] %v5600_v42  ;;  %3093 = vrot.lane.b32.xlu0 %v5600_v42, %s4440_s25 }
 0x1d1   : > { %v2884_v3 = vpop.f32.mrb[36].mxu0 }
 0x1d2   : > { %v5607_v17 = vadd.f32 %v2884_v3, %v5494_v4  ;;  %v4101_v40 = vpop.f32.mrb[37].mxu0 }
 0x1d3   : > { %v2887_v45 = vpop.f32.mrb[38].mxu0 }
 0x1d4   : > { %5996 = vst [vmem:[#allocation4_spill] sm:$0xff] %v5607_v17  ;;  %v5610_v11 = vadd.f32 %v2887_v45, %v5498_v12  ;;  %v4102_v23 = vpop.f32.mrb[39].mxu0  ;;  %3095 = vrot.lane.b32.xlu1 %v5607_v17, %s4440_s25 }
 0x1d6   : > { %5997 = vst [vmem:[#allocation5_spill] sm:$0xff] %v5610_v11  ;;  %3097 = vrot.lane.b32.xlu0 %v5610_v11, %s4440_s25 }
 0x1d9   : > { %v2892_v5 = vpop.f32.mrb[40].mxu0 }
 0x1da   : > { %v5617_v46 = vadd.f32 %v2892_v5, %v5503_v48  ;;  %v4105_v1 = vpop.f32.mrb[41].mxu0 }
 0x1db   : > { %v2895_v30 = vpop.f32.mrb[42].mxu0 }
 0x1dc   : > { %5998 = vst [vmem:[#allocation6_spill] sm:$0xff] %v5617_v46  ;;  %v5620_v4 = vadd.f32 %v2895_v30, %v5505_v22  ;;  %v4106_v41 = vpop.f32.mrb[43].mxu0  ;;  %3099 = vrot.lane.b32.xlu1 %v5617_v46, %s4440_s25 }
 0x1de   : > { %5999 = vst [vmem:[#allocation7_spill] sm:$0xff] %v5620_v4  ;;  %3101 = vrot.lane.b32.xlu0 %v5620_v4, %s4440_s25 }
 0x1e1   : > { %v2900_v12 = vpop.f32.mrb[44].mxu0 }
 0x1e2   : > { %v5627_v32 = vadd.f32 %v2900_v12, %v5508_v13  ;;  %v4109_v6 = vpop.f32.mrb[45].mxu0 }
 0x1e3   : > { %v2903_v57 = vpop.f32.mrb[46].mxu0 }
 0x1e4   : > { %6000 = vst [vmem:[#allocation8_spill] sm:$0xff] %v5627_v32  ;;  %v5630_v48 = vadd.f32 %v2903_v57, %v5510_v8  ;;  %v4110_v55 = vpop.f32.mrb[47].mxu0 }
 0x1e6   : > { %6001 = vst [vmem:[#allocation9_spill] sm:$0xff] %v5630_v48 }
 0x1e9   : > { %v2684_v56 = vpop.f32.mrb[52].mxu1  ;;  %v2908_v22 = vpop.f32.mrb[48].mxu0 }
 0x1ea   : > { %v2686_v26 = vpop.f32.mrb[53].mxu1  ;;  %v5633_v7 = vadd.f32 %v2908_v22, %v5512_v0  ;;  %v4113_v10 = vpop.f32.mrb[49].mxu0 }
 0x1eb   : > { %v2687_v59 = vpop.f32.mrb[54].mxu1  ;;  %v2911_v44 = vpop.f32.mrb[50].mxu0 }
 0x1ec   : > { %v2689_v60 = vpop.f32.mrb[55].mxu1  ;;  %v5636_v50 = vadd.f32 %v2911_v44, %v5514_v52  ;;  %v4114_v13 = vpop.f32.mrb[51].mxu0  ;;  %3107 = vrot.lane.b32.xlu0 %v5633_v7, %s4440_s25 }
 0x1ee   : > { %3109 = vrot.lane.b32.xlu1 %v5636_v50, %s4440_s25 }
 0x1f1   : > { %v2692_v8 = vpop.f32.mrb[56].mxu1  ;;  %v2916_v54 = vpop.f32.mrb[52].mxu0 }
 0x1f2   : > { %v2694_v14 = vpop.f32.mrb[57].mxu1  ;;  %v5642_v21 = vadd.f32 %v2916_v54, %v2684_v56  ;;  %v4117_v0 = vpop.f32.mrb[53].mxu0 }
 0x1f3   : > { %v2695_v28 = vpop.f32.mrb[58].mxu1  ;;  %v2919_v25 = vpop.f32.mrb[54].mxu0 }
 0x1f4   : > { %v2697_v29 = vpop.f32.mrb[59].mxu1  ;;  %v5644_v43 = vadd.f32 %v2919_v25, %v2687_v59  ;;  %v4118_v52 = vpop.f32.mrb[55].mxu0  ;;  %3111 = vrot.lane.b32.xlu0 %v5642_v21, %s4440_s25 }
 0x1f6   : > { %3113 = vrot.lane.b32.xlu1 %v5644_v43, %s4440_s25 }
 0x1f9   : > { %v2700_v9 = vpop.f32.mrb[60].mxu1  ;;  %v2924_v61 = vpop.f32.mrb[56].mxu0 }
 0x1fa   : > { %v2702_v39 = vpop.f32.mrb[61].mxu1  ;;  %v5650_v27 = vadd.f32 %v2924_v61, %v2692_v8  ;;  %v4121_v37 = vpop.f32.mrb[57].mxu0 }
 0x1fb   : > { %v2703_v36 = vpop.f32.mrb[62].mxu1  ;;  %v2927_v47 = vpop.f32.mrb[58].mxu0 }
 0x1fc   : > { %v2705_v49 = vpop.f32.mrb[63].mxu1  ;;  %v5652_v3 = vadd.f32 %v2927_v47, %v2695_v28  ;;  %v4122_v40 = vpop.f32.mrb[59].mxu0  ;;  %3115 = vrot.lane.b32.xlu0 %v5650_v27, %s4440_s25 }
 0x1fe   : > { %3117 = vrot.lane.b32.xlu1 %v5652_v3, %s4440_s25 }
 0x201   : > { %v2708_v45 = vpop.f32.mrb[64].mxu1  ;;  %v2932_v23 = vpop.f32.mrb[60].mxu0 }
 0x202   : > { %v2710_v5 = vpop.f32.mrb[65].mxu1  ;;  %v5658_v1 = vadd.f32 %v2932_v23, %v2700_v9  ;;  %v4125_v30 = vpop.f32.mrb[61].mxu0 }
 0x203   : > { %v2711_v41 = vpop.f32.mrb[66].mxu1  ;;  %v2935_v12 = vpop.f32.mrb[62].mxu0 }
 0x204   : > { %v5660_v6 = vadd.f32 %v2935_v12, %v2703_v36  ;;  %v4126_v57 = vpop.f32.mrb[63].mxu0  ;;  %3119 = vrot.lane.b32.xlu0 %v5658_v1, %s4440_s25  ;;  %v2713_v55 = vpop.f32.mrb[67].mxu1 }
 0x206   : > { %3121 = vrot.lane.b32.xlu1 %v5660_v6, %s4440_s25 }
 0x209   : > { %v2716_v56 = vpop.f32.mrb[68].mxu1  ;;  %v2940_v22 = vpop.f32.mrb[64].mxu0 }
 0x20a   : > { %v2718_v26 = vpop.f32.mrb[69].mxu1  ;;  %v5666_v10 = vadd.f32 %v2940_v22, %v2708_v45  ;;  %v4129_v59 = vpop.f32.mrb[65].mxu0 }
 0x20b   : > { %v2719_v44 = vpop.f32.mrb[70].mxu1  ;;  %v2943_v60 = vpop.f32.mrb[66].mxu0 }
 0x20c   : > { %v5668_v13 = vadd.f32 %v2943_v60, %v2711_v41  ;;  %v4130_v8 = vpop.f32.mrb[67].mxu0  ;;  %3123 = vrot.lane.b32.xlu0 %v5666_v10, %s4440_s25  ;;  %v2721_v54 = vpop.f32.mrb[71].mxu1 }
 0x20e   : > { %3125 = vrot.lane.b32.xlu1 %v5668_v13, %s4440_s25 }
 0x211   : > { %v2724_v14 = vpop.f32.mrb[72].mxu1  ;;  %v2948_v0 = vpop.f32.mrb[68].mxu0 }
 0x212   : > { %v2726_v28 = vpop.f32.mrb[73].mxu1  ;;  %v5674_v25 = vadd.f32 %v2948_v0, %v2716_v56  ;;  %v4133_v29 = vpop.f32.mrb[69].mxu0 }
 0x213   : > { %v2727_v52 = vpop.f32.mrb[74].mxu1  ;;  %v2951_v9 = vpop.f32.mrb[70].mxu0 }
 0x214   : > { %v2729_v61 = vpop.f32.mrb[75].mxu1  ;;  %v5676_v39 = vadd.f32 %v2951_v9, %v2719_v44  ;;  %v4134_v37 = vpop.f32.mrb[71].mxu0  ;;  %3127 = vrot.lane.b32.xlu0 %v5674_v25, %s4440_s25 }
 0x216   : > { %3129 = vrot.lane.b32.xlu1 %v5676_v39, %s4440_s25 }
 0x219   : > { %v2732_v36 = vpop.f32.mrb[76].mxu1  ;;  %v2956_v47 = vpop.f32.mrb[72].mxu0 }
 0x21a   : > { %v2734_v49 = vpop.f32.mrb[77].mxu1  ;;  %v5682_v40 = vadd.f32 %v2956_v47, %v2724_v14  ;;  %v4137_v45 = vpop.f32.mrb[73].mxu0 }
 0x21b   : > { %v2735_v23 = vpop.f32.mrb[78].mxu1  ;;  %v2959_v5 = vpop.f32.mrb[74].mxu0 }
 0x21c   : > { %v2737_v30 = vpop.f32.mrb[79].mxu1  ;;  %v5684_v41 = vadd.f32 %v2959_v5, %v2727_v52  ;;  %v4138_v12 = vpop.f32.mrb[75].mxu0  ;;  %3131 = vrot.lane.b32.xlu0 %v5682_v40, %s4440_s25 }
 0x21d   : > { %v5698_v14 = vpop.permute.xlu0 %3059  ;;  %v5706_v45 = vpop.permute.xlu1 %3063 }
 0x21e   : > { %3133 = vrot.lane.b32.xlu1 %v5684_v41, %s4440_s25 }
 0x221   : > { %v2740_v57 = vpop.f32.mrb[80].mxu1  ;;  %v2964_v55 = vpop.f32.mrb[76].mxu0 }
 0x222   : > { %v2742_v56 = vpop.f32.mrb[81].mxu1  ;;  %v5690_v22 = vadd.f32 %v2964_v55, %v2732_v36  ;;  %v4141_v26 = vpop.f32.mrb[77].mxu0 }
 0x223   : > { %v2743_v59 = vpop.f32.mrb[82].mxu1  ;;  %v2967_v44 = vpop.f32.mrb[78].mxu0 }
 0x224   : > { %v2745_v60 = vpop.f32.mrb[83].mxu1  ;;  %v5692_v8 = vadd.f32 %v2967_v44, %v2735_v23  ;;  %v4142_v54 = vpop.f32.mrb[79].mxu0  ;;  %3135 = vrot.lane.b32.xlu0 %v5690_v22, %s4440_s25 }
 0x225   : > { %v5710_v23 = vpop.permute.xlu0 %3061  ;;  %v5714_v44 = vpop.permute.xlu1 %3065 }
 0x226   : > { %3137 = vrot.lane.b32.xlu1 %v5692_v8, %s4440_s25 }
 0x229   : > { %v2748_v0 = vpop.f32.mrb[84].mxu1  ;;  %v2972_v28 = vpop.f32.mrb[80].mxu0 }
 0x22a   : > { %v2750_v29 = vpop.f32.mrb[85].mxu1  ;;  %v5700_v52 = vadd.f32 %v2972_v28, %v2740_v57  ;;  %v4145_v9 = vpop.f32.mrb[81].mxu0 }
 0x22b   : > { %v2751_v61 = vpop.f32.mrb[86].mxu1  ;;  %v2975_v37 = vpop.f32.mrb[82].mxu0 }
 0x22c   : > { %v2753_v36 = vpop.f32.mrb[87].mxu1  ;;  %v5702_v47 = vadd.f32 %v2975_v37, %v2743_v59  ;;  %v4146_v49 = vpop.f32.mrb[83].mxu0  ;;  %3139 = vrot.lane.b32.xlu0 %v5700_v52, %s4440_s25 }
 0x22d   : > { %v5722_v28 = vpop.permute.xlu0 %3067  ;;  %v5724_v29 = vpop.permute.xlu1 %3069 }
 0x22e   : > { %3141 = vrot.lane.b32.xlu1 %v5702_v47, %s4440_s25 }
 0x231   : > { %v2756_v5 = vpop.f32.mrb[88].mxu1  ;;  %v2980_v30 = vpop.f32.mrb[84].mxu0 }
 0x232   : > { %v2758_v12 = vpop.f32.mrb[89].mxu1  ;;  %v5712_v57 = vadd.f32 %v2980_v30, %v2748_v0  ;;  %v4149_v55 = vpop.f32.mrb[85].mxu0 }
 0x233   : > { %v2759_v56 = vpop.f32.mrb[90].mxu1  ;;  %v2983_v26 = vpop.f32.mrb[86].mxu0 }
 0x234   : > { %v2761_v59 = vpop.f32.mrb[91].mxu1  ;;  %v5716_v60 = vadd.f32 %v2983_v26, %v2751_v61  ;;  %v4150_v54 = vpop.f32.mrb[87].mxu0  ;;  %3143 = vrot.lane.b32.xlu0 %v5712_v57, %s4440_s25 }
 0x235   : > { %v5728_v55 = vpop.permute.xlu0 %3071  ;;  %v5736_v54 = vpop.permute.xlu1 %3073 }
 0x236   : > { %3145 = vrot.lane.b32.xlu1 %v5716_v60, %s4440_s25 }
 0x239   : > { %v2764_v0 = vpop.f32.mrb[92].mxu1  ;;  %v2988_v9 = vpop.f32.mrb[88].mxu0 }
 0x23a   : > { %v2766_v37 = vpop.f32.mrb[93].mxu1  ;;  %v5726_v36 = vadd.f32 %v2988_v9, %v2756_v5  ;;  %v4153_v49 = vpop.f32.mrb[89].mxu0 }
 0x23b   : > { %v2767_v30 = vpop.f32.mrb[94].mxu1  ;;  %v2991_v61 = vpop.f32.mrb[90].mxu0 }
 0x23c   : > { %6002 = vst [vmem:[#allocation10_spill] sm:$0xff] %v5726_v36  ;;  %v2769_v12 = vpop.f32.mrb[95].mxu1  ;;  %v5730_v26 = vadd.f32 %v2991_v61, %v2759_v56  ;;  %v4154_v59 = vpop.f32.mrb[91].mxu0  ;;  %3147 = vrot.lane.b32.xlu0 %v5726_v36, %s4440_s25 }
 0x23d   : > { %v5738_v37 = vpop.permute.xlu0 %3075  ;;  %v5742_v59 = vpop.permute.xlu1 %3077 }
 0x23e   : > { %6003 = vst [vmem:[#allocation11_spill] sm:$0xff] %v5730_v26  ;;  %3149 = vrot.lane.b32.xlu1 %v5730_v26, %s4440_s25 }
 0x241   : > { %v2772_v5 = vpop.f32.mrb[96].mxu1  ;;  %v2996_v9 = vpop.f32.mrb[92].mxu0 }
 0x242   : > { %v2774_v49 = vpop.f32.mrb[97].mxu1  ;;  %v5740_v4 = vadd.f32 %v2996_v9, %v2764_v0  ;;  %v4157_v12 = vpop.f32.mrb[93].mxu0 }
 0x243   : > { %v2775_v46 = vpop.f32.mrb[98].mxu1  ;;  %v2999_v56 = vpop.f32.mrb[94].mxu0 }
 0x244   : > { %6004 = vst [vmem:[#allocation12_spill] sm:$0xff] %v5740_v4  ;;  %v2776_v61 = vpop.f32.mrb[99].mxu1  ;;  %v5744_v11 = vadd.f32 %v2999_v56, %v2767_v30  ;;  %v4158_v36 = vpop.f32.mrb[95].mxu0  ;;  %3151 = vrot.lane.b32.xlu0 %v5740_v4, %s4440_s25 }
 0x245   : > { %v5748_v26 = vpop.permute.xlu0 %3079  ;;  %v5752_v49 = vpop.permute.xlu1 %3081 }
 0x246   : > { %6005 = vst [vmem:[#allocation13_spill] sm:$0xff] %v5744_v11  ;;  %3153 = vrot.lane.b32.xlu1 %v5744_v11, %s4440_s25 }
 0x249   : > { %v3004_v0 = vpop.f32.mrb[96].mxu0  ;;  %v5754_v9 = vpop.permute.xlu0 %3083 }
 0x24a   : > { %v5756_v46 = vadd.f32 %v3004_v0, %v2772_v5  ;;  %v4161_v12 = vpop.f32.mrb[97].mxu0  ;;  %3103 = vrot.lane.b32.xlu1 %v5627_v32, %s4440_s25  ;;  %v5760_v30 = vpop.permute.xlu1 %3085 }
 0x24b   : > { %v3007_v36 = vpop.f32.mrb[98].mxu0 }
 0x24c   : > { %6006 = vst [vmem:[#allocation14_spill] sm:$0xff] %v5756_v46  ;;  %v4162_v56 = vpop.f32.mrb[99].mxu0  ;;  %3155 = vrot.lane.b32.xlu0 %v5756_v46, %s4440_s25 }
 0x24d   : > { %v5764_v61 = vpop.permute.xlu0 %3089 }
 0x24e   : > { %v5766_v11 = vpop.permute.xlu1 %3087 }
 0x250   : > { %3105 = vrot.lane.b32.xlu0 %v5630_v48, %s4440_s25 }
 0x251   : > { %v5770_v5 = vpop.permute.xlu0 %3093 }
 0x252   : > { %6007 = vst [vmem:[#allocation15_spill] sm:$0xff] %v5770_v5  ;;  %v5772_v0 = vpop.permute.xlu1 %3091 }
 0x255   : > { %v5774_v12 = vpop.permute.xlu0 %3097 }
 0x256   : > { %6008 = vst [vmem:[#allocation16_spill] sm:$0xff] %v5774_v12  ;;  %v5776_v36 = vpop.permute.xlu1 %3095  ;;  %v3206_v12 = vmax.f32 %v5517_v34, %v5698_v14  ;;  %v3207_v34 = vmax.f32 %v5520_v18, %v5710_v23 }
 0x257   : > { %6009 = vst [vmem:[#allocation17_spill] sm:$0xff] %v5776_v36 }
 0x259   : > { %v5778_v56 = vpop.permute.xlu0 %3101 }
 0x25a   : > { %6010 = vst [vmem:[#allocation18_spill] sm:$0xff] %v5778_v56  ;;  %v5780_v32 = vpop.permute.xlu1 %3099  ;;  %v5794_v56 = vld [vmem:[%s5973_s2] ss:$0 sm:$0xff] }
 0x25b   : > { %6011 = vst [vmem:[#allocation19_spill] sm:$0xff] %v5780_v32 }
 0x25e   : > { %v3108_v46 = vpop.permute.xlu0 %3107 }
 0x25f   : > { %v5783_v4 = vmax.f32 %v5633_v7, %v3108_v46 }
 0x260   : > { %v3110_v17 = vpop.permute.xlu1 %3109 }
 0x261   : > { %6012 = vst [vmem:[#allocation20_spill] sm:$0xff] %v5783_v4  ;;  %v3231_v48 = vmax.f32 %v5636_v50, %v3110_v17  ;;  %v3281_v42 = vrot.slane %v5783_v4, 4 }
 0x263   : > { %v3282_v5 = vrot.slane %v3231_v48, 4 }
 0x265   : > { %v3283_v7 = vsel %vm3280_vm2, %v3281_v42, %v3282_v5 }
 0x266   : > { %v3355_v46 = vmax.f32 %v3206_v12, %v3283_v7  ;;  %v3112_v32 = vpop.permute.xlu0 %3111 }
 0x267   : > { %v3232_v17 = vmax.f32 %v5642_v21, %v3112_v32  ;;  %v3208_v32 = vmax.f32 %v5527_v53, %v5706_v45  ;;  %v3209_v45 = vmax.f32 %v5530_v33, %v5714_v44 }
 0x268   : > { %v3387_v50 = vadd.f32 %v5794_v56, %v3355_v46  ;;  %v3114_v4 = vpop.permute.xlu1 %3113 }
 0x269   : > { %v3284_v36 = vrot.slane %v3232_v17, 4  ;;  %v3233_v48 = vmax.f32 %v5644_v43, %v3114_v4 }
 0x26a   : > { %v3412_v14 = vmax.f32 %v3387_v50, 0.0 }
 0x26b   : > { %v3285_v42 = vsel %vm3280_vm2, %v3282_v5, %v3284_v36  ;;  %v3286_v12 = vrot.slane %v3233_v48, 4 }
 0x26c   : > { %v4001_v21 = vpack.c.bf16 %v3412_v14, %v3412_v14  ;;  %v3356_v7 = vmax.f32 %v3207_v34, %v3285_v42 }
 0x26d   : > { %v3287_v4 = vsel %vm3280_vm2, %v3284_v36, %v3286_v12 }
 0x26e   : > { %3538 = vst.msk [vmem:[%s5805_s16] sm:$0xf] %vm185_vm9, %v4001_v21  ;;  %v3388_v18 = vadd.f32 %v5794_v56, %v3356_v7  ;;  %v3357_v43 = vmax.f32 %v3208_v32, %v3287_v4  ;;  %v3116_v23 = vpop.permute.xlu0 %3115  ;;  %v3210_v32 = vmax.f32 %v5537_v62, %v5722_v28 }
 0x26f   : > { %v3234_v46 = vmax.f32 %v5650_v27, %v3116_v23  ;;  %v3211_v23 = vmax.f32 %v5540_v51, %v5724_v29 }
 0x270   : > { %v3413_v17 = vmax.f32 %v3388_v18, 0.0  ;;  %v3389_v5 = vadd.f32 %v5794_v56, %v3357_v43  ;;  %v3118_v50 = vpop.permute.xlu1 %3117 }
 0x271   : > { %v3288_v48 = vrot.slane %v3234_v46, 4  ;;  %v3235_v53 = vmax.f32 %v5652_v3, %v3118_v50 }
 0x272   : > { %v4002_v36 = vpack.c.bf16 %v3413_v17, %v3413_v17  ;;  %v3414_v34 = vmax.f32 %v3389_v5, 0.0 }
 0x273   : > { %v3289_v14 = vsel %vm3280_vm2, %v3286_v12, %v3288_v48  ;;  %v3290_v42 = vrot.slane %v3235_v53, 4 }
 0x274   : > { %3539 = vst.msk [vmem:[%s5805_s16 + $0x4] sm:$0xf] %vm185_vm9, %v4002_v36  ;;  %v4003_v27 = vpack.c.bf16 %v3414_v34, %v3414_v34  ;;  %v3358_v21 = vmax.f32 %v3209_v45, %v3289_v14 }
 0x275   : > { %v3291_v7 = vsel %vm3280_vm2, %v3288_v48, %v3290_v42  ;;  %v3212_v48 = vmax.f32 %v5547_v35, %v5728_v55 }
 0x276   : > { %3540 = vst.msk [vmem:[%s5805_s16 + $0x8] sm:$0xf] %vm185_vm9, %v4003_v27  ;;  %v3390_v3 = vadd.f32 %v5794_v56, %v3358_v21  ;;  %v3359_v33 = vmax.f32 %v3210_v32, %v3291_v7  ;;  %v3120_v44 = vpop.permute.xlu0 %3119  ;;  %v3213_v32 = vmax.f32 %v5550_v24, %v5736_v54 }
 0x277   : > { %v3236_v4 = vmax.f32 %v5658_v1, %v3120_v44 }
 0x278   : > { %v3415_v12 = vmax.f32 %v3390_v3, 0.0  ;;  %v3391_v18 = vadd.f32 %v5794_v56, %v3359_v33  ;;  %v3122_v62 = vpop.permute.xlu1 %3121  ;;  %v3214_v33 = vmax.f32 %v5557_v38, %v5738_v37 }
 0x279   : > { %v3292_v28 = vrot.slane %v3236_v4, 4  ;;  %v3237_v43 = vmax.f32 %v5660_v6, %v3122_v62 }
 0x27a   : > { %v4004_v46 = vpack.c.bf16 %v3415_v12, %v3415_v12  ;;  %v3416_v17 = vmax.f32 %v3391_v18, 0.0 }
 0x27b   : > { %v3293_v5 = vsel %vm3280_vm2, %v3290_v42, %v3292_v28  ;;  %v3294_v50 = vrot.slane %v3237_v43, 4  ;;  %v3215_v43 = vmax.f32 %v5560_v15, %v5742_v59 }
 0x27c   : > { %3541 = vst.msk [vmem:[%s5805_s16 + $0xc] sm:$0xf] %vm185_vm9, %v4004_v46  ;;  %v4005_v1 = vpack.c.bf16 %v3416_v17, %v3416_v17  ;;  %v3360_v53 = vmax.f32 %v3211_v23, %v3293_v5 }
 0x27d   : > { %v3295_v45 = vsel %vm3280_vm2, %v3292_v28, %v3294_v50 }
 0x27e   : > { %3542 = vst.msk [vmem:[%s5805_s16 + $0x10] sm:$0xf] %vm185_vm9, %v4005_v1  ;;  %v3392_v6 = vadd.f32 %v5794_v56, %v3360_v53  ;;  %v3361_v51 = vmax.f32 %v3212_v48, %v3295_v45  ;;  %v3124_v29 = vpop.permute.xlu0 %3123 }
 0x27f   : > { %v3238_v36 = vmax.f32 %v5666_v10, %v3124_v29  ;;  %v3217_v29 = vmax.f32 %v5570_v2, %v5752_v49 }
 0x280   : > { %v3417_v34 = vmax.f32 %v3392_v6, 0.0  ;;  %v3393_v14 = vadd.f32 %v5794_v56, %v3361_v51  ;;  %v3126_v35 = vpop.permute.xlu1 %3125 }
 0x281   : > { %v3296_v55 = vrot.slane %v3238_v36, 4  ;;  %v3239_v42 = vmax.f32 %v5668_v13, %v3126_v35 }
 0x282   : > { %v4006_v27 = vpack.c.bf16 %v3417_v34, %v3417_v34  ;;  %v3418_v21 = vmax.f32 %v3393_v14, 0.0 }
 0x283   : > { %v3297_v7 = vsel %vm3280_vm2, %v3294_v50, %v3296_v55  ;;  %v3298_v3 = vrot.slane %v3239_v42, 4  ;;  %v3216_v50 = vmax.f32 %v5567_v31, %v5748_v26 }
 0x284   : > { %3543 = vst.msk [vmem:[%s5805_s16 + $0x14] sm:$0xf] %vm185_vm9, %v4006_v27  ;;  %v4007_v10 = vpack.c.bf16 %v3418_v21, %v3418_v21  ;;  %v3362_v44 = vmax.f32 %v3213_v32, %v3297_v7 }
 0x285   : > { %v3299_v4 = vsel %vm3280_vm2, %v3296_v55, %v3298_v3  ;;  %v3218_v55 = vmax.f32 %v5577_v20, %v5754_v9 }
 0x286   : > { %3544 = vst.msk [vmem:[%s5805_s16 + $0x18] sm:$0xf] %vm185_vm9, %v4007_v10  ;;  %v3394_v13 = vadd.f32 %v5794_v56, %v3362_v44  ;;  %v3363_v24 = vmax.f32 %v3214_v33, %v3299_v4  ;;  %v3128_v54 = vpop.permute.xlu0 %3127  ;;  %v3219_v33 = vmax.f32 %v5580_v63, %v5760_v30 }
 0x287   : > { %v3240_v12 = vmax.f32 %v5674_v25, %v3128_v54 }
 0x288   : > { %v3419_v18 = vmax.f32 %v3394_v13, 0.0  ;;  %v3395_v62 = vadd.f32 %v5794_v56, %v3363_v24  ;;  %v3130_v38 = vpop.permute.xlu1 %3129  ;;  %v3220_v24 = vmax.f32 %v5587_v16, %v5766_v11 }
 0x289   : > { %v3300_v37 = vrot.slane %v3240_v12, 4  ;;  %v3241_v28 = vmax.f32 %v5676_v39, %v3130_v38 }
 0x28a   : > { %v4008_v23 = vpack.c.bf16 %v3419_v18, %v3419_v18  ;;  %v3420_v46 = vmax.f32 %v3395_v62, 0.0 }
 0x28b   : > { %v3301_v17 = vsel %vm3280_vm2, %v3298_v3, %v3300_v37  ;;  %v3302_v5 = vrot.slane %v3241_v28, 4  ;;  %v3221_v28 = vmax.f32 %v5590_v19, %v5764_v61 }
 0x28c   : > { %3545 = vst.msk [vmem:[%s5805_s16 + $0x1c] sm:$0xf] %vm185_vm9, %v4008_v23  ;;  %v4009_v25 = vpack.c.bf16 %v3420_v46, %v3420_v46  ;;  %v3364_v48 = vmax.f32 %v3215_v43, %v3301_v17 }
 0x28d   : > { %v3303_v1 = vsel %vm3280_vm2, %v3300_v37, %v3302_v5 }
 0x28e   : > { %3546 = vst.msk [vmem:[%s5805_s16 + $0x20] sm:$0xf] %vm185_vm9, %v4009_v25  ;;  %v3396_v39 = vadd.f32 %v5794_v56, %v3364_v48  ;;  %v3365_v15 = vmax.f32 %v3216_v50, %v3303_v1  ;;  %v3132_v59 = vpop.permute.xlu0 %3131 }
 0x28f   : > { %v3242_v53 = vmax.f32 %v5682_v40, %v3132_v59  ;;  %v6013_v59 = vld [vmem:[#allocation15_spill] sm:$0xff] }
 0x290   : > { %v3421_v45 = vmax.f32 %v3396_v39, 0.0  ;;  %v3397_v6 = vadd.f32 %v5794_v56, %v3365_v15  ;;  %v3134_v31 = vpop.permute.xlu1 %3133 }
 0x291   : > { %v3304_v26 = vrot.slane %v3242_v53, 4  ;;  %v3243_v51 = vmax.f32 %v5684_v41, %v3134_v31  ;;  %v6014_v53 = vld [vmem:[#allocation3_spill] sm:$0xff] }
 0x292   : > { %v4010_v36 = vpack.c.bf16 %v3421_v45, %v3421_v45  ;;  %v3422_v34 = vmax.f32 %v3397_v6, 0.0  ;;  %v3223_v45 = vmax.f32 %v6014_v53, %v6013_v59  ;;  %v6028_v53 = vld [vmem:[#allocation14_spill] sm:$0xff] }
 0x293   : > { %v3305_v14 = vsel %vm3280_vm2, %v3302_v5, %v3304_v26  ;;  %v3306_v35 = vrot.slane %v3243_v51, 4  ;;  %v3222_v5 = vmax.f32 %v5597_v58, %v5772_v0 }
 0x294   : > { %3547 = vst.msk [vmem:[%s5805_s16 + $0x24] sm:$0xf] %vm185_vm9, %v4010_v36  ;;  %v4011_v40 = vpack.c.bf16 %v3422_v34, %v3422_v34  ;;  %v3366_v42 = vmax.f32 %v3217_v29, %v3305_v14  ;;  %v6015_v29 = vld [vmem:[#allocation17_spill] sm:$0xff]  ;;  %v6016_v36 = vld [vmem:[#allocation4_spill] sm:$0xff] }
 0x295   : > { %v3307_v32 = vsel %vm3280_vm2, %v3304_v26, %v3306_v35  ;;  %v3224_v34 = vmax.f32 %v6016_v36, %v6015_v29 }
 0x296   : > { %3548 = vst.msk [vmem:[%s5805_s16 + $0x28] sm:$0xf] %vm185_vm9, %v4011_v40  ;;  %v3398_v41 = vadd.f32 %v5794_v56, %v3366_v42  ;;  %v3367_v2 = vmax.f32 %v3218_v55, %v3307_v32  ;;  %v3136_v49 = vpop.permute.xlu0 %3135  ;;  %v6017_v42 = vld [vmem:[#allocation10_spill] sm:$0xff] }
 0x297   : > { %v3244_v27 = vmax.f32 %v5690_v22, %v3136_v49 }
 0x298   : > { %v3423_v21 = vmax.f32 %v3398_v41, 0.0  ;;  %v3399_v7 = vadd.f32 %v5794_v56, %v3367_v2  ;;  %v3138_v20 = vpop.permute.xlu1 %3137 }
 0x299   : > { %v3308_v9 = vrot.slane %v3244_v27, 4  ;;  %v3245_v3 = vmax.f32 %v5692_v8, %v3138_v20  ;;  %v6019_v20 = vld [vmem:[#allocation16_spill] sm:$0xff] }
 0x29a   : > { %v4012_v10 = vpack.c.bf16 %v3423_v21, %v3423_v21  ;;  %v3424_v44 = vmax.f32 %v3399_v7, 0.0  ;;  %v6018_v21 = vld [vmem:[#allocation11_spill] sm:$0xff] }
 0x29b   : > { %v3309_v4 = vsel %vm3280_vm2, %v3306_v35, %v3308_v9  ;;  %v3310_v13 = vrot.slane %v3245_v3, 4 }
 0x29c   : > { %3549 = vst.msk [vmem:[%s5805_s16 + $0x2c] sm:$0xf] %vm185_vm9, %v4012_v10  ;;  %v4013_v22 = vpack.c.bf16 %v3424_v44, %v3424_v44  ;;  %v3368_v54 = vmax.f32 %v3219_v33, %v3309_v4 }
 0x29d   : > { %v3311_v12 = vsel %vm3280_vm2, %v3308_v9, %v3310_v13  ;;  %v6020_v9 = vld [vmem:[#allocation5_spill] sm:$0xff] }
 0x29e   : > { %3550 = vst.msk [vmem:[%s5805_s16 + $0x30] sm:$0xf] %vm185_vm9, %v4013_v22  ;;  %v3400_v8 = vadd.f32 %v5794_v56, %v3368_v54  ;;  %v3369_v63 = vmax.f32 %v3220_v24, %v3311_v12  ;;  %v3140_v30 = vpop.permute.xlu0 %3139  ;;  %v3225_v3 = vmax.f32 %v6020_v9, %v6019_v20  ;;  %v6022_v24 = vld [vmem:[#allocation6_spill] sm:$0xff] }
 0x29f   : > { %v3246_v18 = vmax.f32 %v5700_v52, %v3140_v30 }
 0x2a0   : > { %v3425_v62 = vmax.f32 %v3400_v8, 0.0  ;;  %v3401_v38 = vadd.f32 %v5794_v56, %v3369_v63  ;;  %v3142_v16 = vpop.permute.xlu1 %3141 }
 0x2a1   : > { %v3312_v11 = vrot.slane %v3246_v18, 4  ;;  %v3247_v37 = vmax.f32 %v5702_v47, %v3142_v16 }
 0x2a2   : > { %v4014_v43 = vpack.c.bf16 %v3425_v62, %v3425_v62  ;;  %v3426_v23 = vmax.f32 %v3401_v38, 0.0  ;;  %v6023_v62 = vld [vmem:[#allocation12_spill] sm:$0xff] }
 0x2a3   : > { %v3313_v46 = vsel %vm3280_vm2, %v3310_v13, %v3312_v11  ;;  %v3314_v17 = vrot.slane %v3247_v37, 4  ;;  %v6021_v13 = vld [vmem:[#allocation19_spill] sm:$0xff] }
 0x2a4   : > { %3551 = vst.msk [vmem:[%s5805_s16 + $0x34] sm:$0xf] %vm185_vm9, %v4014_v43  ;;  %v4015_v52 = vpack.c.bf16 %v3426_v23, %v3426_v23  ;;  %v3370_v50 = vmax.f32 %v3221_v28, %v3313_v46  ;;  %v3226_v22 = vmax.f32 %v6022_v24, %v6021_v13  ;;  %v6024_v43 = vld [vmem:[#allocation13_spill] sm:$0xff]  ;;  %v6025_v46 = vld [vmem:[#allocation18_spill] sm:$0xff] }
 0x2a5   : > { %v3315_v25 = vsel %vm3280_vm2, %v3312_v11, %v3314_v17 }
 0x2a6   : > { %3552 = vst.msk [vmem:[%s5805_s16 + $0x38] sm:$0xf] %vm185_vm9, %v4015_v52  ;;  %v3402_v47 = vadd.f32 %v5794_v56, %v3370_v50  ;;  %v3371_v19 = vmax.f32 %v3222_v5, %v3315_v25  ;;  %v3144_v61 = vpop.permute.xlu0 %3143 }
 0x2a7   : > { %v3248_v48 = vmax.f32 %v5712_v57, %v3144_v61 }
 0x2a8   : > { %v3427_v1 = vmax.f32 %v3402_v47, 0.0  ;;  %v3403_v39 = vadd.f32 %v5794_v56, %v3371_v19  ;;  %v3146_v58 = vpop.permute.xlu1 %3145 }
 0x2a9   : > { %v3316_v0 = vrot.slane %v3248_v48, 4  ;;  %v3249_v15 = vmax.f32 %v5716_v60, %v3146_v58 }
 0x2aa   : > { %v4016_v6 = vpack.c.bf16 %v3427_v1, %v3427_v1  ;;  %v3428_v31 = vmax.f32 %v3403_v39, 0.0  ;;  %v6027_v39 = vld [vmem:[#allocation8_spill] sm:$0xff] }
 0x2ab   : > { %v3317_v26 = vsel %vm3280_vm2, %v3314_v17, %v3316_v0  ;;  %v3318_v51 = vrot.slane %v3249_v15, 4  ;;  %v6026_v17 = vld [vmem:[#allocation7_spill] sm:$0xff] }
 0x2ac   : > { %3553 = vst.msk [vmem:[%s5805_s16 + $0x3c] sm:$0xf] %vm185_vm9, %v4016_v6  ;;  %v4017_v57 = vpack.c.bf16 %v3428_v31, %v3428_v31  ;;  %v3372_v14 = vmax.f32 %v3223_v45, %v3317_v26  ;;  %v3227_v5 = vmax.f32 %v6026_v17, %v6025_v46 }
 0x2ad   : > { %v3319_v35 = vsel %vm3280_vm2, %v3316_v0, %v3318_v51 }
 0x2ae   : > { %3554 = vst.msk [vmem:[%s5805_s16 + $0x40] sm:$0xf] %vm185_vm9, %v4017_v57  ;;  %v3404_v60 = vadd.f32 %v5794_v56, %v3372_v14  ;;  %v3373_v55 = vmax.f32 %v3224_v34, %v3319_v35  ;;  %v3148_v40 = vpop.permute.xlu0 %3147  ;;  %v6029_v34 = vld [vmem:[#allocation20_spill] sm:$0xff]  ;;  %v6030_v35 = vld [vmem:[#allocation9_spill] sm:$0xff] }
 0x2af   : > { %v3250_v32 = vmax.f32 %v6017_v42, %v3148_v40 }
 0x2b0   : > { %v3429_v41 = vmax.f32 %v3404_v60, 0.0  ;;  %v3405_v2 = vadd.f32 %v5794_v56, %v3373_v55  ;;  %v3150_v49 = vpop.permute.xlu1 %3149 }
 0x2b1   : > { %v3320_v27 = vrot.slane %v3250_v32, 4  ;;  %v3251_v7 = vmax.f32 %v6018_v21, %v3150_v49 }
 0x2b2   : > { %v4018_v33 = vpack.c.bf16 %v3429_v41, %v3429_v41  ;;  %v3430_v10 = vmax.f32 %v3405_v2, 0.0 }
 0x2b3   : > { %v3321_v44 = vsel %vm3280_vm2, %v3318_v51, %v3320_v27  ;;  %v3322_v4 = vrot.slane %v3251_v7, 4 }
 0x2b4   : > { %3555 = vst.msk [vmem:[%s5805_s16 + $0x44] sm:$0xf] %vm185_vm9, %v4018_v33  ;;  %v4019_v54 = vpack.c.bf16 %v3430_v10, %v3430_v10  ;;  %v3374_v12 = vmax.f32 %v3225_v3, %v3321_v44 }
 0x2b5   : > { %v3323_v8 = vsel %vm3280_vm2, %v3320_v27, %v3322_v4 }
 0x2b6   : > { %3556 = vst.msk [vmem:[%s5805_s16 + $0x48] sm:$0xf] %vm185_vm9, %v4019_v54  ;;  %v3406_v63 = vadd.f32 %v5794_v56, %v3374_v12  ;;  %v3375_v30 = vmax.f32 %v3226_v22, %v3323_v8  ;;  %v3152_v18 = vpop.permute.xlu0 %3151 }
 0x2b7   : > { %v3252_v38 = vmax.f32 %v6023_v62, %v3152_v18 }
 0x2b8   : > { %v3431_v16 = vmax.f32 %v3406_v63, 0.0  ;;  %v3407_v11 = vadd.f32 %v5794_v56, %v3375_v30  ;;  %v3154_v37 = vpop.permute.xlu1 %3153 }
 0x2b9   : > { %v3324_v28 = vrot.slane %v3252_v38, 4  ;;  %v3253_v23 = vmax.f32 %v6024_v43, %v3154_v37 }
 0x2ba   : > { %v4020_v52 = vpack.c.bf16 %v3431_v16, %v3431_v16  ;;  %v3432_v50 = vmax.f32 %v3407_v11, 0.0 }
 0x2bb   : > { %v3325_v25 = vsel %vm3280_vm2, %v3322_v4, %v3324_v28  ;;  %v3326_v47 = vrot.slane %v3253_v23, 4 }
 0x2bc   : > { %3557 = vst.msk [vmem:[%s5805_s16 + $0x4c] sm:$0xf] %vm185_vm9, %v4020_v52  ;;  %v4021_v19 = vpack.c.bf16 %v3432_v50, %v3432_v50  ;;  %v3376_v61 = vmax.f32 %v3227_v5, %v3325_v25  ;;  %v3104_v48 = vpop.permute.xlu1 %3103 }
 0x2bd   : > { %v3327_v1 = vsel %vm3280_vm2, %v3324_v28, %v3326_v47  ;;  %v3228_v58 = vmax.f32 %v6027_v39, %v3104_v48 }
 0x2be   : > { %3558 = vst.msk [vmem:[%s5805_s16 + $0x50] sm:$0xf] %vm185_vm9, %v4021_v19  ;;  %v3408_v0 = vadd.f32 %v5794_v56, %v3376_v61  ;;  %v3156_v15 = vpop.permute.xlu0 %3155 }
 0x2bf   : > { %v3377_v59 = vmax.f32 %v3228_v58, %v3327_v1  ;;  %v3254_v45 = vmax.f32 %v6028_v53, %v3156_v15 }
 0x2c0   : > { %v3433_v6 = vmax.f32 %v3408_v0, 0.0 }
 0x2c1   : > { %v3409_v31 = vadd.f32 %v5794_v56, %v3377_v59  ;;  %v3328_v26 = vrot.slane %v3254_v45, 4 }
 0x2c2   : > { %v4022_v51 = vpack.c.bf16 %v3433_v6, %v3433_v6  ;;  %v3106_v29 = vpop.permute.xlu0 %3105 }
 0x2c3   : > { %v3434_v36 = vmax.f32 %v3409_v31, 0.0  ;;  %v3379_v57 = vmax.f32 %v6029_v34, %v3328_v26  ;;  %v3329_v14 = vsel %vm3280_vm2, %v3326_v47, %v3328_v26  ;;  %v3229_v60 = vmax.f32 %v6030_v35, %v3106_v29 }
 0x2c4   : > { %3559 = vst.msk [vmem:[%s5805_s16 + $0x54] sm:$0xf] %vm185_vm9, %v4022_v51 }
 0x2c5   : > { %v4023_v55 = vpack.c.bf16 %v3434_v36, %v3434_v36  ;;  %v3411_v40 = vadd.f32 %v5794_v56, %v3379_v57  ;;  %v3378_v42 = vmax.f32 %v3229_v60, %v3329_v14 }
 0x2c7   : > { %3560 = vst.msk [vmem:[%s5805_s16 + $0x58] sm:$0xf] %vm185_vm9, %v4023_v55  ;;  %v3436_v32 = vmax.f32 %v3411_v40, 0.0  ;;  %v3410_v41 = vadd.f32 %v5794_v56, %v3378_v42 }
 0x2c9   : > { %v4025_v2 = vpack.c.bf16 %v3436_v32, %v3436_v32  ;;  %v3435_v49 = vmax.f32 %v3410_v41, 0.0 }
 0x2cb   : > { %3562 = vst.msk [vmem:[%s5805_s16 + $0x60] sm:$0x3] %vm240_vm12, %v4025_v2  ;;  %v4024_v27 = vpack.c.bf16 %v3435_v49, %v3435_v49 }
 0x2cd   : > { %3561 = vst.msk [vmem:[%s5805_s16 + $0x5c] sm:$0xf] %vm185_vm9, %v4024_v27 }
 0x2ce PF: > { %s13_s12 = sadd.s32 1, %s4435_s12  }
 0x2cf   : > { %p10_p5 = scmp.ge.s32.totalorder %s13_s12, 4  }
 0x2d1   :  { %12 = sbr.rel (!%p10_p5) target bundleno = 1 (0x1), region = 89 }

// kernel: mnist_forward.5
= control target key start
LH: loop header
LB: loop body
LE: loop exit
PB: predicated region body
PF: predicated region fallthrough
CT: control target
= control target key end

     0   :  { %vm11959_vm0 = vmmov 0   ;;  %s14768_s1 = inlined_call_operand.vmem [shape: bf16[12544,128], index: 1, kind: input, shape index: {}]   ;;  %s14769_s0 = inlined_call_operand.vmem [shape: bf16[16,12544], index: 0, kind: input, shape index: {}]   ;;  %s14770_s2 = inlined_call_operand.vmem [shape: f32[1,128], index: 2, kind: input, shape index: {}]   ;;  %s14771_s3 = inlined_call_operand.vmem [shape: bf16[128,128], index: 3, kind: input, shape index: {}]   ;;  %s14772_s4 = inlined_call_operand.vmem [shape: f32[1,128], index: 4, kind: input, shape index: {}]   ;;  %s14773_s5 = inlined_call_operand.vmem [shape: f32[16,128], index: 5, kind: output, shape index: {}]  }
   0x1   :  { %v11019_v0 = vld [vmem:[%s14768_s1 + $0x40] sm:$0xff]   ;;  %v11023_v4 = vld [vmem:[%s14768_s1 + $0x48] sm:$0xff]   ;;  %v11027_v8 = vld [vmem:[%s14768_s1 + $0x50] sm:$0xff]  }
   0x2   :  { %v11020_v1 = vld [vmem:[%s14768_s1] sm:$0xff]   ;;  %9910 = vmatprep.subr.bf16.mxu0 %v11019_v0  ;;  %v11024_v5 = vld [vmem:[%s14768_s1 + $0x8] sm:$0xff]   ;;  %v11028_v9 = vld [vmem:[%s14768_s1 + $0x10] sm:$0xff]  }
   0x3   :  { %v11021_v2 = vld [vmem:[%s14768_s1 + $0xc0] sm:$0xff]   ;;  %9911 = vmatpush3.bf16.msra.mxu0 %v11020_v1  ;;  %v11025_v6 = vld [vmem:[%s14768_s1 + $0xc8] sm:$0xff]   ;;  %v11029_v10 = vld [vmem:[%s14768_s1 + $0xd0] sm:$0xff]  }
   0x4   :  { %v11022_v3 = vld [vmem:[%s14768_s1 + $0x80] sm:$0xff]   ;;  %9932 = vmatprep.subr.bf16.mxu1 %v11021_v2  ;;  %9912 = vmatprep.subr.bf16.mxu0 %v11023_v4  ;;  %v11026_v7 = vld [vmem:[%s14768_s1 + $0x88] sm:$0xff]   ;;  %v11030_v11 = vld [vmem:[%s14768_s1 + $0x90] sm:$0xff]  }
   0x5   :  { %9933 = vmatpush3.bf16.msra.mxu1 %v11022_v3  ;;  %v11031_v12 = vld [vmem:[%s14768_s1 + $0x58] sm:$0xff]   ;;  %v11035_v16 = vld [vmem:[%s14768_s1 + $0x60] sm:$0xff]   ;;  %v11039_v20 = vld [vmem:[%s14768_s1 + $0x68] sm:$0xff]  }
   0x6   :  { %9934 = vmatprep.subr.bf16.mxu1 %v11025_v6  ;;  %v11032_v13 = vld [vmem:[%s14768_s1 + $0x18] sm:$0xff]   ;;  %v11036_v17 = vld [vmem:[%s14768_s1 + $0x20] sm:$0xff]   ;;  %v11040_v21 = vld [vmem:[%s14768_s1 + $0x28] sm:$0xff]  }
   0x7   :  { %9913 = vmatpush3.bf16.msra.mxu0 %v11024_v5  ;;  %v11033_v14 = vld [vmem:[%s14768_s1 + $0xd8] sm:$0xff]   ;;  %v11037_v18 = vld [vmem:[%s14768_s1 + $0xe0] sm:$0xff]   ;;  %v11041_v22 = vld [vmem:[%s14768_s1 + $0xe8] sm:$0xff]  }
   0x8   :  { %9914 = vmatprep.subr.bf16.mxu0 %v11027_v8  ;;  %v11034_v15 = vld [vmem:[%s14768_s1 + $0x98] sm:$0xff]   ;;  %v11038_v19 = vld [vmem:[%s14768_s1 + $0xa0] sm:$0xff]   ;;  %v11042_v23 = vld [vmem:[%s14768_s1 + $0xa8] sm:$0xff]  }
   0x9   :  { %9935 = vmatpush3.bf16.msra.mxu1 %v11026_v7  ;;  %v11043_v24 = vld [vmem:[%s14768_s1 + $0x70] sm:$0xff]   ;;  %v11047_v28 = vld [vmem:[%s14768_s1 + $0x78] sm:$0xff]   ;;  %v11050_v31 = vld [vmem:[%s14769_s0] ss:$392 sps:$4 sm:$0xff]  }
   0xa   :  { %9936 = vmatprep.subr.bf16.mxu1 %v11029_v10  ;;  %v11044_v25 = vld [vmem:[%s14768_s1 + $0x30] sm:$0xff]   ;;  %v11048_v29 = vld [vmem:[%s14768_s1 + $0x38] sm:$0xff]   ;;  %v11052_v32 = vld [vmem:[%s14769_s0 + $0x4] ss:$392 sps:$4 sm:$0xff]  }
   0xb   :  { %9915 = vmatpush3.bf16.msra.mxu0 %v11028_v9  ;;  %v11045_v26 = vld [vmem:[%s14768_s1 + $0xf0] sm:$0xff]   ;;  %v11049_v30 = vld [vmem:[%s14768_s1 + $0xf8] sm:$0xff]   ;;  %6920 = vmatprep.mubr.bf16.mxu0 %v11052_v32  ;;  %v11054_v34 = vld [vmem:[%s14768_s1 + $0x140] sm:$0xff]  }
   0xc   :  { %9916 = vmatprep.subr.bf16.mxu0 %v11031_v12  ;;  %v11046_v27 = vld [vmem:[%s14768_s1 + $0xb0] sm:$0xff]   ;;  %v11053_v33 = vld [vmem:[%s14768_s1 + $0xb8] sm:$0xff]   ;;  %v11058_v37 = vld [vmem:[%s14768_s1 + $0x100] sm:$0xff]  }
   0xd   :  { %9937 = vmatpush3.bf16.msra.mxu1 %v11030_v11  ;;  %v11055_v35 = vld [vmem:[%s14769_s0 + $0x8] ss:$392 sps:$4 sm:$0xff]   ;;  %v11057_v36 = vld [vmem:[%s14769_s0 + $0xc] ss:$392 sps:$4 sm:$0xff]   ;;  %v11059_v38 = vld [vmem:[%s14768_s1 + $0x1c0] sm:$0xff]  }
   0xe   :  { %9938 = vmatprep.subr.bf16.mxu1 %v11033_v14  ;;  %6961 = vmatprep.mubr.bf16.mxu1 %v11057_v36  ;;  %v11060_v39 = vld [vmem:[%s14768_s1 + $0x180] sm:$0xff]   ;;  %v11061_v40 = vld [vmem:[%s14768_s1 + $0x148] sm:$0xff]   ;;  %v11065_v44 = vld [vmem:[%s14768_s1 + $0x150] sm:$0xff]  }
   0xf   :  { %9917 = vmatpush3.bf16.msra.mxu0 %v11032_v13  ;;  %v11062_v41 = vld [vmem:[%s14768_s1 + $0x108] sm:$0xff]   ;;  %v11066_v45 = vld [vmem:[%s14768_s1 + $0x110] sm:$0xff]   ;;  %v11069_v48 = vld [vmem:[%s14768_s1 + $0x158] sm:$0xff]  }
  0x10   :  { %9918 = vmatprep.subr.bf16.mxu0 %v11035_v16  ;;  %v11063_v42 = vld [vmem:[%s14768_s1 + $0x1c8] sm:$0xff]   ;;  %v11067_v46 = vld [vmem:[%s14768_s1 + $0x1d0] sm:$0xff]   ;;  %v11070_v49 = vld [vmem:[%s14768_s1 + $0x118] sm:$0xff]  }
  0x11   :  { %9939 = vmatpush3.bf16.msra.mxu1 %v11034_v15  ;;  %v11064_v43 = vld [vmem:[%s14768_s1 + $0x188] sm:$0xff]   ;;  %v11068_v47 = vld [vmem:[%s14768_s1 + $0x190] sm:$0xff]   ;;  %v11071_v50 = vld [vmem:[%s14768_s1 + $0x1d8] sm:$0xff]  }
  0x12   :  { %9940 = vmatprep.subr.bf16.mxu1 %v11037_v18  ;;  %v11072_v51 = vld [vmem:[%s14768_s1 + $0x198] sm:$0xff]   ;;  %v11073_v52 = vld [vmem:[%s14768_s1 + $0x160] sm:$0xff]   ;;  %v11077_v56 = vld [vmem:[%s14768_s1 + $0x168] sm:$0xff]  }
  0x13   :  { %9919 = vmatpush3.bf16.msra.mxu0 %v11036_v17  ;;  %v11074_v53 = vld [vmem:[%s14768_s1 + $0x120] sm:$0xff]   ;;  %v11078_v57 = vld [vmem:[%s14768_s1 + $0x128] sm:$0xff]   ;;  %v11081_v60 = vld [vmem:[%s14768_s1 + $0x170] sm:$0xff]  }
  0x14   :  { %9920 = vmatprep.subr.bf16.mxu0 %v11039_v20  ;;  %v11075_v54 = vld [vmem:[%s14768_s1 + $0x1e0] sm:$0xff]   ;;  %v11079_v58 = vld [vmem:[%s14768_s1 + $0x1e8] sm:$0xff]   ;;  %v11082_v61 = vld [vmem:[%s14768_s1 + $0x130] sm:$0xff]  }
  0x15   :  { %9941 = vmatpush3.bf16.msra.mxu1 %v11038_v19  ;;  %v11076_v55 = vld [vmem:[%s14768_s1 + $0x1a0] sm:$0xff]   ;;  %v11080_v59 = vld [vmem:[%s14768_s1 + $0x1a8] sm:$0xff]   ;;  %v11083_v62 = vld [vmem:[%s14768_s1 + $0x1f0] sm:$0xff]  }
  0x16   :  { %9942 = vmatprep.subr.bf16.mxu1 %v11041_v22  ;;  %v11084_v63 = vld [vmem:[%s14768_s1 + $0x1b0] sm:$0xff]   ;;  %v11085_v0 = vld [vmem:[%s14768_s1 + $0x178] sm:$0xff]   ;;  %v11092_v6 = vld [vmem:[%s14768_s1 + $0x240] sm:$0xff]  }
  0x17   :  { %9921 = vmatpush3.bf16.msra.mxu0 %v11040_v21  ;;  %v11086_v1 = vld [vmem:[%s14768_s1 + $0x138] sm:$0xff]   ;;  %v11096_v9 = vld [vmem:[%s14768_s1 + $0x200] sm:$0xff]   ;;  %v11099_v12 = vld [vmem:[%s14768_s1 + $0x248] sm:$0xff]  }
  0x18   :  { %9922 = vmatprep.subr.bf16.mxu0 %v11043_v24  ;;  %v11087_v2 = vld [vmem:[%s14768_s1 + $0x1f8] sm:$0xff]   ;;  %v11097_v10 = vld [vmem:[%s14768_s1 + $0x2c0] sm:$0xff]   ;;  %v11100_v13 = vld [vmem:[%s14768_s1 + $0x208] sm:$0xff]  }
  0x19   :  { %9943 = vmatpush3.bf16.msra.mxu1 %v11042_v23  ;;  %v11088_v3 = vld [vmem:[%s14769_s0 + $0x10] ss:$392 sps:$4 sm:$0xff]   ;;  %v11090_v4 = vld [vmem:[%s14769_s0 + $0x14] ss:$392 sps:$4 sm:$0xff]   ;;  %v11098_v11 = vld [vmem:[%s14768_s1 + $0x280] sm:$0xff]  }
  0x1a   :  { %9944 = vmatprep.subr.bf16.mxu1 %v11045_v26  ;;  %v11091_v5 = vld [vmem:[%s14768_s1 + $0x1b8] sm:$0xff]   ;;  %v11101_v14 = vld [vmem:[%s14768_s1 + $0x2c8] sm:$0xff]   ;;  %v11103_v16 = vld [vmem:[%s14768_s1 + $0x250] sm:$0xff]  }
  0x1b   :  { %9923 = vmatpush3.bf16.msra.mxu0 %v11044_v25  ;;  %v11093_v7 = vld [vmem:[%s14769_s0 + $0x18] ss:$392 sps:$4 sm:$0xff]   ;;  %v11095_v8 = vld [vmem:[%s14769_s0 + $0x1c] ss:$392 sps:$4 sm:$0xff]   ;;  %v11102_v15 = vld [vmem:[%s14768_s1 + $0x288] sm:$0xff]  }
  0x1c   :  { %9924 = vmatprep.subr.bf16.mxu0 %v11047_v28  ;;  %v11104_v17 = vld [vmem:[%s14768_s1 + $0x210] sm:$0xff]   ;;  %v11107_v20 = vld [vmem:[%s14768_s1 + $0x258] sm:$0xff]   ;;  %v11111_v24 = vld [vmem:[%s14768_s1 + $0x260] sm:$0xff]  }
  0x1d   :  { %9945 = vmatpush3.bf16.msra.mxu1 %v11046_v27  ;;  %v11105_v18 = vld [vmem:[%s14768_s1 + $0x2d0] sm:$0xff]   ;;  %v11108_v21 = vld [vmem:[%s14768_s1 + $0x218] sm:$0xff]   ;;  %v11112_v25 = vld [vmem:[%s14768_s1 + $0x220] sm:$0xff]  }
  0x1e   :  { %9946 = vmatprep.subr.bf16.mxu1 %v11049_v30  ;;  %v11106_v19 = vld [vmem:[%s14768_s1 + $0x290] sm:$0xff]   ;;  %v11109_v22 = vld [vmem:[%s14768_s1 + $0x2d8] sm:$0xff]   ;;  %v11113_v26 = vld [vmem:[%s14768_s1 + $0x2e0] sm:$0xff]  }
  0x1f   :  { %9925 = vmatpush3.bf16.msra.mxu0 %v11048_v29  ;;  %v11110_v23 = vld [vmem:[%s14768_s1 + $0x298] sm:$0xff]   ;;  %v11114_v27 = vld [vmem:[%s14768_s1 + $0x2a0] sm:$0xff]   ;;  %v11115_v28 = vld [vmem:[%s14768_s1 + $0x268] sm:$0xff]  }
  0x20   :  { %9954 = vmatprep.subr.bf16.mxu0 %v11054_v34  ;;  %v11116_v29 = vld [vmem:[%s14768_s1 + $0x228] sm:$0xff]   ;;  %v11119_v32 = vld [vmem:[%s14768_s1 + $0x270] sm:$0xff]   ;;  %v11123_v36 = vld [vmem:[%s14768_s1 + $0x278] sm:$0xff]  }
  0x21   :  { %9947 = vmatpush3.bf16.msra.mxu1 %v11053_v33  ;;  %v11117_v30 = vld [vmem:[%s14768_s1 + $0x2e8] sm:$0xff]   ;;  %v11120_v33 = vld [vmem:[%s14768_s1 + $0x230] sm:$0xff]  }
  0x22   :  { %6921 = vmatmul.mubr.bf16.vlgmr.msra.gmra.mrb[0].mxu0 %v11050_v31  ;;  %9976 = vmatprep.subr.bf16.mxu1 %v11059_v38  ;;  %v11118_v31 = vld [vmem:[%s14768_s1 + $0x2a8] sm:$0xff]   ;;  %v11121_v34 = vld [vmem:[%s14768_s1 + $0x2f0] sm:$0xff]   ;;  %v11125_v38 = vld [vmem:[%s14768_s1 + $0x2f8] sm:$0xff]  }
  0x23   :  { %9955 = vmatpush3.bf16.msra.mxu0 %v11058_v37  ;;  %7002 = vmatprep.mubr.bf16.mxu0 %v11090_v4  ;;  %v11124_v37 = vld [vmem:[%s14768_s1 + $0x238] sm:$0xff]   ;;  %v11157_v4 = vld [vmem:[%s14768_s1 + $0x370] sm:$0xff]  }
  0x24   :  { %6962 = vmatmul.mubr.bf16.vlgmr.msra.gmra.mrb[0].mxu1 %v11055_v35  ;;  %9956 = vmatprep.subr.bf16.mxu0 %v11061_v40  ;;  %v11122_v35 = vld [vmem:[%s14768_s1 + $0x2b0] sm:$0xff]   ;;  %v11128_v40 = vld [vmem:[%s14769_s0 + $0x24] ss:$392 sps:$4 sm:$0xff]  }
  0x25   :  { %9977 = vmatpush3.bf16.msra.mxu1 %v11060_v39  ;;  %7043 = vmatprep.mubr.bf16.mxu1 %v11095_v8  ;;  %v11126_v39 = vld [vmem:[%s14769_s0 + $0x20] ss:$392 sps:$4 sm:$0xff]   ;;  %v11161_v8 = vld [vmem:[%s14768_s1 + $0x378] sm:$0xff]  }
  0x26   :  { %9978 = vmatprep.subr.bf16.mxu1 %v11063_v42  ;;  %v11130_v42 = vld [vmem:[%s14768_s1 + $0x340] sm:$0xff]  }
  0x27   :  { %9957 = vmatpush3.bf16.msra.mxu0 %v11062_v41  ;;  %v11129_v41 = vld [vmem:[%s14768_s1 + $0x2b8] sm:$0xff]  }
  0x28   :  { %9958 = vmatprep.subr.bf16.mxu0 %v11065_v44  ;;  %v11133_v44 = vld [vmem:[%s14769_s0 + $0x2c] ss:$392 sps:$4 sm:$0xff]  }
  0x29   :  { %9979 = vmatpush3.bf16.msra.mxu1 %v11064_v43  ;;  %v11131_v43 = vld [vmem:[%s14769_s0 + $0x28] ss:$392 sps:$4 sm:$0xff]  }
  0x2a   :  { %9980 = vmatprep.subr.bf16.mxu1 %v11067_v46  ;;  %v11135_v46 = vld [vmem:[%s14768_s1 + $0x3c0] sm:$0xff]  }
  0x2b   :  { %9959 = vmatpush3.bf16.msra.mxu0 %v11066_v45  ;;  %v11134_v45 = vld [vmem:[%s14768_s1 + $0x300] sm:$0xff]  }
  0x2c   :  { %9960 = vmatprep.subr.bf16.mxu0 %v11069_v48  ;;  %v11137_v48 = vld [vmem:[%s14768_s1 + $0x348] sm:$0xff]  }
  0x2d   :  { %9981 = vmatpush3.bf16.msra.mxu1 %v11068_v47  ;;  %v11136_v47 = vld [vmem:[%s14768_s1 + $0x380] sm:$0xff]  }
  0x2e   :  { %9982 = vmatprep.subr.bf16.mxu1 %v11071_v50  ;;  %v11139_v50 = vld [vmem:[%s14768_s1 + $0x3c8] sm:$0xff]  }
  0x2f   :  { %9961 = vmatpush3.bf16.msra.mxu0 %v11070_v49  ;;  %v11138_v49 = vld [vmem:[%s14768_s1 + $0x308] sm:$0xff]  }
  0x30   :  { %9962 = vmatprep.subr.bf16.mxu0 %v11073_v52  ;;  %v11141_v52 = vld [vmem:[%s14768_s1 + $0x350] sm:$0xff]  }
  0x31   :  { %9983 = vmatpush3.bf16.msra.mxu1 %v11072_v51  ;;  %v11140_v51 = vld [vmem:[%s14768_s1 + $0x388] sm:$0xff]  }
  0x32   :  { %9984 = vmatprep.subr.bf16.mxu1 %v11075_v54  ;;  %v11143_v54 = vld [vmem:[%s14768_s1 + $0x3d0] sm:$0xff]  }
  0x33   :  { %9963 = vmatpush3.bf16.msra.mxu0 %v11074_v53  ;;  %v11142_v53 = vld [vmem:[%s14768_s1 + $0x310] sm:$0xff]  }
  0x34   :  { %9964 = vmatprep.subr.bf16.mxu0 %v11077_v56  ;;  %v11145_v56 = vld [vmem:[%s14768_s1 + $0x358] sm:$0xff]  }
  0x35   :  { %9985 = vmatpush3.bf16.msra.mxu1 %v11076_v55  ;;  %v11144_v55 = vld [vmem:[%s14768_s1 + $0x390] sm:$0xff]  }
  0x36   :  { %9986 = vmatprep.subr.bf16.mxu1 %v11079_v58  ;;  %v11147_v58 = vld [vmem:[%s14768_s1 + $0x3d8] sm:$0xff]  }
  0x37   :  { %9965 = vmatpush3.bf16.msra.mxu0 %v11078_v57  ;;  %v11146_v57 = vld [vmem:[%s14768_s1 + $0x318] sm:$0xff]  }
  0x38   :  { %9966 = vmatprep.subr.bf16.mxu0 %v11081_v60  ;;  %v11149_v60 = vld [vmem:[%s14768_s1 + $0x360] sm:$0xff]  }
  0x39   :  { %9987 = vmatpush3.bf16.msra.mxu1 %v11080_v59  ;;  %v11148_v59 = vld [vmem:[%s14768_s1 + $0x398] sm:$0xff]  }
  0x3a   :  { %9988 = vmatprep.subr.bf16.mxu1 %v11083_v62  ;;  %v11151_v62 = vld [vmem:[%s14768_s1 + $0x3e0] sm:$0xff]  }
  0x3b   :  { %9967 = vmatpush3.bf16.msra.mxu0 %v11082_v61  ;;  %v11150_v61 = vld [vmem:[%s14768_s1 + $0x320] sm:$0xff]  }
  0x3c   :  { %9968 = vmatprep.subr.bf16.mxu0 %v11085_v0  ;;  %v11153_v0 = vld [vmem:[%s14768_s1 + $0x368] sm:$0xff]  }
  0x3d   :  { %9989 = vmatpush3.bf16.msra.mxu1 %v11084_v63  ;;  %v11152_v63 = vld [vmem:[%s14768_s1 + $0x3a0] sm:$0xff]  }
  0x3e   :  { %9990 = vmatprep.subr.bf16.mxu1 %v11087_v2  ;;  %v11155_v2 = vld [vmem:[%s14768_s1 + $0x3e8] sm:$0xff]  }
  0x3f   :  { %9969 = vmatpush3.bf16.msra.mxu0 %v11086_v1  ;;  %v11154_v1 = vld [vmem:[%s14768_s1 + $0x328] sm:$0xff]  }
  0x40   :  { %9998 = vmatprep.subr.bf16.mxu0 %v11092_v6  ;;  %v11159_v6 = vld [vmem:[%s14768_s1 + $0x3f0] sm:$0xff]  }
  0x41   :  { %9991 = vmatpush3.bf16.msra.mxu1 %v11091_v5  ;;  %v11158_v5 = vld [vmem:[%s14768_s1 + $0x330] sm:$0xff]  }
  0x42   :  { %7003 = vmatmul.mubr.bf16.vlgmr.msra.gmra.mrb[4].mxu0 %v11088_v3  ;;  %10020 = vmatprep.subr.bf16.mxu1 %v11097_v10  ;;  %v11156_v3 = vld [vmem:[%s14768_s1 + $0x3a8] sm:$0xff]   ;;  %v11163_v10 = vld [vmem:[%s14768_s1 + $0x3f8] sm:$0xff]  }
  0x43   :  { %9999 = vmatpush3.bf16.msra.mxu0 %v11096_v9  ;;  %7084 = vmatprep.mubr.bf16.mxu0 %v11128_v40  ;;  %v11162_v9 = vld [vmem:[%s14768_s1 + $0x338] sm:$0xff]   ;;  %v11195_v40 = vld [vmem:[%s14768_s1 + $0x470] sm:$0xff]  }
  0x44   :  { %7044 = vmatmul.mubr.bf16.vlgmr.msra.gmra.mrb[4].mxu1 %v11093_v7  ;;  %10000 = vmatprep.subr.bf16.mxu0 %v11099_v12  ;;  %v11160_v7 = vld [vmem:[%s14768_s1 + $0x3b0] sm:$0xff]  }
  0x45   :  { %10021 = vmatpush3.bf16.msra.mxu1 %v11098_v11  ;;  %7125 = vmatprep.mubr.bf16.mxu1 %v11133_v44  ;;  %v11164_v11 = vld [vmem:[%s14769_s0 + $0x30] ss:$392 sps:$4 sm:$0xff]   ;;  %v11166_v12 = vld [vmem:[%s14769_s0 + $0x34] ss:$392 sps:$4 sm:$0xff]  }
  0x46   :  { %10022 = vmatprep.subr.bf16.mxu1 %v11101_v14  ;;  %v11168_v14 = vld [vmem:[%s14768_s1 + $0x440] sm:$0xff]   ;;  %v11199_v44 = vld [vmem:[%s14768_s1 + $0x478] sm:$0xff]  }
  0x47   :  { %10001 = vmatpush3.bf16.msra.mxu0 %v11100_v13  ;;  %v11167_v13 = vld [vmem:[%s14768_s1 + $0x3b8] sm:$0xff]  }
  0x48   :  { %10002 = vmatprep.subr.bf16.mxu0 %v11103_v16  ;;  %v11171_v16 = vld [vmem:[%s14769_s0 + $0x3c] ss:$392 sps:$4 sm:$0xff]  }
  0x49   :  { %10023 = vmatpush3.bf16.msra.mxu1 %v11102_v15  ;;  %v11169_v15 = vld [vmem:[%s14769_s0 + $0x38] ss:$392 sps:$4 sm:$0xff]  }
  0x4a   :  { %10024 = vmatprep.subr.bf16.mxu1 %v11105_v18  ;;  %v11173_v18 = vld [vmem:[%s14768_s1 + $0x4c0] sm:$0xff]  }
  0x4b   :  { %10003 = vmatpush3.bf16.msra.mxu0 %v11104_v17  ;;  %v11172_v17 = vld [vmem:[%s14768_s1 + $0x400] sm:$0xff]  }
  0x4c   :  { %10004 = vmatprep.subr.bf16.mxu0 %v11107_v20  ;;  %v11175_v20 = vld [vmem:[%s14768_s1 + $0x448] sm:$0xff]  }
  0x4d   :  { %10025 = vmatpush3.bf16.msra.mxu1 %v11106_v19  ;;  %v11174_v19 = vld [vmem:[%s14768_s1 + $0x480] sm:$0xff]  }
  0x4e   :  { %10026 = vmatprep.subr.bf16.mxu1 %v11109_v22  ;;  %v11177_v22 = vld [vmem:[%s14768_s1 + $0x4c8] sm:$0xff]  }
  0x4f   :  { %10005 = vmatpush3.bf16.msra.mxu0 %v11108_v21  ;;  %v11176_v21 = vld [vmem:[%s14768_s1 + $0x408] sm:$0xff]  }
  0x50   :  { %10006 = vmatprep.subr.bf16.mxu0 %v11111_v24  ;;  %v11179_v24 = vld [vmem:[%s14768_s1 + $0x450] sm:$0xff]  }
  0x51   :  { %10027 = vmatpush3.bf16.msra.mxu1 %v11110_v23  ;;  %v11178_v23 = vld [vmem:[%s14768_s1 + $0x488] sm:$0xff]  }
  0x52   :  { %10028 = vmatprep.subr.bf16.mxu1 %v11113_v26  ;;  %v11181_v26 = vld [vmem:[%s14768_s1 + $0x4d0] sm:$0xff]  }
  0x53   :  { %10007 = vmatpush3.bf16.msra.mxu0 %v11112_v25  ;;  %v11180_v25 = vld [vmem:[%s14768_s1 + $0x410] sm:$0xff]  }
  0x54   :  { %10008 = vmatprep.subr.bf16.mxu0 %v11115_v28  ;;  %v11183_v28 = vld [vmem:[%s14768_s1 + $0x458] sm:$0xff]  }
  0x55   :  { %10029 = vmatpush3.bf16.msra.mxu1 %v11114_v27  ;;  %v11182_v27 = vld [vmem:[%s14768_s1 + $0x490] sm:$0xff]  }
  0x56   :  { %10030 = vmatprep.subr.bf16.mxu1 %v11117_v30  ;;  %v11185_v30 = vld [vmem:[%s14768_s1 + $0x4d8] sm:$0xff]  }
  0x57   :  { %10009 = vmatpush3.bf16.msra.mxu0 %v11116_v29  ;;  %v11184_v29 = vld [vmem:[%s14768_s1 + $0x418] sm:$0xff]  }
  0x58   :  { %10010 = vmatprep.subr.bf16.mxu0 %v11119_v32  ;;  %v11187_v32 = vld [vmem:[%s14768_s1 + $0x460] sm:$0xff]  }
  0x59   :  { %10031 = vmatpush3.bf16.msra.mxu1 %v11118_v31  ;;  %v11186_v31 = vld [vmem:[%s14768_s1 + $0x498] sm:$0xff]  }
  0x5a   :  { %10032 = vmatprep.subr.bf16.mxu1 %v11121_v34  ;;  %v11189_v34 = vld [vmem:[%s14768_s1 + $0x4e0] sm:$0xff]  }
  0x5b   :  { %10011 = vmatpush3.bf16.msra.mxu0 %v11120_v33  ;;  %v11188_v33 = vld [vmem:[%s14768_s1 + $0x420] sm:$0xff]  }
  0x5c   :  { %10012 = vmatprep.subr.bf16.mxu0 %v11123_v36  ;;  %v11191_v36 = vld [vmem:[%s14768_s1 + $0x468] sm:$0xff]  }
  0x5d   :  { %10033 = vmatpush3.bf16.msra.mxu1 %v11122_v35  ;;  %v11190_v35 = vld [vmem:[%s14768_s1 + $0x4a0] sm:$0xff]  }
  0x5e   :  { %10034 = vmatprep.subr.bf16.mxu1 %v11125_v38  ;;  %v11193_v38 = vld [vmem:[%s14768_s1 + $0x4e8] sm:$0xff]  }
  0x5f   :  { %10013 = vmatpush3.bf16.msra.mxu0 %v11124_v37  ;;  %v11192_v37 = vld [vmem:[%s14768_s1 + $0x428] sm:$0xff]  }
  0x60   :  { %10042 = vmatprep.subr.bf16.mxu0 %v11130_v42  ;;  %v11197_v42 = vld [vmem:[%s14768_s1 + $0x4f0] sm:$0xff]  }
  0x61   :  { %10035 = vmatpush3.bf16.msra.mxu1 %v11129_v41  ;;  %v11196_v41 = vld [vmem:[%s14768_s1 + $0x430] sm:$0xff]  }
  0x62   :  { %7085 = vmatmul.mubr.bf16.vlgmr.msra.gmra.mrb[8].mxu0 %v11126_v39  ;;  %10064 = vmatprep.subr.bf16.mxu1 %v11135_v46  ;;  %v11194_v39 = vld [vmem:[%s14768_s1 + $0x4a8] sm:$0xff]   ;;  %v11201_v46 = vld [vmem:[%s14768_s1 + $0x4f8] sm:$0xff]  }
  0x63   :  { %10043 = vmatpush3.bf16.msra.mxu0 %v11134_v45  ;;  %7166 = vmatprep.mubr.bf16.mxu0 %v11166_v12  ;;  %v11200_v45 = vld [vmem:[%s14768_s1 + $0x438] sm:$0xff]   ;;  %v11233_v12 = vld [vmem:[%s14768_s1 + $0x570] sm:$0xff]  }
  0x64   :  { %7126 = vmatmul.mubr.bf16.vlgmr.msra.gmra.mrb[8].mxu1 %v11131_v43  ;;  %10044 = vmatprep.subr.bf16.mxu0 %v11137_v48  ;;  %v11198_v43 = vld [vmem:[%s14768_s1 + $0x4b0] sm:$0xff]   ;;  %v11204_v48 = vld [vmem:[%s14769_s0 + $0x44] ss:$392 sps:$4 sm:$0xff]  }
  0x65   :  { %10065 = vmatpush3.bf16.msra.mxu1 %v11136_v47  ;;  %7207 = vmatprep.mubr.bf16.mxu1 %v11171_v16  ;;  %v11202_v47 = vld [vmem:[%s14769_s0 + $0x40] ss:$392 sps:$4 sm:$0xff]   ;;  %v11237_v16 = vld [vmem:[%s14768_s1 + $0x578] sm:$0xff]  }
  0x66   :  { %10066 = vmatprep.subr.bf16.mxu1 %v11139_v50  ;;  %v11206_v50 = vld [vmem:[%s14768_s1 + $0x540] sm:$0xff]  }
  0x67   :  { %10045 = vmatpush3.bf16.msra.mxu0 %v11138_v49  ;;  %v11205_v49 = vld [vmem:[%s14768_s1 + $0x4b8] sm:$0xff]  }
  0x68   :  { %10046 = vmatprep.subr.bf16.mxu0 %v11141_v52  ;;  %v11209_v52 = vld [vmem:[%s14769_s0 + $0x4c] ss:$392 sps:$4 sm:$0xff]  }
  0x69   :  { %10067 = vmatpush3.bf16.msra.mxu1 %v11140_v51  ;;  %v11207_v51 = vld [vmem:[%s14769_s0 + $0x48] ss:$392 sps:$4 sm:$0xff]  }
  0x6a   :  { %10068 = vmatprep.subr.bf16.mxu1 %v11143_v54  ;;  %v11211_v54 = vld [vmem:[%s14768_s1 + $0x5c0] sm:$0xff]  }
  0x6b   :  { %10047 = vmatpush3.bf16.msra.mxu0 %v11142_v53  ;;  %v11210_v53 = vld [vmem:[%s14768_s1 + $0x500] sm:$0xff]  }
  0x6c   :  { %10048 = vmatprep.subr.bf16.mxu0 %v11145_v56  ;;  %v11213_v56 = vld [vmem:[%s14768_s1 + $0x548] sm:$0xff]  }
  0x6d   :  { %10069 = vmatpush3.bf16.msra.mxu1 %v11144_v55  ;;  %v11212_v55 = vld [vmem:[%s14768_s1 + $0x580] sm:$0xff]  }
  0x6e   :  { %10070 = vmatprep.subr.bf16.mxu1 %v11147_v58  ;;  %v11215_v58 = vld [vmem:[%s14768_s1 + $0x5c8] sm:$0xff]  }
  0x6f   :  { %10049 = vmatpush3.bf16.msra.mxu0 %v11146_v57  ;;  %v11214_v57 = vld [vmem:[%s14768_s1 + $0x508] sm:$0xff]  }
  0x70   :  { %10050 = vmatprep.subr.bf16.mxu0 %v11149_v60  ;;  %v11217_v60 = vld [vmem:[%s14768_s1 + $0x550] sm:$0xff]  }
  0x71   :  { %10071 = vmatpush3.bf16.msra.mxu1 %v11148_v59  ;;  %v11216_v59 = vld [vmem:[%s14768_s1 + $0x588] sm:$0xff]  }
  0x72   :  { %10072 = vmatprep.subr.bf16.mxu1 %v11151_v62  ;;  %v11219_v62 = vld [vmem:[%s14768_s1 + $0x5d0] sm:$0xff]  }
  0x73   :  { %10051 = vmatpush3.bf16.msra.mxu0 %v11150_v61  ;;  %v11218_v61 = vld [vmem:[%s14768_s1 + $0x510] sm:$0xff]  }
  0x74   :  { %10052 = vmatprep.subr.bf16.mxu0 %v11153_v0  ;;  %v11221_v0 = vld [vmem:[%s14768_s1 + $0x558] sm:$0xff]  }
  0x75   :  { %10073 = vmatpush3.bf16.msra.mxu1 %v11152_v63  ;;  %v11220_v63 = vld [vmem:[%s14768_s1 + $0x590] sm:$0xff]  }
  0x76   :  { %10074 = vmatprep.subr.bf16.mxu1 %v11155_v2  ;;  %v11223_v2 = vld [vmem:[%s14768_s1 + $0x5d8] sm:$0xff]  }
  0x77   :  { %10053 = vmatpush3.bf16.msra.mxu0 %v11154_v1  ;;  %v11222_v1 = vld [vmem:[%s14768_s1 + $0x518] sm:$0xff]  }
  0x78   :  { %10054 = vmatprep.subr.bf16.mxu0 %v11157_v4  ;;  %v11225_v4 = vld [vmem:[%s14768_s1 + $0x560] sm:$0xff]  }
  0x79   :  { %10075 = vmatpush3.bf16.msra.mxu1 %v11156_v3  ;;  %v11224_v3 = vld [vmem:[%s14768_s1 + $0x598] sm:$0xff]  }
  0x7a   :  { %10076 = vmatprep.subr.bf16.mxu1 %v11159_v6  ;;  %v11227_v6 = vld [vmem:[%s14768_s1 + $0x5e0] sm:$0xff]  }
  0x7b   :  { %10055 = vmatpush3.bf16.msra.mxu0 %v11158_v5  ;;  %v11226_v5 = vld [vmem:[%s14768_s1 + $0x520] sm:$0xff]  }
  0x7c   :  { %10056 = vmatprep.subr.bf16.mxu0 %v11161_v8  ;;  %v11229_v8 = vld [vmem:[%s14768_s1 + $0x568] sm:$0xff]  }
  0x7d   :  { %10077 = vmatpush3.bf16.msra.mxu1 %v11160_v7  ;;  %v11228_v7 = vld [vmem:[%s14768_s1 + $0x5a0] sm:$0xff]  }
  0x7e   :  { %10078 = vmatprep.subr.bf16.mxu1 %v11163_v10  ;;  %v11231_v10 = vld [vmem:[%s14768_s1 + $0x5e8] sm:$0xff]  }
  0x7f   :  { %10057 = vmatpush3.bf16.msra.mxu0 %v11162_v9  ;;  %v11230_v9 = vld [vmem:[%s14768_s1 + $0x528] sm:$0xff]  }
  0x80   :  { %10086 = vmatprep.subr.bf16.mxu0 %v11168_v14  ;;  %v11235_v14 = vld [vmem:[%s14768_s1 + $0x5f0] sm:$0xff]  }
  0x81   :  { %10079 = vmatpush3.bf16.msra.mxu1 %v11167_v13  ;;  %v11234_v13 = vld [vmem:[%s14768_s1 + $0x530] sm:$0xff]  }
  0x82   :  { %7167 = vmatmul.mubr.bf16.vlgmr.msra.gmra.mrb[12].mxu0 %v11164_v11  ;;  %10108 = vmatprep.subr.bf16.mxu1 %v11173_v18  ;;  %v11232_v11 = vld [vmem:[%s14768_s1 + $0x5a8] sm:$0xff]   ;;  %v11239_v18 = vld [vmem:[%s14768_s1 + $0x5f8] sm:$0xff]  }
  0x83   :  { %10087 = vmatpush3.bf16.msra.mxu0 %v11172_v17  ;;  %7248 = vmatprep.mubr.bf16.mxu0 %v11204_v48  ;;  %v11238_v17 = vld [vmem:[%s14768_s1 + $0x538] sm:$0xff]   ;;  %v11271_v48 = vld [vmem:[%s14768_s1 + $0x670] sm:$0xff]  }
  0x84   :  { %7208 = vmatmul.mubr.bf16.vlgmr.msra.gmra.mrb[12].mxu1 %v11169_v15  ;;  %10088 = vmatprep.subr.bf16.mxu0 %v11175_v20  ;;  %v11236_v15 = vld [vmem:[%s14768_s1 + $0x5b0] sm:$0xff]  }
  0x85   :  { %10109 = vmatpush3.bf16.msra.mxu1 %v11174_v19  ;;  %7289 = vmatprep.mubr.bf16.mxu1 %v11209_v52  ;;  %v11240_v19 = vld [vmem:[%s14769_s0 + $0x50] ss:$392 sps:$4 sm:$0xff]   ;;  %v11242_v20 = vld [vmem:[%s14769_s0 + $0x54] ss:$392 sps:$4 sm:$0xff]  }
  0x86   :  { %10110 = vmatprep.subr.bf16.mxu1 %v11177_v22  ;;  %v11244_v22 = vld [vmem:[%s14768_s1 + $0x640] sm:$0xff]   ;;  %v11275_v52 = vld [vmem:[%s14768_s1 + $0x678] sm:$0xff]  }
  0x87   :  { %10089 = vmatpush3.bf16.msra.mxu0 %v11176_v21  ;;  %v11243_v21 = vld [vmem:[%s14768_s1 + $0x5b8] sm:$0xff]  }
  0x88   :  { %10090 = vmatprep.subr.bf16.mxu0 %v11179_v24  ;;  %v11247_v24 = vld [vmem:[%s14769_s0 + $0x5c] ss:$392 sps:$4 sm:$0xff]  }
  0x89   :  { %10111 = vmatpush3.bf16.msra.mxu1 %v11178_v23  ;;  %v11245_v23 = vld [vmem:[%s14769_s0 + $0x58] ss:$392 sps:$4 sm:$0xff]  }
  0x8a   :  { %10112 = vmatprep.subr.bf16.mxu1 %v11181_v26  ;;  %v11249_v26 = vld [vmem:[%s14768_s1 + $0x6c0] sm:$0xff]  }
  0x8b   :  { %10091 = vmatpush3.bf16.msra.mxu0 %v11180_v25  ;;  %v11248_v25 = vld [vmem:[%s14768_s1 + $0x600] sm:$0xff]  }
  0x8c   :  { %10092 = vmatprep.subr.bf16.mxu0 %v11183_v28  ;;  %v11251_v28 = vld [vmem:[%s14768_s1 + $0x648] sm:$0xff]  }
  0x8d   :  { %10113 = vmatpush3.bf16.msra.mxu1 %v11182_v27  ;;  %v11250_v27 = vld [vmem:[%s14768_s1 + $0x680] sm:$0xff]  }
  0x8e   :  { %10114 = vmatprep.subr.bf16.mxu1 %v11185_v30  ;;  %v11253_v30 = vld [vmem:[%s14768_s1 + $0x6c8] sm:$0xff]  }
  0x8f   :  { %10093 = vmatpush3.bf16.msra.mxu0 %v11184_v29  ;;  %v11252_v29 = vld [vmem:[%s14768_s1 + $0x608] sm:$0xff]  }
  0x90   :  { %10094 = vmatprep.subr.bf16.mxu0 %v11187_v32  ;;  %v11255_v32 = vld [vmem:[%s14768_s1 + $0x650] sm:$0xff]  }
  0x91   :  { %10115 = vmatpush3.bf16.msra.mxu1 %v11186_v31  ;;  %v11254_v31 = vld [vmem:[%s14768_s1 + $0x688] sm:$0xff]  }
  0x92   :  { %10116 = vmatprep.subr.bf16.mxu1 %v11189_v34  ;;  %v11257_v34 = vld [vmem:[%s14768_s1 + $0x6d0] sm:$0xff]  }
  0x93   :  { %10095 = vmatpush3.bf16.msra.mxu0 %v11188_v33  ;;  %v11256_v33 = vld [vmem:[%s14768_s1 + $0x610] sm:$0xff]  }
  0x94   :  { %10096 = vmatprep.subr.bf16.mxu0 %v11191_v36  ;;  %v11259_v36 = vld [vmem:[%s14768_s1 + $0x658] sm:$0xff]  }
  0x95   :  { %10117 = vmatpush3.bf16.msra.mxu1 %v11190_v35  ;;  %v11258_v35 = vld [vmem:[%s14768_s1 + $0x690] sm:$0xff]  }
  0x96   :  { %10118 = vmatprep.subr.bf16.mxu1 %v11193_v38  ;;  %v11261_v38 = vld [vmem:[%s14768_s1 + $0x6d8] sm:$0xff]  }
  0x97   :  { %10097 = vmatpush3.bf16.msra.mxu0 %v11192_v37  ;;  %v11260_v37 = vld [vmem:[%s14768_s1 + $0x618] sm:$0xff]  }
  0x98   :  { %10098 = vmatprep.subr.bf16.mxu0 %v11195_v40  ;;  %v11263_v40 = vld [vmem:[%s14768_s1 + $0x660] sm:$0xff]  }
  0x99   :  { %10119 = vmatpush3.bf16.msra.mxu1 %v11194_v39  ;;  %v11262_v39 = vld [vmem:[%s14768_s1 + $0x698] sm:$0xff]  }
  0x9a   :  { %10120 = vmatprep.subr.bf16.mxu1 %v11197_v42  ;;  %v11265_v42 = vld [vmem:[%s14768_s1 + $0x6e0] sm:$0xff]  }
  0x9b   :  { %10099 = vmatpush3.bf16.msra.mxu0 %v11196_v41  ;;  %v11264_v41 = vld [vmem:[%s14768_s1 + $0x620] sm:$0xff]  }
  0x9c   :  { %10100 = vmatprep.subr.bf16.mxu0 %v11199_v44  ;;  %v11267_v44 = vld [vmem:[%s14768_s1 + $0x668] sm:$0xff]  }
  0x9d   :  { %10121 = vmatpush3.bf16.msra.mxu1 %v11198_v43  ;;  %v11266_v43 = vld [vmem:[%s14768_s1 + $0x6a0] sm:$0xff]  }
  0x9e   :  { %10122 = vmatprep.subr.bf16.mxu1 %v11201_v46  ;;  %v11269_v46 = vld [vmem:[%s14768_s1 + $0x6e8] sm:$0xff]  }
  0x9f   :  { %10101 = vmatpush3.bf16.msra.mxu0 %v11200_v45  ;;  %v11268_v45 = vld [vmem:[%s14768_s1 + $0x628] sm:$0xff]  }
  0xa0   :  { %10130 = vmatprep.subr.bf16.mxu0 %v11206_v50  ;;  %v11273_v50 = vld [vmem:[%s14768_s1 + $0x6f0] sm:$0xff]  }
  0xa1   :  { %10123 = vmatpush3.bf16.msra.mxu1 %v11205_v49  ;;  %v11272_v49 = vld [vmem:[%s14768_s1 + $0x630] sm:$0xff]  }
  0xa2   :  { %7249 = vmatmul.mubr.bf16.vlgmr.msra.gmra.mrb[16].mxu0 %v11202_v47  ;;  %10152 = vmatprep.subr.bf16.mxu1 %v11211_v54  ;;  %v11270_v47 = vld [vmem:[%s14768_s1 + $0x6a8] sm:$0xff]   ;;  %v11277_v54 = vld [vmem:[%s14768_s1 + $0x6f8] sm:$0xff]  }
  0xa3   :  { %10131 = vmatpush3.bf16.msra.mxu0 %v11210_v53  ;;  %7330 = vmatprep.mubr.bf16.mxu0 %v11242_v20  ;;  %v11276_v53 = vld [vmem:[%s14768_s1 + $0x638] sm:$0xff]  }
  0xa4   :  { %7290 = vmatmul.mubr.bf16.vlgmr.msra.gmra.mrb[16].mxu1 %v11207_v51  ;;  %10132 = vmatprep.subr.bf16.mxu0 %v11213_v56  ;;  %v11274_v51 = vld [vmem:[%s14768_s1 + $0x6b0] sm:$0xff]   ;;  %v11280_v56 = vld [vmem:[%s14769_s0 + $0x64] ss:$392 sps:$4 sm:$0xff]   ;;  %v11297_v20 = vld [vmem:[%s14768_s1 + $0x758] sm:$0xff]  }
  0xa5   :  { %10153 = vmatpush3.bf16.msra.mxu1 %v11212_v55  ;;  %7371 = vmatprep.mubr.bf16.mxu1 %v11247_v24  ;;  %v11278_v55 = vld [vmem:[%s14769_s0 + $0x60] ss:$392 sps:$4 sm:$0xff]  }
  0xa6   :  { %10154 = vmatprep.subr.bf16.mxu1 %v11215_v58  ;;  %v11282_v58 = vld [vmem:[%s14768_s1 + $0x740] sm:$0xff]  }
  0xa7   :  { %10133 = vmatpush3.bf16.msra.mxu0 %v11214_v57  ;;  %v11281_v57 = vld [vmem:[%s14768_s1 + $0x6b8] sm:$0xff]   ;;  %v11301_v24 = vld [vmem:[%s14768_s1 + $0x760] sm:$0xff]  }
  0xa8   :  { %10134 = vmatprep.subr.bf16.mxu0 %v11217_v60  ;;  %v11285_v60 = vld [vmem:[%s14769_s0 + $0x6c] ss:$392 sps:$4 sm:$0xff]  }
  0xa9   :  { %10155 = vmatpush3.bf16.msra.mxu1 %v11216_v59  ;;  %v11283_v59 = vld [vmem:[%s14769_s0 + $0x68] ss:$392 sps:$4 sm:$0xff]  }
  0xaa   :  { %10156 = vmatprep.subr.bf16.mxu1 %v11219_v62  ;;  %v11287_v62 = vld [vmem:[%s14768_s1 + $0x7c0] sm:$0xff]  }
  0xab   :  { %10135 = vmatpush3.bf16.msra.mxu0 %v11218_v61  ;;  %v11286_v61 = vld [vmem:[%s14768_s1 + $0x700] sm:$0xff]  }
  0xac   :  { %10136 = vmatprep.subr.bf16.mxu0 %v11221_v0 }
  0xad   :  { %10157 = vmatpush3.bf16.msra.mxu1 %v11220_v63  ;;  %v11288_v63 = vld [vmem:[%s14768_s1 + $0x780] sm:$0xff]  }
  0xae   :  { %10158 = vmatprep.subr.bf16.mxu1 %v11223_v2 }
  0xaf   :  { %10137 = vmatpush3.bf16.msra.mxu0 %v11222_v1  ;;  %v11289_v1 = vld [vmem:[%s14768_s1 + $0x748] sm:$0xff]  }
  0xb0   :  { %10138 = vmatprep.subr.bf16.mxu0 %v11225_v4 }
  0xb1   :  { %10159 = vmatpush3.bf16.msra.mxu1 %v11224_v3  ;;  %v11290_v3 = vld [vmem:[%s14768_s1 + $0x708] sm:$0xff]  }
  0xb2   :  { %10160 = vmatprep.subr.bf16.mxu1 %v11227_v6  ;;  %v11291_v6 = vld [vmem:[%s14768_s1 + $0x7c8] sm:$0xff]  }
  0xb3   :  { %10139 = vmatpush3.bf16.msra.mxu0 %v11226_v5 }
  0xb4   :  { %10140 = vmatprep.subr.bf16.mxu0 %v11229_v8  ;;  %v11292_v8 = vld [vmem:[%s14768_s1 + $0x788] sm:$0xff]  }
  0xb5   :  { %10161 = vmatpush3.bf16.msra.mxu1 %v11228_v7 }
  0xb6   :  { %10162 = vmatprep.subr.bf16.mxu1 %v11231_v10  ;;  %v11293_v10 = vld [vmem:[%s14768_s1 + $0x750] sm:$0xff]  }
  0xb7   :  { %10141 = vmatpush3.bf16.msra.mxu0 %v11230_v9 }
  0xb8   :  { %10142 = vmatprep.subr.bf16.mxu0 %v11233_v12 }
  0xb9   :  { %10163 = vmatpush3.bf16.msra.mxu1 %v11232_v11 }
  0xba   :  { %10164 = vmatprep.subr.bf16.mxu1 %v11235_v14 }
  0xbb   :  { %10143 = vmatpush3.bf16.msra.mxu0 %v11234_v13  ;;  %v11294_v13 = vld [vmem:[%s14768_s1 + $0x710] sm:$0xff]  }
  0xbc   :  { %10144 = vmatprep.subr.bf16.mxu0 %v11237_v16  ;;  %v11295_v16 = vld [vmem:[%s14768_s1 + $0x7d0] sm:$0xff]  }
  0xbd   :  { %10165 = vmatpush3.bf16.msra.mxu1 %v11236_v15 }
  0xbe   :  { %10166 = vmatprep.subr.bf16.mxu1 %v11239_v18  ;;  %v11296_v18 = vld [vmem:[%s14768_s1 + $0x790] sm:$0xff]  }
  0xbf   :  { %10145 = vmatpush3.bf16.msra.mxu0 %v11238_v17 }
  0xc0   :  { %10174 = vmatprep.subr.bf16.mxu0 %v11244_v22  ;;  %v11299_v22 = vld [vmem:[%s14768_s1 + $0x7d8] sm:$0xff]  }
  0xc1   :  { %10167 = vmatpush3.bf16.msra.mxu1 %v11243_v21  ;;  %v11298_v21 = vld [vmem:[%s14768_s1 + $0x718] sm:$0xff]  }
  0xc2   :  { %7331 = vmatmul.mubr.bf16.vlgmr.msra.gmra.mrb[20].mxu0 %v11240_v19  ;;  %10196 = vmatprep.subr.bf16.mxu1 %v11249_v26  ;;  %v11303_v26 = vld [vmem:[%s14768_s1 + $0x7e0] sm:$0xff]  }
  0xc3   :  { %10175 = vmatpush3.bf16.msra.mxu0 %v11248_v25  ;;  %7412 = vmatprep.mubr.bf16.mxu0 %v11280_v56  ;;  %v11302_v25 = vld [vmem:[%s14768_s1 + $0x720] sm:$0xff]  }
  0xc4   :  { %7372 = vmatmul.mubr.bf16.vlgmr.msra.gmra.mrb[20].mxu1 %v11245_v23  ;;  %10176 = vmatprep.subr.bf16.mxu0 %v11251_v28  ;;  %v11300_v23 = vld [vmem:[%s14768_s1 + $0x798] sm:$0xff]   ;;  %v9018_v28 = vld [vmem:[%s14770_s2] ss:$0 sm:$0xff] }
  0xc5   :  { %10197 = vmatpush3.bf16.msra.mxu1 %v11250_v27  ;;  %7453 = vmatprep.mubr.bf16.mxu1 %v11285_v60  ;;  %v11304_v27 = vld [vmem:[%s14768_s1 + $0x7a0] sm:$0xff]   ;;  %v11329_v60 = vld [vmem:[%s14768_s1 + $0x8c8] sm:$0xff]  }
  0xc6   :  { %10198 = vmatprep.subr.bf16.mxu1 %v11253_v30  ;;  %v11305_v30 = vld [vmem:[%s14768_s1 + $0x768] sm:$0xff]  }
  0xc7   :  { %10177 = vmatpush3.bf16.msra.mxu0 %v11252_v29 }
  0xc8   :  { %10178 = vmatprep.subr.bf16.mxu0 %v11255_v32  ;;  %v11306_v32 = vld [vmem:[%s14768_s1 + $0x728] sm:$0xff]  }
  0xc9   :  { %10199 = vmatpush3.bf16.msra.mxu1 %v11254_v31 }
  0xca   :  { %10200 = vmatprep.subr.bf16.mxu1 %v11257_v34  ;;  %v11307_v34 = vld [vmem:[%s14768_s1 + $0x7e8] sm:$0xff]  }
  0xcb   :  { %10179 = vmatpush3.bf16.msra.mxu0 %v11256_v33 }
  0xcc   :  { %10180 = vmatprep.subr.bf16.mxu0 %v11259_v36  ;;  %v11308_v36 = vld [vmem:[%s14768_s1 + $0x7a8] sm:$0xff]  }
  0xcd   :  { %10201 = vmatpush3.bf16.msra.mxu1 %v11258_v35 }
  0xce   :  { %10202 = vmatprep.subr.bf16.mxu1 %v11261_v38  ;;  %v11310_v38 = vld [vmem:[%s14768_s1 + $0x730] sm:$0xff]  }
  0xcf   :  { %10181 = vmatpush3.bf16.msra.mxu0 %v11260_v37  ;;  %v11309_v37 = vld [vmem:[%s14768_s1 + $0x770] sm:$0xff]  }
  0xd0   :  { %10182 = vmatprep.subr.bf16.mxu0 %v11263_v40  ;;  %v11312_v40 = vld [vmem:[%s14768_s1 + $0x7b0] sm:$0xff]  }
  0xd1   :  { %10203 = vmatpush3.bf16.msra.mxu1 %v11262_v39  ;;  %v11311_v39 = vld [vmem:[%s14768_s1 + $0x7f0] sm:$0xff]  }
  0xd2   :  { %10204 = vmatprep.subr.bf16.mxu1 %v11265_v42  ;;  %v11314_v42 = vld [vmem:[%s14768_s1 + $0x738] sm:$0xff]  }
  0xd3   :  { %10183 = vmatpush3.bf16.msra.mxu0 %v11264_v41  ;;  %v11313_v41 = vld [vmem:[%s14768_s1 + $0x778] sm:$0xff]  }
  0xd4   :  { %10184 = vmatprep.subr.bf16.mxu0 %v11267_v44  ;;  %v11316_v44 = vld [vmem:[%s14769_s0 + $0x70] ss:$392 sps:$4 sm:$0xff]  }
  0xd5   :  { %10205 = vmatpush3.bf16.msra.mxu1 %v11266_v43  ;;  %v11315_v43 = vld [vmem:[%s14768_s1 + $0x7f8] sm:$0xff]  }
  0xd6   :  { %10206 = vmatprep.subr.bf16.mxu1 %v11269_v46  ;;  %v11319_v46 = vld [vmem:[%s14768_s1 + $0x7b8] sm:$0xff]  }
  0xd7   :  { %10185 = vmatpush3.bf16.msra.mxu0 %v11268_v45  ;;  %v11318_v45 = vld [vmem:[%s14769_s0 + $0x74] ss:$392 sps:$4 sm:$0xff]  }
  0xd8   :  { %10186 = vmatprep.subr.bf16.mxu0 %v11271_v48  ;;  %v11321_v48 = vld [vmem:[%s14769_s0 + $0x78] ss:$392 sps:$4 sm:$0xff]  }
  0xd9   :  { %10207 = vmatpush3.bf16.msra.mxu1 %v11270_v47  ;;  %v11320_v47 = vld [vmem:[%s14768_s1 + $0x840] sm:$0xff]  }
  0xda   :  { %10208 = vmatprep.subr.bf16.mxu1 %v11273_v50  ;;  %v11324_v50 = vld [vmem:[%s14768_s1 + $0x800] sm:$0xff]  }
  0xdb   :  { %10187 = vmatpush3.bf16.msra.mxu0 %v11272_v49  ;;  %v11323_v49 = vld [vmem:[%s14769_s0 + $0x7c] ss:$392 sps:$4 sm:$0xff]  }
  0xdc   :  { %10188 = vmatprep.subr.bf16.mxu0 %v11275_v52 }
  0xdd   :  { %10209 = vmatpush3.bf16.msra.mxu1 %v11274_v51  ;;  %v11325_v51 = vld [vmem:[%s14768_s1 + $0x8c0] sm:$0xff]  }
  0xde   :  { %10210 = vmatprep.subr.bf16.mxu1 %v11277_v54 }
  0xdf   :  { %10189 = vmatpush3.bf16.msra.mxu0 %v11276_v53  ;;  %v11326_v53 = vld [vmem:[%s14768_s1 + $0x880] sm:$0xff]  }
  0xe0   :  { %10218 = vmatprep.subr.bf16.mxu0 %v11282_v58  ;;  %v11328_v58 = vld [vmem:[%s14768_s1 + $0x808] sm:$0xff]  }
  0xe1   :  { %10211 = vmatpush3.bf16.msra.mxu1 %v11281_v57 }
  0xe2   :  { %7413 = vmatmul.mubr.bf16.vlgmr.msra.gmra.mrb[24].mxu0 %v11278_v55  ;;  %10240 = vmatprep.subr.bf16.mxu1 %v11287_v62  ;;  %v11327_v55 = vld [vmem:[%s14768_s1 + $0x848] sm:$0xff]  }
  0xe3   :  { %10219 = vmatpush3.bf16.msra.mxu0 %v11286_v61  ;;  %7494 = vmatprep.mubr.bf16.mxu0 %v11318_v45 }
  0xe4   :  { %7454 = vmatmul.mubr.bf16.vlgmr.msra.gmra.mrb[24].mxu1 %v11283_v59  ;;  %10220 = vmatprep.subr.bf16.mxu0 %v11289_v1 }
  0xe5   :  { %10241 = vmatpush3.bf16.msra.mxu1 %v11288_v63  ;;  %7535 = vmatprep.mubr.bf16.mxu1 %v11323_v49 }
  0xe6   :  { %10242 = vmatprep.subr.bf16.mxu1 %v11291_v6  ;;  %v11332_v6 = vld [vmem:[%s14768_s1 + $0x810] sm:$0xff]  }
  0xe7   :  { %10221 = vmatpush3.bf16.msra.mxu0 %v11290_v3 }
  0xe8   :  { %10222 = vmatprep.subr.bf16.mxu0 %v11293_v10 }
  0xe9   :  { %10243 = vmatpush3.bf16.msra.mxu1 %v11292_v8  ;;  %v11333_v8 = vld [vmem:[%s14768_s1 + $0x8d0] sm:$0xff]  }
  0xea   :  { %10244 = vmatprep.subr.bf16.mxu1 %v11295_v16  ;;  %v11338_v16 = vld [vmem:[%s14768_s1 + $0x898] sm:$0xff]  }
  0xeb   :  { %10223 = vmatpush3.bf16.msra.mxu0 %v11294_v13 }
  0xec   :  { %10224 = vmatprep.subr.bf16.mxu0 %v11297_v20  ;;  %v11342_v20 = vld [vmem:[%s14768_s1 + $0x8a0] sm:$0xff]  }
  0xed   :  { %10245 = vmatpush3.bf16.msra.mxu1 %v11296_v18  ;;  %v11340_v18 = vld [vmem:[%s14768_s1 + $0x820] sm:$0xff]  }
  0xee   :  { %10246 = vmatprep.subr.bf16.mxu1 %v11299_v22  ;;  %v11344_v22 = vld [vmem:[%s14768_s1 + $0x828] sm:$0xff]  }
  0xef   :  { %10225 = vmatpush3.bf16.msra.mxu0 %v11298_v21  ;;  %v11343_v21 = vld [vmem:[%s14768_s1 + $0x868] sm:$0xff]  }
  0xf0   :  { %10226 = vmatprep.subr.bf16.mxu0 %v11301_v24  ;;  %v11346_v24 = vld [vmem:[%s14768_s1 + $0x8a8] sm:$0xff]  }
  0xf1   :  { %10247 = vmatpush3.bf16.msra.mxu1 %v11300_v23  ;;  %v11345_v23 = vld [vmem:[%s14768_s1 + $0x8e8] sm:$0xff]  }
  0xf2   :  { %10248 = vmatprep.subr.bf16.mxu1 %v11303_v26  ;;  %v11348_v26 = vld [vmem:[%s14768_s1 + $0x830] sm:$0xff]  }
  0xf3   :  { %10227 = vmatpush3.bf16.msra.mxu0 %v11302_v25  ;;  %v11347_v25 = vld [vmem:[%s14768_s1 + $0x870] sm:$0xff]  }
  0xf4   :  { %10228 = vmatprep.subr.bf16.mxu0 %v11305_v30  ;;  %v11352_v30 = vld [vmem:[%s14768_s1 + $0x838] sm:$0xff]  }
  0xf5   :  { %v9926_v0 = vpop.f32.mrb[0].mxu0  ;;  %10249 = vmatpush3.bf16.msra.mxu1 %v11304_v27  ;;  %v11349_v27 = vld [vmem:[%s14768_s1 + $0x8f0] sm:$0xff]  }
  0xf6   :  { %v9927_v2 = vpop.f32.mrb[1].mxu0  ;;  %10250 = vmatprep.subr.bf16.mxu1 %v11307_v34  ;;  %v11357_v34 = vld [vmem:[%s14768_s1 + $0x8b8] sm:$0xff]  }
  0xf7   :  { %v9928_v4 = vadd.f32 %v9927_v2, %v9926_v0  ;;  %v9929_v5 = vpop.f32.mrb[2].mxu0  ;;  %v9948_v7 = vpop.f32.mrb[0].mxu1  ;;  %10229 = vmatpush3.bf16.msra.mxu0 %v11306_v32  ;;  %v11330_v0 = vld [vmem:[%s14768_s1 + $0x888] sm:$0xff]   ;;  %v11331_v2 = vld [vmem:[%s14768_s1 + $0x850] sm:$0xff]  }
  0xf8   :  { %v9930_v9 = vpop.f32.mrb[3].mxu0  ;;  %v9949_v12 = vpop.f32.mrb[1].mxu1  ;;  %10230 = vmatprep.subr.bf16.mxu0 %v11309_v37  ;;  %v11354_v32 = vld [vmem:[%s14769_s0 + $0x80] ss:$392 sps:$4 sm:$0xff]   ;;  %v11361_v37 = vld [vmem:[%s14769_s0 + $0x8c] ss:$392 sps:$4 sm:$0xff]  }
  0xf9   :  { %v9931_v11 = vadd.f32 %v9930_v9, %v9929_v5  ;;  %v9950_v14 = vadd.f32 %v9949_v12, %v9948_v7  ;;  %v9951_v15 = vpop.f32.mrb[2].mxu1  ;;  %v6923_v29 = vadd.f32 %v9928_v4, %v9018_v28  ;;  %10251 = vmatpush3.bf16.msra.mxu1 %v11308_v36  ;;  %v11335_v12 = vld [vmem:[%s14768_s1 + $0x858] sm:$0xff]   ;;  %v11359_v36 = vld [vmem:[%s14769_s0 + $0x88] ss:$392 sps:$4 sm:$0xff]  }
  0xfa   :  { %v9952_v17 = vpop.f32.mrb[3].mxu1  ;;  %10252 = vmatprep.subr.bf16.mxu1 %v11311_v39  ;;  %v11363_v39 = vld [vmem:[%s14768_s1 + $0x9c0] sm:$0xff]  }
  0xfb   :  { %v9953_v19 = vadd.f32 %v9952_v17, %v9951_v15  ;;  %v6926_v31 = vadd.f32 %v9931_v11, %v9018_v28  ;;  %v6964_v33 = vadd.f32 %v9950_v14, %v6923_v29  ;;  %10231 = vmatpush3.bf16.msra.mxu0 %v11310_v38  ;;  %v11334_v11 = vld [vmem:[%s14768_s1 + $0x890] sm:$0xff]   ;;  %v11336_v14 = vld [vmem:[%s14768_s1 + $0x818] sm:$0xff]   ;;  %v11339_v17 = vld [vmem:[%s14768_s1 + $0x860] sm:$0xff]  }
  0xfc   :  { %10232 = vmatprep.subr.bf16.mxu0 %v11313_v41  ;;  %v11337_v15 = vld [vmem:[%s14768_s1 + $0x8d8] sm:$0xff]   ;;  %v11350_v28 = vld [vmem:[%s14768_s1 + $0x8b0] sm:$0xff]   ;;  %v11362_v38 = vld [vmem:[%s14768_s1 + $0x900] sm:$0xff]  }
  0xfd   :  { %v6967_v35 = vadd.f32 %v9953_v19, %v6926_v31  ;;  %10253 = vmatpush3.bf16.msra.mxu1 %v11312_v40  ;;  %v11341_v19 = vld [vmem:[%s14768_s1 + $0x8e0] sm:$0xff]   ;;  %v11351_v29 = vld [vmem:[%s14768_s1 + $0x878] sm:$0xff]  }
  0xfe   :  { %10254 = vmatprep.subr.bf16.mxu1 %v11315_v43  ;;  %v11353_v31 = vld [vmem:[%s14768_s1 + $0x8f8] sm:$0xff]   ;;  %v11364_v41 = vld [vmem:[%s14768_s1 + $0x980] sm:$0xff]   ;;  %v11365_v43 = vld [vmem:[%s14768_s1 + $0x948] sm:$0xff]  }
  0xff   :  { %10233 = vmatpush3.bf16.msra.mxu0 %v11314_v42 }
 0x100   :  { %10262 = vmatprep.subr.bf16.mxu0 %v11320_v47 }
 0x101   :  { %10255 = vmatpush3.bf16.msra.mxu1 %v11319_v46  ;;  %v11366_v46 = vld [vmem:[%s14768_s1 + $0x908] sm:$0xff]  }
 0x102   :  { %7495 = vmatmul.mubr.bf16.vlgmr.msra.gmra.mrb[28].mxu0 %v11316_v44  ;;  %10284 = vmatprep.subr.bf16.mxu1 %v11325_v51  ;;  %v11368_v51 = vld [vmem:[%s14768_s1 + $0x988] sm:$0xff]  }
 0x103   :  { %10263 = vmatpush3.bf16.msra.mxu0 %v11324_v50 }
 0x104   :  { %7536 = vmatmul.mubr.bf16.vlgmr.msra.gmra.mrb[28].mxu1 %v11321_v48  ;;  %10264 = vmatprep.subr.bf16.mxu0 %v11327_v55  ;;  %v11367_v48 = vld [vmem:[%s14768_s1 + $0x9c8] sm:$0xff]  }
 0x105   :  { %10285 = vmatpush3.bf16.msra.mxu1 %v11326_v53  ;;  %7617 = vmatprep.mubr.bf16.mxu1 %v11361_v37  ;;  %v11406_v37 = vld [vmem:[%s14768_s1 + $0xa88] sm:$0xff]  }
 0x106   :  { %10286 = vmatprep.subr.bf16.mxu1 %v11329_v60  ;;  %v11371_v60 = vld [vmem:[%s14768_s1 + $0x9d0] sm:$0xff]  }
 0x107   :  { %10265 = vmatpush3.bf16.msra.mxu0 %v11328_v58 }
 0x108   :  { %10266 = vmatprep.subr.bf16.mxu0 %v11331_v2  ;;  %v11374_v2 = vld [vmem:[%s14768_s1 + $0x918] sm:$0xff]  }
 0x109   :  { %10287 = vmatpush3.bf16.msra.mxu1 %v11330_v0  ;;  %v11373_v0 = vld [vmem:[%s14768_s1 + $0x958] sm:$0xff]  }
 0x10a   :  { %10288 = vmatprep.subr.bf16.mxu1 %v11333_v8  ;;  %v11380_v8 = vld [vmem:[%s14768_s1 + $0x9a0] sm:$0xff]  }
 0x10b   :  { %10267 = vmatpush3.bf16.msra.mxu0 %v11332_v6  ;;  %v11378_v6 = vld [vmem:[%s14768_s1 + $0x920] sm:$0xff]  }
 0x10c   :  { %10268 = vmatprep.subr.bf16.mxu0 %v11335_v12  ;;  %v11384_v12 = vld [vmem:[%s14768_s1 + $0x9a8] sm:$0xff]  }
 0x10d   :  { %10289 = vmatpush3.bf16.msra.mxu1 %v11334_v11  ;;  %v11383_v11 = vld [vmem:[%s14768_s1 + $0x9e8] sm:$0xff]  }
 0x10e   :  { %10290 = vmatprep.subr.bf16.mxu1 %v11337_v15  ;;  %v11387_v15 = vld [vmem:[%s14768_s1 + $0x9f0] sm:$0xff]  }
 0x10f   :  { %10269 = vmatpush3.bf16.msra.mxu0 %v11336_v14  ;;  %v11386_v14 = vld [vmem:[%s14768_s1 + $0x930] sm:$0xff]  }
 0x110   :  { %10270 = vmatprep.subr.bf16.mxu0 %v11339_v17  ;;  %v11389_v17 = vld [vmem:[%s14768_s1 + $0x978] sm:$0xff]  }
 0x111   :  { %10291 = vmatpush3.bf16.msra.mxu1 %v11338_v16  ;;  %v11388_v16 = vld [vmem:[%s14768_s1 + $0x9b0] sm:$0xff]  }
 0x112   :  { %10292 = vmatprep.subr.bf16.mxu1 %v11341_v19  ;;  %v11391_v19 = vld [vmem:[%s14768_s1 + $0x9f8] sm:$0xff]  }
 0x113   :  { %10271 = vmatpush3.bf16.msra.mxu0 %v11340_v18  ;;  %v11390_v18 = vld [vmem:[%s14768_s1 + $0x938] sm:$0xff]  }
 0x114   :  { %10272 = vmatprep.subr.bf16.mxu0 %v11343_v21  ;;  %v11394_v21 = vld [vmem:[%s14769_s0 + $0x94] ss:$392 sps:$4 sm:$0xff]  }
 0x115   :  { %v9970_v52 = vpop.f32.mrb[4].mxu0  ;;  %10293 = vmatpush3.bf16.msra.mxu1 %v11342_v20  ;;  %v11392_v20 = vld [vmem:[%s14769_s0 + $0x90] ss:$392 sps:$4 sm:$0xff]  }
 0x116   :  { %v9971_v54 = vpop.f32.mrb[5].mxu0  ;;  %10294 = vmatprep.subr.bf16.mxu1 %v11345_v23  ;;  %v11396_v23 = vld [vmem:[%s14768_s1 + $0xa40] sm:$0xff]  }
 0x117   :  { %v9972_v56 = vadd.f32 %v9971_v54, %v9970_v52  ;;  %v9973_v57 = vpop.f32.mrb[6].mxu0  ;;  %v9992_v62 = vpop.f32.mrb[4].mxu1  ;;  %10273 = vmatpush3.bf16.msra.mxu0 %v11344_v22  ;;  %v11369_v54 = vld [vmem:[%s14768_s1 + $0x950] sm:$0xff]   ;;  %v11395_v22 = vld [vmem:[%s14768_s1 + $0x9b8] sm:$0xff]  }
 0x118   :  { %v9974_v59 = vpop.f32.mrb[7].mxu0  ;;  %v9993_v1 = vpop.f32.mrb[5].mxu1  ;;  %10274 = vmatprep.subr.bf16.mxu0 %v11347_v25  ;;  %v11399_v25 = vld [vmem:[%s14769_s0 + $0x9c] ss:$392 sps:$4 sm:$0xff]  }
 0x119   :  { %v7005_v61 = vadd.f32 %v9972_v56, %v6964_v33  ;;  %v9975_v63 = vadd.f32 %v9974_v59, %v9973_v57  ;;  %v9994_v4 = vadd.f32 %v9993_v1, %v9992_v62  ;;  %v9995_v5 = vpop.f32.mrb[6].mxu1  ;;  %10295 = vmatpush3.bf16.msra.mxu1 %v11346_v24  ;;  %v11356_v33 = vld [vmem:[%s14769_s0 + $0x84] ss:$392 sps:$4 sm:$0xff]   ;;  %v11370_v57 = vld [vmem:[%s14768_s1 + $0x910] sm:$0xff]   ;;  %v11397_v24 = vld [vmem:[%s14769_s0 + $0x98] ss:$392 sps:$4 sm:$0xff]  }
 0x11a   :  { %v9996_v7 = vpop.f32.mrb[7].mxu1  ;;  %10296 = vmatprep.subr.bf16.mxu1 %v11349_v27  ;;  %7576 = vmatprep.mubr.bf16.mxu0 %v11356_v33  ;;  %v11401_v27 = vld [vmem:[%s14768_s1 + $0xac0] sm:$0xff]  }
 0x11b   :  { %v7008_v3 = vadd.f32 %v9975_v63, %v6967_v35  ;;  %v12890_v9 = vadd.f32 %v9994_v4, %v7005_v61  ;;  %v9997_v10 = vadd.f32 %v9996_v7, %v9995_v5  ;;  %10275 = vmatpush3.bf16.msra.mxu0 %v11348_v26  ;;  %v11358_v35 = vld [vmem:[%s14768_s1 + $0x940] sm:$0xff]   ;;  %v11372_v63 = vld [vmem:[%s14768_s1 + $0x990] sm:$0xff]   ;;  %v11376_v4 = vld [vmem:[%s14768_s1 + $0x998] sm:$0xff]  }
 0x11c   :  { %10276 = vmatprep.subr.bf16.mxu0 %v11351_v29  ;;  %v11377_v5 = vld [vmem:[%s14768_s1 + $0x960] sm:$0xff]  }
 0x11d   :  { %v12898_v13 = vadd.f32 %v9997_v10, %v7008_v3  ;;  %10297 = vmatpush3.bf16.msra.mxu1 %v11350_v28  ;;  %v11375_v3 = vld [vmem:[%s14768_s1 + $0x9d8] sm:$0xff]   ;;  %v11379_v7 = vld [vmem:[%s14768_s1 + $0x9e0] sm:$0xff]   ;;  %v11382_v10 = vld [vmem:[%s14768_s1 + $0x928] sm:$0xff]  }
 0x11e   :  { %10298 = vmatprep.subr.bf16.mxu1 %v11353_v31  ;;  %v11400_v26 = vld [vmem:[%s14768_s1 + $0xa00] sm:$0xff]  }
 0x11f   :  { %10277 = vmatpush3.bf16.msra.mxu0 %v11352_v30  ;;  %v11402_v28 = vld [vmem:[%s14768_s1 + $0xa80] sm:$0xff]   ;;  %v11403_v30 = vld [vmem:[%s14768_s1 + $0xa48] sm:$0xff]  }
 0x120   :  { %10306 = vmatprep.subr.bf16.mxu0 %v11358_v35  ;;  %v11405_v35 = vld [vmem:[%s14768_s1 + $0xac8] sm:$0xff]  }
 0x121   :  { %10299 = vmatpush3.bf16.msra.mxu1 %v11357_v34 }
 0x122   :  { %7577 = vmatmul.mubr.bf16.vlgmr.msra.gmra.mrb[32].mxu0 %v11354_v32  ;;  %10328 = vmatprep.subr.bf16.mxu1 %v11363_v39  ;;  %v11404_v32 = vld [vmem:[%s14768_s1 + $0xa08] sm:$0xff]  }
 0x123   :  { %10307 = vmatpush3.bf16.msra.mxu0 %v11362_v38  ;;  %7658 = vmatprep.mubr.bf16.mxu0 %v11394_v21 }
 0x124   :  { %7618 = vmatmul.mubr.bf16.vlgmr.msra.gmra.mrb[32].mxu1 %v11359_v36  ;;  %10308 = vmatprep.subr.bf16.mxu0 %v11365_v43  ;;  %v11408_v43 = vld [vmem:[%s14768_s1 + $0xa10] sm:$0xff]  }
 0x125   :  { %10329 = vmatpush3.bf16.msra.mxu1 %v11364_v41  ;;  %7699 = vmatprep.mubr.bf16.mxu1 %v11399_v25 }
 0x126   :  { %10330 = vmatprep.subr.bf16.mxu1 %v11367_v48 }
 0x127   :  { %10309 = vmatpush3.bf16.msra.mxu0 %v11366_v46  ;;  %v11409_v46 = vld [vmem:[%s14768_s1 + $0xad0] sm:$0xff]  }
 0x128   :  { %10310 = vmatprep.subr.bf16.mxu0 %v11369_v54 }
 0x129   :  { %10331 = vmatpush3.bf16.msra.mxu1 %v11368_v51 }
 0x12a   :  { %10332 = vmatprep.subr.bf16.mxu1 %v11371_v60  ;;  %v11418_v60 = vld [vmem:[%s14768_s1 + $0xaa0] sm:$0xff]  }
 0x12b   :  { %10311 = vmatpush3.bf16.msra.mxu0 %v11370_v57  ;;  %v11415_v57 = vld [vmem:[%s14768_s1 + $0xa60] sm:$0xff]  }
 0x12c   :  { %10312 = vmatprep.subr.bf16.mxu0 %v11373_v0  ;;  %v11422_v0 = vld [vmem:[%s14768_s1 + $0xaa8] sm:$0xff]  }
 0x12d   :  { %10333 = vmatpush3.bf16.msra.mxu1 %v11372_v63  ;;  %v11421_v63 = vld [vmem:[%s14768_s1 + $0xae8] sm:$0xff]  }
 0x12e   :  { %10334 = vmatprep.subr.bf16.mxu1 %v11375_v3  ;;  %v11425_v3 = vld [vmem:[%s14768_s1 + $0xaf0] sm:$0xff]  }
 0x12f   :  { %10313 = vmatpush3.bf16.msra.mxu0 %v11374_v2  ;;  %v11424_v2 = vld [vmem:[%s14768_s1 + $0xa30] sm:$0xff]  }
 0x130   :  { %10314 = vmatprep.subr.bf16.mxu0 %v11377_v5  ;;  %v11427_v5 = vld [vmem:[%s14768_s1 + $0xa78] sm:$0xff]  }
 0x131   :  { %10335 = vmatpush3.bf16.msra.mxu1 %v11376_v4  ;;  %v11426_v4 = vld [vmem:[%s14768_s1 + $0xab0] sm:$0xff]  }
 0x132   :  { %10336 = vmatprep.subr.bf16.mxu1 %v11379_v7  ;;  %v11429_v7 = vld [vmem:[%s14768_s1 + $0xaf8] sm:$0xff]  }
 0x133   :  { %10315 = vmatpush3.bf16.msra.mxu0 %v11378_v6  ;;  %v11428_v6 = vld [vmem:[%s14768_s1 + $0xa38] sm:$0xff]  }
 0x135   :  { %v10014_v40 = vpop.f32.mrb[8].mxu0  ;;  %10337 = vmatpush3.bf16.msra.mxu1 %v11380_v8  ;;  %v11430_v8 = vld [vmem:[%s14769_s0 + $0xa0] ss:$392 sps:$4 sm:$0xff]  }
 0x136   :  { %v10015_v42 = vpop.f32.mrb[9].mxu0  ;;  %10338 = vmatprep.subr.bf16.mxu1 %v11383_v11  ;;  %v11434_v11 = vld [vmem:[%s14768_s1 + $0xb40] sm:$0xff]  }
 0x137   :  { %v10016_v44 = vadd.f32 %v10015_v42, %v10014_v40  ;;  %v10017_v45 = vpop.f32.mrb[10].mxu0  ;;  %v10036_v47 = vpop.f32.mrb[8].mxu1  ;;  %v11407_v40 = vld [vmem:[%s14768_s1 + $0xa50] sm:$0xff]  }
 0x138   :  { %v10018_v50 = vpop.f32.mrb[11].mxu0  ;;  %v10037_v53 = vpop.f32.mrb[9].mxu1 }
 0x139   :  { %v7087_v49 = vadd.f32 %v10016_v44, %v12890_v9  ;;  %v10019_v52 = vadd.f32 %v10018_v50, %v10017_v45  ;;  %v10038_v55 = vadd.f32 %v10037_v53, %v10036_v47  ;;  %v10039_v56 = vpop.f32.mrb[10].mxu1  ;;  %v11381_v9 = vld [vmem:[%s14768_s1 + $0x968] sm:$0xff]   ;;  %10339 = vmatpush3.bf16.msra.mxu1 %v11384_v12  ;;  %v11412_v53 = vld [vmem:[%s14768_s1 + $0xa18] sm:$0xff]  }
 0x13a   :  { %v10040_v59 = vpop.f32.mrb[11].mxu1  ;;  %10316 = vmatprep.subr.bf16.mxu0 %v11381_v9  ;;  %10340 = vmatprep.subr.bf16.mxu1 %v11387_v15  ;;  %v11432_v9 = vld [vmem:[%s14769_s0 + $0xa4] ss:$392 sps:$4 sm:$0xff]   ;;  %v11435_v12 = vld [vmem:[%s14769_s0 + $0xa8] ss:$392 sps:$4 sm:$0xff]  }
 0x13b   :  { %v7090_v58 = vadd.f32 %v10019_v52, %v12898_v13  ;;  %v13004_v61 = vadd.f32 %v10038_v55, %v7087_v49  ;;  %v10041_v62 = vadd.f32 %v10040_v59, %v10039_v56  ;;  %10317 = vmatpush3.bf16.msra.mxu0 %v11382_v10  ;;  %v11385_v13 = vld [vmem:[%s14768_s1 + $0x970] sm:$0xff]   ;;  %v11411_v52 = vld [vmem:[%s14768_s1 + $0xa58] sm:$0xff]   ;;  %v11417_v59 = vld [vmem:[%s14768_s1 + $0xae0] sm:$0xff]  }
 0x13c   :  { %10318 = vmatprep.subr.bf16.mxu0 %v11385_v13  ;;  %v11410_v49 = vld [vmem:[%s14768_s1 + $0xa90] sm:$0xff]   ;;  %v11413_v55 = vld [vmem:[%s14768_s1 + $0xad8] sm:$0xff]   ;;  %v11439_v15 = vld [vmem:[%s14768_s1 + $0xbc0] sm:$0xff]  }
 0x13d   :  { %v13012_v1 = vadd.f32 %v10041_v62, %v7090_v58  ;;  %10341 = vmatpush3.bf16.msra.mxu1 %v11388_v16  ;;  %v11414_v56 = vld [vmem:[%s14768_s1 + $0xa98] sm:$0xff]   ;;  %v11416_v58 = vld [vmem:[%s14768_s1 + $0xa20] sm:$0xff]   ;;  %v11420_v62 = vld [vmem:[%s14768_s1 + $0xa28] sm:$0xff]  }
 0x13e   :  { %10342 = vmatprep.subr.bf16.mxu1 %v11391_v19  ;;  %v11433_v10 = vld [vmem:[%s14768_s1 + $0xab8] sm:$0xff]   ;;  %v11437_v13 = vld [vmem:[%s14769_s0 + $0xac] ss:$392 sps:$4 sm:$0xff]  }
 0x13f   :  { %10319 = vmatpush3.bf16.msra.mxu0 %v11386_v14  ;;  %v11438_v14 = vld [vmem:[%s14768_s1 + $0xb00] sm:$0xff]   ;;  %v11441_v19 = vld [vmem:[%s14768_s1 + $0xb48] sm:$0xff]  }
 0x140   :  { %10320 = vmatprep.subr.bf16.mxu0 %v11389_v17  ;;  %v11440_v17 = vld [vmem:[%s14768_s1 + $0xb80] sm:$0xff]  }
 0x141   :  { %10343 = vmatpush3.bf16.msra.mxu1 %v11395_v22  ;;  %v11442_v22 = vld [vmem:[%s14768_s1 + $0xb08] sm:$0xff]  }
 0x142   :  { %10372 = vmatprep.subr.bf16.mxu1 %v11401_v27 }
 0x143   :  { %10321 = vmatpush3.bf16.msra.mxu0 %v11390_v18 }
 0x144   :  { %10350 = vmatprep.subr.bf16.mxu0 %v11396_v23  ;;  %7700 = vmatmul.mubr.bf16.vlgmr.msra.gmra.mrb[36].mxu1 %v11397_v24  ;;  %v11443_v24 = vld [vmem:[%s14768_s1 + $0xbc8] sm:$0xff]  }
 0x145   :  { %10373 = vmatpush3.bf16.msra.mxu1 %v11402_v28  ;;  %7781 = vmatprep.mubr.bf16.mxu1 %v11437_v13  ;;  %v11444_v28 = vld [vmem:[%s14768_s1 + $0xb88] sm:$0xff]  }
 0x146   :  { %7659 = vmatmul.mubr.bf16.vlgmr.msra.gmra.mrb[36].mxu0 %v11392_v20  ;;  %10374 = vmatprep.subr.bf16.mxu1 %v11405_v35 }
 0x147   :  { %10351 = vmatpush3.bf16.msra.mxu0 %v11400_v26  ;;  %7740 = vmatprep.mubr.bf16.mxu0 %v11432_v9 }
 0x148   :  { %10352 = vmatprep.subr.bf16.mxu0 %v11403_v30  ;;  %v11445_v30 = vld [vmem:[%s14768_s1 + $0xb50] sm:$0xff]  }
 0x149   :  { %10375 = vmatpush3.bf16.msra.mxu1 %v11406_v37 }
 0x14a   :  { %10376 = vmatprep.subr.bf16.mxu1 %v11409_v46  ;;  %v11454_v46 = vld [vmem:[%s14768_s1 + $0xb20] sm:$0xff]  }
 0x14b   :  { %10353 = vmatpush3.bf16.msra.mxu0 %v11404_v32 }
 0x14c   :  { %10354 = vmatprep.subr.bf16.mxu0 %v11407_v40  ;;  %v11449_v40 = vld [vmem:[%s14768_s1 + $0xb58] sm:$0xff]  }
 0x14d   :  { %10377 = vmatpush3.bf16.msra.mxu1 %v11410_v49  ;;  %v11457_v49 = vld [vmem:[%s14768_s1 + $0xb68] sm:$0xff]  }
 0x14e   :  { %10378 = vmatprep.subr.bf16.mxu1 %v11413_v55  ;;  %v11463_v55 = vld [vmem:[%s14768_s1 + $0xbf0] sm:$0xff]  }
 0x14f   :  { %10355 = vmatpush3.bf16.msra.mxu0 %v11408_v43  ;;  %v11451_v43 = vld [vmem:[%s14768_s1 + $0xbd8] sm:$0xff]  }
 0x150   :  { %10356 = vmatprep.subr.bf16.mxu0 %v11411_v52  ;;  %v11460_v52 = vld [vmem:[%s14768_s1 + $0xba8] sm:$0xff]  }
 0x151   :  { %10379 = vmatpush3.bf16.msra.mxu1 %v11414_v56  ;;  %v11464_v56 = vld [vmem:[%s14768_s1 + $0xbb0] sm:$0xff]  }
 0x152   :  { %10380 = vmatprep.subr.bf16.mxu1 %v11417_v59  ;;  %v11467_v59 = vld [vmem:[%s14768_s1 + $0xbf8] sm:$0xff]  }
 0x153   :  { %10357 = vmatpush3.bf16.msra.mxu0 %v11412_v53  ;;  %v11461_v53 = vld [vmem:[%s14768_s1 + $0xb70] sm:$0xff]  }
 0x154   :  { %10358 = vmatprep.subr.bf16.mxu0 %v11415_v57  ;;  %v11465_v57 = vld [vmem:[%s14768_s1 + $0xb78] sm:$0xff]  }
 0x155   :  { %v10058_v29 = vpop.f32.mrb[12].mxu0  ;;  %10381 = vmatpush3.bf16.msra.mxu1 %v11418_v60  ;;  %v11468_v60 = vld [vmem:[%s14769_s0 + $0xb0] ss:$392 sps:$4 sm:$0xff]  }
 0x156   :  { %v10059_v31 = vpop.f32.mrb[13].mxu0  ;;  %10382 = vmatprep.subr.bf16.mxu1 %v11421_v63  ;;  %v11472_v63 = vld [vmem:[%s14768_s1 + $0xc40] sm:$0xff]  }
 0x157   :  { %v10060_v33 = vadd.f32 %v10059_v31, %v10058_v29  ;;  %v10061_v34 = vpop.f32.mrb[14].mxu0  ;;  %v10080_v36 = vpop.f32.mrb[12].mxu1  ;;  %10359 = vmatpush3.bf16.msra.mxu0 %v11416_v58  ;;  %v11466_v58 = vld [vmem:[%s14768_s1 + $0xb38] sm:$0xff]  }
 0x158   :  { %v10062_v39 = vpop.f32.mrb[15].mxu0  ;;  %v10081_v42 = vpop.f32.mrb[13].mxu1 }
 0x159   :  { %v7169_v38 = vadd.f32 %v10060_v33, %v13004_v61  ;;  %v10063_v41 = vadd.f32 %v10062_v39, %v10061_v34  ;;  %v10082_v44 = vadd.f32 %v10081_v42, %v10080_v36  ;;  %v10083_v45 = vpop.f32.mrb[14].mxu1  ;;  %v11419_v61 = vld [vmem:[%s14768_s1 + $0xa68] sm:$0xff]   ;;  %10383 = vmatpush3.bf16.msra.mxu1 %v11422_v0  ;;  %v11446_v34 = vld [vmem:[%s14768_s1 + $0xb10] sm:$0xff]   ;;  %v11450_v42 = vld [vmem:[%s14768_s1 + $0xb18] sm:$0xff]  }
 0x15a   :  { %v10084_v48 = vpop.f32.mrb[15].mxu1  ;;  %10360 = vmatprep.subr.bf16.mxu0 %v11419_v61  ;;  %10384 = vmatprep.subr.bf16.mxu1 %v11425_v3  ;;  %v11447_v36 = vld [vmem:[%s14768_s1 + $0xbd0] sm:$0xff]   ;;  %v11473_v0 = vld [vmem:[%s14769_s0 + $0xb8] ss:$392 sps:$4 sm:$0xff]  }
 0x15b   :  { %v7172_v47 = vadd.f32 %v10063_v41, %v13012_v1  ;;  %v13121_v50 = vadd.f32 %v10082_v44, %v7169_v38  ;;  %v10085_v51 = vadd.f32 %v10084_v48, %v10083_v45  ;;  %10361 = vmatpush3.bf16.msra.mxu0 %v11420_v62  ;;  %v11423_v1 = vld [vmem:[%s14768_s1 + $0xa70] sm:$0xff]   ;;  %v11452_v44 = vld [vmem:[%s14768_s1 + $0xb98] sm:$0xff]   ;;  %v11453_v45 = vld [vmem:[%s14768_s1 + $0xb60] sm:$0xff]  }
 0x15c   :  { %10362 = vmatprep.subr.bf16.mxu0 %v11423_v1  ;;  %v11448_v39 = vld [vmem:[%s14768_s1 + $0xb90] sm:$0xff]   ;;  %v11456_v48 = vld [vmem:[%s14768_s1 + $0xba0] sm:$0xff]   ;;  %v11471_v62 = vld [vmem:[%s14768_s1 + $0xbb8] sm:$0xff]  }
 0x15d   :  { %v13129_v54 = vadd.f32 %v10085_v51, %v7172_v47  ;;  %10385 = vmatpush3.bf16.msra.mxu1 %v11426_v4  ;;  %v11455_v47 = vld [vmem:[%s14768_s1 + $0xbe0] sm:$0xff]   ;;  %v11459_v51 = vld [vmem:[%s14768_s1 + $0xbe8] sm:$0xff]   ;;  %v11470_v61 = vld [vmem:[%s14769_s0 + $0xb4] ss:$392 sps:$4 sm:$0xff]  }
 0x15e   :  { %10386 = vmatprep.subr.bf16.mxu1 %v11429_v7  ;;  %v11475_v1 = vld [vmem:[%s14769_s0 + $0xbc] ss:$392 sps:$4 sm:$0xff]   ;;  %v11479_v7 = vld [vmem:[%s14768_s1 + $0xc48] sm:$0xff]  }
 0x15f   :  { %10363 = vmatpush3.bf16.msra.mxu0 %v11424_v2  ;;  %v11476_v2 = vld [vmem:[%s14768_s1 + $0xc00] sm:$0xff]  }
 0x160   :  { %10364 = vmatprep.subr.bf16.mxu0 %v11427_v5  ;;  %v11477_v3 = vld [vmem:[%s14768_s1 + $0xcc0] sm:$0xff]  }
 0x161   :  { %10387 = vmatpush3.bf16.msra.mxu1 %v11433_v10  ;;  %v11478_v5 = vld [vmem:[%s14768_s1 + $0xc80] sm:$0xff]   ;;  %v11480_v10 = vld [vmem:[%s14768_s1 + $0xc08] sm:$0xff]  }
 0x162   :  { %10416 = vmatprep.subr.bf16.mxu1 %v11439_v15  ;;  %v11482_v15 = vld [vmem:[%s14768_s1 + $0xc88] sm:$0xff]  }
 0x163   :  { %10365 = vmatpush3.bf16.msra.mxu0 %v11428_v6 }
 0x164   :  { %10394 = vmatprep.subr.bf16.mxu0 %v11434_v11  ;;  %7782 = vmatmul.mubr.bf16.vlgmr.msra.gmra.mrb[40].mxu1 %v11435_v12  ;;  %v11481_v12 = vld [vmem:[%s14768_s1 + $0xcc8] sm:$0xff]  }
 0x165   :  { %10417 = vmatpush3.bf16.msra.mxu1 %v11440_v17  ;;  %7863 = vmatprep.mubr.bf16.mxu1 %v11475_v1  ;;  %v11520_v1 = vld [vmem:[%s14768_s1 + $0xd88] sm:$0xff]  }
 0x166   :  { %7741 = vmatmul.mubr.bf16.vlgmr.msra.gmra.mrb[40].mxu0 %v11430_v8  ;;  %10418 = vmatprep.subr.bf16.mxu1 %v11443_v24  ;;  %v11485_v24 = vld [vmem:[%s14768_s1 + $0xcd0] sm:$0xff]  }
 0x167   :  { %10395 = vmatpush3.bf16.msra.mxu0 %v11438_v14  ;;  %7822 = vmatprep.mubr.bf16.mxu0 %v11470_v61 }
 0x168   :  { %10396 = vmatprep.subr.bf16.mxu0 %v11441_v19 }
 0x169   :  { %10419 = vmatpush3.bf16.msra.mxu1 %v11444_v28  ;;  %v11487_v28 = vld [vmem:[%s14768_s1 + $0xc58] sm:$0xff]  }
 0x16a   :  { %10420 = vmatprep.subr.bf16.mxu1 %v11447_v36  ;;  %v11494_v36 = vld [vmem:[%s14768_s1 + $0xca0] sm:$0xff]  }
 0x16b   :  { %10397 = vmatpush3.bf16.msra.mxu0 %v11442_v22 }
 0x16c   :  { %10398 = vmatprep.subr.bf16.mxu0 %v11445_v30  ;;  %v11488_v30 = vld [vmem:[%s14768_s1 + $0xc18] sm:$0xff]  }
 0x16d   :  { %10421 = vmatpush3.bf16.msra.mxu1 %v11448_v39  ;;  %v11497_v39 = vld [vmem:[%s14768_s1 + $0xce8] sm:$0xff]  }
 0x16e   :  { %10422 = vmatprep.subr.bf16.mxu1 %v11451_v43  ;;  %v11501_v43 = vld [vmem:[%s14768_s1 + $0xcf0] sm:$0xff]  }
 0x16f   :  { %10399 = vmatpush3.bf16.msra.mxu0 %v11446_v34  ;;  %v11492_v34 = vld [vmem:[%s14768_s1 + $0xc20] sm:$0xff]  }
 0x170   :  { %10400 = vmatprep.subr.bf16.mxu0 %v11449_v40  ;;  %v11498_v40 = vld [vmem:[%s14768_s1 + $0xca8] sm:$0xff]  }
 0x171   :  { %10423 = vmatpush3.bf16.msra.mxu1 %v11452_v44  ;;  %v11502_v44 = vld [vmem:[%s14768_s1 + $0xcb0] sm:$0xff]  }
 0x172   :  { %10424 = vmatprep.subr.bf16.mxu1 %v11455_v47  ;;  %v11505_v47 = vld [vmem:[%s14768_s1 + $0xcf8] sm:$0xff]  }
 0x173   :  { %10401 = vmatpush3.bf16.msra.mxu0 %v11450_v42  ;;  %v11500_v42 = vld [vmem:[%s14768_s1 + $0xc30] sm:$0xff]  }
 0x174   :  { %10402 = vmatprep.subr.bf16.mxu0 %v11453_v45  ;;  %v11503_v45 = vld [vmem:[%s14768_s1 + $0xc78] sm:$0xff]  }
 0x175   :  { %v10102_v16 = vpop.f32.mrb[16].mxu0  ;;  %10425 = vmatpush3.bf16.msra.mxu1 %v11456_v48  ;;  %v11506_v48 = vld [vmem:[%s14769_s0 + $0xc0] ss:$392 sps:$4 sm:$0xff]  }
 0x176   :  { %v10103_v18 = vpop.f32.mrb[17].mxu0  ;;  %10426 = vmatprep.subr.bf16.mxu1 %v11459_v51  ;;  %v11510_v51 = vld [vmem:[%s14768_s1 + $0xd40] sm:$0xff]  }
 0x177   :  { %v10104_v20 = vadd.f32 %v10103_v18, %v10102_v16  ;;  %v10105_v21 = vpop.f32.mrb[18].mxu0  ;;  %v10124_v26 = vpop.f32.mrb[16].mxu1  ;;  %10403 = vmatpush3.bf16.msra.mxu0 %v11454_v46  ;;  %v11483_v18 = vld [vmem:[%s14768_s1 + $0xc50] sm:$0xff]   ;;  %v11504_v46 = vld [vmem:[%s14768_s1 + $0xc38] sm:$0xff]  }
 0x178   :  { %v10106_v23 = vpop.f32.mrb[19].mxu0  ;;  %v10125_v29 = vpop.f32.mrb[17].mxu1  ;;  %10404 = vmatprep.subr.bf16.mxu0 %v11457_v49  ;;  %v11508_v49 = vld [vmem:[%s14769_s0 + $0xc4] ss:$392 sps:$4 sm:$0xff]  }
 0x179   :  { %v7251_v25 = vadd.f32 %v10104_v20, %v13121_v50  ;;  %v10107_v27 = vadd.f32 %v10106_v23, %v10105_v21  ;;  %v10126_v32 = vadd.f32 %v10125_v29, %v10124_v26  ;;  %v10127_v33 = vpop.f32.mrb[18].mxu1  ;;  %v11458_v50 = vld [vmem:[%s14768_s1 + $0xb28] sm:$0xff]   ;;  %10427 = vmatpush3.bf16.msra.mxu1 %v11460_v52  ;;  %v11484_v21 = vld [vmem:[%s14768_s1 + $0xc10] sm:$0xff]  }
 0x17a   :  { %v10128_v35 = vpop.f32.mrb[19].mxu1  ;;  %10428 = vmatprep.subr.bf16.mxu1 %v11463_v55  ;;  %v11511_v52 = vld [vmem:[%s14769_s0 + $0xc8] ss:$392 sps:$4 sm:$0xff]   ;;  %v11515_v55 = vld [vmem:[%s14768_s1 + $0xdc0] sm:$0xff]  }
 0x17b   :  { %v7254_v31 = vadd.f32 %v10107_v27, %v13129_v54  ;;  %v13232_v37 = vadd.f32 %v10126_v32, %v7251_v25  ;;  %v10129_v38 = vadd.f32 %v10128_v35, %v10127_v33  ;;  %10405 = vmatpush3.bf16.msra.mxu0 %v11458_v50  ;;  %v11462_v54 = vld [vmem:[%s14768_s1 + $0xb30] sm:$0xff]   ;;  %v11490_v32 = vld [vmem:[%s14768_s1 + $0xc98] sm:$0xff]   ;;  %v11491_v33 = vld [vmem:[%s14768_s1 + $0xc60] sm:$0xff]  }
 0x17c   :  { %10406 = vmatprep.subr.bf16.mxu0 %v11461_v53  ;;  %v11486_v27 = vld [vmem:[%s14768_s1 + $0xc90] sm:$0xff]   ;;  %v11493_v35 = vld [vmem:[%s14768_s1 + $0xce0] sm:$0xff]   ;;  %v11509_v50 = vld [vmem:[%s14768_s1 + $0xcb8] sm:$0xff]  }
 0x17d   :  { %v13240_v41 = vadd.f32 %v10129_v38, %v7254_v31  ;;  %10429 = vmatpush3.bf16.msra.mxu1 %v11464_v56  ;;  %v11489_v31 = vld [vmem:[%s14768_s1 + $0xcd8] sm:$0xff]   ;;  %v11496_v38 = vld [vmem:[%s14768_s1 + $0xc28] sm:$0xff]   ;;  %v11516_v56 = vld [vmem:[%s14768_s1 + $0xd80] sm:$0xff]  }
 0x17e   :  { %10430 = vmatprep.subr.bf16.mxu1 %v11467_v59  ;;  %v11513_v53 = vld [vmem:[%s14769_s0 + $0xcc] ss:$392 sps:$4 sm:$0xff]  }
 0x17f   :  { %10407 = vmatpush3.bf16.msra.mxu0 %v11462_v54  ;;  %v11514_v54 = vld [vmem:[%s14768_s1 + $0xd00] sm:$0xff]  }
 0x180   :  { %10408 = vmatprep.subr.bf16.mxu0 %v11465_v57 }
 0x181   :  { %10431 = vmatpush3.bf16.msra.mxu1 %v11471_v62 }
 0x182   :  { %10460 = vmatprep.subr.bf16.mxu1 %v11477_v3 }
 0x183   :  { %10409 = vmatpush3.bf16.msra.mxu0 %v11466_v58  ;;  %v11517_v58 = vld [vmem:[%s14768_s1 + $0xd48] sm:$0xff]  }
 0x184   :  { %10438 = vmatprep.subr.bf16.mxu0 %v11472_v63  ;;  %7864 = vmatmul.mubr.bf16.vlgmr.msra.gmra.mrb[44].mxu1 %v11473_v0  ;;  %v11519_v63 = vld [vmem:[%s14768_s1 + $0xdc8] sm:$0xff]  }
 0x185   :  { %10461 = vmatpush3.bf16.msra.mxu1 %v11478_v5  ;;  %7945 = vmatprep.mubr.bf16.mxu1 %v11513_v53  ;;  %v11558_v53 = vld [vmem:[%s14768_s1 + $0xe88] sm:$0xff]  }
 0x186   :  { %7823 = vmatmul.mubr.bf16.vlgmr.msra.gmra.mrb[44].mxu0 %v11468_v60  ;;  %10462 = vmatprep.subr.bf16.mxu1 %v11481_v12  ;;  %v11518_v60 = vld [vmem:[%s14768_s1 + $0xd08] sm:$0xff]  }
 0x187   :  { %10439 = vmatpush3.bf16.msra.mxu0 %v11476_v2  ;;  %7904 = vmatprep.mubr.bf16.mxu0 %v11508_v49 }
 0x188   :  { %10440 = vmatprep.subr.bf16.mxu0 %v11479_v7  ;;  %v11522_v7 = vld [vmem:[%s14768_s1 + $0xd10] sm:$0xff]  }
 0x189   :  { %10463 = vmatpush3.bf16.msra.mxu1 %v11482_v15 }
 0x18a   :  { %10464 = vmatprep.subr.bf16.mxu1 %v11485_v24  ;;  %v11532_v24 = vld [vmem:[%s14768_s1 + $0xda0] sm:$0xff]  }
 0x18b   :  { %10441 = vmatpush3.bf16.msra.mxu0 %v11480_v10  ;;  %v11523_v10 = vld [vmem:[%s14768_s1 + $0xdd0] sm:$0xff]  }
 0x18c   :  { %10442 = vmatprep.subr.bf16.mxu0 %v11483_v18 }
 0x18d   :  { %10465 = vmatpush3.bf16.msra.mxu1 %v11486_v27  ;;  %v11535_v27 = vld [vmem:[%s14768_s1 + $0xde8] sm:$0xff]  }
 0x18e   :  { %10466 = vmatprep.subr.bf16.mxu1 %v11489_v31  ;;  %v11539_v31 = vld [vmem:[%s14768_s1 + $0xdf0] sm:$0xff]  }
 0x18f   :  { %10443 = vmatpush3.bf16.msra.mxu0 %v11484_v21  ;;  %v11529_v21 = vld [vmem:[%s14768_s1 + $0xd60] sm:$0xff]  }
 0x190   :  { %10444 = vmatprep.subr.bf16.mxu0 %v11487_v28  ;;  %v11536_v28 = vld [vmem:[%s14768_s1 + $0xda8] sm:$0xff]  }
 0x191   :  { %10467 = vmatpush3.bf16.msra.mxu1 %v11490_v32  ;;  %v11540_v32 = vld [vmem:[%s14768_s1 + $0xdb0] sm:$0xff]  }
 0x192   :  { %10468 = vmatprep.subr.bf16.mxu1 %v11493_v35  ;;  %v11543_v35 = vld [vmem:[%s14768_s1 + $0xdf8] sm:$0xff]  }
 0x193   :  { %10445 = vmatpush3.bf16.msra.mxu0 %v11488_v30  ;;  %v11538_v30 = vld [vmem:[%s14768_s1 + $0xd30] sm:$0xff]  }
 0x194   :  { %10446 = vmatprep.subr.bf16.mxu0 %v11491_v33  ;;  %v11541_v33 = vld [vmem:[%s14768_s1 + $0xd78] sm:$0xff]  }
 0x195   :  { %v10146_v4 = vpop.f32.mrb[20].mxu0  ;;  %10469 = vmatpush3.bf16.msra.mxu1 %v11494_v36  ;;  %v11544_v36 = vld [vmem:[%s14769_s0 + $0xd0] ss:$392 sps:$4 sm:$0xff]  }
 0x196   :  { %v10147_v6 = vpop.f32.mrb[21].mxu0  ;;  %10470 = vmatprep.subr.bf16.mxu1 %v11497_v39  ;;  %v11548_v39 = vld [vmem:[%s14768_s1 + $0xe40] sm:$0xff]  }
 0x197   :  { %v10148_v8 = vadd.f32 %v10147_v6, %v10146_v4  ;;  %v10149_v9 = vpop.f32.mrb[22].mxu0  ;;  %v10168_v11 = vpop.f32.mrb[20].mxu1  ;;  %10447 = vmatpush3.bf16.msra.mxu0 %v11492_v34  ;;  %v11521_v4 = vld [vmem:[%s14768_s1 + $0xd50] sm:$0xff]   ;;  %v11542_v34 = vld [vmem:[%s14768_s1 + $0xd38] sm:$0xff]  }
 0x198   :  { %v10150_v14 = vpop.f32.mrb[23].mxu0  ;;  %v10169_v17 = vpop.f32.mrb[21].mxu1 }
 0x199   :  { %v7333_v13 = vadd.f32 %v10148_v8, %v13232_v37  ;;  %v10151_v16 = vadd.f32 %v10150_v14, %v10149_v9  ;;  %v10170_v19 = vadd.f32 %v10169_v17, %v10168_v11  ;;  %v10171_v20 = vpop.f32.mrb[22].mxu1  ;;  %v11495_v37 = vld [vmem:[%s14768_s1 + $0xc68] sm:$0xff]   ;;  %10471 = vmatpush3.bf16.msra.mxu1 %v11498_v40  ;;  %v11526_v17 = vld [vmem:[%s14768_s1 + $0xd18] sm:$0xff]  }
 0x19a   :  { %v10172_v23 = vpop.f32.mrb[23].mxu1  ;;  %10448 = vmatprep.subr.bf16.mxu0 %v11495_v37  ;;  %10472 = vmatprep.subr.bf16.mxu1 %v11501_v43  ;;  %v11546_v37 = vld [vmem:[%s14769_s0 + $0xd4] ss:$392 sps:$4 sm:$0xff]   ;;  %v11549_v40 = vld [vmem:[%s14769_s0 + $0xd8] ss:$392 sps:$4 sm:$0xff]  }
 0x19b   :  { %v7336_v22 = vadd.f32 %v10151_v16, %v13240_v41  ;;  %v13346_v25 = vadd.f32 %v10170_v19, %v7333_v13  ;;  %v10173_v26 = vadd.f32 %v10172_v23, %v10171_v20  ;;  %10449 = vmatpush3.bf16.msra.mxu0 %v11496_v38  ;;  %v11499_v41 = vld [vmem:[%s14768_s1 + $0xc70] sm:$0xff]   ;;  %v11525_v16 = vld [vmem:[%s14768_s1 + $0xd58] sm:$0xff]   ;;  %v11531_v23 = vld [vmem:[%s14768_s1 + $0xde0] sm:$0xff]  }
 0x19c   :  { %10450 = vmatprep.subr.bf16.mxu0 %v11499_v41  ;;  %v11524_v13 = vld [vmem:[%s14768_s1 + $0xd90] sm:$0xff]   ;;  %v11527_v19 = vld [vmem:[%s14768_s1 + $0xdd8] sm:$0xff]   ;;  %v11553_v43 = vld [vmem:[%s14768_s1 + $0xec0] sm:$0xff]  }
 0x19d   :  { %v13354_v29 = vadd.f32 %v10173_v26, %v7336_v22  ;;  %10473 = vmatpush3.bf16.msra.mxu1 %v11502_v44  ;;  %v11528_v20 = vld [vmem:[%s14768_s1 + $0xd98] sm:$0xff]   ;;  %v11530_v22 = vld [vmem:[%s14768_s1 + $0xd20] sm:$0xff]   ;;  %v11534_v26 = vld [vmem:[%s14768_s1 + $0xd28] sm:$0xff]  }
 0x19e   :  { %10474 = vmatprep.subr.bf16.mxu1 %v11505_v47  ;;  %v11547_v38 = vld [vmem:[%s14768_s1 + $0xdb8] sm:$0xff]   ;;  %v11554_v44 = vld [vmem:[%s14768_s1 + $0xe80] sm:$0xff]  }
 0x19f   :  { %10451 = vmatpush3.bf16.msra.mxu0 %v11500_v42  ;;  %v11551_v41 = vld [vmem:[%s14769_s0 + $0xdc] ss:$392 sps:$4 sm:$0xff]  }
 0x1a0   :  { %10452 = vmatprep.subr.bf16.mxu0 %v11503_v45  ;;  %v11552_v42 = vld [vmem:[%s14768_s1 + $0xe00] sm:$0xff]  }
 0x1a1   :  { %10475 = vmatpush3.bf16.msra.mxu1 %v11509_v50 }
 0x1a2   :  { %10504 = vmatprep.subr.bf16.mxu1 %v11515_v55 }
 0x1a3   :  { %10453 = vmatpush3.bf16.msra.mxu0 %v11504_v46  ;;  %v11555_v46 = vld [vmem:[%s14768_s1 + $0xe48] sm:$0xff]  }
 0x1a4   :  { %10482 = vmatprep.subr.bf16.mxu0 %v11510_v51  ;;  %7946 = vmatmul.mubr.bf16.vlgmr.msra.gmra.mrb[48].mxu1 %v11511_v52  ;;  %v11557_v51 = vld [vmem:[%s14768_s1 + $0xec8] sm:$0xff]  }
 0x1a5   :  { %10505 = vmatpush3.bf16.msra.mxu1 %v11516_v56  ;;  %8027 = vmatprep.mubr.bf16.mxu1 %v11551_v41  ;;  %v11559_v56 = vld [vmem:[%s14768_s1 + $0xe50] sm:$0xff]  }
 0x1a6   :  { %7905 = vmatmul.mubr.bf16.vlgmr.msra.gmra.mrb[48].mxu0 %v11506_v48  ;;  %10506 = vmatprep.subr.bf16.mxu1 %v11519_v63  ;;  %v11556_v48 = vld [vmem:[%s14768_s1 + $0xe08] sm:$0xff]  }
 0x1a7   :  { %10483 = vmatpush3.bf16.msra.mxu0 %v11514_v54  ;;  %7986 = vmatprep.mubr.bf16.mxu0 %v11546_v37 }
 0x1a8   :  { %10484 = vmatprep.subr.bf16.mxu0 %v11517_v58 }
 0x1a9   :  { %10507 = vmatpush3.bf16.msra.mxu1 %v11520_v1  ;;  %v11562_v1 = vld [vmem:[%s14768_s1 + $0xe90] sm:$0xff]  }
 0x1aa   :  { %10508 = vmatprep.subr.bf16.mxu1 %v11523_v10  ;;  %v11568_v10 = vld [vmem:[%s14768_s1 + $0xe20] sm:$0xff]  }
 0x1ab   :  { %10485 = vmatpush3.bf16.msra.mxu0 %v11518_v60 }
 0x1ac   :  { %10486 = vmatprep.subr.bf16.mxu0 %v11521_v4  ;;  %v11563_v4 = vld [vmem:[%s14768_s1 + $0xe58] sm:$0xff]  }
 0x1ad   :  { %10509 = vmatpush3.bf16.msra.mxu1 %v11524_v13  ;;  %v11571_v13 = vld [vmem:[%s14768_s1 + $0xe68] sm:$0xff]  }
 0x1ae   :  { %10510 = vmatprep.subr.bf16.mxu1 %v11527_v19  ;;  %v11577_v19 = vld [vmem:[%s14768_s1 + $0xef0] sm:$0xff]  }
 0x1af   :  { %10487 = vmatpush3.bf16.msra.mxu0 %v11522_v7  ;;  %v11565_v7 = vld [vmem:[%s14768_s1 + $0xed8] sm:$0xff]  }
 0x1b0   :  { %10488 = vmatprep.subr.bf16.mxu0 %v11525_v16  ;;  %v11574_v16 = vld [vmem:[%s14768_s1 + $0xea8] sm:$0xff]  }
 0x1b1   :  { %10511 = vmatpush3.bf16.msra.mxu1 %v11528_v20  ;;  %v11578_v20 = vld [vmem:[%s14768_s1 + $0xeb0] sm:$0xff]  }
 0x1b2   :  { %10512 = vmatprep.subr.bf16.mxu1 %v11531_v23  ;;  %v11581_v23 = vld [vmem:[%s14768_s1 + $0xef8] sm:$0xff]  }
 0x1b3   :  { %10489 = vmatpush3.bf16.msra.mxu0 %v11526_v17  ;;  %v11575_v17 = vld [vmem:[%s14768_s1 + $0xe70] sm:$0xff]  }
 0x1b4   :  { %10490 = vmatprep.subr.bf16.mxu0 %v11529_v21  ;;  %v11579_v21 = vld [vmem:[%s14768_s1 + $0xe78] sm:$0xff]  }
 0x1b5   :  { %v10190_v57 = vpop.f32.mrb[24].mxu0  ;;  %10513 = vmatpush3.bf16.msra.mxu1 %v11532_v24  ;;  %v11582_v24 = vld [vmem:[%s14769_s0 + $0xe0] ss:$392 sps:$4 sm:$0xff]  }
 0x1b6   :  { %v10191_v59 = vpop.f32.mrb[25].mxu0  ;;  %10514 = vmatprep.subr.bf16.mxu1 %v11535_v27  ;;  %v11586_v27 = vld [vmem:[%s14768_s1 + $0xf40] sm:$0xff]  }
 0x1b7   :  { %v10192_v61 = vadd.f32 %v10191_v59, %v10190_v57  ;;  %v10193_v62 = vpop.f32.mrb[26].mxu0  ;;  %v10212_v0 = vpop.f32.mrb[24].mxu1  ;;  %10491 = vmatpush3.bf16.msra.mxu0 %v11530_v22  ;;  %v11560_v59 = vld [vmem:[%s14768_s1 + $0xe10] sm:$0xff]   ;;  %v11580_v22 = vld [vmem:[%s14768_s1 + $0xe38] sm:$0xff]  }
 0x1b8   :  { %v10194_v3 = vpop.f32.mrb[27].mxu0  ;;  %v10213_v6 = vpop.f32.mrb[25].mxu1 }
 0x1b9   :  { %v7415_v2 = vadd.f32 %v10192_v61, %v13346_v25  ;;  %v10195_v5 = vadd.f32 %v10194_v3, %v10193_v62  ;;  %v10214_v8 = vadd.f32 %v10213_v6, %v10212_v0  ;;  %v10215_v9 = vpop.f32.mrb[26].mxu1  ;;  %v11533_v25 = vld [vmem:[%s14768_s1 + $0xd68] sm:$0xff]   ;;  %10515 = vmatpush3.bf16.msra.mxu1 %v11536_v28  ;;  %v11561_v62 = vld [vmem:[%s14768_s1 + $0xed0] sm:$0xff]  }
 0x1ba   :  { %v10216_v12 = vpop.f32.mrb[27].mxu1  ;;  %10492 = vmatprep.subr.bf16.mxu0 %v11533_v25  ;;  %10516 = vmatprep.subr.bf16.mxu1 %v11539_v31  ;;  %v11584_v25 = vld [vmem:[%s14769_s0 + $0xe4] ss:$392 sps:$4 sm:$0xff]   ;;  %v11587_v28 = vld [vmem:[%s14769_s0 + $0xe8] ss:$392 sps:$4 sm:$0xff]  }
 0x1bb   :  { %v7418_v11 = vadd.f32 %v10195_v5, %v13354_v29  ;;  %v13463_v14 = vadd.f32 %v10214_v8, %v7415_v2  ;;  %v10217_v15 = vadd.f32 %v10216_v12, %v10215_v9  ;;  %10493 = vmatpush3.bf16.msra.mxu0 %v11534_v26  ;;  %v11537_v29 = vld [vmem:[%s14768_s1 + $0xd70] sm:$0xff]   ;;  %v11564_v5 = vld [vmem:[%s14768_s1 + $0xe18] sm:$0xff]   ;;  %v11567_v9 = vld [vmem:[%s14768_s1 + $0xe60] sm:$0xff]  }
 0x1bc   :  { %10494 = vmatprep.subr.bf16.mxu0 %v11537_v29  ;;  %v11566_v8 = vld [vmem:[%s14768_s1 + $0xe98] sm:$0xff]   ;;  %v11570_v12 = vld [vmem:[%s14768_s1 + $0xea0] sm:$0xff]   ;;  %v11589_v29 = vld [vmem:[%s14769_s0 + $0xec] ss:$392 sps:$4 sm:$0xff]  }
 0x1bd   :  { %v13471_v18 = vadd.f32 %v10217_v15, %v7418_v11  ;;  %10517 = vmatpush3.bf16.msra.mxu1 %v11540_v32  ;;  %v11569_v11 = vld [vmem:[%s14768_s1 + $0xee0] sm:$0xff]   ;;  %v11573_v15 = vld [vmem:[%s14768_s1 + $0xee8] sm:$0xff]   ;;  %v11585_v26 = vld [vmem:[%s14768_s1 + $0xeb8] sm:$0xff]  }
 0x1be   :  { %10518 = vmatprep.subr.bf16.mxu1 %v11543_v35  ;;  %v11591_v31 = vld [vmem:[%s14768_s1 + $0xfc0] sm:$0xff]   ;;  %v11593_v35 = vld [vmem:[%s14768_s1 + $0xf48] sm:$0xff]  }
 0x1bf   :  { %10495 = vmatpush3.bf16.msra.mxu0 %v11538_v30  ;;  %v11590_v30 = vld [vmem:[%s14768_s1 + $0xf00] sm:$0xff]  }
 0x1c0   :  { %10496 = vmatprep.subr.bf16.mxu0 %v11541_v33  ;;  %v11592_v33 = vld [vmem:[%s14768_s1 + $0xf80] sm:$0xff]  }
 0x1c1   :  { %10519 = vmatpush3.bf16.msra.mxu1 %v11547_v38  ;;  %v11594_v38 = vld [vmem:[%s14768_s1 + $0xf08] sm:$0xff]  }
 0x1c2   :  { %10548 = vmatprep.subr.bf16.mxu1 %v11553_v43 }
 0x1c3   :  { %10497 = vmatpush3.bf16.msra.mxu0 %v11542_v34 }
 0x1c4   :  { %10526 = vmatprep.subr.bf16.mxu0 %v11548_v39  ;;  %8028 = vmatmul.mubr.bf16.vlgmr.msra.gmra.mrb[52].mxu1 %v11549_v40  ;;  %v11595_v40 = vld [vmem:[%s14768_s1 + $0xfc8] sm:$0xff]  }
 0x1c5   :  { %10549 = vmatpush3.bf16.msra.mxu1 %v11554_v44  ;;  %8109 = vmatprep.mubr.bf16.mxu1 %v11589_v29  ;;  %v11596_v44 = vld [vmem:[%s14768_s1 + $0xf88] sm:$0xff]  }
 0x1c6   :  { %7987 = vmatmul.mubr.bf16.vlgmr.msra.gmra.mrb[52].mxu0 %v11544_v36  ;;  %10550 = vmatprep.subr.bf16.mxu1 %v11557_v51  ;;  %v11634_v29 = vld [vmem:[%s14768_s1 + $0x1088] sm:$0xff]  }
 0x1c7   :  { %10527 = vmatpush3.bf16.msra.mxu0 %v11552_v42  ;;  %8068 = vmatprep.mubr.bf16.mxu0 %v11584_v25 }
 0x1c8   :  { %10528 = vmatprep.subr.bf16.mxu0 %v11555_v46  ;;  %v11597_v46 = vld [vmem:[%s14768_s1 + $0xf50] sm:$0xff]  }
 0x1c9   :  { %10551 = vmatpush3.bf16.msra.mxu1 %v11558_v53 }
 0x1ca   :  { %10552 = vmatprep.subr.bf16.mxu1 %v11561_v62  ;;  %v11606_v62 = vld [vmem:[%s14768_s1 + $0xf20] sm:$0xff]  }
 0x1cb   :  { %10529 = vmatpush3.bf16.msra.mxu0 %v11556_v48 }
 0x1cc   :  { %10530 = vmatprep.subr.bf16.mxu0 %v11559_v56  ;;  %v11601_v56 = vld [vmem:[%s14768_s1 + $0xf58] sm:$0xff]  }
 0x1cd   :  { %10553 = vmatpush3.bf16.msra.mxu1 %v11562_v1  ;;  %v11609_v1 = vld [vmem:[%s14768_s1 + $0xf68] sm:$0xff]  }
 0x1ce   :  { %10554 = vmatprep.subr.bf16.mxu1 %v11565_v7  ;;  %v11615_v7 = vld [vmem:[%s14768_s1 + $0xff0] sm:$0xff]  }
 0x1cf   :  { %10531 = vmatpush3.bf16.msra.mxu0 %v11560_v59  ;;  %v11603_v59 = vld [vmem:[%s14768_s1 + $0xfd8] sm:$0xff]  }
 0x1d0   :  { %10532 = vmatprep.subr.bf16.mxu0 %v11563_v4  ;;  %v11612_v4 = vld [vmem:[%s14768_s1 + $0xfa8] sm:$0xff]  }
 0x1d1   :  { %10555 = vmatpush3.bf16.msra.mxu1 %v11566_v8  ;;  %v11616_v8 = vld [vmem:[%s14768_s1 + $0xfb0] sm:$0xff]  }
 0x1d2   :  { %10556 = vmatprep.subr.bf16.mxu1 %v11569_v11  ;;  %v11619_v11 = vld [vmem:[%s14768_s1 + $0xff8] sm:$0xff]  }
 0x1d3   :  { %10533 = vmatpush3.bf16.msra.mxu0 %v11564_v5  ;;  %v11613_v5 = vld [vmem:[%s14768_s1 + $0xf70] sm:$0xff]  }
 0x1d4   :  { %10534 = vmatprep.subr.bf16.mxu0 %v11567_v9  ;;  %v11617_v9 = vld [vmem:[%s14768_s1 + $0xf78] sm:$0xff]  }
 0x1d5   :  { %v10234_v45 = vpop.f32.mrb[28].mxu0  ;;  %10557 = vmatpush3.bf16.msra.mxu1 %v11570_v12  ;;  %v11620_v12 = vld [vmem:[%s14769_s0 + $0xf0] ss:$392 sps:$4 sm:$0xff]  }
 0x1d6   :  { %v10235_v47 = vpop.f32.mrb[29].mxu0  ;;  %10558 = vmatprep.subr.bf16.mxu1 %v11573_v15  ;;  %v11624_v15 = vld [vmem:[%s14768_s1 + $0x1040] sm:$0xff]  }
 0x1d7   :  { %v10236_v49 = vadd.f32 %v10235_v47, %v10234_v45  ;;  %v10237_v50 = vpop.f32.mrb[30].mxu0  ;;  %v10256_v52 = vpop.f32.mrb[28].mxu1  ;;  %10535 = vmatpush3.bf16.msra.mxu0 %v11568_v10  ;;  %v11618_v10 = vld [vmem:[%s14768_s1 + $0xf38] sm:$0xff]  }
 0x1d8   :  { %v10238_v55 = vpop.f32.mrb[31].mxu0  ;;  %v10257_v58 = vpop.f32.mrb[29].mxu1  ;;  %10536 = vmatprep.subr.bf16.mxu0 %v11571_v13  ;;  %v11622_v13 = vld [vmem:[%s14769_s0 + $0xf4] ss:$392 sps:$4 sm:$0xff]  }
 0x1d9   :  { %v7497_v54 = vadd.f32 %v10236_v49, %v13463_v14  ;;  %v10239_v57 = vadd.f32 %v10238_v55, %v10237_v50  ;;  %v10258_v60 = vadd.f32 %v10257_v58, %v10256_v52  ;;  %v10259_v61 = vpop.f32.mrb[30].mxu1  ;;  %v11572_v14 = vld [vmem:[%s14768_s1 + $0xe28] sm:$0xff]   ;;  %10559 = vmatpush3.bf16.msra.mxu1 %v11574_v16  ;;  %v11598_v50 = vld [vmem:[%s14768_s1 + $0xf10] sm:$0xff]   ;;  %v11602_v58 = vld [vmem:[%s14768_s1 + $0xf18] sm:$0xff]  }
 0x1da   :  { %v10260_v0 = vpop.f32.mrb[31].mxu1  ;;  %10560 = vmatprep.subr.bf16.mxu1 %v11577_v19  ;;  %v11599_v52 = vld [vmem:[%s14768_s1 + $0xfd0] sm:$0xff]   ;;  %v11625_v16 = vld [vmem:[%s14769_s0 + $0xf8] ss:$392 sps:$4 sm:$0xff]  }
 0x1db   :  { %v7500_v63 = vadd.f32 %v10239_v57, %v13471_v18  ;;  %v13577_v2 = vadd.f32 %v10258_v60, %v7497_v54  ;;  %v10261_v3 = vadd.f32 %v10260_v0, %v10259_v61  ;;  %10537 = vmatpush3.bf16.msra.mxu0 %v11572_v14  ;;  %v11576_v18 = vld [vmem:[%s14768_s1 + $0xe30] sm:$0xff]   ;;  %v11604_v60 = vld [vmem:[%s14768_s1 + $0xf98] sm:$0xff]   ;;  %v11605_v61 = vld [vmem:[%s14768_s1 + $0xf60] sm:$0xff]  }
 0x1dc   :  { %10538 = vmatprep.subr.bf16.mxu0 %v11575_v17  ;;  %v11600_v55 = vld [vmem:[%s14768_s1 + $0xf90] sm:$0xff]   ;;  %v11608_v0 = vld [vmem:[%s14768_s1 + $0xfa0] sm:$0xff]   ;;  %v11623_v14 = vld [vmem:[%s14768_s1 + $0xfb8] sm:$0xff]  }
 0x1dd   :  { %v13585_v6 = vadd.f32 %v10261_v3, %v7500_v63  ;;  %10561 = vmatpush3.bf16.msra.mxu1 %v11578_v20  ;;  %v11607_v63 = vld [vmem:[%s14768_s1 + $0xfe0] sm:$0xff]   ;;  %v11611_v3 = vld [vmem:[%s14768_s1 + $0xfe8] sm:$0xff]  }
 0x1de   :  { %10562 = vmatprep.subr.bf16.mxu1 %v11581_v23  ;;  %v11627_v17 = vld [vmem:[%s14769_s0 + $0xfc] ss:$392 sps:$4 sm:$0xff]  }
 0x1df   :  { %10539 = vmatpush3.bf16.msra.mxu0 %v11576_v18  ;;  %v11628_v18 = vld [vmem:[%s14768_s1 + $0x1000] sm:$0xff]  }
 0x1e0   :  { %10540 = vmatprep.subr.bf16.mxu0 %v11579_v21  ;;  %v11629_v19 = vld [vmem:[%s14768_s1 + $0x10c0] sm:$0xff]  }
 0x1e1   :  { %10563 = vmatpush3.bf16.msra.mxu1 %v11585_v26  ;;  %v11630_v20 = vld [vmem:[%s14768_s1 + $0x1080] sm:$0xff]  }
 0x1e2   :  { %10592 = vmatprep.subr.bf16.mxu1 %v11591_v31 }
 0x1e3   :  { %10541 = vmatpush3.bf16.msra.mxu0 %v11580_v22  ;;  %v11631_v22 = vld [vmem:[%s14768_s1 + $0x1048] sm:$0xff]  }
 0x1e4   :  { %10570 = vmatprep.subr.bf16.mxu0 %v11586_v27  ;;  %8110 = vmatmul.mubr.bf16.vlgmr.msra.gmra.mrb[56].mxu1 %v11587_v28  ;;  %v11633_v27 = vld [vmem:[%s14768_s1 + $0x10c8] sm:$0xff]  }
 0x1e5   :  { %10593 = vmatpush3.bf16.msra.mxu1 %v11592_v33  ;;  %8191 = vmatprep.mubr.bf16.mxu1 %v11627_v17  ;;  %v11672_v17 = vld [vmem:[%s14768_s1 + $0x1188] sm:$0xff]  }
 0x1e6   :  { %8069 = vmatmul.mubr.bf16.vlgmr.msra.gmra.mrb[56].mxu0 %v11582_v24  ;;  %10594 = vmatprep.subr.bf16.mxu1 %v11595_v40  ;;  %v11632_v24 = vld [vmem:[%s14768_s1 + $0x1008] sm:$0xff]  }
 0x1e7   :  { %10571 = vmatpush3.bf16.msra.mxu0 %v11590_v30  ;;  %8150 = vmatprep.mubr.bf16.mxu0 %v11622_v13 }
 0x1e8   :  { %10572 = vmatprep.subr.bf16.mxu0 %v11593_v35  ;;  %v11636_v35 = vld [vmem:[%s14768_s1 + $0x1010] sm:$0xff]  }
 0x1e9   :  { %10595 = vmatpush3.bf16.msra.mxu1 %v11596_v44  ;;  %v11639_v44 = vld [vmem:[%s14768_s1 + $0x1058] sm:$0xff]  }
 0x1ea   :  { %10596 = vmatprep.subr.bf16.mxu1 %v11599_v52  ;;  %v11646_v52 = vld [vmem:[%s14768_s1 + $0x10a0] sm:$0xff]  }
 0x1eb   :  { %10573 = vmatpush3.bf16.msra.mxu0 %v11594_v38  ;;  %v11637_v38 = vld [vmem:[%s14768_s1 + $0x10d0] sm:$0xff]  }
 0x1ec   :  { %10574 = vmatprep.subr.bf16.mxu0 %v11597_v46 }
 0x1ed   :  { %10597 = vmatpush3.bf16.msra.mxu1 %v11600_v55  ;;  %v11649_v55 = vld [vmem:[%s14768_s1 + $0x10e8] sm:$0xff]  }
 0x1ee   :  { %10598 = vmatprep.subr.bf16.mxu1 %v11603_v59  ;;  %v11653_v59 = vld [vmem:[%s14768_s1 + $0x10f0] sm:$0xff]  }
 0x1ef   :  { %10575 = vmatpush3.bf16.msra.mxu0 %v11598_v50  ;;  %v11644_v50 = vld [vmem:[%s14768_s1 + $0x1020] sm:$0xff]  }
 0x1f0   :  { %10576 = vmatprep.subr.bf16.mxu0 %v11601_v56  ;;  %v11650_v56 = vld [vmem:[%s14768_s1 + $0x10a8] sm:$0xff]  }
 0x1f1   :  { %10599 = vmatpush3.bf16.msra.mxu1 %v11604_v60  ;;  %v11654_v60 = vld [vmem:[%s14768_s1 + $0x10b0] sm:$0xff]  }
 0x1f2   :  { %10600 = vmatprep.subr.bf16.mxu1 %v11607_v63  ;;  %v11657_v63 = vld [vmem:[%s14768_s1 + $0x10f8] sm:$0xff]  }
 0x1f3   :  { %10577 = vmatpush3.bf16.msra.mxu0 %v11602_v58  ;;  %v11652_v58 = vld [vmem:[%s14768_s1 + $0x1030] sm:$0xff]  }
 0x1f4   :  { %10578 = vmatprep.subr.bf16.mxu0 %v11605_v61  ;;  %v11655_v61 = vld [vmem:[%s14768_s1 + $0x1078] sm:$0xff]  }
 0x1f5   :  { %v10278_v32 = vpop.f32.mrb[32].mxu0  ;;  %10601 = vmatpush3.bf16.msra.mxu1 %v11608_v0  ;;  %v11658_v0 = vld [vmem:[%s14769_s0 + $0x100] ss:$392 sps:$4 sm:$0xff]  }
 0x1f6   :  { %v10279_v34 = vpop.f32.mrb[33].mxu0  ;;  %10602 = vmatprep.subr.bf16.mxu1 %v11611_v3  ;;  %v11662_v3 = vld [vmem:[%s14768_s1 + $0x1140] sm:$0xff]  }
 0x1f7   :  { %v10280_v36 = vadd.f32 %v10279_v34, %v10278_v32  ;;  %v10281_v37 = vpop.f32.mrb[34].mxu0  ;;  %v10300_v42 = vpop.f32.mrb[32].mxu1  ;;  %10579 = vmatpush3.bf16.msra.mxu0 %v11606_v62  ;;  %v11635_v32 = vld [vmem:[%s14768_s1 + $0x1050] sm:$0xff]   ;;  %v11656_v62 = vld [vmem:[%s14768_s1 + $0x1038] sm:$0xff]  }
 0x1f8   :  { %v10282_v39 = vpop.f32.mrb[35].mxu0  ;;  %v10301_v45 = vpop.f32.mrb[33].mxu1  ;;  %10580 = vmatprep.subr.bf16.mxu0 %v11609_v1  ;;  %v11660_v1 = vld [vmem:[%s14769_s0 + $0x104] ss:$392 sps:$4 sm:$0xff]  }
 0x1f9   :  { %v7579_v41 = vadd.f32 %v10280_v36, %v13577_v2  ;;  %v10283_v43 = vadd.f32 %v10282_v39, %v10281_v37  ;;  %v10302_v48 = vadd.f32 %v10301_v45, %v10300_v42  ;;  %v10303_v49 = vpop.f32.mrb[34].mxu1  ;;  %v11610_v2 = vld [vmem:[%s14768_s1 + $0xf28] sm:$0xff]   ;;  %10603 = vmatpush3.bf16.msra.mxu1 %v11612_v4  ;;  %v11640_v45 = vld [vmem:[%s14768_s1 + $0x1018] sm:$0xff]  }
 0x1fa   :  { %v10304_v51 = vpop.f32.mrb[35].mxu1  ;;  %10604 = vmatprep.subr.bf16.mxu1 %v11615_v7  ;;  %v11663_v4 = vld [vmem:[%s14769_s0 + $0x108] ss:$392 sps:$4 sm:$0xff]   ;;  %v11667_v7 = vld [vmem:[%s14768_s1 + $0x11c0] sm:$0xff]  }
 0x1fb   :  { %v7582_v47 = vadd.f32 %v10283_v43, %v13585_v6  ;;  %v13688_v53 = vadd.f32 %v10302_v48, %v7579_v41  ;;  %v10305_v54 = vadd.f32 %v10304_v51, %v10303_v49  ;;  %10581 = vmatpush3.bf16.msra.mxu0 %v11610_v2  ;;  %v11614_v6 = vld [vmem:[%s14768_s1 + $0xf30] sm:$0xff]   ;;  %v11642_v48 = vld [vmem:[%s14768_s1 + $0x1098] sm:$0xff]   ;;  %v11643_v49 = vld [vmem:[%s14768_s1 + $0x1060] sm:$0xff]  }
 0x1fc   :  { %10582 = vmatprep.subr.bf16.mxu0 %v11613_v5  ;;  %v11638_v41 = vld [vmem:[%s14768_s1 + $0x1090] sm:$0xff]   ;;  %v11645_v51 = vld [vmem:[%s14768_s1 + $0x10e0] sm:$0xff]   ;;  %v11661_v2 = vld [vmem:[%s14768_s1 + $0x10b8] sm:$0xff]  }
 0x1fd   :  { %v13696_v57 = vadd.f32 %v10305_v54, %v7582_v47  ;;  %10605 = vmatpush3.bf16.msra.mxu1 %v11616_v8  ;;  %v11641_v47 = vld [vmem:[%s14768_s1 + $0x10d8] sm:$0xff]   ;;  %v11648_v54 = vld [vmem:[%s14768_s1 + $0x1028] sm:$0xff]   ;;  %v11668_v8 = vld [vmem:[%s14768_s1 + $0x1180] sm:$0xff]  }
 0x1fe   :  { %10606 = vmatprep.subr.bf16.mxu1 %v11619_v11  ;;  %v11665_v5 = vld [vmem:[%s14769_s0 + $0x10c] ss:$392 sps:$4 sm:$0xff]  }
 0x1ff   :  { %10583 = vmatpush3.bf16.msra.mxu0 %v11614_v6  ;;  %v11666_v6 = vld [vmem:[%s14768_s1 + $0x1100] sm:$0xff]  }
 0x200   :  { %10584 = vmatprep.subr.bf16.mxu0 %v11617_v9 }
 0x201   :  { %10607 = vmatpush3.bf16.msra.mxu1 %v11623_v14 }
 0x202   :  { %10636 = vmatprep.subr.bf16.mxu1 %v11629_v19 }
 0x203   :  { %10585 = vmatpush3.bf16.msra.mxu0 %v11618_v10  ;;  %v11669_v10 = vld [vmem:[%s14768_s1 + $0x1148] sm:$0xff]  }
 0x204   :  { %10614 = vmatprep.subr.bf16.mxu0 %v11624_v15  ;;  %8192 = vmatmul.mubr.bf16.vlgmr.msra.gmra.mrb[60].mxu1 %v11625_v16  ;;  %v11671_v15 = vld [vmem:[%s14768_s1 + $0x11c8] sm:$0xff]  }
 0x205   :  { %10637 = vmatpush3.bf16.msra.mxu1 %v11630_v20  ;;  %8273 = vmatprep.mubr.bf16.mxu1 %v11665_v5  ;;  %v11673_v20 = vld [vmem:[%s14768_s1 + $0x1150] sm:$0xff]  }
 0x206   :  { %8151 = vmatmul.mubr.bf16.vlgmr.msra.gmra.mrb[60].mxu0 %v11620_v12  ;;  %10638 = vmatprep.subr.bf16.mxu1 %v11633_v27  ;;  %v11670_v12 = vld [vmem:[%s14768_s1 + $0x1108] sm:$0xff]  }
 0x207   :  { %10615 = vmatpush3.bf16.msra.mxu0 %v11628_v18  ;;  %8232 = vmatprep.mubr.bf16.mxu0 %v11660_v1 }
 0x208   :  { %10616 = vmatprep.subr.bf16.mxu0 %v11631_v22 }
 0x209   :  { %10639 = vmatpush3.bf16.msra.mxu1 %v11634_v29  ;;  %v11676_v29 = vld [vmem:[%s14768_s1 + $0x1190] sm:$0xff]  }
 0x20a   :  { %10640 = vmatprep.subr.bf16.mxu1 %v11637_v38  ;;  %v11682_v38 = vld [vmem:[%s14768_s1 + $0x1120] sm:$0xff]  }
 0x20b   :  { %10617 = vmatpush3.bf16.msra.mxu0 %v11632_v24 }
 0x20c   :  { %10618 = vmatprep.subr.bf16.mxu0 %v11635_v32  ;;  %v11677_v32 = vld [vmem:[%s14768_s1 + $0x1158] sm:$0xff]  }
 0x20d   :  { %10641 = vmatpush3.bf16.msra.mxu1 %v11638_v41  ;;  %v11685_v41 = vld [vmem:[%s14768_s1 + $0x1168] sm:$0xff]  }
 0x20e   :  { %10642 = vmatprep.subr.bf16.mxu1 %v11641_v47  ;;  %v11691_v47 = vld [vmem:[%s14768_s1 + $0x11f0] sm:$0xff]  }
 0x20f   :  { %10619 = vmatpush3.bf16.msra.mxu0 %v11636_v35  ;;  %v11679_v35 = vld [vmem:[%s14768_s1 + $0x11d8] sm:$0xff]  }
 0x210   :  { %10620 = vmatprep.subr.bf16.mxu0 %v11639_v44  ;;  %v11688_v44 = vld [vmem:[%s14768_s1 + $0x11a8] sm:$0xff]  }
 0x211   :  { %10643 = vmatpush3.bf16.msra.mxu1 %v11642_v48  ;;  %v11692_v48 = vld [vmem:[%s14768_s1 + $0x11b0] sm:$0xff]  }
 0x212   :  { %10644 = vmatprep.subr.bf16.mxu1 %v11645_v51  ;;  %v11695_v51 = vld [vmem:[%s14768_s1 + $0x11f8] sm:$0xff]  }
 0x213   :  { %10621 = vmatpush3.bf16.msra.mxu0 %v11640_v45  ;;  %v11689_v45 = vld [vmem:[%s14768_s1 + $0x1170] sm:$0xff]  }
 0x214   :  { %10622 = vmatprep.subr.bf16.mxu0 %v11643_v49  ;;  %v11693_v49 = vld [vmem:[%s14768_s1 + $0x1178] sm:$0xff]  }
 0x215   :  { %10645 = vmatpush3.bf16.msra.mxu1 %v11646_v52  ;;  %v11696_v52 = vld [vmem:[%s14769_s0 + $0x110] ss:$392 sps:$4 sm:$0xff]  }
 0x216   :  { %10646 = vmatprep.subr.bf16.mxu1 %v11649_v55  ;;  %v11700_v55 = vld [vmem:[%s14768_s1 + $0x1240] sm:$0xff]  }
 0x217   :  { %v10344_v28 = vpop.f32.mrb[36].mxu1  ;;  %10623 = vmatpush3.bf16.msra.mxu0 %v11644_v50  ;;  %v11694_v50 = vld [vmem:[%s14768_s1 + $0x1138] sm:$0xff]  }
 0x218   :  { %v10345_v34 = vpop.f32.mrb[37].mxu1 }
 0x219   :  { %v10322_v21 = vpop.f32.mrb[36].mxu0  ;;  %v10346_v36 = vadd.f32 %v10345_v34, %v10344_v28  ;;  %v10347_v37 = vpop.f32.mrb[38].mxu1  ;;  %10647 = vmatpush3.bf16.msra.mxu1 %v11650_v56  ;;  %v11701_v56 = vld [vmem:[%s14769_s0 + $0x118] ss:$392 sps:$4 sm:$0xff]  }
 0x21a   :  { %v10323_v23 = vpop.f32.mrb[37].mxu0  ;;  %v10348_v40 = vpop.f32.mrb[39].mxu1  ;;  %10648 = vmatprep.subr.bf16.mxu1 %v11653_v59  ;;  %v11705_v59 = vld [vmem:[%s14768_s1 + $0x12c0] sm:$0xff]  }
 0x21b   :  { %v10324_v25 = vadd.f32 %v10323_v23, %v10322_v21  ;;  %v10325_v26 = vpop.f32.mrb[38].mxu0  ;;  %v10349_v43 = vadd.f32 %v10348_v40, %v10347_v37  ;;  %v11674_v23 = vld [vmem:[%s14768_s1 + $0x1110] sm:$0xff]   ;;  %v11681_v37 = vld [vmem:[%s14768_s1 + $0x1160] sm:$0xff]  }
 0x21c   :  { %v10326_v31 = vpop.f32.mrb[39].mxu0  ;;  %v11684_v40 = vld [vmem:[%s14768_s1 + $0x11a0] sm:$0xff]  }
 0x21d   :  { %v7661_v30 = vadd.f32 %v10324_v25, %v13688_v53  ;;  %v10327_v33 = vadd.f32 %v10326_v31, %v10325_v26  ;;  %v11647_v53 = vld [vmem:[%s14768_s1 + $0x1068] sm:$0xff]   ;;  %10649 = vmatpush3.bf16.msra.mxu1 %v11654_v60  ;;  %v11675_v26 = vld [vmem:[%s14768_s1 + $0x11d0] sm:$0xff]  }
 0x21e   :  { %10624 = vmatprep.subr.bf16.mxu0 %v11647_v53  ;;  %10650 = vmatprep.subr.bf16.mxu1 %v11657_v63  ;;  %v11698_v53 = vld [vmem:[%s14769_s0 + $0x114] ss:$392 sps:$4 sm:$0xff]   ;;  %v11707_v63 = vld [vmem:[%s14768_s1 + $0x1248] sm:$0xff]  }
 0x21f   :  { %v7664_v39 = vadd.f32 %v10327_v33, %v13696_v57  ;;  %v13805_v42 = vadd.f32 %v10346_v36, %v7661_v30  ;;  %10625 = vmatpush3.bf16.msra.mxu0 %v11648_v54  ;;  %v11651_v57 = vld [vmem:[%s14768_s1 + $0x1070] sm:$0xff]   ;;  %v11678_v33 = vld [vmem:[%s14768_s1 + $0x1118] sm:$0xff]  }
 0x220   :  { %10626 = vmatprep.subr.bf16.mxu0 %v11651_v57  ;;  %v11680_v36 = vld [vmem:[%s14768_s1 + $0x1198] sm:$0xff]  }
 0x221   :  { %v13813_v46 = vadd.f32 %v10349_v43, %v7664_v39  ;;  %10651 = vmatpush3.bf16.msra.mxu1 %v11661_v2  ;;  %v11683_v39 = vld [vmem:[%s14768_s1 + $0x11e0] sm:$0xff]   ;;  %v11687_v43 = vld [vmem:[%s14768_s1 + $0x11e8] sm:$0xff]   ;;  %v11699_v54 = vld [vmem:[%s14768_s1 + $0x11b8] sm:$0xff]  }
 0x222   :  { %10680 = vmatprep.subr.bf16.mxu1 %v11667_v7  ;;  %v11703_v57 = vld [vmem:[%s14769_s0 + $0x11c] ss:$392 sps:$4 sm:$0xff]   ;;  %v11708_v2 = vld [vmem:[%s14768_s1 + $0x1208] sm:$0xff]  }
 0x223   :  { %10627 = vmatpush3.bf16.msra.mxu0 %v11652_v58  ;;  %v11704_v58 = vld [vmem:[%s14768_s1 + $0x1200] sm:$0xff]  }
 0x224   :  { %10628 = vmatprep.subr.bf16.mxu0 %v11655_v61  ;;  %8274 = vmatmul.mubr.bf16.vlgmr.msra.gmra.mrb[64].mxu1 %v11663_v4  ;;  %v11706_v61 = vld [vmem:[%s14768_s1 + $0x1280] sm:$0xff]   ;;  %v11709_v4 = vld [vmem:[%s14768_s1 + $0x12c8] sm:$0xff]  }
 0x225   :  { %10681 = vmatpush3.bf16.msra.mxu1 %v11668_v8  ;;  %8355 = vmatprep.mubr.bf16.mxu1 %v11703_v57  ;;  %v11710_v8 = vld [vmem:[%s14768_s1 + $0x1288] sm:$0xff]  }
 0x226   :  { %10682 = vmatprep.subr.bf16.mxu1 %v11671_v15  ;;  %v11748_v57 = vld [vmem:[%s14768_s1 + $0x1388] sm:$0xff]  }
 0x227   :  { %10629 = vmatpush3.bf16.msra.mxu0 %v11656_v62 }
 0x228   :  { %10658 = vmatprep.subr.bf16.mxu0 %v11662_v3 }
 0x229   :  { %10683 = vmatpush3.bf16.msra.mxu1 %v11672_v17 }
 0x22a   :  { %8233 = vmatmul.mubr.bf16.vlgmr.msra.gmra.mrb[64].mxu0 %v11658_v0  ;;  %10684 = vmatprep.subr.bf16.mxu1 %v11675_v26  ;;  %v11720_v26 = vld [vmem:[%s14768_s1 + $0x1220] sm:$0xff]  }
 0x22b   :  { %10659 = vmatpush3.bf16.msra.mxu0 %v11666_v6  ;;  %8314 = vmatprep.mubr.bf16.mxu0 %v11698_v53 }
 0x22c   :  { %10660 = vmatprep.subr.bf16.mxu0 %v11669_v10  ;;  %v11711_v10 = vld [vmem:[%s14768_s1 + $0x1250] sm:$0xff]  }
 0x22d   :  { %10685 = vmatpush3.bf16.msra.mxu1 %v11676_v29  ;;  %v11723_v29 = vld [vmem:[%s14768_s1 + $0x1268] sm:$0xff]  }
 0x22e   :  { %10686 = vmatprep.subr.bf16.mxu1 %v11679_v35  ;;  %v11729_v35 = vld [vmem:[%s14768_s1 + $0x12f0] sm:$0xff]  }
 0x22f   :  { %10661 = vmatpush3.bf16.msra.mxu0 %v11670_v12 }
 0x230   :  { %10662 = vmatprep.subr.bf16.mxu0 %v11673_v20  ;;  %v11715_v20 = vld [vmem:[%s14768_s1 + $0x1258] sm:$0xff]  }
 0x231   :  { %10687 = vmatpush3.bf16.msra.mxu1 %v11680_v36  ;;  %v11730_v36 = vld [vmem:[%s14768_s1 + $0x12b0] sm:$0xff]  }
 0x232   :  { %10688 = vmatprep.subr.bf16.mxu1 %v11683_v39  ;;  %v11733_v39 = vld [vmem:[%s14768_s1 + $0x12f8] sm:$0xff]  }
 0x233   :  { %10663 = vmatpush3.bf16.msra.mxu0 %v11674_v23  ;;  %v11717_v23 = vld [vmem:[%s14768_s1 + $0x12d8] sm:$0xff]  }
 0x234   :  { %10664 = vmatprep.subr.bf16.mxu0 %v11677_v32  ;;  %v11726_v32 = vld [vmem:[%s14768_s1 + $0x12a8] sm:$0xff]  }
 0x235   :  { %10689 = vmatpush3.bf16.msra.mxu1 %v11684_v40  ;;  %v11734_v40 = vld [vmem:[%s14769_s0 + $0x120] ss:$392 sps:$4 sm:$0xff]  }
 0x236   :  { %10690 = vmatprep.subr.bf16.mxu1 %v11687_v43  ;;  %v11738_v43 = vld [vmem:[%s14768_s1 + $0x1340] sm:$0xff]  }
 0x237   :  { %v10388_v16 = vpop.f32.mrb[40].mxu1  ;;  %10665 = vmatpush3.bf16.msra.mxu0 %v11678_v33  ;;  %v11727_v33 = vld [vmem:[%s14768_s1 + $0x1270] sm:$0xff]  }
 0x238   :  { %v10389_v22 = vpop.f32.mrb[41].mxu1  ;;  %10666 = vmatprep.subr.bf16.mxu0 %v11681_v37  ;;  %v11731_v37 = vld [vmem:[%s14768_s1 + $0x1278] sm:$0xff]  }
 0x239   :  { %v10366_v9 = vpop.f32.mrb[40].mxu0  ;;  %v10390_v24 = vadd.f32 %v10389_v22, %v10388_v16  ;;  %v10391_v25 = vpop.f32.mrb[42].mxu1  ;;  %10691 = vmatpush3.bf16.msra.mxu1 %v11688_v44  ;;  %v11713_v16 = vld [vmem:[%s14768_s1 + $0x12d0] sm:$0xff]   ;;  %v11716_v22 = vld [vmem:[%s14768_s1 + $0x1218] sm:$0xff]  }
 0x23a   :  { %v10367_v11 = vpop.f32.mrb[41].mxu0  ;;  %v10392_v28 = vpop.f32.mrb[43].mxu1  ;;  %10692 = vmatprep.subr.bf16.mxu1 %v11691_v47  ;;  %v11739_v44 = vld [vmem:[%s14769_s0 + $0x128] ss:$392 sps:$4 sm:$0xff]   ;;  %v11743_v47 = vld [vmem:[%s14768_s1 + $0x13c0] sm:$0xff]  }
 0x23b   :  { %v10368_v13 = vadd.f32 %v10367_v11, %v10366_v9  ;;  %v10369_v14 = vpop.f32.mrb[42].mxu0  ;;  %v10393_v31 = vadd.f32 %v10392_v28, %v10391_v25  ;;  %10667 = vmatpush3.bf16.msra.mxu0 %v11682_v38  ;;  %v11719_v25 = vld [vmem:[%s14768_s1 + $0x1260] sm:$0xff]   ;;  %v11732_v38 = vld [vmem:[%s14768_s1 + $0x1238] sm:$0xff]  }
 0x23c   :  { %v10370_v19 = vpop.f32.mrb[43].mxu0  ;;  %10668 = vmatprep.subr.bf16.mxu0 %v11685_v41  ;;  %v11722_v28 = vld [vmem:[%s14768_s1 + $0x12a0] sm:$0xff]  }
 0x23d   :  { %v7743_v18 = vadd.f32 %v10368_v13, %v13805_v42  ;;  %v10371_v21 = vadd.f32 %v10370_v19, %v10369_v14  ;;  %v11686_v42 = vld [vmem:[%s14768_s1 + $0x1128] sm:$0xff]   ;;  %10693 = vmatpush3.bf16.msra.mxu1 %v11692_v48  ;;  %v11712_v14 = vld [vmem:[%s14768_s1 + $0x1210] sm:$0xff]   ;;  %v11744_v48 = vld [vmem:[%s14768_s1 + $0x1380] sm:$0xff]  }
 0x23e   :  { %10694 = vmatprep.subr.bf16.mxu1 %v11695_v51  ;;  %v11714_v19 = vld [vmem:[%s14768_s1 + $0x1290] sm:$0xff]   ;;  %v11736_v41 = vld [vmem:[%s14769_s0 + $0x124] ss:$392 sps:$4 sm:$0xff]  }
 0x23f   :  { %v7746_v27 = vadd.f32 %v10371_v21, %v13813_v46  ;;  %v13919_v30 = vadd.f32 %v10390_v24, %v7743_v18  ;;  %10669 = vmatpush3.bf16.msra.mxu0 %v11686_v42  ;;  %v11690_v46 = vld [vmem:[%s14768_s1 + $0x1130] sm:$0xff]   ;;  %v11718_v24 = vld [vmem:[%s14768_s1 + $0x1298] sm:$0xff]  }
 0x240   :  { %10670 = vmatprep.subr.bf16.mxu0 %v11689_v45  ;;  %v11737_v42 = vld [vmem:[%s14768_s1 + $0x12b8] sm:$0xff]   ;;  %v11741_v45 = vld [vmem:[%s14769_s0 + $0x12c] ss:$392 sps:$4 sm:$0xff]  }
 0x241   :  { %v13927_v34 = vadd.f32 %v10393_v31, %v7746_v27  ;;  %10695 = vmatpush3.bf16.msra.mxu1 %v11699_v54  ;;  %v11721_v27 = vld [vmem:[%s14768_s1 + $0x12e0] sm:$0xff]   ;;  %v11725_v31 = vld [vmem:[%s14768_s1 + $0x12e8] sm:$0xff]  }
 0x242   :  { %10724 = vmatprep.subr.bf16.mxu1 %v11705_v59 }
 0x243   :  { %10671 = vmatpush3.bf16.msra.mxu0 %v11690_v46  ;;  %v11742_v46 = vld [vmem:[%s14768_s1 + $0x1300] sm:$0xff]  }
 0x244   :  { %10672 = vmatprep.subr.bf16.mxu0 %v11693_v49  ;;  %8356 = vmatmul.mubr.bf16.vlgmr.msra.gmra.mrb[68].mxu1 %v11701_v56 }
 0x245   :  { %10725 = vmatpush3.bf16.msra.mxu1 %v11706_v61  ;;  %8437 = vmatprep.mubr.bf16.mxu1 %v11741_v45  ;;  %v11786_v45 = vld [vmem:[%s14768_s1 + $0x1488] sm:$0xff]  }
 0x246   :  { %10726 = vmatprep.subr.bf16.mxu1 %v11709_v4 }
 0x247   :  { %10673 = vmatpush3.bf16.msra.mxu0 %v11694_v50  ;;  %v11745_v50 = vld [vmem:[%s14768_s1 + $0x1348] sm:$0xff]  }
 0x248   :  { %10702 = vmatprep.subr.bf16.mxu0 %v11700_v55  ;;  %v11747_v55 = vld [vmem:[%s14768_s1 + $0x13c8] sm:$0xff]  }
 0x249   :  { %10727 = vmatpush3.bf16.msra.mxu1 %v11710_v8  ;;  %v11753_v8 = vld [vmem:[%s14768_s1 + $0x1358] sm:$0xff]  }
 0x24a   :  { %8315 = vmatmul.mubr.bf16.vlgmr.msra.gmra.mrb[68].mxu0 %v11696_v52  ;;  %10728 = vmatprep.subr.bf16.mxu1 %v11713_v16  ;;  %v11746_v52 = vld [vmem:[%s14768_s1 + $0x1308] sm:$0xff]   ;;  %v11760_v16 = vld [vmem:[%s14768_s1 + $0x13a0] sm:$0xff]  }
 0x24b   :  { %10703 = vmatpush3.bf16.msra.mxu0 %v11704_v58  ;;  %8396 = vmatprep.mubr.bf16.mxu0 %v11736_v41 }
 0x24c   :  { %10704 = vmatprep.subr.bf16.mxu0 %v11707_v63  ;;  %v11750_v63 = vld [vmem:[%s14768_s1 + $0x1310] sm:$0xff]  }
 0x24d   :  { %10729 = vmatpush3.bf16.msra.mxu1 %v11714_v19  ;;  %v11763_v19 = vld [vmem:[%s14768_s1 + $0x13e8] sm:$0xff]  }
 0x24e   :  { %10730 = vmatprep.subr.bf16.mxu1 %v11717_v23  ;;  %v11767_v23 = vld [vmem:[%s14768_s1 + $0x13f0] sm:$0xff]  }
 0x24f   :  { %10705 = vmatpush3.bf16.msra.mxu0 %v11708_v2  ;;  %v11751_v2 = vld [vmem:[%s14768_s1 + $0x13d0] sm:$0xff]  }
 0x250   :  { %10706 = vmatprep.subr.bf16.mxu0 %v11711_v10 }
 0x251   :  { %10731 = vmatpush3.bf16.msra.mxu1 %v11718_v24  ;;  %v11768_v24 = vld [vmem:[%s14768_s1 + $0x13b0] sm:$0xff]  }
 0x252   :  { %10732 = vmatprep.subr.bf16.mxu1 %v11721_v27  ;;  %v11771_v27 = vld [vmem:[%s14768_s1 + $0x13f8] sm:$0xff]  }
 0x253   :  { %10707 = vmatpush3.bf16.msra.mxu0 %v11712_v14  ;;  %v11758_v14 = vld [vmem:[%s14768_s1 + $0x1320] sm:$0xff]  }
 0x254   :  { %10708 = vmatprep.subr.bf16.mxu0 %v11715_v20  ;;  %v11764_v20 = vld [vmem:[%s14768_s1 + $0x13a8] sm:$0xff]  }
 0x255   :  { %10733 = vmatpush3.bf16.msra.mxu1 %v11722_v28  ;;  %v11772_v28 = vld [vmem:[%s14769_s0 + $0x130] ss:$392 sps:$4 sm:$0xff]  }
 0x256   :  { %10734 = vmatprep.subr.bf16.mxu1 %v11725_v31  ;;  %v11776_v31 = vld [vmem:[%s14768_s1 + $0x1440] sm:$0xff]  }
 0x257   :  { %v10432_v6 = vpop.f32.mrb[44].mxu1  ;;  %10709 = vmatpush3.bf16.msra.mxu0 %v11716_v22  ;;  %v11766_v22 = vld [vmem:[%s14768_s1 + $0x1330] sm:$0xff]  }
 0x258   :  { %v10433_v9 = vpop.f32.mrb[45].mxu1  ;;  %10710 = vmatprep.subr.bf16.mxu0 %v11719_v25  ;;  %v11769_v25 = vld [vmem:[%s14768_s1 + $0x1378] sm:$0xff]  }
 0x259   :  { %v10410_v60 = vpop.f32.mrb[44].mxu0  ;;  %v10434_v12 = vadd.f32 %v10433_v9, %v10432_v6  ;;  %v10435_v13 = vpop.f32.mrb[46].mxu1  ;;  %10735 = vmatpush3.bf16.msra.mxu1 %v11726_v32  ;;  %v11754_v9 = vld [vmem:[%s14768_s1 + $0x1318] sm:$0xff]  }
 0x25a   :  { %v10411_v62 = vpop.f32.mrb[45].mxu0  ;;  %v10436_v15 = vpop.f32.mrb[47].mxu1  ;;  %10736 = vmatprep.subr.bf16.mxu1 %v11729_v35  ;;  %v11777_v32 = vld [vmem:[%s14769_s0 + $0x138] ss:$392 sps:$4 sm:$0xff]  }
 0x25b   :  { %v10412_v0 = vadd.f32 %v10411_v62, %v10410_v60  ;;  %v10413_v1 = vpop.f32.mrb[46].mxu0  ;;  %v10437_v18 = vadd.f32 %v10436_v15, %v10435_v13  ;;  %10711 = vmatpush3.bf16.msra.mxu0 %v11720_v26  ;;  %v11749_v60 = vld [vmem:[%s14768_s1 + $0x1350] sm:$0xff]   ;;  %v11757_v13 = vld [vmem:[%s14768_s1 + $0x1360] sm:$0xff]   ;;  %v11770_v26 = vld [vmem:[%s14768_s1 + $0x1338] sm:$0xff]  }
 0x25c   :  { %v10414_v3 = vpop.f32.mrb[47].mxu0  ;;  %10712 = vmatprep.subr.bf16.mxu0 %v11723_v29  ;;  %v11759_v15 = vld [vmem:[%s14768_s1 + $0x13e0] sm:$0xff]   ;;  %v11774_v29 = vld [vmem:[%s14769_s0 + $0x134] ss:$392 sps:$4 sm:$0xff]  }
 0x25d   :  { %v7825_v5 = vadd.f32 %v10412_v0, %v13919_v30  ;;  %v10415_v7 = vadd.f32 %v10414_v3, %v10413_v1  ;;  %v11724_v30 = vld [vmem:[%s14768_s1 + $0x1228] sm:$0xff]   ;;  %10737 = vmatpush3.bf16.msra.mxu1 %v11730_v36  ;;  %v11781_v35 = vld [vmem:[%s14768_s1 + $0x14c0] sm:$0xff]  }
 0x25e   :  { %10738 = vmatprep.subr.bf16.mxu1 %v11733_v39  ;;  %v11782_v36 = vld [vmem:[%s14768_s1 + $0x1480] sm:$0xff]  }
 0x25f   :  { %v7828_v11 = vadd.f32 %v10415_v7, %v13927_v34  ;;  %v14030_v17 = vadd.f32 %v10434_v12, %v7825_v5  ;;  %10713 = vmatpush3.bf16.msra.mxu0 %v11724_v30  ;;  %v11728_v34 = vld [vmem:[%s14768_s1 + $0x1230] sm:$0xff]   ;;  %v11756_v12 = vld [vmem:[%s14768_s1 + $0x1398] sm:$0xff]  }
 0x260   :  { %10714 = vmatprep.subr.bf16.mxu0 %v11727_v33  ;;  %v11752_v5 = vld [vmem:[%s14768_s1 + $0x1390] sm:$0xff]   ;;  %v11775_v30 = vld [vmem:[%s14768_s1 + $0x13b8] sm:$0xff]  }
 0x261   :  { %v14038_v21 = vadd.f32 %v10437_v18, %v7828_v11  ;;  %10739 = vmatpush3.bf16.msra.mxu1 %v11737_v42  ;;  %v11755_v11 = vld [vmem:[%s14768_s1 + $0x13d8] sm:$0xff]   ;;  %v11762_v18 = vld [vmem:[%s14768_s1 + $0x1328] sm:$0xff]  }
 0x262   :  { %10768 = vmatprep.subr.bf16.mxu1 %v11743_v47  ;;  %v11779_v33 = vld [vmem:[%s14769_s0 + $0x13c] ss:$392 sps:$4 sm:$0xff]  }
 0x263   :  { %10715 = vmatpush3.bf16.msra.mxu0 %v11728_v34  ;;  %v11780_v34 = vld [vmem:[%s14768_s1 + $0x1400] sm:$0xff]  }
 0x264   :  { %10716 = vmatprep.subr.bf16.mxu0 %v11731_v37  ;;  %8438 = vmatmul.mubr.bf16.vlgmr.msra.gmra.mrb[72].mxu1 %v11739_v44 }
 0x265   :  { %10769 = vmatpush3.bf16.msra.mxu1 %v11744_v48  ;;  %8519 = vmatprep.mubr.bf16.mxu1 %v11779_v33  ;;  %v11787_v48 = vld [vmem:[%s14768_s1 + $0x1450] sm:$0xff]  }
 0x266   :  { %10770 = vmatprep.subr.bf16.mxu1 %v11747_v55 }
 0x267   :  { %10717 = vmatpush3.bf16.msra.mxu0 %v11732_v38  ;;  %v11783_v38 = vld [vmem:[%s14768_s1 + $0x1448] sm:$0xff]  }
 0x268   :  { %10746 = vmatprep.subr.bf16.mxu0 %v11738_v43  ;;  %v11785_v43 = vld [vmem:[%s14768_s1 + $0x14c8] sm:$0xff]  }
 0x269   :  { %10771 = vmatpush3.bf16.msra.mxu1 %v11748_v57  ;;  %v11790_v57 = vld [vmem:[%s14768_s1 + $0x1490] sm:$0xff]  }
 0x26a   :  { %8397 = vmatmul.mubr.bf16.vlgmr.msra.gmra.mrb[72].mxu0 %v11734_v40  ;;  %10772 = vmatprep.subr.bf16.mxu1 %v11751_v2  ;;  %v11784_v40 = vld [vmem:[%s14768_s1 + $0x1408] sm:$0xff]   ;;  %v11796_v2 = vld [vmem:[%s14768_s1 + $0x1420] sm:$0xff]  }
 0x26b   :  { %10747 = vmatpush3.bf16.msra.mxu0 %v11742_v46  ;;  %8478 = vmatprep.mubr.bf16.mxu0 %v11774_v29 }
 0x26c   :  { %10748 = vmatprep.subr.bf16.mxu0 %v11745_v50 }
 0x26d   :  { %10773 = vmatpush3.bf16.msra.mxu1 %v11752_v5  ;;  %v11799_v5 = vld [vmem:[%s14768_s1 + $0x1468] sm:$0xff]  }
 0x26e   :  { %10774 = vmatprep.subr.bf16.mxu1 %v11755_v11  ;;  %v11805_v11 = vld [vmem:[%s14768_s1 + $0x14f0] sm:$0xff]  }
 0x26f   :  { %10749 = vmatpush3.bf16.msra.mxu0 %v11746_v52 }
 0x270   :  { %10750 = vmatprep.subr.bf16.mxu0 %v11749_v60  ;;  %v11791_v60 = vld [vmem:[%s14768_s1 + $0x1458] sm:$0xff]  }
 0x271   :  { %10775 = vmatpush3.bf16.msra.mxu1 %v11756_v12  ;;  %v11806_v12 = vld [vmem:[%s14768_s1 + $0x14b0] sm:$0xff]  }
 0x272   :  { %10776 = vmatprep.subr.bf16.mxu1 %v11759_v15  ;;  %v11809_v15 = vld [vmem:[%s14768_s1 + $0x14f8] sm:$0xff]  }
 0x273   :  { %10751 = vmatpush3.bf16.msra.mxu0 %v11750_v63  ;;  %v11793_v63 = vld [vmem:[%s14768_s1 + $0x14d8] sm:$0xff]  }
 0x274   :  { %10752 = vmatprep.subr.bf16.mxu0 %v11753_v8  ;;  %v11802_v8 = vld [vmem:[%s14768_s1 + $0x14a8] sm:$0xff]  }
 0x275   :  { %10777 = vmatpush3.bf16.msra.mxu1 %v11760_v16  ;;  %v11810_v16 = vld [vmem:[%s14769_s0 + $0x140] ss:$392 sps:$4 sm:$0xff]  }
 0x276   :  { %10778 = vmatprep.subr.bf16.mxu1 %v11763_v19  ;;  %v11814_v19 = vld [vmem:[%s14768_s1 + $0x1540] sm:$0xff]  }
 0x277   :  { %v10476_v56 = vpop.f32.mrb[48].mxu1  ;;  %10753 = vmatpush3.bf16.msra.mxu0 %v11754_v9  ;;  %v11803_v9 = vld [vmem:[%s14768_s1 + $0x1470] sm:$0xff]  }
 0x278   :  { %v10477_v62 = vpop.f32.mrb[49].mxu1  ;;  %10754 = vmatprep.subr.bf16.mxu0 %v11757_v13  ;;  %v11807_v13 = vld [vmem:[%s14768_s1 + $0x1478] sm:$0xff]  }
 0x279   :  { %v10454_v49 = vpop.f32.mrb[48].mxu0  ;;  %v10478_v0 = vadd.f32 %v10477_v62, %v10476_v56  ;;  %v10479_v1 = vpop.f32.mrb[50].mxu1  ;;  %10779 = vmatpush3.bf16.msra.mxu1 %v11764_v20  ;;  %v11815_v20 = vld [vmem:[%s14769_s0 + $0x148] ss:$392 sps:$4 sm:$0xff]  }
 0x27a   :  { %v10455_v51 = vpop.f32.mrb[49].mxu0  ;;  %v10480_v4 = vpop.f32.mrb[51].mxu1  ;;  %10780 = vmatprep.subr.bf16.mxu1 %v11767_v23  ;;  %v11819_v23 = vld [vmem:[%s14768_s1 + $0x15c0] sm:$0xff]  }
 0x27b   :  { %v10456_v53 = vadd.f32 %v10455_v51, %v10454_v49  ;;  %v10457_v54 = vpop.f32.mrb[50].mxu0  ;;  %v10481_v7 = vadd.f32 %v10480_v4, %v10479_v1  ;;  %10755 = vmatpush3.bf16.msra.mxu0 %v11758_v14  ;;  %v11788_v51 = vld [vmem:[%s14768_s1 + $0x1410] sm:$0xff]   ;;  %v11795_v1 = vld [vmem:[%s14768_s1 + $0x1460] sm:$0xff]   ;;  %v11808_v14 = vld [vmem:[%s14768_s1 + $0x1438] sm:$0xff]  }
 0x27c   :  { %v10458_v59 = vpop.f32.mrb[51].mxu0  ;;  %v11798_v4 = vld [vmem:[%s14768_s1 + $0x14a0] sm:$0xff]  }
 0x27d   :  { %v7907_v58 = vadd.f32 %v10456_v53, %v14030_v17  ;;  %v10459_v61 = vadd.f32 %v10458_v59, %v10457_v54  ;;  %v11761_v17 = vld [vmem:[%s14768_s1 + $0x1368] sm:$0xff]   ;;  %10781 = vmatpush3.bf16.msra.mxu1 %v11768_v24  ;;  %v11789_v54 = vld [vmem:[%s14768_s1 + $0x14d0] sm:$0xff]  }
 0x27e   :  { %10756 = vmatprep.subr.bf16.mxu0 %v11761_v17  ;;  %10782 = vmatprep.subr.bf16.mxu1 %v11771_v27  ;;  %v11812_v17 = vld [vmem:[%s14769_s0 + $0x144] ss:$392 sps:$4 sm:$0xff]  }
 0x27f   :  { %v7910_v3 = vadd.f32 %v10459_v61, %v14038_v21  ;;  %v14147_v6 = vadd.f32 %v10478_v0, %v7907_v58  ;;  %10757 = vmatpush3.bf16.msra.mxu0 %v11762_v18  ;;  %v11765_v21 = vld [vmem:[%s14768_s1 + $0x1370] sm:$0xff]   ;;  %v11792_v61 = vld [vmem:[%s14768_s1 + $0x1418] sm:$0xff]   ;;  %v11821_v27 = vld [vmem:[%s14768_s1 + $0x1548] sm:$0xff]  }
 0x280   :  { %10758 = vmatprep.subr.bf16.mxu0 %v11765_v21  ;;  %v11794_v0 = vld [vmem:[%s14768_s1 + $0x1498] sm:$0xff]   ;;  %v11817_v21 = vld [vmem:[%s14769_s0 + $0x14c] ss:$392 sps:$4 sm:$0xff]  }
 0x281   :  { %v14155_v10 = vadd.f32 %v10481_v7, %v7910_v3  ;;  %10783 = vmatpush3.bf16.msra.mxu1 %v11775_v30  ;;  %v11797_v3 = vld [vmem:[%s14768_s1 + $0x14e0] sm:$0xff]   ;;  %v11801_v7 = vld [vmem:[%s14768_s1 + $0x14e8] sm:$0xff]   ;;  %v11813_v18 = vld [vmem:[%s14768_s1 + $0x14b8] sm:$0xff]  }
 0x282   :  { %10812 = vmatprep.subr.bf16.mxu1 %v11781_v35  ;;  %v11822_v30 = vld [vmem:[%s14768_s1 + $0x1508] sm:$0xff]  }
 0x283   :  { %10759 = vmatpush3.bf16.msra.mxu0 %v11766_v22  ;;  %v11818_v22 = vld [vmem:[%s14768_s1 + $0x1500] sm:$0xff]  }
 0x284   :  { %10760 = vmatprep.subr.bf16.mxu0 %v11769_v25  ;;  %8520 = vmatmul.mubr.bf16.vlgmr.msra.gmra.mrb[76].mxu1 %v11777_v32  ;;  %v11820_v25 = vld [vmem:[%s14768_s1 + $0x1580] sm:$0xff]   ;;  %v11823_v32 = vld [vmem:[%s14768_s1 + $0x15c8] sm:$0xff]  }
 0x285   :  { %10813 = vmatpush3.bf16.msra.mxu1 %v11782_v36  ;;  %8601 = vmatprep.mubr.bf16.mxu1 %v11817_v21  ;;  %v11824_v36 = vld [vmem:[%s14768_s1 + $0x1588] sm:$0xff]  }
 0x286   :  { %10814 = vmatprep.subr.bf16.mxu1 %v11785_v43  ;;  %v11862_v21 = vld [vmem:[%s14768_s1 + $0x1688] sm:$0xff]  }
 0x287   :  { %10761 = vmatpush3.bf16.msra.mxu0 %v11770_v26 }
 0x288   :  { %10790 = vmatprep.subr.bf16.mxu0 %v11776_v31 }
 0x289   :  { %10815 = vmatpush3.bf16.msra.mxu1 %v11786_v45 }
 0x28a   :  { %8479 = vmatmul.mubr.bf16.vlgmr.msra.gmra.mrb[76].mxu0 %v11772_v28  ;;  %10816 = vmatprep.subr.bf16.mxu1 %v11789_v54  ;;  %v11834_v54 = vld [vmem:[%s14768_s1 + $0x1520] sm:$0xff]  }
 0x28b   :  { %10791 = vmatpush3.bf16.msra.mxu0 %v11780_v34  ;;  %8560 = vmatprep.mubr.bf16.mxu0 %v11812_v17 }
 0x28c   :  { %10792 = vmatprep.subr.bf16.mxu0 %v11783_v38  ;;  %v11825_v38 = vld [vmem:[%s14768_s1 + $0x1550] sm:$0xff]  }
 0x28d   :  { %10817 = vmatpush3.bf16.msra.mxu1 %v11790_v57  ;;  %v11837_v57 = vld [vmem:[%s14768_s1 + $0x1568] sm:$0xff]  }
 0x28e   :  { %10818 = vmatprep.subr.bf16.mxu1 %v11793_v63  ;;  %v11843_v63 = vld [vmem:[%s14768_s1 + $0x15f0] sm:$0xff]  }
 0x28f   :  { %10793 = vmatpush3.bf16.msra.mxu0 %v11784_v40 }
 0x290   :  { %10794 = vmatprep.subr.bf16.mxu0 %v11787_v48  ;;  %v11829_v48 = vld [vmem:[%s14768_s1 + $0x1558] sm:$0xff]  }
 0x291   :  { %10819 = vmatpush3.bf16.msra.mxu1 %v11794_v0  ;;  %v11844_v0 = vld [vmem:[%s14768_s1 + $0x15b0] sm:$0xff]  }
 0x292   :  { %10820 = vmatprep.subr.bf16.mxu1 %v11797_v3  ;;  %v11847_v3 = vld [vmem:[%s14768_s1 + $0x15f8] sm:$0xff]  }
 0x293   :  { %10795 = vmatpush3.bf16.msra.mxu0 %v11788_v51  ;;  %v11831_v51 = vld [vmem:[%s14768_s1 + $0x15d8] sm:$0xff]  }
 0x294   :  { %10796 = vmatprep.subr.bf16.mxu0 %v11791_v60  ;;  %v11840_v60 = vld [vmem:[%s14768_s1 + $0x15a8] sm:$0xff]  }
 0x295   :  { %10821 = vmatpush3.bf16.msra.mxu1 %v11798_v4  ;;  %v11848_v4 = vld [vmem:[%s14769_s0 + $0x150] ss:$392 sps:$4 sm:$0xff]  }
 0x296   :  { %10822 = vmatprep.subr.bf16.mxu1 %v11801_v7  ;;  %v11852_v7 = vld [vmem:[%s14768_s1 + $0x1640] sm:$0xff]  }
 0x297   :  { %v10520_v44 = vpop.f32.mrb[52].mxu1  ;;  %10797 = vmatpush3.bf16.msra.mxu0 %v11792_v61  ;;  %v11841_v61 = vld [vmem:[%s14768_s1 + $0x1570] sm:$0xff]  }
 0x298   :  { %v10521_v50 = vpop.f32.mrb[53].mxu1  ;;  %10798 = vmatprep.subr.bf16.mxu0 %v11795_v1  ;;  %v11845_v1 = vld [vmem:[%s14768_s1 + $0x1578] sm:$0xff]  }
 0x299   :  { %v10498_v37 = vpop.f32.mrb[52].mxu0  ;;  %v10522_v52 = vadd.f32 %v10521_v50, %v10520_v44  ;;  %v10523_v53 = vpop.f32.mrb[54].mxu1  ;;  %10823 = vmatpush3.bf16.msra.mxu1 %v11802_v8  ;;  %v11827_v44 = vld [vmem:[%s14768_s1 + $0x15d0] sm:$0xff]   ;;  %v11830_v50 = vld [vmem:[%s14768_s1 + $0x1518] sm:$0xff]  }
 0x29a   :  { %v10499_v39 = vpop.f32.mrb[53].mxu0  ;;  %v10524_v56 = vpop.f32.mrb[55].mxu1  ;;  %10824 = vmatprep.subr.bf16.mxu1 %v11805_v11  ;;  %v11853_v8 = vld [vmem:[%s14769_s0 + $0x158] ss:$392 sps:$4 sm:$0xff]  }
 0x29b   :  { %v10500_v41 = vadd.f32 %v10499_v39, %v10498_v37  ;;  %v10501_v42 = vpop.f32.mrb[54].mxu0  ;;  %v10525_v59 = vadd.f32 %v10524_v56, %v10523_v53  ;;  %10799 = vmatpush3.bf16.msra.mxu0 %v11796_v2  ;;  %v11833_v53 = vld [vmem:[%s14768_s1 + $0x1560] sm:$0xff]   ;;  %v11846_v2 = vld [vmem:[%s14768_s1 + $0x1538] sm:$0xff]  }
 0x29c   :  { %v10502_v47 = vpop.f32.mrb[55].mxu0  ;;  %10800 = vmatprep.subr.bf16.mxu0 %v11799_v5  ;;  %v11836_v56 = vld [vmem:[%s14768_s1 + $0x15a0] sm:$0xff]   ;;  %v11850_v5 = vld [vmem:[%s14769_s0 + $0x154] ss:$392 sps:$4 sm:$0xff]  }
 0x29d   :  { %v7989_v46 = vadd.f32 %v10500_v41, %v14147_v6  ;;  %v10503_v49 = vadd.f32 %v10502_v47, %v10501_v42  ;;  %v11800_v6 = vld [vmem:[%s14768_s1 + $0x1428] sm:$0xff]   ;;  %10825 = vmatpush3.bf16.msra.mxu1 %v11806_v12  ;;  %v11826_v42 = vld [vmem:[%s14768_s1 + $0x1510] sm:$0xff]   ;;  %v11857_v11 = vld [vmem:[%s14768_s1 + $0x16c0] sm:$0xff]  }
 0x29e   :  { %10826 = vmatprep.subr.bf16.mxu1 %v11809_v15  ;;  %v11828_v47 = vld [vmem:[%s14768_s1 + $0x1590] sm:$0xff]   ;;  %v11858_v12 = vld [vmem:[%s14768_s1 + $0x1680] sm:$0xff]  }
 0x29f   :  { %v7992_v55 = vadd.f32 %v10503_v49, %v14155_v10  ;;  %v14261_v58 = vadd.f32 %v10522_v52, %v7989_v46  ;;  %10801 = vmatpush3.bf16.msra.mxu0 %v11800_v6  ;;  %v11804_v10 = vld [vmem:[%s14768_s1 + $0x1430] sm:$0xff]   ;;  %v11832_v52 = vld [vmem:[%s14768_s1 + $0x1598] sm:$0xff]  }
 0x2a0   :  { %10802 = vmatprep.subr.bf16.mxu0 %v11803_v9  ;;  %v11851_v6 = vld [vmem:[%s14768_s1 + $0x15b8] sm:$0xff]  }
 0x2a1   :  { %v14269_v62 = vadd.f32 %v10525_v59, %v7992_v55  ;;  %10827 = vmatpush3.bf16.msra.mxu1 %v11813_v18  ;;  %v11835_v55 = vld [vmem:[%s14768_s1 + $0x15e0] sm:$0xff]   ;;  %v11839_v59 = vld [vmem:[%s14768_s1 + $0x15e8] sm:$0xff]  }
 0x2a2   :  { %10856 = vmatprep.subr.bf16.mxu1 %v11819_v23  ;;  %v11855_v9 = vld [vmem:[%s14769_s0 + $0x15c] ss:$392 sps:$4 sm:$0xff]  }
 0x2a3   :  { %10803 = vmatpush3.bf16.msra.mxu0 %v11804_v10  ;;  %v11856_v10 = vld [vmem:[%s14768_s1 + $0x1600] sm:$0xff]  }
 0x2a4   :  { %10804 = vmatprep.subr.bf16.mxu0 %v11807_v13  ;;  %8602 = vmatmul.mubr.bf16.vlgmr.msra.gmra.mrb[80].mxu1 %v11815_v20 }
 0x2a5   :  { %10857 = vmatpush3.bf16.msra.mxu1 %v11820_v25  ;;  %8683 = vmatprep.mubr.bf16.mxu1 %v11855_v9  ;;  %v11900_v9 = vld [vmem:[%s14768_s1 + $0x1788] sm:$0xff]  }
 0x2a6   :  { %10858 = vmatprep.subr.bf16.mxu1 %v11823_v32 }
 0x2a7   :  { %10805 = vmatpush3.bf16.msra.mxu0 %v11808_v14  ;;  %v11859_v14 = vld [vmem:[%s14768_s1 + $0x1648] sm:$0xff]  }
 0x2a8   :  { %10834 = vmatprep.subr.bf16.mxu0 %v11814_v19  ;;  %v11861_v19 = vld [vmem:[%s14768_s1 + $0x16c8] sm:$0xff]  }
 0x2a9   :  { %10859 = vmatpush3.bf16.msra.mxu1 %v11824_v36  ;;  %v11867_v36 = vld [vmem:[%s14768_s1 + $0x1658] sm:$0xff]  }
 0x2aa   :  { %8561 = vmatmul.mubr.bf16.vlgmr.msra.gmra.mrb[80].mxu0 %v11810_v16  ;;  %10860 = vmatprep.subr.bf16.mxu1 %v11827_v44  ;;  %v11860_v16 = vld [vmem:[%s14768_s1 + $0x1608] sm:$0xff]   ;;  %v11874_v44 = vld [vmem:[%s14768_s1 + $0x16a0] sm:$0xff]  }
 0x2ab   :  { %10835 = vmatpush3.bf16.msra.mxu0 %v11818_v22  ;;  %8642 = vmatprep.mubr.bf16.mxu0 %v11850_v5 }
 0x2ac   :  { %10836 = vmatprep.subr.bf16.mxu0 %v11821_v27  ;;  %v11864_v27 = vld [vmem:[%s14768_s1 + $0x1610] sm:$0xff]  }
 0x2ad   :  { %10861 = vmatpush3.bf16.msra.mxu1 %v11828_v47  ;;  %v11877_v47 = vld [vmem:[%s14768_s1 + $0x16e8] sm:$0xff]  }
 0x2ae   :  { %10862 = vmatprep.subr.bf16.mxu1 %v11831_v51  ;;  %v11881_v51 = vld [vmem:[%s14768_s1 + $0x16f0] sm:$0xff]  }
 0x2af   :  { %10837 = vmatpush3.bf16.msra.mxu0 %v11822_v30  ;;  %v11865_v30 = vld [vmem:[%s14768_s1 + $0x16d0] sm:$0xff]  }
 0x2b0   :  { %10838 = vmatprep.subr.bf16.mxu0 %v11825_v38 }
 0x2b1   :  { %10863 = vmatpush3.bf16.msra.mxu1 %v11832_v52  ;;  %v11882_v52 = vld [vmem:[%s14768_s1 + $0x16b0] sm:$0xff]  }
 0x2b2   :  { %10864 = vmatprep.subr.bf16.mxu1 %v11835_v55  ;;  %v11885_v55 = vld [vmem:[%s14768_s1 + $0x16f8] sm:$0xff]  }
 0x2b3   :  { %10839 = vmatpush3.bf16.msra.mxu0 %v11826_v42  ;;  %v11872_v42 = vld [vmem:[%s14768_s1 + $0x1620] sm:$0xff]  }
 0x2b4   :  { %10840 = vmatprep.subr.bf16.mxu0 %v11829_v48  ;;  %v11878_v48 = vld [vmem:[%s14768_s1 + $0x16a8] sm:$0xff]  }
 0x2b5   :  { %10865 = vmatpush3.bf16.msra.mxu1 %v11836_v56  ;;  %v11886_v56 = vld [vmem:[%s14769_s0 + $0x160] ss:$392 sps:$4 sm:$0xff]  }
 0x2b6   :  { %10866 = vmatprep.subr.bf16.mxu1 %v11839_v59  ;;  %v11890_v59 = vld [vmem:[%s14768_s1 + $0x1740] sm:$0xff]  }
 0x2b7   :  { %v10564_v34 = vpop.f32.mrb[56].mxu1  ;;  %10841 = vmatpush3.bf16.msra.mxu0 %v11830_v50  ;;  %v11880_v50 = vld [vmem:[%s14768_s1 + $0x1630] sm:$0xff]  }
 0x2b8   :  { %v10565_v37 = vpop.f32.mrb[57].mxu1  ;;  %10842 = vmatprep.subr.bf16.mxu0 %v11833_v53  ;;  %v11883_v53 = vld [vmem:[%s14768_s1 + $0x1678] sm:$0xff]  }
 0x2b9   :  { %v10542_v24 = vpop.f32.mrb[56].mxu0  ;;  %v10566_v40 = vadd.f32 %v10565_v37, %v10564_v34  ;;  %v10567_v41 = vpop.f32.mrb[58].mxu1  ;;  %10867 = vmatpush3.bf16.msra.mxu1 %v11840_v60  ;;  %v11868_v37 = vld [vmem:[%s14768_s1 + $0x1618] sm:$0xff]   ;;  %v11891_v60 = vld [vmem:[%s14769_s0 + $0x168] ss:$392 sps:$4 sm:$0xff]  }
 0x2ba   :  { %v10543_v26 = vpop.f32.mrb[57].mxu0  ;;  %v10568_v43 = vpop.f32.mrb[59].mxu1  ;;  %10868 = vmatprep.subr.bf16.mxu1 %v11843_v63  ;;  %v11895_v63 = vld [vmem:[%s14768_s1 + $0x17c0] sm:$0xff]  }
 0x2bb   :  { %v10544_v28 = vadd.f32 %v10543_v26, %v10542_v24  ;;  %v10545_v29 = vpop.f32.mrb[58].mxu0  ;;  %v10569_v46 = vadd.f32 %v10568_v43, %v10567_v41  ;;  %10843 = vmatpush3.bf16.msra.mxu0 %v11834_v54  ;;  %v11863_v24 = vld [vmem:[%s14768_s1 + $0x1650] sm:$0xff]   ;;  %v11871_v41 = vld [vmem:[%s14768_s1 + $0x1660] sm:$0xff]   ;;  %v11884_v54 = vld [vmem:[%s14768_s1 + $0x1638] sm:$0xff]  }
 0x2bc   :  { %v10546_v31 = vpop.f32.mrb[59].mxu0  ;;  %10844 = vmatprep.subr.bf16.mxu0 %v11837_v57  ;;  %v11873_v43 = vld [vmem:[%s14768_s1 + $0x16e0] sm:$0xff]  }
 0x2bd   :  { %v8071_v33 = vadd.f32 %v10544_v28, %v14261_v58  ;;  %v10547_v35 = vadd.f32 %v10546_v31, %v10545_v29  ;;  %v11838_v58 = vld [vmem:[%s14768_s1 + $0x1528] sm:$0xff]   ;;  %10869 = vmatpush3.bf16.msra.mxu1 %v11844_v0  ;;  %v11896_v0 = vld [vmem:[%s14768_s1 + $0x1780] sm:$0xff]  }
 0x2be   :  { %10870 = vmatprep.subr.bf16.mxu1 %v11847_v3  ;;  %v11888_v57 = vld [vmem:[%s14769_s0 + $0x164] ss:$392 sps:$4 sm:$0xff]  }
 0x2bf   :  { %v8074_v39 = vadd.f32 %v10547_v35, %v14269_v62  ;;  %v14372_v45 = vadd.f32 %v10566_v40, %v8071_v33  ;;  %10845 = vmatpush3.bf16.msra.mxu0 %v11838_v58  ;;  %v11842_v62 = vld [vmem:[%s14768_s1 + $0x1530] sm:$0xff]   ;;  %v11870_v40 = vld [vmem:[%s14768_s1 + $0x1698] sm:$0xff]  }
 0x2c0   :  { %10846 = vmatprep.subr.bf16.mxu0 %v11841_v61  ;;  %v11866_v33 = vld [vmem:[%s14768_s1 + $0x1690] sm:$0xff]   ;;  %v11889_v58 = vld [vmem:[%s14768_s1 + $0x16b8] sm:$0xff]  }
 0x2c1   :  { %v14380_v49 = vadd.f32 %v10569_v46, %v8074_v39  ;;  %10871 = vmatpush3.bf16.msra.mxu1 %v11851_v6  ;;  %v11869_v39 = vld [vmem:[%s14768_s1 + $0x16d8] sm:$0xff]   ;;  %v11876_v46 = vld [vmem:[%s14768_s1 + $0x1628] sm:$0xff]  }
 0x2c2   :  { %10900 = vmatprep.subr.bf16.mxu1 %v11857_v11  ;;  %v11893_v61 = vld [vmem:[%s14769_s0 + $0x16c] ss:$392 sps:$4 sm:$0xff]  }
 0x2c3   :  { %10847 = vmatpush3.bf16.msra.mxu0 %v11842_v62  ;;  %v11894_v62 = vld [vmem:[%s14768_s1 + $0x1700] sm:$0xff]  }
 0x2c4   :  { %10848 = vmatprep.subr.bf16.mxu0 %v11845_v1  ;;  %8684 = vmatmul.mubr.bf16.vlgmr.msra.gmra.mrb[84].mxu1 %v11853_v8 }
 0x2c5   :  { %10901 = vmatpush3.bf16.msra.mxu1 %v11858_v12  ;;  %8765 = vmatprep.mubr.bf16.mxu1 %v11893_v61  ;;  %v11901_v12 = vld [vmem:[%s14768_s1 + $0x1750] sm:$0xff]  }
 0x2c6   :  { %10902 = vmatprep.subr.bf16.mxu1 %v11861_v19 }
 0x2c7   :  { %10849 = vmatpush3.bf16.msra.mxu0 %v11846_v2  ;;  %v11897_v2 = vld [vmem:[%s14768_s1 + $0x1748] sm:$0xff]  }
 0x2c8   :  { %10878 = vmatprep.subr.bf16.mxu0 %v11852_v7  ;;  %v11899_v7 = vld [vmem:[%s14768_s1 + $0x17c8] sm:$0xff]  }
 0x2c9   :  { %10903 = vmatpush3.bf16.msra.mxu1 %v11862_v21  ;;  %v11904_v21 = vld [vmem:[%s14768_s1 + $0x1790] sm:$0xff]  }
 0x2ca   :  { %8643 = vmatmul.mubr.bf16.vlgmr.msra.gmra.mrb[84].mxu0 %v11848_v4  ;;  %10904 = vmatprep.subr.bf16.mxu1 %v11865_v30  ;;  %v11898_v4 = vld [vmem:[%s14768_s1 + $0x1708] sm:$0xff]   ;;  %v11910_v30 = vld [vmem:[%s14768_s1 + $0x1720] sm:$0xff]  }
 0x2cb   :  { %10879 = vmatpush3.bf16.msra.mxu0 %v11856_v10  ;;  %8724 = vmatprep.mubr.bf16.mxu0 %v11888_v57 }
 0x2cc   :  { %10880 = vmatprep.subr.bf16.mxu0 %v11859_v14 }
 0x2cd   :  { %10905 = vmatpush3.bf16.msra.mxu1 %v11866_v33  ;;  %v11913_v33 = vld [vmem:[%s14768_s1 + $0x1768] sm:$0xff]  }
 0x2ce   :  { %10906 = vmatprep.subr.bf16.mxu1 %v11869_v39  ;;  %v11919_v39 = vld [vmem:[%s14768_s1 + $0x17f0] sm:$0xff]  }
 0x2cf   :  { %10881 = vmatpush3.bf16.msra.mxu0 %v11860_v16 }
 0x2d0   :  { %10882 = vmatprep.subr.bf16.mxu0 %v11863_v24  ;;  %v11905_v24 = vld [vmem:[%s14768_s1 + $0x1758] sm:$0xff]  }
 0x2d1   :  { %10907 = vmatpush3.bf16.msra.mxu1 %v11870_v40  ;;  %v11920_v40 = vld [vmem:[%s14768_s1 + $0x17b0] sm:$0xff]  }
 0x2d2   :  { %10908 = vmatprep.subr.bf16.mxu1 %v11873_v43  ;;  %v11923_v43 = vld [vmem:[%s14768_s1 + $0x17f8] sm:$0xff]  }
 0x2d3   :  { %10883 = vmatpush3.bf16.msra.mxu0 %v11864_v27  ;;  %v11907_v27 = vld [vmem:[%s14768_s1 + $0x17d8] sm:$0xff]  }
 0x2d4   :  { %10884 = vmatprep.subr.bf16.mxu0 %v11867_v36  ;;  %v11916_v36 = vld [vmem:[%s14768_s1 + $0x17a8] sm:$0xff]  }
 0x2d5   :  { %10909 = vmatpush3.bf16.msra.mxu1 %v11874_v44  ;;  %v11924_v44 = vld [vmem:[%s14769_s0 + $0x170] ss:$392 sps:$4 sm:$0xff]  }
 0x2d6   :  { %10910 = vmatprep.subr.bf16.mxu1 %v11877_v47  ;;  %v11928_v47 = vld [vmem:[%s14768_s1 + $0x1840] sm:$0xff]  }
 0x2d7   :  { %v10608_v20 = vpop.f32.mrb[60].mxu1  ;;  %10885 = vmatpush3.bf16.msra.mxu0 %v11868_v37  ;;  %v11917_v37 = vld [vmem:[%s14768_s1 + $0x1770] sm:$0xff]  }
 0x2d8   :  { %v10609_v26 = vpop.f32.mrb[61].mxu1  ;;  %10886 = vmatprep.subr.bf16.mxu0 %v11871_v41  ;;  %v11921_v41 = vld [vmem:[%s14768_s1 + $0x1778] sm:$0xff]  }
 0x2d9   :  { %v10586_v13 = vpop.f32.mrb[60].mxu0  ;;  %v10610_v28 = vadd.f32 %v10609_v26, %v10608_v20  ;;  %v10611_v29 = vpop.f32.mrb[62].mxu1  ;;  %10911 = vmatpush3.bf16.msra.mxu1 %v11878_v48  ;;  %v11929_v48 = vld [vmem:[%s14769_s0 + $0x178] ss:$392 sps:$4 sm:$0xff]  }
 0x2da   :  { %v10587_v15 = vpop.f32.mrb[61].mxu0  ;;  %v10612_v32 = vpop.f32.mrb[63].mxu1  ;;  %10912 = vmatprep.subr.bf16.mxu1 %v11881_v51  ;;  %v11933_v51 = vld [vmem:[%s14768_s1 + $0x1848] sm:$0xff]  }
 0x2db   :  { %v10588_v17 = vadd.f32 %v10587_v15, %v10586_v13  ;;  %v10589_v18 = vpop.f32.mrb[62].mxu0  ;;  %v10613_v35 = vadd.f32 %v10612_v32, %v10611_v29  ;;  %10887 = vmatpush3.bf16.msra.mxu0 %v11872_v42  ;;  %v11902_v15 = vld [vmem:[%s14768_s1 + $0x1710] sm:$0xff]   ;;  %v11909_v29 = vld [vmem:[%s14768_s1 + $0x1760] sm:$0xff]   ;;  %v11922_v42 = vld [vmem:[%s14768_s1 + $0x1738] sm:$0xff]  }
 0x2dc   :  { %v10590_v23 = vpop.f32.mrb[63].mxu0  ;;  %v11912_v32 = vld [vmem:[%s14768_s1 + $0x17a0] sm:$0xff]  }
 0x2dd   :  { %v8153_v22 = vadd.f32 %v10588_v17, %v14372_v45  ;;  %v10591_v25 = vadd.f32 %v10590_v23, %v10589_v18  ;;  %v11875_v45 = vld [vmem:[%s14768_s1 + $0x1668] sm:$0xff]   ;;  %10913 = vmatpush3.bf16.msra.mxu1 %v11882_v52  ;;  %v11903_v18 = vld [vmem:[%s14768_s1 + $0x17d0] sm:$0xff]  }
 0x2de   :  { %10888 = vmatprep.subr.bf16.mxu0 %v11875_v45  ;;  %10914 = vmatprep.subr.bf16.mxu1 %v11885_v55  ;;  %v11926_v45 = vld [vmem:[%s14769_s0 + $0x174] ss:$392 sps:$4 sm:$0xff]  }
 0x2df   :  { %v8156_v31 = vadd.f32 %v10591_v25, %v14380_v49  ;;  %v14489_v34 = vadd.f32 %v10610_v28, %v8153_v22  ;;  %10889 = vmatpush3.bf16.msra.mxu0 %v11876_v46  ;;  %v11879_v49 = vld [vmem:[%s14768_s1 + $0x1670] sm:$0xff]   ;;  %v11906_v25 = vld [vmem:[%s14768_s1 + $0x1718] sm:$0xff]  }
 0x2e0   :  { %10890 = vmatprep.subr.bf16.mxu0 %v11879_v49  ;;  %v11908_v28 = vld [vmem:[%s14768_s1 + $0x1798] sm:$0xff]   ;;  %v11935_v55 = vld [vmem:[%s14768_s1 + $0x1850] sm:$0xff]  }
 0x2e1   :  { %v14497_v38 = vadd.f32 %v10613_v35, %v8156_v31  ;;  %10915 = vmatpush3.bf16.msra.mxu1 %v11889_v58  ;;  %v11911_v31 = vld [vmem:[%s14768_s1 + $0x17e0] sm:$0xff]   ;;  %v11915_v35 = vld [vmem:[%s14768_s1 + $0x17e8] sm:$0xff]   ;;  %v11927_v46 = vld [vmem:[%s14768_s1 + $0x17b8] sm:$0xff]  }
 0x2e2   :  { %10944 = vmatprep.subr.bf16.mxu1 %v11895_v63  ;;  %v11931_v49 = vld [vmem:[%s14769_s0 + $0x17c] ss:$392 sps:$4 sm:$0xff]  }
 0x2e3   :  { %10891 = vmatpush3.bf16.msra.mxu0 %v11880_v50  ;;  %v11932_v50 = vld [vmem:[%s14768_s1 + $0x1800] sm:$0xff]  }
 0x2e4   :  { %10892 = vmatprep.subr.bf16.mxu0 %v11883_v53  ;;  %8766 = vmatmul.mubr.bf16.vlgmr.msra.gmra.mrb[88].mxu1 %v11891_v60  ;;  %v11934_v53 = vld [vmem:[%s14768_s1 + $0x1808] sm:$0xff]  }
 0x2e5   :  { %10945 = vmatpush3.bf16.msra.mxu1 %v11896_v0  ;;  %8847 = vmatprep.mubr.bf16.mxu1 %v11931_v49  ;;  %v11937_v0 = vld [vmem:[%s14768_s1 + $0x1858] sm:$0xff]  }
 0x2e6   :  { %10946 = vmatprep.subr.bf16.mxu1 %v11899_v7  ;;  %v11938_v7 = vld [vmem:[%s14768_s1 + $0x1818] sm:$0xff]  }
 0x2e7   :  { %10893 = vmatpush3.bf16.msra.mxu0 %v11884_v54 }
 0x2e8   :  { %10922 = vmatprep.subr.bf16.mxu0 %v11890_v59 }
 0x2e9   :  { %10947 = vmatpush3.bf16.msra.mxu1 %v11900_v9 }
 0x2ea   :  { %8725 = vmatmul.mubr.bf16.vlgmr.msra.gmra.mrb[88].mxu0 %v11886_v56  ;;  %10948 = vmatprep.subr.bf16.mxu1 %v11903_v18  ;;  %v11947_v18 = vld [vmem:[%s14769_s0 + $0x180] ss:$392 sps:$4 sm:$0xff]  }
 0x2eb   :  { %10923 = vmatpush3.bf16.msra.mxu0 %v11894_v62  ;;  %8806 = vmatprep.mubr.bf16.mxu0 %v11926_v45  ;;  %v11936_v62 = vld [vmem:[%s14768_s1 + $0x1810] sm:$0xff]  }
 0x2ec   :  { %10924 = vmatprep.subr.bf16.mxu0 %v11897_v2 }
 0x2ed   :  { %10949 = vmatpush3.bf16.msra.mxu1 %v11904_v21 }
 0x2ee   :  { %10950 = vmatprep.subr.bf16.mxu1 %v11907_v27 }
 0x2ef   :  { %10925 = vmatpush3.bf16.msra.mxu0 %v11898_v4 }
 0x2f0   :  { %10926 = vmatprep.subr.bf16.mxu0 %v11901_v12  ;;  %v11949_v12 = vld [vmem:[%s14769_s0 + $0x184] ss:$392 sps:$4 sm:$0xff]  }
 0x2f1   :  { %10951 = vmatpush3.bf16.msra.mxu1 %v11908_v28 }
 0x2f2   :  { %10952 = vmatprep.subr.bf16.mxu1 %v11911_v31 }
 0x2f3   :  { %10927 = vmatpush3.bf16.msra.mxu0 %v11902_v15  ;;  %v11944_v15 = vld [vmem:[%s14768_s1 + $0x1830] sm:$0xff]  }
 0x2f4   :  { %10928 = vmatprep.subr.bf16.mxu0 %v11905_v24 }
 0x2f5   :  { %10953 = vmatpush3.bf16.msra.mxu1 %v11912_v32 }
 0x2f6   :  { %10954 = vmatprep.subr.bf16.mxu1 %v11915_v35 }
 0x2f7   :  { %v10652_v8 = vpop.f32.mrb[64].mxu1  ;;  %10929 = vmatpush3.bf16.msra.mxu0 %v11906_v25 }
 0x2f8   :  { %v10653_v14 = vpop.f32.mrb[65].mxu1  ;;  %10930 = vmatprep.subr.bf16.mxu0 %v11909_v29 }
 0x2f9   :  { %v10654_v16 = vadd.f32 %v10653_v14, %v10652_v8  ;;  %v10655_v17 = vpop.f32.mrb[66].mxu1  ;;  %10955 = vmatpush3.bf16.msra.mxu1 %v11916_v36  ;;  %v11939_v8 = vld [vmem:[%s14768_s1 + $0x1860] sm:$0xff]   ;;  %v11943_v14 = vld [vmem:[%s14768_s1 + $0x1870] sm:$0xff]  }
 0x2fa   :  { %v10656_v20 = vpop.f32.mrb[67].mxu1  ;;  %10956 = vmatprep.subr.bf16.mxu1 %v11919_v39 }
 0x2fb   :  { %v10657_v23 = vadd.f32 %v10656_v20, %v10655_v17  ;;  %10931 = vmatpush3.bf16.msra.mxu0 %v11910_v30  ;;  %v11946_v17 = vld [vmem:[%s14768_s1 + $0x1838] sm:$0xff]  }
 0x2fc   :  { %10932 = vmatprep.subr.bf16.mxu0 %v11913_v33 }
 0x2fd   :  { %v10630_v1 = vpop.f32.mrb[64].mxu0  ;;  %10957 = vmatpush3.bf16.msra.mxu1 %v11920_v40 }
 0x2fe   :  { %v10631_v3 = vpop.f32.mrb[65].mxu0  ;;  %10958 = vmatprep.subr.bf16.mxu1 %v11923_v43 }
 0x2ff   :  { %v10632_v5 = vadd.f32 %v10631_v3, %v10630_v1  ;;  %v10633_v6 = vpop.f32.mrb[66].mxu0 }
 0x300   :  { %v10634_v11 = vpop.f32.mrb[67].mxu0 }
 0x301   :  { %v8235_v10 = vadd.f32 %v10632_v5, %v14489_v34  ;;  %v10635_v13 = vadd.f32 %v10634_v11, %v10633_v6  ;;  %v11914_v34 = vld [vmem:[%s14768_s1 + $0x1728] sm:$0xff]   ;;  %10959 = vmatpush3.bf16.msra.mxu1 %v11927_v46 }
 0x302   :  { %10933 = vmatpush3.bf16.msra.mxu0 %v11914_v34  ;;  %v11941_v11 = vld [vmem:[%s14768_s1 + $0x1868] sm:$0xff]  }
 0x303   :  { %v8238_v19 = vadd.f32 %v10635_v13, %v14497_v38  ;;  %v14603_v22 = vadd.f32 %v10654_v16, %v8235_v10  ;;  %v11918_v38 = vld [vmem:[%s14768_s1 + $0x1730] sm:$0xff]   ;;  %10934 = vmatprep.subr.bf16.mxu0 %v11917_v37  ;;  %v11940_v10 = vld [vmem:[%s14768_s1 + $0x1820] sm:$0xff]   ;;  %v11942_v13 = vld [vmem:[%s14768_s1 + $0x1828] sm:$0xff]  }
 0x304   :  { %8848 = vmatmul.mubr.bf16.vlgmr.msra.gmra.mrb[92].mxu1 %v11929_v48  ;;  %v11945_v16 = vld [vmem:[%s14768_s1 + $0x1878] sm:$0xff]  }
 0x305   :  { %v14611_v26 = vadd.f32 %v10657_v23, %v8238_v19 }
 0x306   :  { %10935 = vmatpush3.bf16.msra.mxu0 %v11918_v38 }
 0x307   :  { %10936 = vmatprep.subr.bf16.mxu0 %v11921_v41 }
 0x30a   :  { %10937 = vmatpush3.bf16.msra.mxu0 %v11922_v42 }
 0x30b   :  { %10966 = vmatprep.subr.bf16.mxu0 %v11928_v47 }
 0x30d   :  { %8807 = vmatmul.mubr.bf16.vlgmr.msra.gmra.mrb[92].mxu0 %v11924_v44 }
 0x30e   :  { %10967 = vmatpush3.bf16.msra.mxu0 %v11932_v50  ;;  %8888 = vmatprep.mubr.bf16.mxu0 %v11949_v12 }
 0x30f   :  { %10968 = vmatprep.subr.bf16.mxu0 %v11933_v51  ;;  %v11958_v51 = vmov 0.0  }
 0x310   :  { %10997 = vmatprep.subr.bf16.mxu1 %v11958_v51  ;;  %11013 = vmatprep.mubr.msk.bf16.mxu1 %vm11959_vm0, %v11958_v51 }
 0x312   :  { %10969 = vmatpush3.bf16.msra.mxu0 %v11934_v53  ;;  %v11951_v53 = vld [vmem:[%s14771_s3 + $0x8] sm:$0xff]  }
 0x313   :  { %10970 = vmatprep.subr.bf16.mxu0 %v11935_v55  ;;  %v11953_v55 = vld [vmem:[%s14771_s3 + $0x18] sm:$0xff]  }
 0x316   :  { %10971 = vmatpush3.bf16.msra.mxu0 %v11936_v62 }
 0x317   :  { %v10696_v60 = vpop.f32.mrb[68].mxu1  ;;  %10972 = vmatprep.subr.bf16.mxu0 %v11937_v0 }
 0x318   :  { %v10697_v63 = vpop.f32.mrb[69].mxu1 }
 0x319   :  { %v10698_v2 = vadd.f32 %v10697_v63, %v10696_v60  ;;  %v10699_v3 = vpop.f32.mrb[70].mxu1 }
 0x31a   :  { %v10700_v4 = vpop.f32.mrb[71].mxu1  ;;  %10973 = vmatpush3.bf16.msra.mxu0 %v11938_v7 }
 0x31b   :  { %v10701_v6 = vadd.f32 %v10700_v4, %v10699_v3  ;;  %10974 = vmatprep.subr.bf16.mxu0 %v11939_v8 }
 0x31d   :  { %v10674_v52 = vpop.f32.mrb[68].mxu0 }
 0x31e   :  { %v10675_v54 = vpop.f32.mrb[69].mxu0  ;;  %10975 = vmatpush3.bf16.msra.mxu0 %v11940_v10  ;;  %v11956_v10 = vld [vmem:[%s14771_s3 + $0x30] sm:$0xff]  }
 0x31f   :  { %v10676_v56 = vadd.f32 %v10675_v54, %v10674_v52  ;;  %v10677_v57 = vpop.f32.mrb[70].mxu0  ;;  %10976 = vmatprep.subr.bf16.mxu0 %v11941_v11  ;;  %v11950_v52 = vld [vmem:[%s14771_s3] sm:$0xff]   ;;  %v11952_v54 = vld [vmem:[%s14771_s3 + $0x10] sm:$0xff]   ;;  %v11957_v11 = vld [vmem:[%s14771_s3 + $0x38] sm:$0xff]  }
 0x320   :  { %v10678_v58 = vpop.f32.mrb[71].mxu0  ;;  %10998 = vmatpush3.bf16.msra.mxu1 %v11950_v52 }
 0x321   :  { %v8317_v59 = vadd.f32 %v10676_v56, %v14603_v22  ;;  %v10679_v61 = vadd.f32 %v10678_v58, %v10677_v57  ;;  %10999 = vmatprep.subr.bf16.mxu1 %v11958_v51  ;;  %v11954_v58 = vld [vmem:[%s14771_s3 + $0x20] sm:$0xff]  }
 0x322   :  { %10977 = vmatpush3.bf16.msra.mxu0 %v11942_v13 }
 0x323   :  { %v8320_v1 = vadd.f32 %v10679_v61, %v14611_v26  ;;  %v8358_v5 = vadd.f32 %v10698_v2, %v8317_v59  ;;  %10978 = vmatprep.subr.bf16.mxu0 %v11943_v14 }
 0x324   :  { %11000 = vmatpush3.bf16.msra.mxu1 %v11951_v53 }
 0x325   :  { %v8361_v9 = vadd.f32 %v10701_v6, %v8320_v1  ;;  %11001 = vmatprep.subr.bf16.mxu1 %v11958_v51 }
 0x326   :  { %10979 = vmatpush3.bf16.msra.mxu0 %v11944_v15 }
 0x327   :  { %10980 = vmatprep.subr.bf16.mxu0 %v11945_v16 }
 0x328   :  { %11002 = vmatpush3.bf16.msra.mxu1 %v11952_v54 }
 0x329   :  { %11003 = vmatprep.subr.bf16.mxu1 %v11958_v51 }
 0x32a   :  { %10981 = vmatpush3.bf16.msra.mxu0 %v11946_v17 }
 0x32c   :  { %11004 = vmatpush3.bf16.msra.mxu1 %v11953_v55 }
 0x32d   :  { %8889 = vmatmul.mubr.bf16.vlgmr.msra.gmra.mrb[96].mxu0 %v11947_v18  ;;  %11005 = vmatprep.subr.bf16.mxu1 %v11958_v51 }
 0x330   :  { %11006 = vmatpush3.bf16.msra.mxu1 %v11954_v58 }
 0x331   :  { %11007 = vmatprep.subr.bf16.mxu1 %v11958_v51 }
 0x337   :  { %v10740_v23 = vpop.f32.mrb[72].mxu1 }
 0x338   :  { %v10741_v27 = vpop.f32.mrb[73].mxu1 }
 0x339   :  { %v10742_v28 = vadd.f32 %v10741_v27, %v10740_v23  ;;  %v10743_v29 = vpop.f32.mrb[74].mxu1 }
 0x33a   :  { %v10744_v31 = vpop.f32.mrb[75].mxu1 }
 0x33b   :  { %v10745_v33 = vadd.f32 %v10744_v31, %v10743_v29 }
 0x33d   :  { %v10718_v19 = vpop.f32.mrb[72].mxu0 }
 0x33e   :  { %v10719_v20 = vpop.f32.mrb[73].mxu0 }
 0x33f   :  { %v10720_v21 = vadd.f32 %v10719_v20, %v10718_v19  ;;  %v10721_v22 = vpop.f32.mrb[74].mxu0 }
 0x340   :  { %v10722_v24 = vpop.f32.mrb[75].mxu0 }
 0x341   :  { %v8399_v25 = vadd.f32 %v10720_v21, %v8358_v5  ;;  %v10723_v26 = vadd.f32 %v10722_v24, %v10721_v22 }
 0x343   :  { %v8402_v30 = vadd.f32 %v10723_v26, %v8361_v9  ;;  %v8440_v32 = vadd.f32 %v10742_v28, %v8399_v25  ;;  %v11955_v9 = vld [vmem:[%s14771_s3 + $0x28] sm:$0xff]  }
 0x344   :  { %11008 = vmatpush3.bf16.msra.mxu1 %v11955_v9 }
 0x345   :  { %v8443_v34 = vadd.f32 %v10745_v33, %v8402_v30  ;;  %11009 = vmatprep.subr.bf16.mxu1 %v11958_v51 }
 0x348   :  { %11010 = vmatpush3.bf16.msra.mxu1 %v11956_v10 }
 0x349   :  { %11011 = vmatprep.subr.bf16.mxu1 %v11958_v51 }
 0x34c   :  { %11012 = vmatpush3.bf16.msra.mxu1 %v11957_v11 }
 0x357   :  { %v10784_v39 = vpop.f32.mrb[76].mxu1 }
 0x358   :  { %v10785_v43 = vpop.f32.mrb[77].mxu1 }
 0x359   :  { %v10786_v44 = vadd.f32 %v10785_v43, %v10784_v39  ;;  %v10787_v45 = vpop.f32.mrb[78].mxu1 }
 0x35a   :  { %v10788_v47 = vpop.f32.mrb[79].mxu1 }
 0x35b   :  { %v10789_v49 = vadd.f32 %v10788_v47, %v10787_v45 }
 0x35d   :  { %v10762_v35 = vpop.f32.mrb[76].mxu0 }
 0x35e   :  { %v10763_v36 = vpop.f32.mrb[77].mxu0 }
 0x35f   :  { %v10764_v37 = vadd.f32 %v10763_v36, %v10762_v35  ;;  %v10765_v38 = vpop.f32.mrb[78].mxu0 }
 0x360   :  { %v10766_v40 = vpop.f32.mrb[79].mxu0 }
 0x361   :  { %v8481_v41 = vadd.f32 %v10764_v37, %v8440_v32  ;;  %v10767_v42 = vadd.f32 %v10766_v40, %v10765_v38 }
 0x363   :  { %v8484_v46 = vadd.f32 %v10767_v42, %v8443_v34  ;;  %v8522_v48 = vadd.f32 %v10786_v44, %v8481_v41 }
 0x365   :  { %v8525_v50 = vadd.f32 %v10789_v49, %v8484_v46 }
 0x377   :  { %v10828_v63 = vpop.f32.mrb[80].mxu1 }
 0x378   :  { %v10829_v1 = vpop.f32.mrb[81].mxu1 }
 0x379   :  { %v10830_v3 = vadd.f32 %v10829_v1, %v10828_v63  ;;  %v10831_v4 = vpop.f32.mrb[82].mxu1 }
 0x37a   :  { %v10832_v5 = vpop.f32.mrb[83].mxu1 }
 0x37b   :  { %v10833_v7 = vadd.f32 %v10832_v5, %v10831_v4 }
 0x37d   :  { %v10806_v56 = vpop.f32.mrb[80].mxu0 }
 0x37e   :  { %v10807_v57 = vpop.f32.mrb[81].mxu0 }
 0x37f   :  { %v10808_v59 = vadd.f32 %v10807_v57, %v10806_v56  ;;  %v10809_v60 = vpop.f32.mrb[82].mxu0 }
 0x380   :  { %v10810_v61 = vpop.f32.mrb[83].mxu0 }
 0x381   :  { %v8563_v62 = vadd.f32 %v10808_v59, %v8522_v48  ;;  %v10811_v0 = vadd.f32 %v10810_v61, %v10809_v60 }
 0x383   :  { %v8566_v2 = vadd.f32 %v10811_v0, %v8525_v50  ;;  %v8604_v6 = vadd.f32 %v10830_v3, %v8563_v62 }
 0x385   :  { %v8607_v8 = vadd.f32 %v10833_v7, %v8566_v2  ;;  %v9901_v7 = vld [vmem:[%s14772_s4] ss:$0 sm:$0xff] }
 0x397   :  { %v10872_v16 = vpop.f32.mrb[84].mxu1 }
 0x398   :  { %v10873_v20 = vpop.f32.mrb[85].mxu1 }
 0x399   :  { %v10874_v21 = vadd.f32 %v10873_v20, %v10872_v16  ;;  %v10875_v22 = vpop.f32.mrb[86].mxu1 }
 0x39a   :  { %v10876_v24 = vpop.f32.mrb[87].mxu1 }
 0x39b   :  { %v10877_v26 = vadd.f32 %v10876_v24, %v10875_v22 }
 0x39d   :  { %v10850_v12 = vpop.f32.mrb[84].mxu0 }
 0x39e   :  { %v10851_v13 = vpop.f32.mrb[85].mxu0 }
 0x39f   :  { %v10852_v14 = vadd.f32 %v10851_v13, %v10850_v12  ;;  %v10853_v15 = vpop.f32.mrb[86].mxu0 }
 0x3a0   :  { %v10854_v17 = vpop.f32.mrb[87].mxu0 }
 0x3a1   :  { %v8645_v18 = vadd.f32 %v10852_v14, %v8604_v6  ;;  %v10855_v19 = vadd.f32 %v10854_v17, %v10853_v15 }
 0x3a3   :  { %v8648_v23 = vadd.f32 %v10855_v19, %v8607_v8  ;;  %v8686_v25 = vadd.f32 %v10874_v21, %v8645_v18 }
 0x3a5   :  { %v8689_v27 = vadd.f32 %v10877_v26, %v8648_v23 }
 0x3b7   :  { %v10916_v32 = vpop.f32.mrb[88].mxu1 }
 0x3b8   :  { %v10917_v36 = vpop.f32.mrb[89].mxu1 }
 0x3b9   :  { %v10918_v37 = vadd.f32 %v10917_v36, %v10916_v32  ;;  %v10919_v38 = vpop.f32.mrb[90].mxu1 }
 0x3ba   :  { %v10920_v40 = vpop.f32.mrb[91].mxu1 }
 0x3bb   :  { %v10921_v42 = vadd.f32 %v10920_v40, %v10919_v38 }
 0x3bd   :  { %v10894_v28 = vpop.f32.mrb[88].mxu0 }
 0x3be   :  { %v10895_v29 = vpop.f32.mrb[89].mxu0 }
 0x3bf   :  { %v10896_v30 = vadd.f32 %v10895_v29, %v10894_v28  ;;  %v10897_v31 = vpop.f32.mrb[90].mxu0 }
 0x3c0   :  { %v10898_v33 = vpop.f32.mrb[91].mxu0 }
 0x3c1   :  { %v8727_v34 = vadd.f32 %v10896_v30, %v8686_v25  ;;  %v10899_v35 = vadd.f32 %v10898_v33, %v10897_v31 }
 0x3c3   :  { %v8730_v39 = vadd.f32 %v10899_v35, %v8689_v27  ;;  %v8768_v41 = vadd.f32 %v10918_v37, %v8727_v34 }
 0x3c5   :  { %v8771_v43 = vadd.f32 %v10921_v42, %v8730_v39 }
 0x3d7   :  { %v10960_v50 = vpop.f32.mrb[92].mxu1 }
 0x3d8   :  { %v10961_v52 = vpop.f32.mrb[93].mxu1 }
 0x3d9   :  { %v10962_v54 = vadd.f32 %v10961_v52, %v10960_v50  ;;  %v10963_v55 = vpop.f32.mrb[94].mxu1 }
 0x3da   :  { %v10964_v56 = vpop.f32.mrb[95].mxu1 }
 0x3db   :  { %v10965_v58 = vadd.f32 %v10964_v56, %v10963_v55 }
 0x3e0   :  { %v10938_v44 = vpop.f32.mrb[92].mxu0 }
 0x3e1   :  { %v10939_v45 = vpop.f32.mrb[93].mxu0 }
 0x3e2   :  { %v10940_v46 = vadd.f32 %v10939_v45, %v10938_v44  ;;  %v10941_v47 = vpop.f32.mrb[94].mxu0 }
 0x3e3   :  { %v10942_v48 = vpop.f32.mrb[95].mxu0 }
 0x3e4   :  { %v8809_v49 = vadd.f32 %v10940_v46, %v8768_v41  ;;  %v10943_v51 = vadd.f32 %v10942_v48, %v10941_v47 }
 0x3e6   :  { %v8812_v53 = vadd.f32 %v10943_v51, %v8771_v43  ;;  %v8850_v57 = vadd.f32 %v10962_v54, %v8809_v49 }
 0x3e8   :  { %v8853_v59 = vadd.f32 %v10965_v58, %v8812_v53 }
 0x400   :  { %v10982_v60 = vpop.f32.mrb[96].mxu0 }
 0x401   :  { %v10983_v61 = vpop.f32.mrb[97].mxu0 }
 0x402   :  { %v10984_v62 = vadd.f32 %v10983_v61, %v10982_v60  ;;  %v10985_v63 = vpop.f32.mrb[98].mxu0 }
 0x403   :  { %v10986_v0 = vpop.f32.mrb[99].mxu0 }
 0x404   :  { %v8891_v1 = vadd.f32 %v10984_v62, %v8850_v57  ;;  %v10987_v2 = vadd.f32 %v10986_v0, %v10985_v63 }
 0x406   :  { %v8894_v3 = vadd.f32 %v10987_v2, %v8853_v59  ;;  %v8897_v4 = vmax.f32 %v8891_v1, 0.0 }
 0x408   :  { %v8898_v5 = vmax.f32 %v8894_v3, 0.0 }
 0x40a   :  { %v8899_v6 = vpack.c.bf16 %v8898_v5, %v8897_v4 }
 0x40c   :  { %11014 = vmatmul.mubr.bf16.vlgmr.msra.gmra.mrb[96].mxu1 %v8899_v6 }
 0x4df   :  { %v9005_v8 = vpop.f32.mrb[96].mxu1 }
 0x4e0   :  { %v9006_v9 = vadd.f32 %v9901_v7, %v9005_v8  ;;  %v11015_v10 = vpop.f32.mrb[97].mxu1 }
 0x4e1   :  { %v9008_v11 = vpop.f32.mrb[98].mxu1 }
 0x4e2   :  { %9012 = vst [vmem:[%s14773_s5] sm:$0xff] %v9006_v9  ;;  %v9009_v12 = vadd.f32 %v9901_v7, %v9008_v11  ;;  %v11016_v13 = vpop.f32.mrb[99].mxu1 }
 0x4e4   :  { %9013 = vst [vmem:[%s14773_s5 + $0x8] sm:$0xff] %v9009_v12 }

</bundles_post_ra>
